<compile_context>
chip_gen: v7x
topology: tpu7x:2x2x1
jax: 0.10.0
libtpu: 0.0.40
codegen_flags: <defaults>
</compile_context>

<pallas_src>
import numpy as np

import jax
import jax.numpy as jnp
from jax import lax
from jax.experimental import pallas as pl
from jax.experimental.pallas import tpu as pltpu

EPS = 1e-5  # PyTorch BatchNorm2d default eps

# Small version hedge: newer jax exposes pltpu.CompilerParams, older ones
# exposed the same dataclass as pltpu.TPUCompilerParams.
_CompilerParams = getattr(pltpu, "CompilerParams",
                          getattr(pltpu, "TPUCompilerParams", None))


# ------------------------------ fused kernel --------------------------------
def _decoder_kernel(w1_ref, s1_ref, w2_ref, s2_ref, w3_ref, b3_ref,   # SMEM scalars
                    x_ref,      # (CVS, 4, Hp, Wc)  packed input canvases (VMEM)
                    m_ref,      # (Hp, Wc)          {0,1} interior mask   (VMEM)
                    o_ref,      # (CVS, 2, Ho, Wc)  packed output canvases
                    y1_ref, y2_ref):                                   # VMEM scratch
    CVS = x_ref.shape[0]
    Hp, Wc = x_ref.shape[2], x_ref.shape[3]     # per-canvas padded extent
    H2 = y2_ref.shape[1]                        # conv-transpose output height
    Ho = o_ref.shape[2]                         # final output height
    W2c = Wc - 1                                # computable widths (taps shift
    W3c = Wc - 4                                #  by <=1 / <=3 lanes)

    maskf = m_ref[...]                          # hoisted once per grid step

    def one_canvas(cv):
        # ---- layer 1: 1x1 conv (BN folded) + ReLU ----------------------------
        # The canvas comes in with a 1-px zero gutter around every image; the
        # mask kills the relu(shift) that would otherwise leak into that ring,
        # leaving y1_ref as the exactly zero-padded y1 the ConvTranspose needs.
        xs = [x_ref[cv, ci] for ci in range(4)]
        for co in range(8):
            z = xs[0] * w1_ref[co * 4 + 0]
            for ci in range(1, 4):
                z = z + xs[ci] * w1_ref[co * 4 + ci]
            y1_ref[co] = jnp.maximum(z + s1_ref[co], 0.0) * maskf

        # ---- layer 2: ConvTranspose2d 2x2 stride 1 (BN folded) + ReLU --------
        # y2[co,i,j] = sum_{ci,dh,dw} y1pad[ci, i+dh, j+dw] * w2[ci,co,1-dh,1-dw]
        # co-outermost: one live accumulator plane, taps re-sliced (vld slack).
        for co in range(4):
            acc = None
            for ci in range(8):
                for dh in range(2):
                    for dw in range(2):
                        w = w2_ref[((ci * 4 + co) * 2 + (1 - dh)) * 2 + (1 - dw)]
                        t = y1_ref[ci, dh:dh + H2, dw:dw + W2c] * w
                        acc = t if acc is None else acc + t
            y2_ref[co, :, :W2c] = jnp.maximum(acc + s2_ref[co], 0.0)

        # ---- layer 3: Conv2d 4x4 + bias + LogSigmoid --------------------------
        for co in range(2):
            acc = None
            for ci in range(4):
                for kh in range(4):
                    for kw in range(4):
                        w = w3_ref[((co * 4 + ci) * 4 + kh) * 4 + kw]
                        t = y2_ref[ci, kh:kh + Ho, kw:kw + W3c] * w
                        acc = t if acc is None else acc + t
            z = acc + b3_ref[co]
            # numerically stable logsigmoid(z) = min(z,0) - log(1 + exp(-|z|))
            o_ref[cv, co, :, :W3c] = (jnp.minimum(z, 0.0)
                                      - jnp.log(1.0 + jnp.exp(-jnp.abs(z))))

    if CVS == 1:
        one_canvas(0)            # fully static path (used by the small tests)
    else:
        def body(cv, carry):
            one_canvas(cv)
            return carry
        lax.fori_loop(0, CVS, body, 0)


# --------------------------------- wrapper -----------------------------------
def decoder_track_e_forward(x_nchw, kp, *, images_per_canvas=None,
                            canvases_per_step=None):
    """x_nchw: (N, 4, H, W) float32 -> (N, 2, H-2, W-2) float32 (NCHW)."""
    N, C, H, W = x_nchw.shape
    assert C == 4 and H >= 3 and W >= 3
    cdiv = lambda a, b: -(-a // b)

    S = W + 2                                    # per-image slot stride (lanes)
    Hp, H2, Ho, Wo = H + 2, H + 1, H - 2, W - 2

    # --- packing factors -----------------------------------------------------
    # P images per 128-lane canvas; keep >= 2 grid steps when N >= 2 so both
    # v7x TensorCores get work (full 7-wide packing kicks in once N >= 14).
    Pmax = max(1, 128 // S)
    if images_per_canvas is not None:
        P = images_per_canvas
    else:
        P = max(1, min(Pmax, cdiv(N, 2)))
    Wc = cdiv(P * S, 128) * 128                  # one (or more) full lane tiles
    G = cdiv(N, P)                               # canvases needed

    # Canvases per grid step: amortise per-step overhead (~0.5 MB input blocks)
    # but keep the grid length >= 2 for megacore.
    canvas_in_bytes = 4 * C * Hp * Wc
    if canvases_per_step is not None:
        CVS = canvases_per_step
    else:
        CVS = max(1, min((512 * 1024) // canvas_in_bytes, cdiv(G, 2)))
    G2 = cdiv(G, CVS)
    Gtot = G2 * CVS
    Npad = Gtot * P

    # --- pack: (N,4,H,W) -> (Gtot, 4, Hp, Wc), P images per canvas ------------
    # Single relayout (pad + transpose + reshape, fused by XLA); the 1-px zero
    # gutter it creates is reused as layer-1's pad ring.
    xp = jnp.pad(x_nchw, ((0, Npad - N), (0, 0), (1, 1), (1, 1)))
    xp = xp.reshape(Gtot, P, C, Hp, S).transpose(0, 2, 3, 1, 4)
    xp = xp.reshape(Gtot, C, Hp, P * S)
    if Wc > P * S:
        xp = jnp.pad(xp, ((0, 0), (0, 0), (0, 0), (0, Wc - P * S)))

    # {0,1} mask of per-image interiors (kills relu(shift) on the pad rings).
    mask = np.zeros((Hp, Wc), np.float32)
    for b in range(P):
        mask[1:H + 1, b * S + 1:b * S + 1 + W] = 1.0
    mask = jnp.asarray(mask)

    # --- VMEM budget (double-buffered in/out blocks + scratch) ----------------
    vmem_need = 4 * (2 * CVS * C * Hp * Wc      # x blocks (x2 buffers)
                     + 2 * Hp * Wc              # mask block
                     + 2 * CVS * 2 * Ho * Wc    # out blocks
                     + 8 * Hp * Wc + 4 * H2 * Wc)   # y1 / y2 scratch
    vmem_limit = int(min(max(2 * vmem_need, 32 * 1024 * 1024),
                         100 * 1024 * 1024))
    # TODO(synk): for very large H*W (whole-image scratch exceeding v7x's
    # 64 MiB VMEM, around H=W~1k), row-tile the canvases with a 4-row halo
    # instead of whole-image blocks.

    grid_spec = pltpu.PrefetchScalarGridSpec(
        num_scalar_prefetch=6,                  # folded weights/shifts -> SMEM
        grid=(G2,),
        in_specs=[
            pl.BlockSpec((CVS, C, Hp, Wc), lambda g, *_: (g, 0, 0, 0)),
            pl.BlockSpec((Hp, Wc), lambda g, *_: (0, 0)),
        ],
        out_specs=pl.BlockSpec((CVS, 2, Ho, Wc), lambda g, *_: (g, 0, 0, 0)),
        scratch_shapes=[
            pltpu.VMEM((8, Hp, Wc), jnp.float32),   # y1 (zero-padded by 1)
            pltpu.VMEM((4, H2, Wc), jnp.float32),   # y2
        ],
    )
    outc = pl.pallas_call(
        _decoder_kernel,
        out_shape=jax.ShapeDtypeStruct((Gtot, 2, Ho, Wc), jnp.float32),
        grid_spec=grid_spec,
        compiler_params=_CompilerParams(
            dimension_semantics=("parallel",),
            vmem_limit_bytes=vmem_limit),
    )(kp["w1"], kp["shift1"], kp["w2"], kp["shift2"], kp["w3"], kp["b3"],
      xp, mask)

    # --- unpack: (Gtot, 2, Ho, Wc) -> (N, 2, Ho, Wo) --------------------------
    out = outc[..., :P * S].reshape(Gtot, 2, Ho, P, S)[..., :Wo]
    out = out.transpose(0, 3, 1, 2, 4).reshape(Npad, 2, Ho, Wo)
    return out[:N]


# --------------------------- parameter handling ------------------------------
def init_params(key):
    ks = jax.random.split(key, 12)
    return dict(
        w1=jax.random.normal(ks[0], (8, 4, 1, 1), jnp.float32) * 0.3,  # Conv2d OIHW
        g1=jax.random.uniform(ks[1], (8,), minval=0.5, maxval=1.5),
        b1=jax.random.normal(ks[2], (8,)) * 0.1,
        m1=jax.random.normal(ks[3], (8,)) * 0.1,
        v1=jax.random.uniform(ks[4], (8,), minval=0.5, maxval=1.5),
        w2=jax.random.normal(ks[5], (8, 4, 2, 2), jnp.float32) * 0.3,  # ConvT (in,out,kh,kw)
        g2=jax.random.uniform(ks[6], (4,), minval=0.5, maxval=1.5),
        b2=jax.random.normal(ks[7], (4,)) * 0.1,
        m2=jax.random.normal(ks[8], (4,)) * 0.1,
        v2=jax.random.uniform(ks[9], (4,), minval=0.5, maxval=1.5),
        w3=jax.random.normal(ks[10], (2, 4, 4, 4), jnp.float32) * 0.3,  # Conv2d OIHW
        b3=jax.random.normal(ks[11], (2,)) * 0.1,
    )


def kernel_params(p):
    """Fold BN scales into the conv weights and flatten everything for SMEM."""
    scale1 = p["g1"] / jnp.sqrt(p["v1"] + EPS)
    shift1 = p["b1"] - p["m1"] * scale1
    scale2 = p["g2"] / jnp.sqrt(p["v2"] + EPS)
    shift2 = p["b2"] - p["m2"] * scale2
    w1f = (p["w1"][:, :, 0, 0] * scale1[:, None]).reshape(-1)          # [co, ci]
    w2f = (p["w2"] * scale2[None, :, None, None]).reshape(-1)          # [ci, co, kh, kw]
    w3f = p["w3"].reshape(-1)                                          # [co, ci, kh, kw]
    f32 = jnp.float32
    return dict(
        w1=w1f.astype(f32), shift1=shift1.astype(f32),
        w2=w2f.astype(f32), shift2=shift2.astype(f32),
        w3=w3f.astype(f32), b3=p["b3"].astype(f32),
    )


# ------------------------- pure-JAX reference (check) ------------------------
def reference_forward(x, p):
    dn = ("NCHW", "OIHW", "NCHW")
    scale1 = p["g1"] / jnp.sqrt(p["v1"] + EPS)
    shift1 = p["b1"] - p["m1"] * scale1
    scale2 = p["g2"] / jnp.sqrt(p["v2"] + EPS)
    shift2 = p["b2"] - p["m2"] * scale2
    z1 = lax.conv_general_dilated(x, p["w1"], (1, 1), "VALID", dimension_numbers=dn)
    y1 = jnp.maximum(z1 * scale1[None, :, None, None] + shift1[None, :, None, None], 0.0)
    w2c = jnp.transpose(jnp.flip(p["w2"], axis=(2, 3)), (1, 0, 2, 3))  # (4, 8, 2, 2)
    z2 = lax.conv_general_dilated(y1, w2c, (1, 1), ((1, 1), (1, 1)), dimension_numbers=dn)
    y2 = jnp.maximum(z2 * scale2[None, :, None, None] + shift2[None, :, None, None], 0.0)
    z3 = lax.conv_general_dilated(y2, p["w3"], (1, 1), "VALID", dimension_numbers=dn)
    z3 = z3 + p["b3"][None, :, None, None]
    return jax.nn.log_sigmoid(z3)


if __name__ == "__main__":
    key = jax.random.PRNGKey(0)
    pkey, xkey, xkey2 = jax.random.split(key, 3)
    params = init_params(pkey)
    kp = kernel_params(params)

    # small shapes implied by the module: N=2, C=4, H=W=16
    x = jax.random.normal(xkey, (2, 4, 16, 16), jnp.float32)
    out = jax.jit(decoder_track_e_forward)(x, kp)
    out = jax.block_until_ready(out)
    assert out.shape == (2, 2, 14, 14), out.shape
    ref = reference_forward(x, params)
    err = float(jnp.max(jnp.abs(out - ref)))
    assert jnp.allclose(out, ref, atol=1e-4, rtol=1e-4), err

    # also exercise the lane-packed path (7 images/canvas + batch padding)
    x2 = jax.random.normal(xkey2, (13, 4, 16, 16), jnp.float32)
    out2 = jax.block_until_ready(jax.jit(decoder_track_e_forward)(x2, kp))
    assert out2.shape == (13, 2, 14, 14), out2.shape
    ref2 = reference_forward(x2, params)
    err2 = float(jnp.max(jnp.abs(out2 - ref2)))
    assert jnp.allclose(out2, ref2, atol=1e-4, rtol=1e-4), err2

    print("KERNEL_OK")
</pallas_src>

<mosaic_0001>
module attributes {stable_mosaic.version = 11 : i64} {
  func.func @_decoder_kernel(%arg0: i32, %arg1: memref<32xf32, #tpu.memory_space<smem>>, %arg2: memref<8xf32, #tpu.memory_space<smem>>, %arg3: memref<128xf32, #tpu.memory_space<smem>>, %arg4: memref<4xf32, #tpu.memory_space<smem>>, %arg5: memref<128xf32, #tpu.memory_space<smem>>, %arg6: memref<2xf32, #tpu.memory_space<smem>>, %arg7: memref<1x4x18x128xf32, #tpu.memory_space<vmem>>, %arg8: memref<18x128xf32, #tpu.memory_space<vmem>>, %arg9: memref<1x2x14x128xf32, #tpu.memory_space<vmem>>, %arg10: memref<8x18x128xf32, #tpu.memory_space<vmem>>, %arg11: memref<4x17x128xf32, #tpu.memory_space<vmem>>) attributes {dimension_semantics = [#tpu.dimension_semantics<parallel>], iteration_bounds = array<i64: 2>, scalar_prefetch = 6 : i64, scratch_operands = 2 : i64, tpu.core_type = #tpu.core_type<tc>, window_params = [{transform_indices = @transform_0, window_bounds = array<i64: 1, 4, 18, 128>}, {pipeline_mode = #tpu.pipeline_mode<synchronous>, transform_indices = @transform_1, window_bounds = array<i64: 18, 128>}, {transform_indices = @transform_2, window_bounds = array<i64: 1, 2, 14, 128>}]} {
    %c0 = arith.constant 0 : index
    %c0_0 = arith.constant 0 : index
    %0 = vector.load %arg8[%c0, %c0_0] : memref<18x128xf32, #tpu.memory_space<vmem>>, vector<18x128xf32>
    %c0_1 = arith.constant 0 : index
    %c0_2 = arith.constant 0 : index
    %c0_3 = arith.constant 0 : index
    %c0_4 = arith.constant 0 : index
    %1 = vector.load %arg7[%c0_1, %c0_2, %c0_3, %c0_4] : memref<1x4x18x128xf32, #tpu.memory_space<vmem>>, vector<1x1x18x128xf32>
    %2 = vector.shape_cast %1 : vector<1x1x18x128xf32> to vector<18x128xf32>
    %c0_5 = arith.constant 0 : index
    %c1 = arith.constant 1 : index
    %c0_6 = arith.constant 0 : index
    %c0_7 = arith.constant 0 : index
    %3 = vector.load %arg7[%c0_5, %c1, %c0_6, %c0_7] : memref<1x4x18x128xf32, #tpu.memory_space<vmem>>, vector<1x1x18x128xf32>
    %4 = vector.shape_cast %3 : vector<1x1x18x128xf32> to vector<18x128xf32>
    %c0_8 = arith.constant 0 : index
    %c2 = arith.constant 2 : index
    %c0_9 = arith.constant 0 : index
    %c0_10 = arith.constant 0 : index
    %5 = vector.load %arg7[%c0_8, %c2, %c0_9, %c0_10] : memref<1x4x18x128xf32, #tpu.memory_space<vmem>>, vector<1x1x18x128xf32>
    %6 = vector.shape_cast %5 : vector<1x1x18x128xf32> to vector<18x128xf32>
    %c0_11 = arith.constant 0 : index
    %c3 = arith.constant 3 : index
    %c0_12 = arith.constant 0 : index
    %c0_13 = arith.constant 0 : index
    %7 = vector.load %arg7[%c0_11, %c3, %c0_12, %c0_13] : memref<1x4x18x128xf32, #tpu.memory_space<vmem>>, vector<1x1x18x128xf32>
    %8 = vector.shape_cast %7 : vector<1x1x18x128xf32> to vector<18x128xf32>
    %c0_14 = arith.constant 0 : index
    %9 = memref.load %arg1[%c0_14] : memref<32xf32, #tpu.memory_space<smem>>
    %10 = vector.broadcast %9 : f32 to vector<18x128xf32>
    %11 = arith.mulf %2, %10 : vector<18x128xf32>
    %c1_15 = arith.constant 1 : index
    %12 = memref.load %arg1[%c1_15] : memref<32xf32, #tpu.memory_space<smem>>
    %13 = vector.broadcast %12 : f32 to vector<18x128xf32>
    %14 = arith.mulf %4, %13 : vector<18x128xf32>
    %15 = arith.addf %11, %14 : vector<18x128xf32>
    %c2_16 = arith.constant 2 : index
    %16 = memref.load %arg1[%c2_16] : memref<32xf32, #tpu.memory_space<smem>>
    %17 = vector.broadcast %16 : f32 to vector<18x128xf32>
    %18 = arith.mulf %6, %17 : vector<18x128xf32>
    %19 = arith.addf %15, %18 : vector<18x128xf32>
    %c3_17 = arith.constant 3 : index
    %20 = memref.load %arg1[%c3_17] : memref<32xf32, #tpu.memory_space<smem>>
    %21 = vector.broadcast %20 : f32 to vector<18x128xf32>
    %22 = arith.mulf %8, %21 : vector<18x128xf32>
    %23 = arith.addf %19, %22 : vector<18x128xf32>
    %c0_18 = arith.constant 0 : index
    %24 = memref.load %arg2[%c0_18] : memref<8xf32, #tpu.memory_space<smem>>
    %25 = vector.broadcast %24 : f32 to vector<18x128xf32>
    %26 = arith.addf %23, %25 : vector<18x128xf32>
    %cst = arith.constant 0.000000e+00 : f32
    %27 = vector.broadcast %cst : f32 to vector<18x128xf32>
    %28 = arith.maximumf %26, %27 : vector<18x128xf32>
    %29 = arith.mulf %28, %0 : vector<18x128xf32>
    %c0_19 = arith.constant 0 : index
    %c0_20 = arith.constant 0 : index
    %c0_21 = arith.constant 0 : index
    %30 = vector.load %arg10[%c0_19, %c0_20, %c0_21] : memref<8x18x128xf32, #tpu.memory_space<vmem>>, vector<1x18x128xf32>
    %31 = vector.shape_cast %30 : vector<1x18x128xf32> to vector<18x128xf32>
    %32 = vector.shape_cast %29 : vector<18x128xf32> to vector<1x18x128xf32>
    tpu.vector_store %arg10[%c0_19, %c0_20, %c0_21], %32 {strides = array<i32>} : memref<8x18x128xf32, #tpu.memory_space<vmem>>, vector<1x18x128xf32>,
    %c4 = arith.constant 4 : index
    %33 = memref.load %arg1[%c4] : memref<32xf32, #tpu.memory_space<smem>>
    %34 = vector.broadcast %33 : f32 to vector<18x128xf32>
    %35 = arith.mulf %2, %34 : vector<18x128xf32>
    %c5 = arith.constant 5 : index
    %36 = memref.load %arg1[%c5] : memref<32xf32, #tpu.memory_space<smem>>
    %37 = vector.broadcast %36 : f32 to vector<18x128xf32>
    %38 = arith.mulf %4, %37 : vector<18x128xf32>
    %39 = arith.addf %35, %38 : vector<18x128xf32>
    %c6 = arith.constant 6 : index
    %40 = memref.load %arg1[%c6] : memref<32xf32, #tpu.memory_space<smem>>
    %41 = vector.broadcast %40 : f32 to vector<18x128xf32>
    %42 = arith.mulf %6, %41 : vector<18x128xf32>
    %43 = arith.addf %39, %42 : vector<18x128xf32>
    %c7 = arith.constant 7 : index
    %44 = memref.load %arg1[%c7] : memref<32xf32, #tpu.memory_space<smem>>
    %45 = vector.broadcast %44 : f32 to vector<18x128xf32>
    %46 = arith.mulf %8, %45 : vector<18x128xf32>
    %47 = arith.addf %43, %46 : vector<18x128xf32>
    %c1_22 = arith.constant 1 : index
    %48 = memref.load %arg2[%c1_22] : memref<8xf32, #tpu.memory_space<smem>>
    %49 = vector.broadcast %48 : f32 to vector<18x128xf32>
    %50 = arith.addf %47, %49 : vector<18x128xf32>
    %cst_23 = arith.constant 0.000000e+00 : f32
    %51 = vector.broadcast %cst_23 : f32 to vector<18x128xf32>
    %52 = arith.maximumf %50, %51 : vector<18x128xf32>
    %53 = arith.mulf %52, %0 : vector<18x128xf32>
    %c1_24 = arith.constant 1 : index
    %c0_25 = arith.constant 0 : index
    %c0_26 = arith.constant 0 : index
    %54 = vector.load %arg10[%c1_24, %c0_25, %c0_26] : memref<8x18x128xf32, #tpu.memory_space<vmem>>, vector<1x18x128xf32>
    %55 = vector.shape_cast %54 : vector<1x18x128xf32> to vector<18x128xf32>
    %56 = vector.shape_cast %53 : vector<18x128xf32> to vector<1x18x128xf32>
    tpu.vector_store %arg10[%c1_24, %c0_25, %c0_26], %56 {strides = array<i32>} : memref<8x18x128xf32, #tpu.memory_space<vmem>>, vector<1x18x128xf32>,
    %c8 = arith.constant 8 : index
    %57 = memref.load %arg1[%c8] : memref<32xf32, #tpu.memory_space<smem>>
    %58 = vector.broadcast %57 : f32 to vector<18x128xf32>
    %59 = arith.mulf %2, %58 : vector<18x128xf32>
    %c9 = arith.constant 9 : index
    %60 = memref.load %arg1[%c9] : memref<32xf32, #tpu.memory_space<smem>>
    %61 = vector.broadcast %60 : f32 to vector<18x128xf32>
    %62 = arith.mulf %4, %61 : vector<18x128xf32>
    %63 = arith.addf %59, %62 : vector<18x128xf32>
    %c10 = arith.constant 10 : index
    %64 = memref.load %arg1[%c10] : memref<32xf32, #tpu.memory_space<smem>>
    %65 = vector.broadcast %64 : f32 to vector<18x128xf32>
    %66 = arith.mulf %6, %65 : vector<18x128xf32>
    %67 = arith.addf %63, %66 : vector<18x128xf32>
    %c11 = arith.constant 11 : index
    %68 = memref.load %arg1[%c11] : memref<32xf32, #tpu.memory_space<smem>>
    %69 = vector.broadcast %68 : f32 to vector<18x128xf32>
    %70 = arith.mulf %8, %69 : vector<18x128xf32>
    %71 = arith.addf %67, %70 : vector<18x128xf32>
    %c2_27 = arith.constant 2 : index
    %72 = memref.load %arg2[%c2_27] : memref<8xf32, #tpu.memory_space<smem>>
    %73 = vector.broadcast %72 : f32 to vector<18x128xf32>
    %74 = arith.addf %71, %73 : vector<18x128xf32>
    %cst_28 = arith.constant 0.000000e+00 : f32
    %75 = vector.broadcast %cst_28 : f32 to vector<18x128xf32>
    %76 = arith.maximumf %74, %75 : vector<18x128xf32>
    %77 = arith.mulf %76, %0 : vector<18x128xf32>
    %c2_29 = arith.constant 2 : index
    %c0_30 = arith.constant 0 : index
    %c0_31 = arith.constant 0 : index
    %78 = vector.load %arg10[%c2_29, %c0_30, %c0_31] : memref<8x18x128xf32, #tpu.memory_space<vmem>>, vector<1x18x128xf32>
    %79 = vector.shape_cast %78 : vector<1x18x128xf32> to vector<18x128xf32>
    %80 = vector.shape_cast %77 : vector<18x128xf32> to vector<1x18x128xf32>
    tpu.vector_store %arg10[%c2_29, %c0_30, %c0_31], %80 {strides = array<i32>} : memref<8x18x128xf32, #tpu.memory_space<vmem>>, vector<1x18x128xf32>,
    %c12 = arith.constant 12 : index
    %81 = memref.load %arg1[%c12] : memref<32xf32, #tpu.memory_space<smem>>
    %82 = vector.broadcast %81 : f32 to vector<18x128xf32>
    %83 = arith.mulf %2, %82 : vector<18x128xf32>
    %c13 = arith.constant 13 : index
    %84 = memref.load %arg1[%c13] : memref<32xf32, #tpu.memory_space<smem>>
    %85 = vector.broadcast %84 : f32 to vector<18x128xf32>
    %86 = arith.mulf %4, %85 : vector<18x128xf32>
    %87 = arith.addf %83, %86 : vector<18x128xf32>
    %c14 = arith.constant 14 : index
    %88 = memref.load %arg1[%c14] : memref<32xf32, #tpu.memory_space<smem>>
    %89 = vector.broadcast %88 : f32 to vector<18x128xf32>
    %90 = arith.mulf %6, %89 : vector<18x128xf32>
    %91 = arith.addf %87, %90 : vector<18x128xf32>
    %c15 = arith.constant 15 : index
    %92 = memref.load %arg1[%c15] : memref<32xf32, #tpu.memory_space<smem>>
    %93 = vector.broadcast %92 : f32 to vector<18x128xf32>
    %94 = arith.mulf %8, %93 : vector<18x128xf32>
    %95 = arith.addf %91, %94 : vector<18x128xf32>
    %c3_32 = arith.constant 3 : index
    %96 = memref.load %arg2[%c3_32] : memref<8xf32, #tpu.memory_space<smem>>
    %97 = vector.broadcast %96 : f32 to vector<18x128xf32>
    %98 = arith.addf %95, %97 : vector<18x128xf32>
    %cst_33 = arith.constant 0.000000e+00 : f32
    %99 = vector.broadcast %cst_33 : f32 to vector<18x128xf32>
    %100 = arith.maximumf %98, %99 : vector<18x128xf32>
    %101 = arith.mulf %100, %0 : vector<18x128xf32>
    %c3_34 = arith.constant 3 : index
    %c0_35 = arith.constant 0 : index
    %c0_36 = arith.constant 0 : index
    %102 = vector.load %arg10[%c3_34, %c0_35, %c0_36] : memref<8x18x128xf32, #tpu.memory_space<vmem>>, vector<1x18x128xf32>
    %103 = vector.shape_cast %102 : vector<1x18x128xf32> to vector<18x128xf32>
    %104 = vector.shape_cast %101 : vector<18x128xf32> to vector<1x18x128xf32>
    tpu.vector_store %arg10[%c3_34, %c0_35, %c0_36], %104 {strides = array<i32>} : memref<8x18x128xf32, #tpu.memory_space<vmem>>, vector<1x18x128xf32>,
    %c16 = arith.constant 16 : index
    %105 = memref.load %arg1[%c16] : memref<32xf32, #tpu.memory_space<smem>>
    %106 = vector.broadcast %105 : f32 to vector<18x128xf32>
    %107 = arith.mulf %2, %106 : vector<18x128xf32>
    %c17 = arith.constant 17 : index
    %108 = memref.load %arg1[%c17] : memref<32xf32, #tpu.memory_space<smem>>
    %109 = vector.broadcast %108 : f32 to vector<18x128xf32>
    %110 = arith.mulf %4, %109 : vector<18x128xf32>
    %111 = arith.addf %107, %110 : vector<18x128xf32>
    %c18 = arith.constant 18 : index
    %112 = memref.load %arg1[%c18] : memref<32xf32, #tpu.memory_space<smem>>
    %113 = vector.broadcast %112 : f32 to vector<18x128xf32>
    %114 = arith.mulf %6, %113 : vector<18x128xf32>
    %115 = arith.addf %111, %114 : vector<18x128xf32>
    %c19 = arith.constant 19 : index
    %116 = memref.load %arg1[%c19] : memref<32xf32, #tpu.memory_space<smem>>
    %117 = vector.broadcast %116 : f32 to vector<18x128xf32>
    %118 = arith.mulf %8, %117 : vector<18x128xf32>
    %119 = arith.addf %115, %118 : vector<18x128xf32>
    %c4_37 = arith.constant 4 : index
    %120 = memref.load %arg2[%c4_37] : memref<8xf32, #tpu.memory_space<smem>>
    %121 = vector.broadcast %120 : f32 to vector<18x128xf32>
    %122 = arith.addf %119, %121 : vector<18x128xf32>
    %cst_38 = arith.constant 0.000000e+00 : f32
    %123 = vector.broadcast %cst_38 : f32 to vector<18x128xf32>
    %124 = arith.maximumf %122, %123 : vector<18x128xf32>
    %125 = arith.mulf %124, %0 : vector<18x128xf32>
    %c4_39 = arith.constant 4 : index
    %c0_40 = arith.constant 0 : index
    %c0_41 = arith.constant 0 : index
    %126 = vector.load %arg10[%c4_39, %c0_40, %c0_41] : memref<8x18x128xf32, #tpu.memory_space<vmem>>, vector<1x18x128xf32>
    %127 = vector.shape_cast %126 : vector<1x18x128xf32> to vector<18x128xf32>
    %128 = vector.shape_cast %125 : vector<18x128xf32> to vector<1x18x128xf32>
    tpu.vector_store %arg10[%c4_39, %c0_40, %c0_41], %128 {strides = array<i32>} : memref<8x18x128xf32, #tpu.memory_space<vmem>>, vector<1x18x128xf32>,
    %c20 = arith.constant 20 : index
    %129 = memref.load %arg1[%c20] : memref<32xf32, #tpu.memory_space<smem>>
    %130 = vector.broadcast %129 : f32 to vector<18x128xf32>
    %131 = arith.mulf %2, %130 : vector<18x128xf32>
    %c21 = arith.constant 21 : index
    %132 = memref.load %arg1[%c21] : memref<32xf32, #tpu.memory_space<smem>>
    %133 = vector.broadcast %132 : f32 to vector<18x128xf32>
    %134 = arith.mulf %4, %133 : vector<18x128xf32>
    %135 = arith.addf %131, %134 : vector<18x128xf32>
    %c22 = arith.constant 22 : index
    %136 = memref.load %arg1[%c22] : memref<32xf32, #tpu.memory_space<smem>>
    %137 = vector.broadcast %136 : f32 to vector<18x128xf32>
    %138 = arith.mulf %6, %137 : vector<18x128xf32>
    %139 = arith.addf %135, %138 : vector<18x128xf32>
    %c23 = arith.constant 23 : index
    %140 = memref.load %arg1[%c23] : memref<32xf32, #tpu.memory_space<smem>>
    %141 = vector.broadcast %140 : f32 to vector<18x128xf32>
    %142 = arith.mulf %8, %141 : vector<18x128xf32>
    %143 = arith.addf %139, %142 : vector<18x128xf32>
    %c5_42 = arith.constant 5 : index
    %144 = memref.load %arg2[%c5_42] : memref<8xf32, #tpu.memory_space<smem>>
    %145 = vector.broadcast %144 : f32 to vector<18x128xf32>
    %146 = arith.addf %143, %145 : vector<18x128xf32>
    %cst_43 = arith.constant 0.000000e+00 : f32
    %147 = vector.broadcast %cst_43 : f32 to vector<18x128xf32>
    %148 = arith.maximumf %146, %147 : vector<18x128xf32>
    %149 = arith.mulf %148, %0 : vector<18x128xf32>
    %c5_44 = arith.constant 5 : index
    %c0_45 = arith.constant 0 : index
    %c0_46 = arith.constant 0 : index
    %150 = vector.load %arg10[%c5_44, %c0_45, %c0_46] : memref<8x18x128xf32, #tpu.memory_space<vmem>>, vector<1x18x128xf32>
    %151 = vector.shape_cast %150 : vector<1x18x128xf32> to vector<18x128xf32>
    %152 = vector.shape_cast %149 : vector<18x128xf32> to vector<1x18x128xf32>
    tpu.vector_store %arg10[%c5_44, %c0_45, %c0_46], %152 {strides = array<i32>} : memref<8x18x128xf32, #tpu.memory_space<vmem>>, vector<1x18x128xf32>,
    %c24 = arith.constant 24 : index
    %153 = memref.load %arg1[%c24] : memref<32xf32, #tpu.memory_space<smem>>
    %154 = vector.broadcast %153 : f32 to vector<18x128xf32>
    %155 = arith.mulf %2, %154 : vector<18x128xf32>
    %c25 = arith.constant 25 : index
    %156 = memref.load %arg1[%c25] : memref<32xf32, #tpu.memory_space<smem>>
    %157 = vector.broadcast %156 : f32 to vector<18x128xf32>
    %158 = arith.mulf %4, %157 : vector<18x128xf32>
    %159 = arith.addf %155, %158 : vector<18x128xf32>
    %c26 = arith.constant 26 : index
    %160 = memref.load %arg1[%c26] : memref<32xf32, #tpu.memory_space<smem>>
    %161 = vector.broadcast %160 : f32 to vector<18x128xf32>
    %162 = arith.mulf %6, %161 : vector<18x128xf32>
    %163 = arith.addf %159, %162 : vector<18x128xf32>
    %c27 = arith.constant 27 : index
    %164 = memref.load %arg1[%c27] : memref<32xf32, #tpu.memory_space<smem>>
    %165 = vector.broadcast %164 : f32 to vector<18x128xf32>
    %166 = arith.mulf %8, %165 : vector<18x128xf32>
    %167 = arith.addf %163, %166 : vector<18x128xf32>
    %c6_47 = arith.constant 6 : index
    %168 = memref.load %arg2[%c6_47] : memref<8xf32, #tpu.memory_space<smem>>
    %169 = vector.broadcast %168 : f32 to vector<18x128xf32>
    %170 = arith.addf %167, %169 : vector<18x128xf32>
    %cst_48 = arith.constant 0.000000e+00 : f32
    %171 = vector.broadcast %cst_48 : f32 to vector<18x128xf32>
    %172 = arith.maximumf %170, %171 : vector<18x128xf32>
    %173 = arith.mulf %172, %0 : vector<18x128xf32>
    %c6_49 = arith.constant 6 : index
    %c0_50 = arith.constant 0 : index
    %c0_51 = arith.constant 0 : index
    %174 = vector.load %arg10[%c6_49, %c0_50, %c0_51] : memref<8x18x128xf32, #tpu.memory_space<vmem>>, vector<1x18x128xf32>
    %175 = vector.shape_cast %174 : vector<1x18x128xf32> to vector<18x128xf32>
    %176 = vector.shape_cast %173 : vector<18x128xf32> to vector<1x18x128xf32>
    tpu.vector_store %arg10[%c6_49, %c0_50, %c0_51], %176 {strides = array<i32>} : memref<8x18x128xf32, #tpu.memory_space<vmem>>, vector<1x18x128xf32>,
    %c28 = arith.constant 28 : index
    %177 = memref.load %arg1[%c28] : memref<32xf32, #tpu.memory_space<smem>>
    %178 = vector.broadcast %177 : f32 to vector<18x128xf32>
    %179 = arith.mulf %2, %178 : vector<18x128xf32>
    %c29 = arith.constant 29 : index
    %180 = memref.load %arg1[%c29] : memref<32xf32, #tpu.memory_space<smem>>
    %181 = vector.broadcast %180 : f32 to vector<18x128xf32>
    %182 = arith.mulf %4, %181 : vector<18x128xf32>
    %183 = arith.addf %179, %182 : vector<18x128xf32>
    %c30 = arith.constant 30 : index
    %184 = memref.load %arg1[%c30] : memref<32xf32, #tpu.memory_space<smem>>
    %185 = vector.broadcast %184 : f32 to vector<18x128xf32>
    %186 = arith.mulf %6, %185 : vector<18x128xf32>
    %187 = arith.addf %183, %186 : vector<18x128xf32>
    %c31 = arith.constant 31 : index
    %188 = memref.load %arg1[%c31] : memref<32xf32, #tpu.memory_space<smem>>
    %189 = vector.broadcast %188 : f32 to vector<18x128xf32>
    %190 = arith.mulf %8, %189 : vector<18x128xf32>
    %191 = arith.addf %187, %190 : vector<18x128xf32>
    %c7_52 = arith.constant 7 : index
    %192 = memref.load %arg2[%c7_52] : memref<8xf32, #tpu.memory_space<smem>>
    %193 = vector.broadcast %192 : f32 to vector<18x128xf32>
    %194 = arith.addf %191, %193 : vector<18x128xf32>
    %cst_53 = arith.constant 0.000000e+00 : f32
    %195 = vector.broadcast %cst_53 : f32 to vector<18x128xf32>
    %196 = arith.maximumf %194, %195 : vector<18x128xf32>
    %197 = arith.mulf %196, %0 : vector<18x128xf32>
    %c7_54 = arith.constant 7 : index
    %c0_55 = arith.constant 0 : index
    %c0_56 = arith.constant 0 : index
    %198 = vector.load %arg10[%c7_54, %c0_55, %c0_56] : memref<8x18x128xf32, #tpu.memory_space<vmem>>, vector<1x18x128xf32>
    %199 = vector.shape_cast %198 : vector<1x18x128xf32> to vector<18x128xf32>
    %200 = vector.shape_cast %197 : vector<18x128xf32> to vector<1x18x128xf32>
    tpu.vector_store %arg10[%c7_54, %c0_55, %c0_56], %200 {strides = array<i32>} : memref<8x18x128xf32, #tpu.memory_space<vmem>>, vector<1x18x128xf32>,
    %c3_57 = arith.constant 3 : index
    %201 = memref.load %arg3[%c3_57] : memref<128xf32, #tpu.memory_space<smem>>
    %c0_58 = arith.constant 0 : index
    %c0_59 = arith.constant 0 : index
    %c0_60 = arith.constant 0 : index
    %202 = vector.load %arg10[%c0_58, %c0_59, %c0_60] : memref<8x18x128xf32, #tpu.memory_space<vmem>>, vector<1x17x127xf32>
    %203 = vector.shape_cast %202 : vector<1x17x127xf32> to vector<17x127xf32>
    %204 = vector.broadcast %201 : f32 to vector<17x127xf32>
    %205 = arith.mulf %203, %204 : vector<17x127xf32>
    %c2_61 = arith.constant 2 : index
    %206 = memref.load %arg3[%c2_61] : memref<128xf32, #tpu.memory_space<smem>>
    %c0_62 = arith.constant 0 : index
    %c0_63 = arith.constant 0 : index
    %c1_64 = arith.constant 1 : index
    %207 = vector.load %arg10[%c0_62, %c0_63, %c1_64] : memref<8x18x128xf32, #tpu.memory_space<vmem>>, vector<1x17x127xf32>
    %208 = vector.shape_cast %207 : vector<1x17x127xf32> to vector<17x127xf32>
    %209 = vector.broadcast %206 : f32 to vector<17x127xf32>
    %210 = arith.mulf %208, %209 : vector<17x127xf32>
    %211 = arith.addf %205, %210 : vector<17x127xf32>
    %c1_65 = arith.constant 1 : index
    %212 = memref.load %arg3[%c1_65] : memref<128xf32, #tpu.memory_space<smem>>
    %c0_66 = arith.constant 0 : index
    %c1_67 = arith.constant 1 : index
    %c0_68 = arith.constant 0 : index
    %213 = vector.load %arg10[%c0_66, %c1_67, %c0_68] : memref<8x18x128xf32, #tpu.memory_space<vmem>>, vector<1x17x127xf32>
    %214 = vector.shape_cast %213 : vector<1x17x127xf32> to vector<17x127xf32>
    %215 = vector.broadcast %212 : f32 to vector<17x127xf32>
    %216 = arith.mulf %214, %215 : vector<17x127xf32>
    %217 = arith.addf %211, %216 : vector<17x127xf32>
    %c0_69 = arith.constant 0 : index
    %218 = memref.load %arg3[%c0_69] : memref<128xf32, #tpu.memory_space<smem>>
    %c0_70 = arith.constant 0 : index
    %c1_71 = arith.constant 1 : index
    %c1_72 = arith.constant 1 : index
    %219 = vector.load %arg10[%c0_70, %c1_71, %c1_72] : memref<8x18x128xf32, #tpu.memory_space<vmem>>, vector<1x17x127xf32>
    %220 = vector.shape_cast %219 : vector<1x17x127xf32> to vector<17x127xf32>
    %221 = vector.broadcast %218 : f32 to vector<17x127xf32>
    %222 = arith.mulf %220, %221 : vector<17x127xf32>
    %223 = arith.addf %217, %222 : vector<17x127xf32>
    %c19_73 = arith.constant 19 : index
    %224 = memref.load %arg3[%c19_73] : memref<128xf32, #tpu.memory_space<smem>>
    %c1_74 = arith.constant 1 : index
    %c0_75 = arith.constant 0 : index
    %c0_76 = arith.constant 0 : index
    %225 = vector.load %arg10[%c1_74, %c0_75, %c0_76] : memref<8x18x128xf32, #tpu.memory_space<vmem>>, vector<1x17x127xf32>
    %226 = vector.shape_cast %225 : vector<1x17x127xf32> to vector<17x127xf32>
    %227 = vector.broadcast %224 : f32 to vector<17x127xf32>
    %228 = arith.mulf %226, %227 : vector<17x127xf32>
    %229 = arith.addf %223, %228 : vector<17x127xf32>
    %c18_77 = arith.constant 18 : index
    %230 = memref.load %arg3[%c18_77] : memref<128xf32, #tpu.memory_space<smem>>
    %c1_78 = arith.constant 1 : index
    %c0_79 = arith.constant 0 : index
    %c1_80 = arith.constant 1 : index
    %231 = vector.load %arg10[%c1_78, %c0_79, %c1_80] : memref<8x18x128xf32, #tpu.memory_space<vmem>>, vector<1x17x127xf32>
    %232 = vector.shape_cast %231 : vector<1x17x127xf32> to vector<17x127xf32>
    %233 = vector.broadcast %230 : f32 to vector<17x127xf32>
    %234 = arith.mulf %232, %233 : vector<17x127xf32>
    %235 = arith.addf %229, %234 : vector<17x127xf32>
    %c17_81 = arith.constant 17 : index
    %236 = memref.load %arg3[%c17_81] : memref<128xf32, #tpu.memory_space<smem>>
    %c1_82 = arith.constant 1 : index
    %c1_83 = arith.constant 1 : index
    %c0_84 = arith.constant 0 : index
    %237 = vector.load %arg10[%c1_82, %c1_83, %c0_84] : memref<8x18x128xf32, #tpu.memory_space<vmem>>, vector<1x17x127xf32>
    %238 = vector.shape_cast %237 : vector<1x17x127xf32> to vector<17x127xf32>
    %239 = vector.broadcast %236 : f32 to vector<17x127xf32>
    %240 = arith.mulf %238, %239 : vector<17x127xf32>
    %241 = arith.addf %235, %240 : vector<17x127xf32>
    %c16_85 = arith.constant 16 : index
    %242 = memref.load %arg3[%c16_85] : memref<128xf32, #tpu.memory_space<smem>>
    %c1_86 = arith.constant 1 : index
    %c1_87 = arith.constant 1 : index
    %c1_88 = arith.constant 1 : index
    %243 = vector.load %arg10[%c1_86, %c1_87, %c1_88] : memref<8x18x128xf32, #tpu.memory_space<vmem>>, vector<1x17x127xf32>
    %244 = vector.shape_cast %243 : vector<1x17x127xf32> to vector<17x127xf32>
    %245 = vector.broadcast %242 : f32 to vector<17x127xf32>
    %246 = arith.mulf %244, %245 : vector<17x127xf32>
    %247 = arith.addf %241, %246 : vector<17x127xf32>
    %c35 = arith.constant 35 : index
    %248 = memref.load %arg3[%c35] : memref<128xf32, #tpu.memory_space<smem>>
    %c2_89 = arith.constant 2 : index
    %c0_90 = arith.constant 0 : index
    %c0_91 = arith.constant 0 : index
    %249 = vector.load %arg10[%c2_89, %c0_90, %c0_91] : memref<8x18x128xf32, #tpu.memory_space<vmem>>, vector<1x17x127xf32>
    %250 = vector.shape_cast %249 : vector<1x17x127xf32> to vector<17x127xf32>
    %251 = vector.broadcast %248 : f32 to vector<17x127xf32>
    %252 = arith.mulf %250, %251 : vector<17x127xf32>
    %253 = arith.addf %247, %252 : vector<17x127xf32>
    %c34 = arith.constant 34 : index
    %254 = memref.load %arg3[%c34] : memref<128xf32, #tpu.memory_space<smem>>
    %c2_92 = arith.constant 2 : index
    %c0_93 = arith.constant 0 : index
    %c1_94 = arith.constant 1 : index
    %255 = vector.load %arg10[%c2_92, %c0_93, %c1_94] : memref<8x18x128xf32, #tpu.memory_space<vmem>>, vector<1x17x127xf32>
    %256 = vector.shape_cast %255 : vector<1x17x127xf32> to vector<17x127xf32>
    %257 = vector.broadcast %254 : f32 to vector<17x127xf32>
    %258 = arith.mulf %256, %257 : vector<17x127xf32>
    %259 = arith.addf %253, %258 : vector<17x127xf32>
    %c33 = arith.constant 33 : index
    %260 = memref.load %arg3[%c33] : memref<128xf32, #tpu.memory_space<smem>>
    %c2_95 = arith.constant 2 : index
    %c1_96 = arith.constant 1 : index
    %c0_97 = arith.constant 0 : index
    %261 = vector.load %arg10[%c2_95, %c1_96, %c0_97] : memref<8x18x128xf32, #tpu.memory_space<vmem>>, vector<1x17x127xf32>
    %262 = vector.shape_cast %261 : vector<1x17x127xf32> to vector<17x127xf32>
    %263 = vector.broadcast %260 : f32 to vector<17x127xf32>
    %264 = arith.mulf %262, %263 : vector<17x127xf32>
    %265 = arith.addf %259, %264 : vector<17x127xf32>
    %c32 = arith.constant 32 : index
    %266 = memref.load %arg3[%c32] : memref<128xf32, #tpu.memory_space<smem>>
    %c2_98 = arith.constant 2 : index
    %c1_99 = arith.constant 1 : index
    %c1_100 = arith.constant 1 : index
    %267 = vector.load %arg10[%c2_98, %c1_99, %c1_100] : memref<8x18x128xf32, #tpu.memory_space<vmem>>, vector<1x17x127xf32>
    %268 = vector.shape_cast %267 : vector<1x17x127xf32> to vector<17x127xf32>
    %269 = vector.broadcast %266 : f32 to vector<17x127xf32>
    %270 = arith.mulf %268, %269 : vector<17x127xf32>
    %271 = arith.addf %265, %270 : vector<17x127xf32>
    %c51 = arith.constant 51 : index
    %272 = memref.load %arg3[%c51] : memref<128xf32, #tpu.memory_space<smem>>
    %c3_101 = arith.constant 3 : index
    %c0_102 = arith.constant 0 : index
    %c0_103 = arith.constant 0 : index
    %273 = vector.load %arg10[%c3_101, %c0_102, %c0_103] : memref<8x18x128xf32, #tpu.memory_space<vmem>>, vector<1x17x127xf32>
    %274 = vector.shape_cast %273 : vector<1x17x127xf32> to vector<17x127xf32>
    %275 = vector.broadcast %272 : f32 to vector<17x127xf32>
    %276 = arith.mulf %274, %275 : vector<17x127xf32>
    %277 = arith.addf %271, %276 : vector<17x127xf32>
    %c50 = arith.constant 50 : index
    %278 = memref.load %arg3[%c50] : memref<128xf32, #tpu.memory_space<smem>>
    %c3_104 = arith.constant 3 : index
    %c0_105 = arith.constant 0 : index
    %c1_106 = arith.constant 1 : index
    %279 = vector.load %arg10[%c3_104, %c0_105, %c1_106] : memref<8x18x128xf32, #tpu.memory_space<vmem>>, vector<1x17x127xf32>
    %280 = vector.shape_cast %279 : vector<1x17x127xf32> to vector<17x127xf32>
    %281 = vector.broadcast %278 : f32 to vector<17x127xf32>
    %282 = arith.mulf %280, %281 : vector<17x127xf32>
    %283 = arith.addf %277, %282 : vector<17x127xf32>
    %c49 = arith.constant 49 : index
    %284 = memref.load %arg3[%c49] : memref<128xf32, #tpu.memory_space<smem>>
    %c3_107 = arith.constant 3 : index
    %c1_108 = arith.constant 1 : index
    %c0_109 = arith.constant 0 : index
    %285 = vector.load %arg10[%c3_107, %c1_108, %c0_109] : memref<8x18x128xf32, #tpu.memory_space<vmem>>, vector<1x17x127xf32>
    %286 = vector.shape_cast %285 : vector<1x17x127xf32> to vector<17x127xf32>
    %287 = vector.broadcast %284 : f32 to vector<17x127xf32>
    %288 = arith.mulf %286, %287 : vector<17x127xf32>
    %289 = arith.addf %283, %288 : vector<17x127xf32>
    %c48 = arith.constant 48 : index
    %290 = memref.load %arg3[%c48] : memref<128xf32, #tpu.memory_space<smem>>
    %c3_110 = arith.constant 3 : index
    %c1_111 = arith.constant 1 : index
    %c1_112 = arith.constant 1 : index
    %291 = vector.load %arg10[%c3_110, %c1_111, %c1_112] : memref<8x18x128xf32, #tpu.memory_space<vmem>>, vector<1x17x127xf32>
    %292 = vector.shape_cast %291 : vector<1x17x127xf32> to vector<17x127xf32>
    %293 = vector.broadcast %290 : f32 to vector<17x127xf32>
    %294 = arith.mulf %292, %293 : vector<17x127xf32>
    %295 = arith.addf %289, %294 : vector<17x127xf32>
    %c67 = arith.constant 67 : index
    %296 = memref.load %arg3[%c67] : memref<128xf32, #tpu.memory_space<smem>>
    %c4_113 = arith.constant 4 : index
    %c0_114 = arith.constant 0 : index
    %c0_115 = arith.constant 0 : index
    %297 = vector.load %arg10[%c4_113, %c0_114, %c0_115] : memref<8x18x128xf32, #tpu.memory_space<vmem>>, vector<1x17x127xf32>
    %298 = vector.shape_cast %297 : vector<1x17x127xf32> to vector<17x127xf32>
    %299 = vector.broadcast %296 : f32 to vector<17x127xf32>
    %300 = arith.mulf %298, %299 : vector<17x127xf32>
    %301 = arith.addf %295, %300 : vector<17x127xf32>
    %c66 = arith.constant 66 : index
    %302 = memref.load %arg3[%c66] : memref<128xf32, #tpu.memory_space<smem>>
    %c4_116 = arith.constant 4 : index
    %c0_117 = arith.constant 0 : index
    %c1_118 = arith.constant 1 : index
    %303 = vector.load %arg10[%c4_116, %c0_117, %c1_118] : memref<8x18x128xf32, #tpu.memory_space<vmem>>, vector<1x17x127xf32>
    %304 = vector.shape_cast %303 : vector<1x17x127xf32> to vector<17x127xf32>
    %305 = vector.broadcast %302 : f32 to vector<17x127xf32>
    %306 = arith.mulf %304, %305 : vector<17x127xf32>
    %307 = arith.addf %301, %306 : vector<17x127xf32>
    %c65 = arith.constant 65 : index
    %308 = memref.load %arg3[%c65] : memref<128xf32, #tpu.memory_space<smem>>
    %c4_119 = arith.constant 4 : index
    %c1_120 = arith.constant 1 : index
    %c0_121 = arith.constant 0 : index
    %309 = vector.load %arg10[%c4_119, %c1_120, %c0_121] : memref<8x18x128xf32, #tpu.memory_space<vmem>>, vector<1x17x127xf32>
    %310 = vector.shape_cast %309 : vector<1x17x127xf32> to vector<17x127xf32>
    %311 = vector.broadcast %308 : f32 to vector<17x127xf32>
    %312 = arith.mulf %310, %311 : vector<17x127xf32>
    %313 = arith.addf %307, %312 : vector<17x127xf32>
    %c64 = arith.constant 64 : index
    %314 = memref.load %arg3[%c64] : memref<128xf32, #tpu.memory_space<smem>>
    %c4_122 = arith.constant 4 : index
    %c1_123 = arith.constant 1 : index
    %c1_124 = arith.constant 1 : index
    %315 = vector.load %arg10[%c4_122, %c1_123, %c1_124] : memref<8x18x128xf32, #tpu.memory_space<vmem>>, vector<1x17x127xf32>
    %316 = vector.shape_cast %315 : vector<1x17x127xf32> to vector<17x127xf32>
    %317 = vector.broadcast %314 : f32 to vector<17x127xf32>
    %318 = arith.mulf %316, %317 : vector<17x127xf32>
    %319 = arith.addf %313, %318 : vector<17x127xf32>
    %c83 = arith.constant 83 : index
    %320 = memref.load %arg3[%c83] : memref<128xf32, #tpu.memory_space<smem>>
    %c5_125 = arith.constant 5 : index
    %c0_126 = arith.constant 0 : index
    %c0_127 = arith.constant 0 : index
    %321 = vector.load %arg10[%c5_125, %c0_126, %c0_127] : memref<8x18x128xf32, #tpu.memory_space<vmem>>, vector<1x17x127xf32>
    %322 = vector.shape_cast %321 : vector<1x17x127xf32> to vector<17x127xf32>
    %323 = vector.broadcast %320 : f32 to vector<17x127xf32>
    %324 = arith.mulf %322, %323 : vector<17x127xf32>
    %325 = arith.addf %319, %324 : vector<17x127xf32>
    %c82 = arith.constant 82 : index
    %326 = memref.load %arg3[%c82] : memref<128xf32, #tpu.memory_space<smem>>
    %c5_128 = arith.constant 5 : index
    %c0_129 = arith.constant 0 : index
    %c1_130 = arith.constant 1 : index
    %327 = vector.load %arg10[%c5_128, %c0_129, %c1_130] : memref<8x18x128xf32, #tpu.memory_space<vmem>>, vector<1x17x127xf32>
    %328 = vector.shape_cast %327 : vector<1x17x127xf32> to vector<17x127xf32>
    %329 = vector.broadcast %326 : f32 to vector<17x127xf32>
    %330 = arith.mulf %328, %329 : vector<17x127xf32>
    %331 = arith.addf %325, %330 : vector<17x127xf32>
    %c81 = arith.constant 81 : index
    %332 = memref.load %arg3[%c81] : memref<128xf32, #tpu.memory_space<smem>>
    %c5_131 = arith.constant 5 : index
    %c1_132 = arith.constant 1 : index
    %c0_133 = arith.constant 0 : index
    %333 = vector.load %arg10[%c5_131, %c1_132, %c0_133] : memref<8x18x128xf32, #tpu.memory_space<vmem>>, vector<1x17x127xf32>
    %334 = vector.shape_cast %333 : vector<1x17x127xf32> to vector<17x127xf32>
    %335 = vector.broadcast %332 : f32 to vector<17x127xf32>
    %336 = arith.mulf %334, %335 : vector<17x127xf32>
    %337 = arith.addf %331, %336 : vector<17x127xf32>
    %c80 = arith.constant 80 : index
    %338 = memref.load %arg3[%c80] : memref<128xf32, #tpu.memory_space<smem>>
    %c5_134 = arith.constant 5 : index
    %c1_135 = arith.constant 1 : index
    %c1_136 = arith.constant 1 : index
    %339 = vector.load %arg10[%c5_134, %c1_135, %c1_136] : memref<8x18x128xf32, #tpu.memory_space<vmem>>, vector<1x17x127xf32>
    %340 = vector.shape_cast %339 : vector<1x17x127xf32> to vector<17x127xf32>
    %341 = vector.broadcast %338 : f32 to vector<17x127xf32>
    %342 = arith.mulf %340, %341 : vector<17x127xf32>
    %343 = arith.addf %337, %342 : vector<17x127xf32>
    %c99 = arith.constant 99 : index
    %344 = memref.load %arg3[%c99] : memref<128xf32, #tpu.memory_space<smem>>
    %c6_137 = arith.constant 6 : index
    %c0_138 = arith.constant 0 : index
    %c0_139 = arith.constant 0 : index
    %345 = vector.load %arg10[%c6_137, %c0_138, %c0_139] : memref<8x18x128xf32, #tpu.memory_space<vmem>>, vector<1x17x127xf32>
    %346 = vector.shape_cast %345 : vector<1x17x127xf32> to vector<17x127xf32>
    %347 = vector.broadcast %344 : f32 to vector<17x127xf32>
    %348 = arith.mulf %346, %347 : vector<17x127xf32>
    %349 = arith.addf %343, %348 : vector<17x127xf32>
    %c98 = arith.constant 98 : index
    %350 = memref.load %arg3[%c98] : memref<128xf32, #tpu.memory_space<smem>>
    %c6_140 = arith.constant 6 : index
    %c0_141 = arith.constant 0 : index
    %c1_142 = arith.constant 1 : index
    %351 = vector.load %arg10[%c6_140, %c0_141, %c1_142] : memref<8x18x128xf32, #tpu.memory_space<vmem>>, vector<1x17x127xf32>
    %352 = vector.shape_cast %351 : vector<1x17x127xf32> to vector<17x127xf32>
    %353 = vector.broadcast %350 : f32 to vector<17x127xf32>
    %354 = arith.mulf %352, %353 : vector<17x127xf32>
    %355 = arith.addf %349, %354 : vector<17x127xf32>
    %c97 = arith.constant 97 : index
    %356 = memref.load %arg3[%c97] : memref<128xf32, #tpu.memory_space<smem>>
    %c6_143 = arith.constant 6 : index
    %c1_144 = arith.constant 1 : index
    %c0_145 = arith.constant 0 : index
    %357 = vector.load %arg10[%c6_143, %c1_144, %c0_145] : memref<8x18x128xf32, #tpu.memory_space<vmem>>, vector<1x17x127xf32>
    %358 = vector.shape_cast %357 : vector<1x17x127xf32> to vector<17x127xf32>
    %359 = vector.broadcast %356 : f32 to vector<17x127xf32>
    %360 = arith.mulf %358, %359 : vector<17x127xf32>
    %361 = arith.addf %355, %360 : vector<17x127xf32>
    %c96 = arith.constant 96 : index
    %362 = memref.load %arg3[%c96] : memref<128xf32, #tpu.memory_space<smem>>
    %c6_146 = arith.constant 6 : index
    %c1_147 = arith.constant 1 : index
    %c1_148 = arith.constant 1 : index
    %363 = vector.load %arg10[%c6_146, %c1_147, %c1_148] : memref<8x18x128xf32, #tpu.memory_space<vmem>>, vector<1x17x127xf32>
    %364 = vector.shape_cast %363 : vector<1x17x127xf32> to vector<17x127xf32>
    %365 = vector.broadcast %362 : f32 to vector<17x127xf32>
    %366 = arith.mulf %364, %365 : vector<17x127xf32>
    %367 = arith.addf %361, %366 : vector<17x127xf32>
    %c115 = arith.constant 115 : index
    %368 = memref.load %arg3[%c115] : memref<128xf32, #tpu.memory_space<smem>>
    %c7_149 = arith.constant 7 : index
    %c0_150 = arith.constant 0 : index
    %c0_151 = arith.constant 0 : index
    %369 = vector.load %arg10[%c7_149, %c0_150, %c0_151] : memref<8x18x128xf32, #tpu.memory_space<vmem>>, vector<1x17x127xf32>
    %370 = vector.shape_cast %369 : vector<1x17x127xf32> to vector<17x127xf32>
    %371 = vector.broadcast %368 : f32 to vector<17x127xf32>
    %372 = arith.mulf %370, %371 : vector<17x127xf32>
    %373 = arith.addf %367, %372 : vector<17x127xf32>
    %c114 = arith.constant 114 : index
    %374 = memref.load %arg3[%c114] : memref<128xf32, #tpu.memory_space<smem>>
    %c7_152 = arith.constant 7 : index
    %c0_153 = arith.constant 0 : index
    %c1_154 = arith.constant 1 : index
    %375 = vector.load %arg10[%c7_152, %c0_153, %c1_154] : memref<8x18x128xf32, #tpu.memory_space<vmem>>, vector<1x17x127xf32>
    %376 = vector.shape_cast %375 : vector<1x17x127xf32> to vector<17x127xf32>
    %377 = vector.broadcast %374 : f32 to vector<17x127xf32>
    %378 = arith.mulf %376, %377 : vector<17x127xf32>
    %379 = arith.addf %373, %378 : vector<17x127xf32>
    %c113 = arith.constant 113 : index
    %380 = memref.load %arg3[%c113] : memref<128xf32, #tpu.memory_space<smem>>
    %c7_155 = arith.constant 7 : index
    %c1_156 = arith.constant 1 : index
    %c0_157 = arith.constant 0 : index
    %381 = vector.load %arg10[%c7_155, %c1_156, %c0_157] : memref<8x18x128xf32, #tpu.memory_space<vmem>>, vector<1x17x127xf32>
    %382 = vector.shape_cast %381 : vector<1x17x127xf32> to vector<17x127xf32>
    %383 = vector.broadcast %380 : f32 to vector<17x127xf32>
    %384 = arith.mulf %382, %383 : vector<17x127xf32>
    %385 = arith.addf %379, %384 : vector<17x127xf32>
    %c112 = arith.constant 112 : index
    %386 = memref.load %arg3[%c112] : memref<128xf32, #tpu.memory_space<smem>>
    %c7_158 = arith.constant 7 : index
    %c1_159 = arith.constant 1 : index
    %c1_160 = arith.constant 1 : index
    %387 = vector.load %arg10[%c7_158, %c1_159, %c1_160] : memref<8x18x128xf32, #tpu.memory_space<vmem>>, vector<1x17x127xf32>
    %388 = vector.shape_cast %387 : vector<1x17x127xf32> to vector<17x127xf32>
    %389 = vector.broadcast %386 : f32 to vector<17x127xf32>
    %390 = arith.mulf %388, %389 : vector<17x127xf32>
    %391 = arith.addf %385, %390 : vector<17x127xf32>
    %c0_161 = arith.constant 0 : index
    %392 = memref.load %arg4[%c0_161] : memref<4xf32, #tpu.memory_space<smem>>
    %393 = vector.broadcast %392 : f32 to vector<17x127xf32>
    %394 = arith.addf %391, %393 : vector<17x127xf32>
    %cst_162 = arith.constant 0.000000e+00 : f32
    %395 = vector.broadcast %cst_162 : f32 to vector<17x127xf32>
    %396 = arith.maximumf %394, %395 : vector<17x127xf32>
    %c0_163 = arith.constant 0 : index
    %c0_164 = arith.constant 0 : index
    %c0_165 = arith.constant 0 : index
    %397 = vector.load %arg11[%c0_163, %c0_164, %c0_165] : memref<4x17x128xf32, #tpu.memory_space<vmem>>, vector<1x17x127xf32>
    %398 = vector.shape_cast %397 : vector<1x17x127xf32> to vector<17x127xf32>
    %399 = vector.shape_cast %396 : vector<17x127xf32> to vector<1x17x127xf32>
    tpu.vector_store %arg11[%c0_163, %c0_164, %c0_165], %399 {strides = array<i32>} : memref<4x17x128xf32, #tpu.memory_space<vmem>>, vector<1x17x127xf32>,
    %c7_166 = arith.constant 7 : index
    %400 = memref.load %arg3[%c7_166] : memref<128xf32, #tpu.memory_space<smem>>
    %c0_167 = arith.constant 0 : index
    %c0_168 = arith.constant 0 : index
    %c0_169 = arith.constant 0 : index
    %401 = vector.load %arg10[%c0_167, %c0_168, %c0_169] : memref<8x18x128xf32, #tpu.memory_space<vmem>>, vector<1x17x127xf32>
    %402 = vector.shape_cast %401 : vector<1x17x127xf32> to vector<17x127xf32>
    %403 = vector.broadcast %400 : f32 to vector<17x127xf32>
    %404 = arith.mulf %402, %403 : vector<17x127xf32>
    %c6_170 = arith.constant 6 : index
    %405 = memref.load %arg3[%c6_170] : memref<128xf32, #tpu.memory_space<smem>>
    %c0_171 = arith.constant 0 : index
    %c0_172 = arith.constant 0 : index
    %c1_173 = arith.constant 1 : index
    %406 = vector.load %arg10[%c0_171, %c0_172, %c1_173] : memref<8x18x128xf32, #tpu.memory_space<vmem>>, vector<1x17x127xf32>
    %407 = vector.shape_cast %406 : vector<1x17x127xf32> to vector<17x127xf32>
    %408 = vector.broadcast %405 : f32 to vector<17x127xf32>
    %409 = arith.mulf %407, %408 : vector<17x127xf32>
    %410 = arith.addf %404, %409 : vector<17x127xf32>
    %c5_174 = arith.constant 5 : index
    %411 = memref.load %arg3[%c5_174] : memref<128xf32, #tpu.memory_space<smem>>
    %c0_175 = arith.constant 0 : index
    %c1_176 = arith.constant 1 : index
    %c0_177 = arith.constant 0 : index
    %412 = vector.load %arg10[%c0_175, %c1_176, %c0_177] : memref<8x18x128xf32, #tpu.memory_space<vmem>>, vector<1x17x127xf32>
    %413 = vector.shape_cast %412 : vector<1x17x127xf32> to vector<17x127xf32>
    %414 = vector.broadcast %411 : f32 to vector<17x127xf32>
    %415 = arith.mulf %413, %414 : vector<17x127xf32>
    %416 = arith.addf %410, %415 : vector<17x127xf32>
    %c4_178 = arith.constant 4 : index
    %417 = memref.load %arg3[%c4_178] : memref<128xf32, #tpu.memory_space<smem>>
    %c0_179 = arith.constant 0 : index
    %c1_180 = arith.constant 1 : index
    %c1_181 = arith.constant 1 : index
    %418 = vector.load %arg10[%c0_179, %c1_180, %c1_181] : memref<8x18x128xf32, #tpu.memory_space<vmem>>, vector<1x17x127xf32>
    %419 = vector.shape_cast %418 : vector<1x17x127xf32> to vector<17x127xf32>
    %420 = vector.broadcast %417 : f32 to vector<17x127xf32>
    %421 = arith.mulf %419, %420 : vector<17x127xf32>
    %422 = arith.addf %416, %421 : vector<17x127xf32>
    %c23_182 = arith.constant 23 : index
    %423 = memref.load %arg3[%c23_182] : memref<128xf32, #tpu.memory_space<smem>>
    %c1_183 = arith.constant 1 : index
    %c0_184 = arith.constant 0 : index
    %c0_185 = arith.constant 0 : index
    %424 = vector.load %arg10[%c1_183, %c0_184, %c0_185] : memref<8x18x128xf32, #tpu.memory_space<vmem>>, vector<1x17x127xf32>
    %425 = vector.shape_cast %424 : vector<1x17x127xf32> to vector<17x127xf32>
    %426 = vector.broadcast %423 : f32 to vector<17x127xf32>
    %427 = arith.mulf %425, %426 : vector<17x127xf32>
    %428 = arith.addf %422, %427 : vector<17x127xf32>
    %c22_186 = arith.constant 22 : index
    %429 = memref.load %arg3[%c22_186] : memref<128xf32, #tpu.memory_space<smem>>
    %c1_187 = arith.constant 1 : index
    %c0_188 = arith.constant 0 : index
    %c1_189 = arith.constant 1 : index
    %430 = vector.load %arg10[%c1_187, %c0_188, %c1_189] : memref<8x18x128xf32, #tpu.memory_space<vmem>>, vector<1x17x127xf32>
    %431 = vector.shape_cast %430 : vector<1x17x127xf32> to vector<17x127xf32>
    %432 = vector.broadcast %429 : f32 to vector<17x127xf32>
    %433 = arith.mulf %431, %432 : vector<17x127xf32>
    %434 = arith.addf %428, %433 : vector<17x127xf32>
    %c21_190 = arith.constant 21 : index
    %435 = memref.load %arg3[%c21_190] : memref<128xf32, #tpu.memory_space<smem>>
    %c1_191 = arith.constant 1 : index
    %c1_192 = arith.constant 1 : index
    %c0_193 = arith.constant 0 : index
    %436 = vector.load %arg10[%c1_191, %c1_192, %c0_193] : memref<8x18x128xf32, #tpu.memory_space<vmem>>, vector<1x17x127xf32>
    %437 = vector.shape_cast %436 : vector<1x17x127xf32> to vector<17x127xf32>
    %438 = vector.broadcast %435 : f32 to vector<17x127xf32>
    %439 = arith.mulf %437, %438 : vector<17x127xf32>
    %440 = arith.addf %434, %439 : vector<17x127xf32>
    %c20_194 = arith.constant 20 : index
    %441 = memref.load %arg3[%c20_194] : memref<128xf32, #tpu.memory_space<smem>>
    %c1_195 = arith.constant 1 : index
    %c1_196 = arith.constant 1 : index
    %c1_197 = arith.constant 1 : index
    %442 = vector.load %arg10[%c1_195, %c1_196, %c1_197] : memref<8x18x128xf32, #tpu.memory_space<vmem>>, vector<1x17x127xf32>
    %443 = vector.shape_cast %442 : vector<1x17x127xf32> to vector<17x127xf32>
    %444 = vector.broadcast %441 : f32 to vector<17x127xf32>
    %445 = arith.mulf %443, %444 : vector<17x127xf32>
    %446 = arith.addf %440, %445 : vector<17x127xf32>
    %c39 = arith.constant 39 : index
    %447 = memref.load %arg3[%c39] : memref<128xf32, #tpu.memory_space<smem>>
    %c2_198 = arith.constant 2 : index
    %c0_199 = arith.constant 0 : index
    %c0_200 = arith.constant 0 : index
    %448 = vector.load %arg10[%c2_198, %c0_199, %c0_200] : memref<8x18x128xf32, #tpu.memory_space<vmem>>, vector<1x17x127xf32>
    %449 = vector.shape_cast %448 : vector<1x17x127xf32> to vector<17x127xf32>
    %450 = vector.broadcast %447 : f32 to vector<17x127xf32>
    %451 = arith.mulf %449, %450 : vector<17x127xf32>
    %452 = arith.addf %446, %451 : vector<17x127xf32>
    %c38 = arith.constant 38 : index
    %453 = memref.load %arg3[%c38] : memref<128xf32, #tpu.memory_space<smem>>
    %c2_201 = arith.constant 2 : index
    %c0_202 = arith.constant 0 : index
    %c1_203 = arith.constant 1 : index
    %454 = vector.load %arg10[%c2_201, %c0_202, %c1_203] : memref<8x18x128xf32, #tpu.memory_space<vmem>>, vector<1x17x127xf32>
    %455 = vector.shape_cast %454 : vector<1x17x127xf32> to vector<17x127xf32>
    %456 = vector.broadcast %453 : f32 to vector<17x127xf32>
    %457 = arith.mulf %455, %456 : vector<17x127xf32>
    %458 = arith.addf %452, %457 : vector<17x127xf32>
    %c37 = arith.constant 37 : index
    %459 = memref.load %arg3[%c37] : memref<128xf32, #tpu.memory_space<smem>>
    %c2_204 = arith.constant 2 : index
    %c1_205 = arith.constant 1 : index
    %c0_206 = arith.constant 0 : index
    %460 = vector.load %arg10[%c2_204, %c1_205, %c0_206] : memref<8x18x128xf32, #tpu.memory_space<vmem>>, vector<1x17x127xf32>
    %461 = vector.shape_cast %460 : vector<1x17x127xf32> to vector<17x127xf32>
    %462 = vector.broadcast %459 : f32 to vector<17x127xf32>
    %463 = arith.mulf %461, %462 : vector<17x127xf32>
    %464 = arith.addf %458, %463 : vector<17x127xf32>
    %c36 = arith.constant 36 : index
    %465 = memref.load %arg3[%c36] : memref<128xf32, #tpu.memory_space<smem>>
    %c2_207 = arith.constant 2 : index
    %c1_208 = arith.constant 1 : index
    %c1_209 = arith.constant 1 : index
    %466 = vector.load %arg10[%c2_207, %c1_208, %c1_209] : memref<8x18x128xf32, #tpu.memory_space<vmem>>, vector<1x17x127xf32>
    %467 = vector.shape_cast %466 : vector<1x17x127xf32> to vector<17x127xf32>
    %468 = vector.broadcast %465 : f32 to vector<17x127xf32>
    %469 = arith.mulf %467, %468 : vector<17x127xf32>
    %470 = arith.addf %464, %469 : vector<17x127xf32>
    %c55 = arith.constant 55 : index
    %471 = memref.load %arg3[%c55] : memref<128xf32, #tpu.memory_space<smem>>
    %c3_210 = arith.constant 3 : index
    %c0_211 = arith.constant 0 : index
    %c0_212 = arith.constant 0 : index
    %472 = vector.load %arg10[%c3_210, %c0_211, %c0_212] : memref<8x18x128xf32, #tpu.memory_space<vmem>>, vector<1x17x127xf32>
    %473 = vector.shape_cast %472 : vector<1x17x127xf32> to vector<17x127xf32>
    %474 = vector.broadcast %471 : f32 to vector<17x127xf32>
    %475 = arith.mulf %473, %474 : vector<17x127xf32>
    %476 = arith.addf %470, %475 : vector<17x127xf32>
    %c54 = arith.constant 54 : index
    %477 = memref.load %arg3[%c54] : memref<128xf32, #tpu.memory_space<smem>>
    %c3_213 = arith.constant 3 : index
    %c0_214 = arith.constant 0 : index
    %c1_215 = arith.constant 1 : index
    %478 = vector.load %arg10[%c3_213, %c0_214, %c1_215] : memref<8x18x128xf32, #tpu.memory_space<vmem>>, vector<1x17x127xf32>
    %479 = vector.shape_cast %478 : vector<1x17x127xf32> to vector<17x127xf32>
    %480 = vector.broadcast %477 : f32 to vector<17x127xf32>
    %481 = arith.mulf %479, %480 : vector<17x127xf32>
    %482 = arith.addf %476, %481 : vector<17x127xf32>
    %c53 = arith.constant 53 : index
    %483 = memref.load %arg3[%c53] : memref<128xf32, #tpu.memory_space<smem>>
    %c3_216 = arith.constant 3 : index
    %c1_217 = arith.constant 1 : index
    %c0_218 = arith.constant 0 : index
    %484 = vector.load %arg10[%c3_216, %c1_217, %c0_218] : memref<8x18x128xf32, #tpu.memory_space<vmem>>, vector<1x17x127xf32>
    %485 = vector.shape_cast %484 : vector<1x17x127xf32> to vector<17x127xf32>
    %486 = vector.broadcast %483 : f32 to vector<17x127xf32>
    %487 = arith.mulf %485, %486 : vector<17x127xf32>
    %488 = arith.addf %482, %487 : vector<17x127xf32>
    %c52 = arith.constant 52 : index
    %489 = memref.load %arg3[%c52] : memref<128xf32, #tpu.memory_space<smem>>
    %c3_219 = arith.constant 3 : index
    %c1_220 = arith.constant 1 : index
    %c1_221 = arith.constant 1 : index
    %490 = vector.load %arg10[%c3_219, %c1_220, %c1_221] : memref<8x18x128xf32, #tpu.memory_space<vmem>>, vector<1x17x127xf32>
    %491 = vector.shape_cast %490 : vector<1x17x127xf32> to vector<17x127xf32>
    %492 = vector.broadcast %489 : f32 to vector<17x127xf32>
    %493 = arith.mulf %491, %492 : vector<17x127xf32>
    %494 = arith.addf %488, %493 : vector<17x127xf32>
    %c71 = arith.constant 71 : index
    %495 = memref.load %arg3[%c71] : memref<128xf32, #tpu.memory_space<smem>>
    %c4_222 = arith.constant 4 : index
    %c0_223 = arith.constant 0 : index
    %c0_224 = arith.constant 0 : index
    %496 = vector.load %arg10[%c4_222, %c0_223, %c0_224] : memref<8x18x128xf32, #tpu.memory_space<vmem>>, vector<1x17x127xf32>
    %497 = vector.shape_cast %496 : vector<1x17x127xf32> to vector<17x127xf32>
    %498 = vector.broadcast %495 : f32 to vector<17x127xf32>
    %499 = arith.mulf %497, %498 : vector<17x127xf32>
    %500 = arith.addf %494, %499 : vector<17x127xf32>
    %c70 = arith.constant 70 : index
    %501 = memref.load %arg3[%c70] : memref<128xf32, #tpu.memory_space<smem>>
    %c4_225 = arith.constant 4 : index
    %c0_226 = arith.constant 0 : index
    %c1_227 = arith.constant 1 : index
    %502 = vector.load %arg10[%c4_225, %c0_226, %c1_227] : memref<8x18x128xf32, #tpu.memory_space<vmem>>, vector<1x17x127xf32>
    %503 = vector.shape_cast %502 : vector<1x17x127xf32> to vector<17x127xf32>
    %504 = vector.broadcast %501 : f32 to vector<17x127xf32>
    %505 = arith.mulf %503, %504 : vector<17x127xf32>
    %506 = arith.addf %500, %505 : vector<17x127xf32>
    %c69 = arith.constant 69 : index
    %507 = memref.load %arg3[%c69] : memref<128xf32, #tpu.memory_space<smem>>
    %c4_228 = arith.constant 4 : index
    %c1_229 = arith.constant 1 : index
    %c0_230 = arith.constant 0 : index
    %508 = vector.load %arg10[%c4_228, %c1_229, %c0_230] : memref<8x18x128xf32, #tpu.memory_space<vmem>>, vector<1x17x127xf32>
    %509 = vector.shape_cast %508 : vector<1x17x127xf32> to vector<17x127xf32>
    %510 = vector.broadcast %507 : f32 to vector<17x127xf32>
    %511 = arith.mulf %509, %510 : vector<17x127xf32>
    %512 = arith.addf %506, %511 : vector<17x127xf32>
    %c68 = arith.constant 68 : index
    %513 = memref.load %arg3[%c68] : memref<128xf32, #tpu.memory_space<smem>>
    %c4_231 = arith.constant 4 : index
    %c1_232 = arith.constant 1 : index
    %c1_233 = arith.constant 1 : index
    %514 = vector.load %arg10[%c4_231, %c1_232, %c1_233] : memref<8x18x128xf32, #tpu.memory_space<vmem>>, vector<1x17x127xf32>
    %515 = vector.shape_cast %514 : vector<1x17x127xf32> to vector<17x127xf32>
    %516 = vector.broadcast %513 : f32 to vector<17x127xf32>
    %517 = arith.mulf %515, %516 : vector<17x127xf32>
    %518 = arith.addf %512, %517 : vector<17x127xf32>
    %c87 = arith.constant 87 : index
    %519 = memref.load %arg3[%c87] : memref<128xf32, #tpu.memory_space<smem>>
    %c5_234 = arith.constant 5 : index
    %c0_235 = arith.constant 0 : index
    %c0_236 = arith.constant 0 : index
    %520 = vector.load %arg10[%c5_234, %c0_235, %c0_236] : memref<8x18x128xf32, #tpu.memory_space<vmem>>, vector<1x17x127xf32>
    %521 = vector.shape_cast %520 : vector<1x17x127xf32> to vector<17x127xf32>
    %522 = vector.broadcast %519 : f32 to vector<17x127xf32>
    %523 = arith.mulf %521, %522 : vector<17x127xf32>
    %524 = arith.addf %518, %523 : vector<17x127xf32>
    %c86 = arith.constant 86 : index
    %525 = memref.load %arg3[%c86] : memref<128xf32, #tpu.memory_space<smem>>
    %c5_237 = arith.constant 5 : index
    %c0_238 = arith.constant 0 : index
    %c1_239 = arith.constant 1 : index
    %526 = vector.load %arg10[%c5_237, %c0_238, %c1_239] : memref<8x18x128xf32, #tpu.memory_space<vmem>>, vector<1x17x127xf32>
    %527 = vector.shape_cast %526 : vector<1x17x127xf32> to vector<17x127xf32>
    %528 = vector.broadcast %525 : f32 to vector<17x127xf32>
    %529 = arith.mulf %527, %528 : vector<17x127xf32>
    %530 = arith.addf %524, %529 : vector<17x127xf32>
    %c85 = arith.constant 85 : index
    %531 = memref.load %arg3[%c85] : memref<128xf32, #tpu.memory_space<smem>>
    %c5_240 = arith.constant 5 : index
    %c1_241 = arith.constant 1 : index
    %c0_242 = arith.constant 0 : index
    %532 = vector.load %arg10[%c5_240, %c1_241, %c0_242] : memref<8x18x128xf32, #tpu.memory_space<vmem>>, vector<1x17x127xf32>
    %533 = vector.shape_cast %532 : vector<1x17x127xf32> to vector<17x127xf32>
    %534 = vector.broadcast %531 : f32 to vector<17x127xf32>
    %535 = arith.mulf %533, %534 : vector<17x127xf32>
    %536 = arith.addf %530, %535 : vector<17x127xf32>
    %c84 = arith.constant 84 : index
    %537 = memref.load %arg3[%c84] : memref<128xf32, #tpu.memory_space<smem>>
    %c5_243 = arith.constant 5 : index
    %c1_244 = arith.constant 1 : index
    %c1_245 = arith.constant 1 : index
    %538 = vector.load %arg10[%c5_243, %c1_244, %c1_245] : memref<8x18x128xf32, #tpu.memory_space<vmem>>, vector<1x17x127xf32>
    %539 = vector.shape_cast %538 : vector<1x17x127xf32> to vector<17x127xf32>
    %540 = vector.broadcast %537 : f32 to vector<17x127xf32>
    %541 = arith.mulf %539, %540 : vector<17x127xf32>
    %542 = arith.addf %536, %541 : vector<17x127xf32>
    %c103 = arith.constant 103 : index
    %543 = memref.load %arg3[%c103] : memref<128xf32, #tpu.memory_space<smem>>
    %c6_246 = arith.constant 6 : index
    %c0_247 = arith.constant 0 : index
    %c0_248 = arith.constant 0 : index
    %544 = vector.load %arg10[%c6_246, %c0_247, %c0_248] : memref<8x18x128xf32, #tpu.memory_space<vmem>>, vector<1x17x127xf32>
    %545 = vector.shape_cast %544 : vector<1x17x127xf32> to vector<17x127xf32>
    %546 = vector.broadcast %543 : f32 to vector<17x127xf32>
    %547 = arith.mulf %545, %546 : vector<17x127xf32>
    %548 = arith.addf %542, %547 : vector<17x127xf32>
    %c102 = arith.constant 102 : index
    %549 = memref.load %arg3[%c102] : memref<128xf32, #tpu.memory_space<smem>>
    %c6_249 = arith.constant 6 : index
    %c0_250 = arith.constant 0 : index
    %c1_251 = arith.constant 1 : index
    %550 = vector.load %arg10[%c6_249, %c0_250, %c1_251] : memref<8x18x128xf32, #tpu.memory_space<vmem>>, vector<1x17x127xf32>
    %551 = vector.shape_cast %550 : vector<1x17x127xf32> to vector<17x127xf32>
    %552 = vector.broadcast %549 : f32 to vector<17x127xf32>
    %553 = arith.mulf %551, %552 : vector<17x127xf32>
    %554 = arith.addf %548, %553 : vector<17x127xf32>
    %c101 = arith.constant 101 : index
    %555 = memref.load %arg3[%c101] : memref<128xf32, #tpu.memory_space<smem>>
    %c6_252 = arith.constant 6 : index
    %c1_253 = arith.constant 1 : index
    %c0_254 = arith.constant 0 : index
    %556 = vector.load %arg10[%c6_252, %c1_253, %c0_254] : memref<8x18x128xf32, #tpu.memory_space<vmem>>, vector<1x17x127xf32>
    %557 = vector.shape_cast %556 : vector<1x17x127xf32> to vector<17x127xf32>
    %558 = vector.broadcast %555 : f32 to vector<17x127xf32>
    %559 = arith.mulf %557, %558 : vector<17x127xf32>
    %560 = arith.addf %554, %559 : vector<17x127xf32>
    %c100 = arith.constant 100 : index
    %561 = memref.load %arg3[%c100] : memref<128xf32, #tpu.memory_space<smem>>
    %c6_255 = arith.constant 6 : index
    %c1_256 = arith.constant 1 : index
    %c1_257 = arith.constant 1 : index
    %562 = vector.load %arg10[%c6_255, %c1_256, %c1_257] : memref<8x18x128xf32, #tpu.memory_space<vmem>>, vector<1x17x127xf32>
    %563 = vector.shape_cast %562 : vector<1x17x127xf32> to vector<17x127xf32>
    %564 = vector.broadcast %561 : f32 to vector<17x127xf32>
    %565 = arith.mulf %563, %564 : vector<17x127xf32>
    %566 = arith.addf %560, %565 : vector<17x127xf32>
    %c119 = arith.constant 119 : index
    %567 = memref.load %arg3[%c119] : memref<128xf32, #tpu.memory_space<smem>>
    %c7_258 = arith.constant 7 : index
    %c0_259 = arith.constant 0 : index
    %c0_260 = arith.constant 0 : index
    %568 = vector.load %arg10[%c7_258, %c0_259, %c0_260] : memref<8x18x128xf32, #tpu.memory_space<vmem>>, vector<1x17x127xf32>
    %569 = vector.shape_cast %568 : vector<1x17x127xf32> to vector<17x127xf32>
    %570 = vector.broadcast %567 : f32 to vector<17x127xf32>
    %571 = arith.mulf %569, %570 : vector<17x127xf32>
    %572 = arith.addf %566, %571 : vector<17x127xf32>
    %c118 = arith.constant 118 : index
    %573 = memref.load %arg3[%c118] : memref<128xf32, #tpu.memory_space<smem>>
    %c7_261 = arith.constant 7 : index
    %c0_262 = arith.constant 0 : index
    %c1_263 = arith.constant 1 : index
    %574 = vector.load %arg10[%c7_261, %c0_262, %c1_263] : memref<8x18x128xf32, #tpu.memory_space<vmem>>, vector<1x17x127xf32>
    %575 = vector.shape_cast %574 : vector<1x17x127xf32> to vector<17x127xf32>
    %576 = vector.broadcast %573 : f32 to vector<17x127xf32>
    %577 = arith.mulf %575, %576 : vector<17x127xf32>
    %578 = arith.addf %572, %577 : vector<17x127xf32>
    %c117 = arith.constant 117 : index
    %579 = memref.load %arg3[%c117] : memref<128xf32, #tpu.memory_space<smem>>
    %c7_264 = arith.constant 7 : index
    %c1_265 = arith.constant 1 : index
    %c0_266 = arith.constant 0 : index
    %580 = vector.load %arg10[%c7_264, %c1_265, %c0_266] : memref<8x18x128xf32, #tpu.memory_space<vmem>>, vector<1x17x127xf32>
    %581 = vector.shape_cast %580 : vector<1x17x127xf32> to vector<17x127xf32>
    %582 = vector.broadcast %579 : f32 to vector<17x127xf32>
    %583 = arith.mulf %581, %582 : vector<17x127xf32>
    %584 = arith.addf %578, %583 : vector<17x127xf32>
    %c116 = arith.constant 116 : index
    %585 = memref.load %arg3[%c116] : memref<128xf32, #tpu.memory_space<smem>>
    %c7_267 = arith.constant 7 : index
    %c1_268 = arith.constant 1 : index
    %c1_269 = arith.constant 1 : index
    %586 = vector.load %arg10[%c7_267, %c1_268, %c1_269] : memref<8x18x128xf32, #tpu.memory_space<vmem>>, vector<1x17x127xf32>
    %587 = vector.shape_cast %586 : vector<1x17x127xf32> to vector<17x127xf32>
    %588 = vector.broadcast %585 : f32 to vector<17x127xf32>
    %589 = arith.mulf %587, %588 : vector<17x127xf32>
    %590 = arith.addf %584, %589 : vector<17x127xf32>
    %c1_270 = arith.constant 1 : index
    %591 = memref.load %arg4[%c1_270] : memref<4xf32, #tpu.memory_space<smem>>
    %592 = vector.broadcast %591 : f32 to vector<17x127xf32>
    %593 = arith.addf %590, %592 : vector<17x127xf32>
    %cst_271 = arith.constant 0.000000e+00 : f32
    %594 = vector.broadcast %cst_271 : f32 to vector<17x127xf32>
    %595 = arith.maximumf %593, %594 : vector<17x127xf32>
    %c1_272 = arith.constant 1 : index
    %c0_273 = arith.constant 0 : index
    %c0_274 = arith.constant 0 : index
    %596 = vector.load %arg11[%c1_272, %c0_273, %c0_274] : memref<4x17x128xf32, #tpu.memory_space<vmem>>, vector<1x17x127xf32>
    %597 = vector.shape_cast %596 : vector<1x17x127xf32> to vector<17x127xf32>
    %598 = vector.shape_cast %595 : vector<17x127xf32> to vector<1x17x127xf32>
    tpu.vector_store %arg11[%c1_272, %c0_273, %c0_274], %598 {strides = array<i32>} : memref<4x17x128xf32, #tpu.memory_space<vmem>>, vector<1x17x127xf32>,
    %c11_275 = arith.constant 11 : index
    %599 = memref.load %arg3[%c11_275] : memref<128xf32, #tpu.memory_space<smem>>
    %c0_276 = arith.constant 0 : index
    %c0_277 = arith.constant 0 : index
    %c0_278 = arith.constant 0 : index
    %600 = vector.load %arg10[%c0_276, %c0_277, %c0_278] : memref<8x18x128xf32, #tpu.memory_space<vmem>>, vector<1x17x127xf32>
    %601 = vector.shape_cast %600 : vector<1x17x127xf32> to vector<17x127xf32>
    %602 = vector.broadcast %599 : f32 to vector<17x127xf32>
    %603 = arith.mulf %601, %602 : vector<17x127xf32>
    %c10_279 = arith.constant 10 : index
    %604 = memref.load %arg3[%c10_279] : memref<128xf32, #tpu.memory_space<smem>>
    %c0_280 = arith.constant 0 : index
    %c0_281 = arith.constant 0 : index
    %c1_282 = arith.constant 1 : index
    %605 = vector.load %arg10[%c0_280, %c0_281, %c1_282] : memref<8x18x128xf32, #tpu.memory_space<vmem>>, vector<1x17x127xf32>
    %606 = vector.shape_cast %605 : vector<1x17x127xf32> to vector<17x127xf32>
    %607 = vector.broadcast %604 : f32 to vector<17x127xf32>
    %608 = arith.mulf %606, %607 : vector<17x127xf32>
    %609 = arith.addf %603, %608 : vector<17x127xf32>
    %c9_283 = arith.constant 9 : index
    %610 = memref.load %arg3[%c9_283] : memref<128xf32, #tpu.memory_space<smem>>
    %c0_284 = arith.constant 0 : index
    %c1_285 = arith.constant 1 : index
    %c0_286 = arith.constant 0 : index
    %611 = vector.load %arg10[%c0_284, %c1_285, %c0_286] : memref<8x18x128xf32, #tpu.memory_space<vmem>>, vector<1x17x127xf32>
    %612 = vector.shape_cast %611 : vector<1x17x127xf32> to vector<17x127xf32>
    %613 = vector.broadcast %610 : f32 to vector<17x127xf32>
    %614 = arith.mulf %612, %613 : vector<17x127xf32>
    %615 = arith.addf %609, %614 : vector<17x127xf32>
    %c8_287 = arith.constant 8 : index
    %616 = memref.load %arg3[%c8_287] : memref<128xf32, #tpu.memory_space<smem>>
    %c0_288 = arith.constant 0 : index
    %c1_289 = arith.constant 1 : index
    %c1_290 = arith.constant 1 : index
    %617 = vector.load %arg10[%c0_288, %c1_289, %c1_290] : memref<8x18x128xf32, #tpu.memory_space<vmem>>, vector<1x17x127xf32>
    %618 = vector.shape_cast %617 : vector<1x17x127xf32> to vector<17x127xf32>
    %619 = vector.broadcast %616 : f32 to vector<17x127xf32>
    %620 = arith.mulf %618, %619 : vector<17x127xf32>
    %621 = arith.addf %615, %620 : vector<17x127xf32>
    %c27_291 = arith.constant 27 : index
    %622 = memref.load %arg3[%c27_291] : memref<128xf32, #tpu.memory_space<smem>>
    %c1_292 = arith.constant 1 : index
    %c0_293 = arith.constant 0 : index
    %c0_294 = arith.constant 0 : index
    %623 = vector.load %arg10[%c1_292, %c0_293, %c0_294] : memref<8x18x128xf32, #tpu.memory_space<vmem>>, vector<1x17x127xf32>
    %624 = vector.shape_cast %623 : vector<1x17x127xf32> to vector<17x127xf32>
    %625 = vector.broadcast %622 : f32 to vector<17x127xf32>
    %626 = arith.mulf %624, %625 : vector<17x127xf32>
    %627 = arith.addf %621, %626 : vector<17x127xf32>
    %c26_295 = arith.constant 26 : index
    %628 = memref.load %arg3[%c26_295] : memref<128xf32, #tpu.memory_space<smem>>
    %c1_296 = arith.constant 1 : index
    %c0_297 = arith.constant 0 : index
    %c1_298 = arith.constant 1 : index
    %629 = vector.load %arg10[%c1_296, %c0_297, %c1_298] : memref<8x18x128xf32, #tpu.memory_space<vmem>>, vector<1x17x127xf32>
    %630 = vector.shape_cast %629 : vector<1x17x127xf32> to vector<17x127xf32>
    %631 = vector.broadcast %628 : f32 to vector<17x127xf32>
    %632 = arith.mulf %630, %631 : vector<17x127xf32>
    %633 = arith.addf %627, %632 : vector<17x127xf32>
    %c25_299 = arith.constant 25 : index
    %634 = memref.load %arg3[%c25_299] : memref<128xf32, #tpu.memory_space<smem>>
    %c1_300 = arith.constant 1 : index
    %c1_301 = arith.constant 1 : index
    %c0_302 = arith.constant 0 : index
    %635 = vector.load %arg10[%c1_300, %c1_301, %c0_302] : memref<8x18x128xf32, #tpu.memory_space<vmem>>, vector<1x17x127xf32>
    %636 = vector.shape_cast %635 : vector<1x17x127xf32> to vector<17x127xf32>
    %637 = vector.broadcast %634 : f32 to vector<17x127xf32>
    %638 = arith.mulf %636, %637 : vector<17x127xf32>
    %639 = arith.addf %633, %638 : vector<17x127xf32>
    %c24_303 = arith.constant 24 : index
    %640 = memref.load %arg3[%c24_303] : memref<128xf32, #tpu.memory_space<smem>>
    %c1_304 = arith.constant 1 : index
    %c1_305 = arith.constant 1 : index
    %c1_306 = arith.constant 1 : index
    %641 = vector.load %arg10[%c1_304, %c1_305, %c1_306] : memref<8x18x128xf32, #tpu.memory_space<vmem>>, vector<1x17x127xf32>
    %642 = vector.shape_cast %641 : vector<1x17x127xf32> to vector<17x127xf32>
    %643 = vector.broadcast %640 : f32 to vector<17x127xf32>
    %644 = arith.mulf %642, %643 : vector<17x127xf32>
    %645 = arith.addf %639, %644 : vector<17x127xf32>
    %c43 = arith.constant 43 : index
    %646 = memref.load %arg3[%c43] : memref<128xf32, #tpu.memory_space<smem>>
    %c2_307 = arith.constant 2 : index
    %c0_308 = arith.constant 0 : index
    %c0_309 = arith.constant 0 : index
    %647 = vector.load %arg10[%c2_307, %c0_308, %c0_309] : memref<8x18x128xf32, #tpu.memory_space<vmem>>, vector<1x17x127xf32>
    %648 = vector.shape_cast %647 : vector<1x17x127xf32> to vector<17x127xf32>
    %649 = vector.broadcast %646 : f32 to vector<17x127xf32>
    %650 = arith.mulf %648, %649 : vector<17x127xf32>
    %651 = arith.addf %645, %650 : vector<17x127xf32>
    %c42 = arith.constant 42 : index
    %652 = memref.load %arg3[%c42] : memref<128xf32, #tpu.memory_space<smem>>
    %c2_310 = arith.constant 2 : index
    %c0_311 = arith.constant 0 : index
    %c1_312 = arith.constant 1 : index
    %653 = vector.load %arg10[%c2_310, %c0_311, %c1_312] : memref<8x18x128xf32, #tpu.memory_space<vmem>>, vector<1x17x127xf32>
    %654 = vector.shape_cast %653 : vector<1x17x127xf32> to vector<17x127xf32>
    %655 = vector.broadcast %652 : f32 to vector<17x127xf32>
    %656 = arith.mulf %654, %655 : vector<17x127xf32>
    %657 = arith.addf %651, %656 : vector<17x127xf32>
    %c41 = arith.constant 41 : index
    %658 = memref.load %arg3[%c41] : memref<128xf32, #tpu.memory_space<smem>>
    %c2_313 = arith.constant 2 : index
    %c1_314 = arith.constant 1 : index
    %c0_315 = arith.constant 0 : index
    %659 = vector.load %arg10[%c2_313, %c1_314, %c0_315] : memref<8x18x128xf32, #tpu.memory_space<vmem>>, vector<1x17x127xf32>
    %660 = vector.shape_cast %659 : vector<1x17x127xf32> to vector<17x127xf32>
    %661 = vector.broadcast %658 : f32 to vector<17x127xf32>
    %662 = arith.mulf %660, %661 : vector<17x127xf32>
    %663 = arith.addf %657, %662 : vector<17x127xf32>
    %c40 = arith.constant 40 : index
    %664 = memref.load %arg3[%c40] : memref<128xf32, #tpu.memory_space<smem>>
    %c2_316 = arith.constant 2 : index
    %c1_317 = arith.constant 1 : index
    %c1_318 = arith.constant 1 : index
    %665 = vector.load %arg10[%c2_316, %c1_317, %c1_318] : memref<8x18x128xf32, #tpu.memory_space<vmem>>, vector<1x17x127xf32>
    %666 = vector.shape_cast %665 : vector<1x17x127xf32> to vector<17x127xf32>
    %667 = vector.broadcast %664 : f32 to vector<17x127xf32>
    %668 = arith.mulf %666, %667 : vector<17x127xf32>
    %669 = arith.addf %663, %668 : vector<17x127xf32>
    %c59 = arith.constant 59 : index
    %670 = memref.load %arg3[%c59] : memref<128xf32, #tpu.memory_space<smem>>
    %c3_319 = arith.constant 3 : index
    %c0_320 = arith.constant 0 : index
    %c0_321 = arith.constant 0 : index
    %671 = vector.load %arg10[%c3_319, %c0_320, %c0_321] : memref<8x18x128xf32, #tpu.memory_space<vmem>>, vector<1x17x127xf32>
    %672 = vector.shape_cast %671 : vector<1x17x127xf32> to vector<17x127xf32>
    %673 = vector.broadcast %670 : f32 to vector<17x127xf32>
    %674 = arith.mulf %672, %673 : vector<17x127xf32>
    %675 = arith.addf %669, %674 : vector<17x127xf32>
    %c58 = arith.constant 58 : index
    %676 = memref.load %arg3[%c58] : memref<128xf32, #tpu.memory_space<smem>>
    %c3_322 = arith.constant 3 : index
    %c0_323 = arith.constant 0 : index
    %c1_324 = arith.constant 1 : index
    %677 = vector.load %arg10[%c3_322, %c0_323, %c1_324] : memref<8x18x128xf32, #tpu.memory_space<vmem>>, vector<1x17x127xf32>
    %678 = vector.shape_cast %677 : vector<1x17x127xf32> to vector<17x127xf32>
    %679 = vector.broadcast %676 : f32 to vector<17x127xf32>
    %680 = arith.mulf %678, %679 : vector<17x127xf32>
    %681 = arith.addf %675, %680 : vector<17x127xf32>
    %c57 = arith.constant 57 : index
    %682 = memref.load %arg3[%c57] : memref<128xf32, #tpu.memory_space<smem>>
    %c3_325 = arith.constant 3 : index
    %c1_326 = arith.constant 1 : index
    %c0_327 = arith.constant 0 : index
    %683 = vector.load %arg10[%c3_325, %c1_326, %c0_327] : memref<8x18x128xf32, #tpu.memory_space<vmem>>, vector<1x17x127xf32>
    %684 = vector.shape_cast %683 : vector<1x17x127xf32> to vector<17x127xf32>
    %685 = vector.broadcast %682 : f32 to vector<17x127xf32>
    %686 = arith.mulf %684, %685 : vector<17x127xf32>
    %687 = arith.addf %681, %686 : vector<17x127xf32>
    %c56 = arith.constant 56 : index
    %688 = memref.load %arg3[%c56] : memref<128xf32, #tpu.memory_space<smem>>
    %c3_328 = arith.constant 3 : index
    %c1_329 = arith.constant 1 : index
    %c1_330 = arith.constant 1 : index
    %689 = vector.load %arg10[%c3_328, %c1_329, %c1_330] : memref<8x18x128xf32, #tpu.memory_space<vmem>>, vector<1x17x127xf32>
    %690 = vector.shape_cast %689 : vector<1x17x127xf32> to vector<17x127xf32>
    %691 = vector.broadcast %688 : f32 to vector<17x127xf32>
    %692 = arith.mulf %690, %691 : vector<17x127xf32>
    %693 = arith.addf %687, %692 : vector<17x127xf32>
    %c75 = arith.constant 75 : index
    %694 = memref.load %arg3[%c75] : memref<128xf32, #tpu.memory_space<smem>>
    %c4_331 = arith.constant 4 : index
    %c0_332 = arith.constant 0 : index
    %c0_333 = arith.constant 0 : index
    %695 = vector.load %arg10[%c4_331, %c0_332, %c0_333] : memref<8x18x128xf32, #tpu.memory_space<vmem>>, vector<1x17x127xf32>
    %696 = vector.shape_cast %695 : vector<1x17x127xf32> to vector<17x127xf32>
    %697 = vector.broadcast %694 : f32 to vector<17x127xf32>
    %698 = arith.mulf %696, %697 : vector<17x127xf32>
    %699 = arith.addf %693, %698 : vector<17x127xf32>
    %c74 = arith.constant 74 : index
    %700 = memref.load %arg3[%c74] : memref<128xf32, #tpu.memory_space<smem>>
    %c4_334 = arith.constant 4 : index
    %c0_335 = arith.constant 0 : index
    %c1_336 = arith.constant 1 : index
    %701 = vector.load %arg10[%c4_334, %c0_335, %c1_336] : memref<8x18x128xf32, #tpu.memory_space<vmem>>, vector<1x17x127xf32>
    %702 = vector.shape_cast %701 : vector<1x17x127xf32> to vector<17x127xf32>
    %703 = vector.broadcast %700 : f32 to vector<17x127xf32>
    %704 = arith.mulf %702, %703 : vector<17x127xf32>
    %705 = arith.addf %699, %704 : vector<17x127xf32>
    %c73 = arith.constant 73 : index
    %706 = memref.load %arg3[%c73] : memref<128xf32, #tpu.memory_space<smem>>
    %c4_337 = arith.constant 4 : index
    %c1_338 = arith.constant 1 : index
    %c0_339 = arith.constant 0 : index
    %707 = vector.load %arg10[%c4_337, %c1_338, %c0_339] : memref<8x18x128xf32, #tpu.memory_space<vmem>>, vector<1x17x127xf32>
    %708 = vector.shape_cast %707 : vector<1x17x127xf32> to vector<17x127xf32>
    %709 = vector.broadcast %706 : f32 to vector<17x127xf32>
    %710 = arith.mulf %708, %709 : vector<17x127xf32>
    %711 = arith.addf %705, %710 : vector<17x127xf32>
    %c72 = arith.constant 72 : index
    %712 = memref.load %arg3[%c72] : memref<128xf32, #tpu.memory_space<smem>>
    %c4_340 = arith.constant 4 : index
    %c1_341 = arith.constant 1 : index
    %c1_342 = arith.constant 1 : index
    %713 = vector.load %arg10[%c4_340, %c1_341, %c1_342] : memref<8x18x128xf32, #tpu.memory_space<vmem>>, vector<1x17x127xf32>
    %714 = vector.shape_cast %713 : vector<1x17x127xf32> to vector<17x127xf32>
    %715 = vector.broadcast %712 : f32 to vector<17x127xf32>
    %716 = arith.mulf %714, %715 : vector<17x127xf32>
    %717 = arith.addf %711, %716 : vector<17x127xf32>
    %c91 = arith.constant 91 : index
    %718 = memref.load %arg3[%c91] : memref<128xf32, #tpu.memory_space<smem>>
    %c5_343 = arith.constant 5 : index
    %c0_344 = arith.constant 0 : index
    %c0_345 = arith.constant 0 : index
    %719 = vector.load %arg10[%c5_343, %c0_344, %c0_345] : memref<8x18x128xf32, #tpu.memory_space<vmem>>, vector<1x17x127xf32>
    %720 = vector.shape_cast %719 : vector<1x17x127xf32> to vector<17x127xf32>
    %721 = vector.broadcast %718 : f32 to vector<17x127xf32>
    %722 = arith.mulf %720, %721 : vector<17x127xf32>
    %723 = arith.addf %717, %722 : vector<17x127xf32>
    %c90 = arith.constant 90 : index
    %724 = memref.load %arg3[%c90] : memref<128xf32, #tpu.memory_space<smem>>
    %c5_346 = arith.constant 5 : index
    %c0_347 = arith.constant 0 : index
    %c1_348 = arith.constant 1 : index
    %725 = vector.load %arg10[%c5_346, %c0_347, %c1_348] : memref<8x18x128xf32, #tpu.memory_space<vmem>>, vector<1x17x127xf32>
    %726 = vector.shape_cast %725 : vector<1x17x127xf32> to vector<17x127xf32>
    %727 = vector.broadcast %724 : f32 to vector<17x127xf32>
    %728 = arith.mulf %726, %727 : vector<17x127xf32>
    %729 = arith.addf %723, %728 : vector<17x127xf32>
    %c89 = arith.constant 89 : index
    %730 = memref.load %arg3[%c89] : memref<128xf32, #tpu.memory_space<smem>>
    %c5_349 = arith.constant 5 : index
    %c1_350 = arith.constant 1 : index
    %c0_351 = arith.constant 0 : index
    %731 = vector.load %arg10[%c5_349, %c1_350, %c0_351] : memref<8x18x128xf32, #tpu.memory_space<vmem>>, vector<1x17x127xf32>
    %732 = vector.shape_cast %731 : vector<1x17x127xf32> to vector<17x127xf32>
    %733 = vector.broadcast %730 : f32 to vector<17x127xf32>
    %734 = arith.mulf %732, %733 : vector<17x127xf32>
    %735 = arith.addf %729, %734 : vector<17x127xf32>
    %c88 = arith.constant 88 : index
    %736 = memref.load %arg3[%c88] : memref<128xf32, #tpu.memory_space<smem>>
    %c5_352 = arith.constant 5 : index
    %c1_353 = arith.constant 1 : index
    %c1_354 = arith.constant 1 : index
    %737 = vector.load %arg10[%c5_352, %c1_353, %c1_354] : memref<8x18x128xf32, #tpu.memory_space<vmem>>, vector<1x17x127xf32>
    %738 = vector.shape_cast %737 : vector<1x17x127xf32> to vector<17x127xf32>
    %739 = vector.broadcast %736 : f32 to vector<17x127xf32>
    %740 = arith.mulf %738, %739 : vector<17x127xf32>
    %741 = arith.addf %735, %740 : vector<17x127xf32>
    %c107 = arith.constant 107 : index
    %742 = memref.load %arg3[%c107] : memref<128xf32, #tpu.memory_space<smem>>
    %c6_355 = arith.constant 6 : index
    %c0_356 = arith.constant 0 : index
    %c0_357 = arith.constant 0 : index
    %743 = vector.load %arg10[%c6_355, %c0_356, %c0_357] : memref<8x18x128xf32, #tpu.memory_space<vmem>>, vector<1x17x127xf32>
    %744 = vector.shape_cast %743 : vector<1x17x127xf32> to vector<17x127xf32>
    %745 = vector.broadcast %742 : f32 to vector<17x127xf32>
    %746 = arith.mulf %744, %745 : vector<17x127xf32>
    %747 = arith.addf %741, %746 : vector<17x127xf32>
    %c106 = arith.constant 106 : index
    %748 = memref.load %arg3[%c106] : memref<128xf32, #tpu.memory_space<smem>>
    %c6_358 = arith.constant 6 : index
    %c0_359 = arith.constant 0 : index
    %c1_360 = arith.constant 1 : index
    %749 = vector.load %arg10[%c6_358, %c0_359, %c1_360] : memref<8x18x128xf32, #tpu.memory_space<vmem>>, vector<1x17x127xf32>
    %750 = vector.shape_cast %749 : vector<1x17x127xf32> to vector<17x127xf32>
    %751 = vector.broadcast %748 : f32 to vector<17x127xf32>
    %752 = arith.mulf %750, %751 : vector<17x127xf32>
    %753 = arith.addf %747, %752 : vector<17x127xf32>
    %c105 = arith.constant 105 : index
    %754 = memref.load %arg3[%c105] : memref<128xf32, #tpu.memory_space<smem>>
    %c6_361 = arith.constant 6 : index
    %c1_362 = arith.constant 1 : index
    %c0_363 = arith.constant 0 : index
    %755 = vector.load %arg10[%c6_361, %c1_362, %c0_363] : memref<8x18x128xf32, #tpu.memory_space<vmem>>, vector<1x17x127xf32>
    %756 = vector.shape_cast %755 : vector<1x17x127xf32> to vector<17x127xf32>
    %757 = vector.broadcast %754 : f32 to vector<17x127xf32>
    %758 = arith.mulf %756, %757 : vector<17x127xf32>
    %759 = arith.addf %753, %758 : vector<17x127xf32>
    %c104 = arith.constant 104 : index
    %760 = memref.load %arg3[%c104] : memref<128xf32, #tpu.memory_space<smem>>
    %c6_364 = arith.constant 6 : index
    %c1_365 = arith.constant 1 : index
    %c1_366 = arith.constant 1 : index
    %761 = vector.load %arg10[%c6_364, %c1_365, %c1_366] : memref<8x18x128xf32, #tpu.memory_space<vmem>>, vector<1x17x127xf32>
    %762 = vector.shape_cast %761 : vector<1x17x127xf32> to vector<17x127xf32>
    %763 = vector.broadcast %760 : f32 to vector<17x127xf32>
    %764 = arith.mulf %762, %763 : vector<17x127xf32>
    %765 = arith.addf %759, %764 : vector<17x127xf32>
    %c123 = arith.constant 123 : index
    %766 = memref.load %arg3[%c123] : memref<128xf32, #tpu.memory_space<smem>>
    %c7_367 = arith.constant 7 : index
    %c0_368 = arith.constant 0 : index
    %c0_369 = arith.constant 0 : index
    %767 = vector.load %arg10[%c7_367, %c0_368, %c0_369] : memref<8x18x128xf32, #tpu.memory_space<vmem>>, vector<1x17x127xf32>
    %768 = vector.shape_cast %767 : vector<1x17x127xf32> to vector<17x127xf32>
    %769 = vector.broadcast %766 : f32 to vector<17x127xf32>
    %770 = arith.mulf %768, %769 : vector<17x127xf32>
    %771 = arith.addf %765, %770 : vector<17x127xf32>
    %c122 = arith.constant 122 : index
    %772 = memref.load %arg3[%c122] : memref<128xf32, #tpu.memory_space<smem>>
    %c7_370 = arith.constant 7 : index
    %c0_371 = arith.constant 0 : index
    %c1_372 = arith.constant 1 : index
    %773 = vector.load %arg10[%c7_370, %c0_371, %c1_372] : memref<8x18x128xf32, #tpu.memory_space<vmem>>, vector<1x17x127xf32>
    %774 = vector.shape_cast %773 : vector<1x17x127xf32> to vector<17x127xf32>
    %775 = vector.broadcast %772 : f32 to vector<17x127xf32>
    %776 = arith.mulf %774, %775 : vector<17x127xf32>
    %777 = arith.addf %771, %776 : vector<17x127xf32>
    %c121 = arith.constant 121 : index
    %778 = memref.load %arg3[%c121] : memref<128xf32, #tpu.memory_space<smem>>
    %c7_373 = arith.constant 7 : index
    %c1_374 = arith.constant 1 : index
    %c0_375 = arith.constant 0 : index
    %779 = vector.load %arg10[%c7_373, %c1_374, %c0_375] : memref<8x18x128xf32, #tpu.memory_space<vmem>>, vector<1x17x127xf32>
    %780 = vector.shape_cast %779 : vector<1x17x127xf32> to vector<17x127xf32>
    %781 = vector.broadcast %778 : f32 to vector<17x127xf32>
    %782 = arith.mulf %780, %781 : vector<17x127xf32>
    %783 = arith.addf %777, %782 : vector<17x127xf32>
    %c120 = arith.constant 120 : index
    %784 = memref.load %arg3[%c120] : memref<128xf32, #tpu.memory_space<smem>>
    %c7_376 = arith.constant 7 : index
    %c1_377 = arith.constant 1 : index
    %c1_378 = arith.constant 1 : index
    %785 = vector.load %arg10[%c7_376, %c1_377, %c1_378] : memref<8x18x128xf32, #tpu.memory_space<vmem>>, vector<1x17x127xf32>
    %786 = vector.shape_cast %785 : vector<1x17x127xf32> to vector<17x127xf32>
    %787 = vector.broadcast %784 : f32 to vector<17x127xf32>
    %788 = arith.mulf %786, %787 : vector<17x127xf32>
    %789 = arith.addf %783, %788 : vector<17x127xf32>
    %c2_379 = arith.constant 2 : index
    %790 = memref.load %arg4[%c2_379] : memref<4xf32, #tpu.memory_space<smem>>
    %791 = vector.broadcast %790 : f32 to vector<17x127xf32>
    %792 = arith.addf %789, %791 : vector<17x127xf32>
    %cst_380 = arith.constant 0.000000e+00 : f32
    %793 = vector.broadcast %cst_380 : f32 to vector<17x127xf32>
    %794 = arith.maximumf %792, %793 : vector<17x127xf32>
    %c2_381 = arith.constant 2 : index
    %c0_382 = arith.constant 0 : index
    %c0_383 = arith.constant 0 : index
    %795 = vector.load %arg11[%c2_381, %c0_382, %c0_383] : memref<4x17x128xf32, #tpu.memory_space<vmem>>, vector<1x17x127xf32>
    %796 = vector.shape_cast %795 : vector<1x17x127xf32> to vector<17x127xf32>
    %797 = vector.shape_cast %794 : vector<17x127xf32> to vector<1x17x127xf32>
    tpu.vector_store %arg11[%c2_381, %c0_382, %c0_383], %797 {strides = array<i32>} : memref<4x17x128xf32, #tpu.memory_space<vmem>>, vector<1x17x127xf32>,
    %c15_384 = arith.constant 15 : index
    %798 = memref.load %arg3[%c15_384] : memref<128xf32, #tpu.memory_space<smem>>
    %c0_385 = arith.constant 0 : index
    %c0_386 = arith.constant 0 : index
    %c0_387 = arith.constant 0 : index
    %799 = vector.load %arg10[%c0_385, %c0_386, %c0_387] : memref<8x18x128xf32, #tpu.memory_space<vmem>>, vector<1x17x127xf32>
    %800 = vector.shape_cast %799 : vector<1x17x127xf32> to vector<17x127xf32>
    %801 = vector.broadcast %798 : f32 to vector<17x127xf32>
    %802 = arith.mulf %800, %801 : vector<17x127xf32>
    %c14_388 = arith.constant 14 : index
    %803 = memref.load %arg3[%c14_388] : memref<128xf32, #tpu.memory_space<smem>>
    %c0_389 = arith.constant 0 : index
    %c0_390 = arith.constant 0 : index
    %c1_391 = arith.constant 1 : index
    %804 = vector.load %arg10[%c0_389, %c0_390, %c1_391] : memref<8x18x128xf32, #tpu.memory_space<vmem>>, vector<1x17x127xf32>
    %805 = vector.shape_cast %804 : vector<1x17x127xf32> to vector<17x127xf32>
    %806 = vector.broadcast %803 : f32 to vector<17x127xf32>
    %807 = arith.mulf %805, %806 : vector<17x127xf32>
    %808 = arith.addf %802, %807 : vector<17x127xf32>
    %c13_392 = arith.constant 13 : index
    %809 = memref.load %arg3[%c13_392] : memref<128xf32, #tpu.memory_space<smem>>
    %c0_393 = arith.constant 0 : index
    %c1_394 = arith.constant 1 : index
    %c0_395 = arith.constant 0 : index
    %810 = vector.load %arg10[%c0_393, %c1_394, %c0_395] : memref<8x18x128xf32, #tpu.memory_space<vmem>>, vector<1x17x127xf32>
    %811 = vector.shape_cast %810 : vector<1x17x127xf32> to vector<17x127xf32>
    %812 = vector.broadcast %809 : f32 to vector<17x127xf32>
    %813 = arith.mulf %811, %812 : vector<17x127xf32>
    %814 = arith.addf %808, %813 : vector<17x127xf32>
    %c12_396 = arith.constant 12 : index
    %815 = memref.load %arg3[%c12_396] : memref<128xf32, #tpu.memory_space<smem>>
    %c0_397 = arith.constant 0 : index
    %c1_398 = arith.constant 1 : index
    %c1_399 = arith.constant 1 : index
    %816 = vector.load %arg10[%c0_397, %c1_398, %c1_399] : memref<8x18x128xf32, #tpu.memory_space<vmem>>, vector<1x17x127xf32>
    %817 = vector.shape_cast %816 : vector<1x17x127xf32> to vector<17x127xf32>
    %818 = vector.broadcast %815 : f32 to vector<17x127xf32>
    %819 = arith.mulf %817, %818 : vector<17x127xf32>
    %820 = arith.addf %814, %819 : vector<17x127xf32>
    %c31_400 = arith.constant 31 : index
    %821 = memref.load %arg3[%c31_400] : memref<128xf32, #tpu.memory_space<smem>>
    %c1_401 = arith.constant 1 : index
    %c0_402 = arith.constant 0 : index
    %c0_403 = arith.constant 0 : index
    %822 = vector.load %arg10[%c1_401, %c0_402, %c0_403] : memref<8x18x128xf32, #tpu.memory_space<vmem>>, vector<1x17x127xf32>
    %823 = vector.shape_cast %822 : vector<1x17x127xf32> to vector<17x127xf32>
    %824 = vector.broadcast %821 : f32 to vector<17x127xf32>
    %825 = arith.mulf %823, %824 : vector<17x127xf32>
    %826 = arith.addf %820, %825 : vector<17x127xf32>
    %c30_404 = arith.constant 30 : index
    %827 = memref.load %arg3[%c30_404] : memref<128xf32, #tpu.memory_space<smem>>
    %c1_405 = arith.constant 1 : index
    %c0_406 = arith.constant 0 : index
    %c1_407 = arith.constant 1 : index
    %828 = vector.load %arg10[%c1_405, %c0_406, %c1_407] : memref<8x18x128xf32, #tpu.memory_space<vmem>>, vector<1x17x127xf32>
    %829 = vector.shape_cast %828 : vector<1x17x127xf32> to vector<17x127xf32>
    %830 = vector.broadcast %827 : f32 to vector<17x127xf32>
    %831 = arith.mulf %829, %830 : vector<17x127xf32>
    %832 = arith.addf %826, %831 : vector<17x127xf32>
    %c29_408 = arith.constant 29 : index
    %833 = memref.load %arg3[%c29_408] : memref<128xf32, #tpu.memory_space<smem>>
    %c1_409 = arith.constant 1 : index
    %c1_410 = arith.constant 1 : index
    %c0_411 = arith.constant 0 : index
    %834 = vector.load %arg10[%c1_409, %c1_410, %c0_411] : memref<8x18x128xf32, #tpu.memory_space<vmem>>, vector<1x17x127xf32>
    %835 = vector.shape_cast %834 : vector<1x17x127xf32> to vector<17x127xf32>
    %836 = vector.broadcast %833 : f32 to vector<17x127xf32>
    %837 = arith.mulf %835, %836 : vector<17x127xf32>
    %838 = arith.addf %832, %837 : vector<17x127xf32>
    %c28_412 = arith.constant 28 : index
    %839 = memref.load %arg3[%c28_412] : memref<128xf32, #tpu.memory_space<smem>>
    %c1_413 = arith.constant 1 : index
    %c1_414 = arith.constant 1 : index
    %c1_415 = arith.constant 1 : index
    %840 = vector.load %arg10[%c1_413, %c1_414, %c1_415] : memref<8x18x128xf32, #tpu.memory_space<vmem>>, vector<1x17x127xf32>
    %841 = vector.shape_cast %840 : vector<1x17x127xf32> to vector<17x127xf32>
    %842 = vector.broadcast %839 : f32 to vector<17x127xf32>
    %843 = arith.mulf %841, %842 : vector<17x127xf32>
    %844 = arith.addf %838, %843 : vector<17x127xf32>
    %c47 = arith.constant 47 : index
    %845 = memref.load %arg3[%c47] : memref<128xf32, #tpu.memory_space<smem>>
    %c2_416 = arith.constant 2 : index
    %c0_417 = arith.constant 0 : index
    %c0_418 = arith.constant 0 : index
    %846 = vector.load %arg10[%c2_416, %c0_417, %c0_418] : memref<8x18x128xf32, #tpu.memory_space<vmem>>, vector<1x17x127xf32>
    %847 = vector.shape_cast %846 : vector<1x17x127xf32> to vector<17x127xf32>
    %848 = vector.broadcast %845 : f32 to vector<17x127xf32>
    %849 = arith.mulf %847, %848 : vector<17x127xf32>
    %850 = arith.addf %844, %849 : vector<17x127xf32>
    %c46 = arith.constant 46 : index
    %851 = memref.load %arg3[%c46] : memref<128xf32, #tpu.memory_space<smem>>
    %c2_419 = arith.constant 2 : index
    %c0_420 = arith.constant 0 : index
    %c1_421 = arith.constant 1 : index
    %852 = vector.load %arg10[%c2_419, %c0_420, %c1_421] : memref<8x18x128xf32, #tpu.memory_space<vmem>>, vector<1x17x127xf32>
    %853 = vector.shape_cast %852 : vector<1x17x127xf32> to vector<17x127xf32>
    %854 = vector.broadcast %851 : f32 to vector<17x127xf32>
    %855 = arith.mulf %853, %854 : vector<17x127xf32>
    %856 = arith.addf %850, %855 : vector<17x127xf32>
    %c45 = arith.constant 45 : index
    %857 = memref.load %arg3[%c45] : memref<128xf32, #tpu.memory_space<smem>>
    %c2_422 = arith.constant 2 : index
    %c1_423 = arith.constant 1 : index
    %c0_424 = arith.constant 0 : index
    %858 = vector.load %arg10[%c2_422, %c1_423, %c0_424] : memref<8x18x128xf32, #tpu.memory_space<vmem>>, vector<1x17x127xf32>
    %859 = vector.shape_cast %858 : vector<1x17x127xf32> to vector<17x127xf32>
    %860 = vector.broadcast %857 : f32 to vector<17x127xf32>
    %861 = arith.mulf %859, %860 : vector<17x127xf32>
    %862 = arith.addf %856, %861 : vector<17x127xf32>
    %c44 = arith.constant 44 : index
    %863 = memref.load %arg3[%c44] : memref<128xf32, #tpu.memory_space<smem>>
    %c2_425 = arith.constant 2 : index
    %c1_426 = arith.constant 1 : index
    %c1_427 = arith.constant 1 : index
    %864 = vector.load %arg10[%c2_425, %c1_426, %c1_427] : memref<8x18x128xf32, #tpu.memory_space<vmem>>, vector<1x17x127xf32>
    %865 = vector.shape_cast %864 : vector<1x17x127xf32> to vector<17x127xf32>
    %866 = vector.broadcast %863 : f32 to vector<17x127xf32>
    %867 = arith.mulf %865, %866 : vector<17x127xf32>
    %868 = arith.addf %862, %867 : vector<17x127xf32>
    %c63 = arith.constant 63 : index
    %869 = memref.load %arg3[%c63] : memref<128xf32, #tpu.memory_space<smem>>
    %c3_428 = arith.constant 3 : index
    %c0_429 = arith.constant 0 : index
    %c0_430 = arith.constant 0 : index
    %870 = vector.load %arg10[%c3_428, %c0_429, %c0_430] : memref<8x18x128xf32, #tpu.memory_space<vmem>>, vector<1x17x127xf32>
    %871 = vector.shape_cast %870 : vector<1x17x127xf32> to vector<17x127xf32>
    %872 = vector.broadcast %869 : f32 to vector<17x127xf32>
    %873 = arith.mulf %871, %872 : vector<17x127xf32>
    %874 = arith.addf %868, %873 : vector<17x127xf32>
    %c62 = arith.constant 62 : index
    %875 = memref.load %arg3[%c62] : memref<128xf32, #tpu.memory_space<smem>>
    %c3_431 = arith.constant 3 : index
    %c0_432 = arith.constant 0 : index
    %c1_433 = arith.constant 1 : index
    %876 = vector.load %arg10[%c3_431, %c0_432, %c1_433] : memref<8x18x128xf32, #tpu.memory_space<vmem>>, vector<1x17x127xf32>
    %877 = vector.shape_cast %876 : vector<1x17x127xf32> to vector<17x127xf32>
    %878 = vector.broadcast %875 : f32 to vector<17x127xf32>
    %879 = arith.mulf %877, %878 : vector<17x127xf32>
    %880 = arith.addf %874, %879 : vector<17x127xf32>
    %c61 = arith.constant 61 : index
    %881 = memref.load %arg3[%c61] : memref<128xf32, #tpu.memory_space<smem>>
    %c3_434 = arith.constant 3 : index
    %c1_435 = arith.constant 1 : index
    %c0_436 = arith.constant 0 : index
    %882 = vector.load %arg10[%c3_434, %c1_435, %c0_436] : memref<8x18x128xf32, #tpu.memory_space<vmem>>, vector<1x17x127xf32>
    %883 = vector.shape_cast %882 : vector<1x17x127xf32> to vector<17x127xf32>
    %884 = vector.broadcast %881 : f32 to vector<17x127xf32>
    %885 = arith.mulf %883, %884 : vector<17x127xf32>
    %886 = arith.addf %880, %885 : vector<17x127xf32>
    %c60 = arith.constant 60 : index
    %887 = memref.load %arg3[%c60] : memref<128xf32, #tpu.memory_space<smem>>
    %c3_437 = arith.constant 3 : index
    %c1_438 = arith.constant 1 : index
    %c1_439 = arith.constant 1 : index
    %888 = vector.load %arg10[%c3_437, %c1_438, %c1_439] : memref<8x18x128xf32, #tpu.memory_space<vmem>>, vector<1x17x127xf32>
    %889 = vector.shape_cast %888 : vector<1x17x127xf32> to vector<17x127xf32>
    %890 = vector.broadcast %887 : f32 to vector<17x127xf32>
    %891 = arith.mulf %889, %890 : vector<17x127xf32>
    %892 = arith.addf %886, %891 : vector<17x127xf32>
    %c79 = arith.constant 79 : index
    %893 = memref.load %arg3[%c79] : memref<128xf32, #tpu.memory_space<smem>>
    %c4_440 = arith.constant 4 : index
    %c0_441 = arith.constant 0 : index
    %c0_442 = arith.constant 0 : index
    %894 = vector.load %arg10[%c4_440, %c0_441, %c0_442] : memref<8x18x128xf32, #tpu.memory_space<vmem>>, vector<1x17x127xf32>
    %895 = vector.shape_cast %894 : vector<1x17x127xf32> to vector<17x127xf32>
    %896 = vector.broadcast %893 : f32 to vector<17x127xf32>
    %897 = arith.mulf %895, %896 : vector<17x127xf32>
    %898 = arith.addf %892, %897 : vector<17x127xf32>
    %c78 = arith.constant 78 : index
    %899 = memref.load %arg3[%c78] : memref<128xf32, #tpu.memory_space<smem>>
    %c4_443 = arith.constant 4 : index
    %c0_444 = arith.constant 0 : index
    %c1_445 = arith.constant 1 : index
    %900 = vector.load %arg10[%c4_443, %c0_444, %c1_445] : memref<8x18x128xf32, #tpu.memory_space<vmem>>, vector<1x17x127xf32>
    %901 = vector.shape_cast %900 : vector<1x17x127xf32> to vector<17x127xf32>
    %902 = vector.broadcast %899 : f32 to vector<17x127xf32>
    %903 = arith.mulf %901, %902 : vector<17x127xf32>
    %904 = arith.addf %898, %903 : vector<17x127xf32>
    %c77 = arith.constant 77 : index
    %905 = memref.load %arg3[%c77] : memref<128xf32, #tpu.memory_space<smem>>
    %c4_446 = arith.constant 4 : index
    %c1_447 = arith.constant 1 : index
    %c0_448 = arith.constant 0 : index
    %906 = vector.load %arg10[%c4_446, %c1_447, %c0_448] : memref<8x18x128xf32, #tpu.memory_space<vmem>>, vector<1x17x127xf32>
    %907 = vector.shape_cast %906 : vector<1x17x127xf32> to vector<17x127xf32>
    %908 = vector.broadcast %905 : f32 to vector<17x127xf32>
    %909 = arith.mulf %907, %908 : vector<17x127xf32>
    %910 = arith.addf %904, %909 : vector<17x127xf32>
    %c76 = arith.constant 76 : index
    %911 = memref.load %arg3[%c76] : memref<128xf32, #tpu.memory_space<smem>>
    %c4_449 = arith.constant 4 : index
    %c1_450 = arith.constant 1 : index
    %c1_451 = arith.constant 1 : index
    %912 = vector.load %arg10[%c4_449, %c1_450, %c1_451] : memref<8x18x128xf32, #tpu.memory_space<vmem>>, vector<1x17x127xf32>
    %913 = vector.shape_cast %912 : vector<1x17x127xf32> to vector<17x127xf32>
    %914 = vector.broadcast %911 : f32 to vector<17x127xf32>
    %915 = arith.mulf %913, %914 : vector<17x127xf32>
    %916 = arith.addf %910, %915 : vector<17x127xf32>
    %c95 = arith.constant 95 : index
    %917 = memref.load %arg3[%c95] : memref<128xf32, #tpu.memory_space<smem>>
    %c5_452 = arith.constant 5 : index
    %c0_453 = arith.constant 0 : index
    %c0_454 = arith.constant 0 : index
    %918 = vector.load %arg10[%c5_452, %c0_453, %c0_454] : memref<8x18x128xf32, #tpu.memory_space<vmem>>, vector<1x17x127xf32>
    %919 = vector.shape_cast %918 : vector<1x17x127xf32> to vector<17x127xf32>
    %920 = vector.broadcast %917 : f32 to vector<17x127xf32>
    %921 = arith.mulf %919, %920 : vector<17x127xf32>
    %922 = arith.addf %916, %921 : vector<17x127xf32>
    %c94 = arith.constant 94 : index
    %923 = memref.load %arg3[%c94] : memref<128xf32, #tpu.memory_space<smem>>
    %c5_455 = arith.constant 5 : index
    %c0_456 = arith.constant 0 : index
    %c1_457 = arith.constant 1 : index
    %924 = vector.load %arg10[%c5_455, %c0_456, %c1_457] : memref<8x18x128xf32, #tpu.memory_space<vmem>>, vector<1x17x127xf32>
    %925 = vector.shape_cast %924 : vector<1x17x127xf32> to vector<17x127xf32>
    %926 = vector.broadcast %923 : f32 to vector<17x127xf32>
    %927 = arith.mulf %925, %926 : vector<17x127xf32>
    %928 = arith.addf %922, %927 : vector<17x127xf32>
    %c93 = arith.constant 93 : index
    %929 = memref.load %arg3[%c93] : memref<128xf32, #tpu.memory_space<smem>>
    %c5_458 = arith.constant 5 : index
    %c1_459 = arith.constant 1 : index
    %c0_460 = arith.constant 0 : index
    %930 = vector.load %arg10[%c5_458, %c1_459, %c0_460] : memref<8x18x128xf32, #tpu.memory_space<vmem>>, vector<1x17x127xf32>
    %931 = vector.shape_cast %930 : vector<1x17x127xf32> to vector<17x127xf32>
    %932 = vector.broadcast %929 : f32 to vector<17x127xf32>
    %933 = arith.mulf %931, %932 : vector<17x127xf32>
    %934 = arith.addf %928, %933 : vector<17x127xf32>
    %c92 = arith.constant 92 : index
    %935 = memref.load %arg3[%c92] : memref<128xf32, #tpu.memory_space<smem>>
    %c5_461 = arith.constant 5 : index
    %c1_462 = arith.constant 1 : index
    %c1_463 = arith.constant 1 : index
    %936 = vector.load %arg10[%c5_461, %c1_462, %c1_463] : memref<8x18x128xf32, #tpu.memory_space<vmem>>, vector<1x17x127xf32>
    %937 = vector.shape_cast %936 : vector<1x17x127xf32> to vector<17x127xf32>
    %938 = vector.broadcast %935 : f32 to vector<17x127xf32>
    %939 = arith.mulf %937, %938 : vector<17x127xf32>
    %940 = arith.addf %934, %939 : vector<17x127xf32>
    %c111 = arith.constant 111 : index
    %941 = memref.load %arg3[%c111] : memref<128xf32, #tpu.memory_space<smem>>
    %c6_464 = arith.constant 6 : index
    %c0_465 = arith.constant 0 : index
    %c0_466 = arith.constant 0 : index
    %942 = vector.load %arg10[%c6_464, %c0_465, %c0_466] : memref<8x18x128xf32, #tpu.memory_space<vmem>>, vector<1x17x127xf32>
    %943 = vector.shape_cast %942 : vector<1x17x127xf32> to vector<17x127xf32>
    %944 = vector.broadcast %941 : f32 to vector<17x127xf32>
    %945 = arith.mulf %943, %944 : vector<17x127xf32>
    %946 = arith.addf %940, %945 : vector<17x127xf32>
    %c110 = arith.constant 110 : index
    %947 = memref.load %arg3[%c110] : memref<128xf32, #tpu.memory_space<smem>>
    %c6_467 = arith.constant 6 : index
    %c0_468 = arith.constant 0 : index
    %c1_469 = arith.constant 1 : index
    %948 = vector.load %arg10[%c6_467, %c0_468, %c1_469] : memref<8x18x128xf32, #tpu.memory_space<vmem>>, vector<1x17x127xf32>
    %949 = vector.shape_cast %948 : vector<1x17x127xf32> to vector<17x127xf32>
    %950 = vector.broadcast %947 : f32 to vector<17x127xf32>
    %951 = arith.mulf %949, %950 : vector<17x127xf32>
    %952 = arith.addf %946, %951 : vector<17x127xf32>
    %c109 = arith.constant 109 : index
    %953 = memref.load %arg3[%c109] : memref<128xf32, #tpu.memory_space<smem>>
    %c6_470 = arith.constant 6 : index
    %c1_471 = arith.constant 1 : index
    %c0_472 = arith.constant 0 : index
    %954 = vector.load %arg10[%c6_470, %c1_471, %c0_472] : memref<8x18x128xf32, #tpu.memory_space<vmem>>, vector<1x17x127xf32>
    %955 = vector.shape_cast %954 : vector<1x17x127xf32> to vector<17x127xf32>
    %956 = vector.broadcast %953 : f32 to vector<17x127xf32>
    %957 = arith.mulf %955, %956 : vector<17x127xf32>
    %958 = arith.addf %952, %957 : vector<17x127xf32>
    %c108 = arith.constant 108 : index
    %959 = memref.load %arg3[%c108] : memref<128xf32, #tpu.memory_space<smem>>
    %c6_473 = arith.constant 6 : index
    %c1_474 = arith.constant 1 : index
    %c1_475 = arith.constant 1 : index
    %960 = vector.load %arg10[%c6_473, %c1_474, %c1_475] : memref<8x18x128xf32, #tpu.memory_space<vmem>>, vector<1x17x127xf32>
    %961 = vector.shape_cast %960 : vector<1x17x127xf32> to vector<17x127xf32>
    %962 = vector.broadcast %959 : f32 to vector<17x127xf32>
    %963 = arith.mulf %961, %962 : vector<17x127xf32>
    %964 = arith.addf %958, %963 : vector<17x127xf32>
    %c127 = arith.constant 127 : index
    %965 = memref.load %arg3[%c127] : memref<128xf32, #tpu.memory_space<smem>>
    %c7_476 = arith.constant 7 : index
    %c0_477 = arith.constant 0 : index
    %c0_478 = arith.constant 0 : index
    %966 = vector.load %arg10[%c7_476, %c0_477, %c0_478] : memref<8x18x128xf32, #tpu.memory_space<vmem>>, vector<1x17x127xf32>
    %967 = vector.shape_cast %966 : vector<1x17x127xf32> to vector<17x127xf32>
    %968 = vector.broadcast %965 : f32 to vector<17x127xf32>
    %969 = arith.mulf %967, %968 : vector<17x127xf32>
    %970 = arith.addf %964, %969 : vector<17x127xf32>
    %c126 = arith.constant 126 : index
    %971 = memref.load %arg3[%c126] : memref<128xf32, #tpu.memory_space<smem>>
    %c7_479 = arith.constant 7 : index
    %c0_480 = arith.constant 0 : index
    %c1_481 = arith.constant 1 : index
    %972 = vector.load %arg10[%c7_479, %c0_480, %c1_481] : memref<8x18x128xf32, #tpu.memory_space<vmem>>, vector<1x17x127xf32>
    %973 = vector.shape_cast %972 : vector<1x17x127xf32> to vector<17x127xf32>
    %974 = vector.broadcast %971 : f32 to vector<17x127xf32>
    %975 = arith.mulf %973, %974 : vector<17x127xf32>
    %976 = arith.addf %970, %975 : vector<17x127xf32>
    %c125 = arith.constant 125 : index
    %977 = memref.load %arg3[%c125] : memref<128xf32, #tpu.memory_space<smem>>
    %c7_482 = arith.constant 7 : index
    %c1_483 = arith.constant 1 : index
    %c0_484 = arith.constant 0 : index
    %978 = vector.load %arg10[%c7_482, %c1_483, %c0_484] : memref<8x18x128xf32, #tpu.memory_space<vmem>>, vector<1x17x127xf32>
    %979 = vector.shape_cast %978 : vector<1x17x127xf32> to vector<17x127xf32>
    %980 = vector.broadcast %977 : f32 to vector<17x127xf32>
    %981 = arith.mulf %979, %980 : vector<17x127xf32>
    %982 = arith.addf %976, %981 : vector<17x127xf32>
    %c124 = arith.constant 124 : index
    %983 = memref.load %arg3[%c124] : memref<128xf32, #tpu.memory_space<smem>>
    %c7_485 = arith.constant 7 : index
    %c1_486 = arith.constant 1 : index
    %c1_487 = arith.constant 1 : index
    %984 = vector.load %arg10[%c7_485, %c1_486, %c1_487] : memref<8x18x128xf32, #tpu.memory_space<vmem>>, vector<1x17x127xf32>
    %985 = vector.shape_cast %984 : vector<1x17x127xf32> to vector<17x127xf32>
    %986 = vector.broadcast %983 : f32 to vector<17x127xf32>
    %987 = arith.mulf %985, %986 : vector<17x127xf32>
    %988 = arith.addf %982, %987 : vector<17x127xf32>
    %c3_488 = arith.constant 3 : index
    %989 = memref.load %arg4[%c3_488] : memref<4xf32, #tpu.memory_space<smem>>
    %990 = vector.broadcast %989 : f32 to vector<17x127xf32>
    %991 = arith.addf %988, %990 : vector<17x127xf32>
    %cst_489 = arith.constant 0.000000e+00 : f32
    %992 = vector.broadcast %cst_489 : f32 to vector<17x127xf32>
    %993 = arith.maximumf %991, %992 : vector<17x127xf32>
    %c3_490 = arith.constant 3 : index
    %c0_491 = arith.constant 0 : index
    %c0_492 = arith.constant 0 : index
    %994 = vector.load %arg11[%c3_490, %c0_491, %c0_492] : memref<4x17x128xf32, #tpu.memory_space<vmem>>, vector<1x17x127xf32>
    %995 = vector.shape_cast %994 : vector<1x17x127xf32> to vector<17x127xf32>
    %996 = vector.shape_cast %993 : vector<17x127xf32> to vector<1x17x127xf32>
    tpu.vector_store %arg11[%c3_490, %c0_491, %c0_492], %996 {strides = array<i32>} : memref<4x17x128xf32, #tpu.memory_space<vmem>>, vector<1x17x127xf32>,
    %c0_493 = arith.constant 0 : index
    %997 = memref.load %arg5[%c0_493] : memref<128xf32, #tpu.memory_space<smem>>
    %c0_494 = arith.constant 0 : index
    %c0_495 = arith.constant 0 : index
    %c0_496 = arith.constant 0 : index
    %998 = vector.load %arg11[%c0_494, %c0_495, %c0_496] : memref<4x17x128xf32, #tpu.memory_space<vmem>>, vector<1x14x124xf32>
    %999 = vector.shape_cast %998 : vector<1x14x124xf32> to vector<14x124xf32>
    %1000 = vector.broadcast %997 : f32 to vector<14x124xf32>
    %1001 = arith.mulf %999, %1000 : vector<14x124xf32>
    %c1_497 = arith.constant 1 : index
    %1002 = memref.load %arg5[%c1_497] : memref<128xf32, #tpu.memory_space<smem>>
    %c0_498 = arith.constant 0 : index
    %c0_499 = arith.constant 0 : index
    %c1_500 = arith.constant 1 : index
    %1003 = vector.load %arg11[%c0_498, %c0_499, %c1_500] : memref<4x17x128xf32, #tpu.memory_space<vmem>>, vector<1x14x124xf32>
    %1004 = vector.shape_cast %1003 : vector<1x14x124xf32> to vector<14x124xf32>
    %1005 = vector.broadcast %1002 : f32 to vector<14x124xf32>
    %1006 = arith.mulf %1004, %1005 : vector<14x124xf32>
    %1007 = arith.addf %1001, %1006 : vector<14x124xf32>
    %c2_501 = arith.constant 2 : index
    %1008 = memref.load %arg5[%c2_501] : memref<128xf32, #tpu.memory_space<smem>>
    %c0_502 = arith.constant 0 : index
    %c0_503 = arith.constant 0 : index
    %c2_504 = arith.constant 2 : index
    %1009 = vector.load %arg11[%c0_502, %c0_503, %c2_504] : memref<4x17x128xf32, #tpu.memory_space<vmem>>, vector<1x14x124xf32>
    %1010 = vector.shape_cast %1009 : vector<1x14x124xf32> to vector<14x124xf32>
    %1011 = vector.broadcast %1008 : f32 to vector<14x124xf32>
    %1012 = arith.mulf %1010, %1011 : vector<14x124xf32>
    %1013 = arith.addf %1007, %1012 : vector<14x124xf32>
    %c3_505 = arith.constant 3 : index
    %1014 = memref.load %arg5[%c3_505] : memref<128xf32, #tpu.memory_space<smem>>
    %c0_506 = arith.constant 0 : index
    %c0_507 = arith.constant 0 : index
    %c3_508 = arith.constant 3 : index
    %1015 = vector.load %arg11[%c0_506, %c0_507, %c3_508] : memref<4x17x128xf32, #tpu.memory_space<vmem>>, vector<1x14x124xf32>
    %1016 = vector.shape_cast %1015 : vector<1x14x124xf32> to vector<14x124xf32>
    %1017 = vector.broadcast %1014 : f32 to vector<14x124xf32>
    %1018 = arith.mulf %1016, %1017 : vector<14x124xf32>
    %1019 = arith.addf %1013, %1018 : vector<14x124xf32>
    %c4_509 = arith.constant 4 : index
    %1020 = memref.load %arg5[%c4_509] : memref<128xf32, #tpu.memory_space<smem>>
    %c0_510 = arith.constant 0 : index
    %c1_511 = arith.constant 1 : index
    %c0_512 = arith.constant 0 : index
    %1021 = vector.load %arg11[%c0_510, %c1_511, %c0_512] : memref<4x17x128xf32, #tpu.memory_space<vmem>>, vector<1x14x124xf32>
    %1022 = vector.shape_cast %1021 : vector<1x14x124xf32> to vector<14x124xf32>
    %1023 = vector.broadcast %1020 : f32 to vector<14x124xf32>
    %1024 = arith.mulf %1022, %1023 : vector<14x124xf32>
    %1025 = arith.addf %1019, %1024 : vector<14x124xf32>
    %c5_513 = arith.constant 5 : index
    %1026 = memref.load %arg5[%c5_513] : memref<128xf32, #tpu.memory_space<smem>>
    %c0_514 = arith.constant 0 : index
    %c1_515 = arith.constant 1 : index
    %c1_516 = arith.constant 1 : index
    %1027 = vector.load %arg11[%c0_514, %c1_515, %c1_516] : memref<4x17x128xf32, #tpu.memory_space<vmem>>, vector<1x14x124xf32>
    %1028 = vector.shape_cast %1027 : vector<1x14x124xf32> to vector<14x124xf32>
    %1029 = vector.broadcast %1026 : f32 to vector<14x124xf32>
    %1030 = arith.mulf %1028, %1029 : vector<14x124xf32>
    %1031 = arith.addf %1025, %1030 : vector<14x124xf32>
    %c6_517 = arith.constant 6 : index
    %1032 = memref.load %arg5[%c6_517] : memref<128xf32, #tpu.memory_space<smem>>
    %c0_518 = arith.constant 0 : index
    %c1_519 = arith.constant 1 : index
    %c2_520 = arith.constant 2 : index
    %1033 = vector.load %arg11[%c0_518, %c1_519, %c2_520] : memref<4x17x128xf32, #tpu.memory_space<vmem>>, vector<1x14x124xf32>
    %1034 = vector.shape_cast %1033 : vector<1x14x124xf32> to vector<14x124xf32>
    %1035 = vector.broadcast %1032 : f32 to vector<14x124xf32>
    %1036 = arith.mulf %1034, %1035 : vector<14x124xf32>
    %1037 = arith.addf %1031, %1036 : vector<14x124xf32>
    %c7_521 = arith.constant 7 : index
    %1038 = memref.load %arg5[%c7_521] : memref<128xf32, #tpu.memory_space<smem>>
    %c0_522 = arith.constant 0 : index
    %c1_523 = arith.constant 1 : index
    %c3_524 = arith.constant 3 : index
    %1039 = vector.load %arg11[%c0_522, %c1_523, %c3_524] : memref<4x17x128xf32, #tpu.memory_space<vmem>>, vector<1x14x124xf32>
    %1040 = vector.shape_cast %1039 : vector<1x14x124xf32> to vector<14x124xf32>
    %1041 = vector.broadcast %1038 : f32 to vector<14x124xf32>
    %1042 = arith.mulf %1040, %1041 : vector<14x124xf32>
    %1043 = arith.addf %1037, %1042 : vector<14x124xf32>
    %c8_525 = arith.constant 8 : index
    %1044 = memref.load %arg5[%c8_525] : memref<128xf32, #tpu.memory_space<smem>>
    %c0_526 = arith.constant 0 : index
    %c2_527 = arith.constant 2 : index
    %c0_528 = arith.constant 0 : index
    %1045 = vector.load %arg11[%c0_526, %c2_527, %c0_528] : memref<4x17x128xf32, #tpu.memory_space<vmem>>, vector<1x14x124xf32>
    %1046 = vector.shape_cast %1045 : vector<1x14x124xf32> to vector<14x124xf32>
    %1047 = vector.broadcast %1044 : f32 to vector<14x124xf32>
    %1048 = arith.mulf %1046, %1047 : vector<14x124xf32>
    %1049 = arith.addf %1043, %1048 : vector<14x124xf32>
    %c9_529 = arith.constant 9 : index
    %1050 = memref.load %arg5[%c9_529] : memref<128xf32, #tpu.memory_space<smem>>
    %c0_530 = arith.constant 0 : index
    %c2_531 = arith.constant 2 : index
    %c1_532 = arith.constant 1 : index
    %1051 = vector.load %arg11[%c0_530, %c2_531, %c1_532] : memref<4x17x128xf32, #tpu.memory_space<vmem>>, vector<1x14x124xf32>
    %1052 = vector.shape_cast %1051 : vector<1x14x124xf32> to vector<14x124xf32>
    %1053 = vector.broadcast %1050 : f32 to vector<14x124xf32>
    %1054 = arith.mulf %1052, %1053 : vector<14x124xf32>
    %1055 = arith.addf %1049, %1054 : vector<14x124xf32>
    %c10_533 = arith.constant 10 : index
    %1056 = memref.load %arg5[%c10_533] : memref<128xf32, #tpu.memory_space<smem>>
    %c0_534 = arith.constant 0 : index
    %c2_535 = arith.constant 2 : index
    %c2_536 = arith.constant 2 : index
    %1057 = vector.load %arg11[%c0_534, %c2_535, %c2_536] : memref<4x17x128xf32, #tpu.memory_space<vmem>>, vector<1x14x124xf32>
    %1058 = vector.shape_cast %1057 : vector<1x14x124xf32> to vector<14x124xf32>
    %1059 = vector.broadcast %1056 : f32 to vector<14x124xf32>
    %1060 = arith.mulf %1058, %1059 : vector<14x124xf32>
    %1061 = arith.addf %1055, %1060 : vector<14x124xf32>
    %c11_537 = arith.constant 11 : index
    %1062 = memref.load %arg5[%c11_537] : memref<128xf32, #tpu.memory_space<smem>>
    %c0_538 = arith.constant 0 : index
    %c2_539 = arith.constant 2 : index
    %c3_540 = arith.constant 3 : index
    %1063 = vector.load %arg11[%c0_538, %c2_539, %c3_540] : memref<4x17x128xf32, #tpu.memory_space<vmem>>, vector<1x14x124xf32>
    %1064 = vector.shape_cast %1063 : vector<1x14x124xf32> to vector<14x124xf32>
    %1065 = vector.broadcast %1062 : f32 to vector<14x124xf32>
    %1066 = arith.mulf %1064, %1065 : vector<14x124xf32>
    %1067 = arith.addf %1061, %1066 : vector<14x124xf32>
    %c12_541 = arith.constant 12 : index
    %1068 = memref.load %arg5[%c12_541] : memref<128xf32, #tpu.memory_space<smem>>
    %c0_542 = arith.constant 0 : index
    %c3_543 = arith.constant 3 : index
    %c0_544 = arith.constant 0 : index
    %1069 = vector.load %arg11[%c0_542, %c3_543, %c0_544] : memref<4x17x128xf32, #tpu.memory_space<vmem>>, vector<1x14x124xf32>
    %1070 = vector.shape_cast %1069 : vector<1x14x124xf32> to vector<14x124xf32>
    %1071 = vector.broadcast %1068 : f32 to vector<14x124xf32>
    %1072 = arith.mulf %1070, %1071 : vector<14x124xf32>
    %1073 = arith.addf %1067, %1072 : vector<14x124xf32>
    %c13_545 = arith.constant 13 : index
    %1074 = memref.load %arg5[%c13_545] : memref<128xf32, #tpu.memory_space<smem>>
    %c0_546 = arith.constant 0 : index
    %c3_547 = arith.constant 3 : index
    %c1_548 = arith.constant 1 : index
    %1075 = vector.load %arg11[%c0_546, %c3_547, %c1_548] : memref<4x17x128xf32, #tpu.memory_space<vmem>>, vector<1x14x124xf32>
    %1076 = vector.shape_cast %1075 : vector<1x14x124xf32> to vector<14x124xf32>
    %1077 = vector.broadcast %1074 : f32 to vector<14x124xf32>
    %1078 = arith.mulf %1076, %1077 : vector<14x124xf32>
    %1079 = arith.addf %1073, %1078 : vector<14x124xf32>
    %c14_549 = arith.constant 14 : index
    %1080 = memref.load %arg5[%c14_549] : memref<128xf32, #tpu.memory_space<smem>>
    %c0_550 = arith.constant 0 : index
    %c3_551 = arith.constant 3 : index
    %c2_552 = arith.constant 2 : index
    %1081 = vector.load %arg11[%c0_550, %c3_551, %c2_552] : memref<4x17x128xf32, #tpu.memory_space<vmem>>, vector<1x14x124xf32>
    %1082 = vector.shape_cast %1081 : vector<1x14x124xf32> to vector<14x124xf32>
    %1083 = vector.broadcast %1080 : f32 to vector<14x124xf32>
    %1084 = arith.mulf %1082, %1083 : vector<14x124xf32>
    %1085 = arith.addf %1079, %1084 : vector<14x124xf32>
    %c15_553 = arith.constant 15 : index
    %1086 = memref.load %arg5[%c15_553] : memref<128xf32, #tpu.memory_space<smem>>
    %c0_554 = arith.constant 0 : index
    %c3_555 = arith.constant 3 : index
    %c3_556 = arith.constant 3 : index
    %1087 = vector.load %arg11[%c0_554, %c3_555, %c3_556] : memref<4x17x128xf32, #tpu.memory_space<vmem>>, vector<1x14x124xf32>
    %1088 = vector.shape_cast %1087 : vector<1x14x124xf32> to vector<14x124xf32>
    %1089 = vector.broadcast %1086 : f32 to vector<14x124xf32>
    %1090 = arith.mulf %1088, %1089 : vector<14x124xf32>
    %1091 = arith.addf %1085, %1090 : vector<14x124xf32>
    %c16_557 = arith.constant 16 : index
    %1092 = memref.load %arg5[%c16_557] : memref<128xf32, #tpu.memory_space<smem>>
    %c1_558 = arith.constant 1 : index
    %c0_559 = arith.constant 0 : index
    %c0_560 = arith.constant 0 : index
    %1093 = vector.load %arg11[%c1_558, %c0_559, %c0_560] : memref<4x17x128xf32, #tpu.memory_space<vmem>>, vector<1x14x124xf32>
    %1094 = vector.shape_cast %1093 : vector<1x14x124xf32> to vector<14x124xf32>
    %1095 = vector.broadcast %1092 : f32 to vector<14x124xf32>
    %1096 = arith.mulf %1094, %1095 : vector<14x124xf32>
    %1097 = arith.addf %1091, %1096 : vector<14x124xf32>
    %c17_561 = arith.constant 17 : index
    %1098 = memref.load %arg5[%c17_561] : memref<128xf32, #tpu.memory_space<smem>>
    %c1_562 = arith.constant 1 : index
    %c0_563 = arith.constant 0 : index
    %c1_564 = arith.constant 1 : index
    %1099 = vector.load %arg11[%c1_562, %c0_563, %c1_564] : memref<4x17x128xf32, #tpu.memory_space<vmem>>, vector<1x14x124xf32>
    %1100 = vector.shape_cast %1099 : vector<1x14x124xf32> to vector<14x124xf32>
    %1101 = vector.broadcast %1098 : f32 to vector<14x124xf32>
    %1102 = arith.mulf %1100, %1101 : vector<14x124xf32>
    %1103 = arith.addf %1097, %1102 : vector<14x124xf32>
    %c18_565 = arith.constant 18 : index
    %1104 = memref.load %arg5[%c18_565] : memref<128xf32, #tpu.memory_space<smem>>
    %c1_566 = arith.constant 1 : index
    %c0_567 = arith.constant 0 : index
    %c2_568 = arith.constant 2 : index
    %1105 = vector.load %arg11[%c1_566, %c0_567, %c2_568] : memref<4x17x128xf32, #tpu.memory_space<vmem>>, vector<1x14x124xf32>
    %1106 = vector.shape_cast %1105 : vector<1x14x124xf32> to vector<14x124xf32>
    %1107 = vector.broadcast %1104 : f32 to vector<14x124xf32>
    %1108 = arith.mulf %1106, %1107 : vector<14x124xf32>
    %1109 = arith.addf %1103, %1108 : vector<14x124xf32>
    %c19_569 = arith.constant 19 : index
    %1110 = memref.load %arg5[%c19_569] : memref<128xf32, #tpu.memory_space<smem>>
    %c1_570 = arith.constant 1 : index
    %c0_571 = arith.constant 0 : index
    %c3_572 = arith.constant 3 : index
    %1111 = vector.load %arg11[%c1_570, %c0_571, %c3_572] : memref<4x17x128xf32, #tpu.memory_space<vmem>>, vector<1x14x124xf32>
    %1112 = vector.shape_cast %1111 : vector<1x14x124xf32> to vector<14x124xf32>
    %1113 = vector.broadcast %1110 : f32 to vector<14x124xf32>
    %1114 = arith.mulf %1112, %1113 : vector<14x124xf32>
    %1115 = arith.addf %1109, %1114 : vector<14x124xf32>
    %c20_573 = arith.constant 20 : index
    %1116 = memref.load %arg5[%c20_573] : memref<128xf32, #tpu.memory_space<smem>>
    %c1_574 = arith.constant 1 : index
    %c1_575 = arith.constant 1 : index
    %c0_576 = arith.constant 0 : index
    %1117 = vector.load %arg11[%c1_574, %c1_575, %c0_576] : memref<4x17x128xf32, #tpu.memory_space<vmem>>, vector<1x14x124xf32>
    %1118 = vector.shape_cast %1117 : vector<1x14x124xf32> to vector<14x124xf32>
    %1119 = vector.broadcast %1116 : f32 to vector<14x124xf32>
    %1120 = arith.mulf %1118, %1119 : vector<14x124xf32>
    %1121 = arith.addf %1115, %1120 : vector<14x124xf32>
    %c21_577 = arith.constant 21 : index
    %1122 = memref.load %arg5[%c21_577] : memref<128xf32, #tpu.memory_space<smem>>
    %c1_578 = arith.constant 1 : index
    %c1_579 = arith.constant 1 : index
    %c1_580 = arith.constant 1 : index
    %1123 = vector.load %arg11[%c1_578, %c1_579, %c1_580] : memref<4x17x128xf32, #tpu.memory_space<vmem>>, vector<1x14x124xf32>
    %1124 = vector.shape_cast %1123 : vector<1x14x124xf32> to vector<14x124xf32>
    %1125 = vector.broadcast %1122 : f32 to vector<14x124xf32>
    %1126 = arith.mulf %1124, %1125 : vector<14x124xf32>
    %1127 = arith.addf %1121, %1126 : vector<14x124xf32>
    %c22_581 = arith.constant 22 : index
    %1128 = memref.load %arg5[%c22_581] : memref<128xf32, #tpu.memory_space<smem>>
    %c1_582 = arith.constant 1 : index
    %c1_583 = arith.constant 1 : index
    %c2_584 = arith.constant 2 : index
    %1129 = vector.load %arg11[%c1_582, %c1_583, %c2_584] : memref<4x17x128xf32, #tpu.memory_space<vmem>>, vector<1x14x124xf32>
    %1130 = vector.shape_cast %1129 : vector<1x14x124xf32> to vector<14x124xf32>
    %1131 = vector.broadcast %1128 : f32 to vector<14x124xf32>
    %1132 = arith.mulf %1130, %1131 : vector<14x124xf32>
    %1133 = arith.addf %1127, %1132 : vector<14x124xf32>
    %c23_585 = arith.constant 23 : index
    %1134 = memref.load %arg5[%c23_585] : memref<128xf32, #tpu.memory_space<smem>>
    %c1_586 = arith.constant 1 : index
    %c1_587 = arith.constant 1 : index
    %c3_588 = arith.constant 3 : index
    %1135 = vector.load %arg11[%c1_586, %c1_587, %c3_588] : memref<4x17x128xf32, #tpu.memory_space<vmem>>, vector<1x14x124xf32>
    %1136 = vector.shape_cast %1135 : vector<1x14x124xf32> to vector<14x124xf32>
    %1137 = vector.broadcast %1134 : f32 to vector<14x124xf32>
    %1138 = arith.mulf %1136, %1137 : vector<14x124xf32>
    %1139 = arith.addf %1133, %1138 : vector<14x124xf32>
    %c24_589 = arith.constant 24 : index
    %1140 = memref.load %arg5[%c24_589] : memref<128xf32, #tpu.memory_space<smem>>
    %c1_590 = arith.constant 1 : index
    %c2_591 = arith.constant 2 : index
    %c0_592 = arith.constant 0 : index
    %1141 = vector.load %arg11[%c1_590, %c2_591, %c0_592] : memref<4x17x128xf32, #tpu.memory_space<vmem>>, vector<1x14x124xf32>
    %1142 = vector.shape_cast %1141 : vector<1x14x124xf32> to vector<14x124xf32>
    %1143 = vector.broadcast %1140 : f32 to vector<14x124xf32>
    %1144 = arith.mulf %1142, %1143 : vector<14x124xf32>
    %1145 = arith.addf %1139, %1144 : vector<14x124xf32>
    %c25_593 = arith.constant 25 : index
    %1146 = memref.load %arg5[%c25_593] : memref<128xf32, #tpu.memory_space<smem>>
    %c1_594 = arith.constant 1 : index
    %c2_595 = arith.constant 2 : index
    %c1_596 = arith.constant 1 : index
    %1147 = vector.load %arg11[%c1_594, %c2_595, %c1_596] : memref<4x17x128xf32, #tpu.memory_space<vmem>>, vector<1x14x124xf32>
    %1148 = vector.shape_cast %1147 : vector<1x14x124xf32> to vector<14x124xf32>
    %1149 = vector.broadcast %1146 : f32 to vector<14x124xf32>
    %1150 = arith.mulf %1148, %1149 : vector<14x124xf32>
    %1151 = arith.addf %1145, %1150 : vector<14x124xf32>
    %c26_597 = arith.constant 26 : index
    %1152 = memref.load %arg5[%c26_597] : memref<128xf32, #tpu.memory_space<smem>>
    %c1_598 = arith.constant 1 : index
    %c2_599 = arith.constant 2 : index
    %c2_600 = arith.constant 2 : index
    %1153 = vector.load %arg11[%c1_598, %c2_599, %c2_600] : memref<4x17x128xf32, #tpu.memory_space<vmem>>, vector<1x14x124xf32>
    %1154 = vector.shape_cast %1153 : vector<1x14x124xf32> to vector<14x124xf32>
    %1155 = vector.broadcast %1152 : f32 to vector<14x124xf32>
    %1156 = arith.mulf %1154, %1155 : vector<14x124xf32>
    %1157 = arith.addf %1151, %1156 : vector<14x124xf32>
    %c27_601 = arith.constant 27 : index
    %1158 = memref.load %arg5[%c27_601] : memref<128xf32, #tpu.memory_space<smem>>
    %c1_602 = arith.constant 1 : index
    %c2_603 = arith.constant 2 : index
    %c3_604 = arith.constant 3 : index
    %1159 = vector.load %arg11[%c1_602, %c2_603, %c3_604] : memref<4x17x128xf32, #tpu.memory_space<vmem>>, vector<1x14x124xf32>
    %1160 = vector.shape_cast %1159 : vector<1x14x124xf32> to vector<14x124xf32>
    %1161 = vector.broadcast %1158 : f32 to vector<14x124xf32>
    %1162 = arith.mulf %1160, %1161 : vector<14x124xf32>
    %1163 = arith.addf %1157, %1162 : vector<14x124xf32>
    %c28_605 = arith.constant 28 : index
    %1164 = memref.load %arg5[%c28_605] : memref<128xf32, #tpu.memory_space<smem>>
    %c1_606 = arith.constant 1 : index
    %c3_607 = arith.constant 3 : index
    %c0_608 = arith.constant 0 : index
    %1165 = vector.load %arg11[%c1_606, %c3_607, %c0_608] : memref<4x17x128xf32, #tpu.memory_space<vmem>>, vector<1x14x124xf32>
    %1166 = vector.shape_cast %1165 : vector<1x14x124xf32> to vector<14x124xf32>
    %1167 = vector.broadcast %1164 : f32 to vector<14x124xf32>
    %1168 = arith.mulf %1166, %1167 : vector<14x124xf32>
    %1169 = arith.addf %1163, %1168 : vector<14x124xf32>
    %c29_609 = arith.constant 29 : index
    %1170 = memref.load %arg5[%c29_609] : memref<128xf32, #tpu.memory_space<smem>>
    %c1_610 = arith.constant 1 : index
    %c3_611 = arith.constant 3 : index
    %c1_612 = arith.constant 1 : index
    %1171 = vector.load %arg11[%c1_610, %c3_611, %c1_612] : memref<4x17x128xf32, #tpu.memory_space<vmem>>, vector<1x14x124xf32>
    %1172 = vector.shape_cast %1171 : vector<1x14x124xf32> to vector<14x124xf32>
    %1173 = vector.broadcast %1170 : f32 to vector<14x124xf32>
    %1174 = arith.mulf %1172, %1173 : vector<14x124xf32>
    %1175 = arith.addf %1169, %1174 : vector<14x124xf32>
    %c30_613 = arith.constant 30 : index
    %1176 = memref.load %arg5[%c30_613] : memref<128xf32, #tpu.memory_space<smem>>
    %c1_614 = arith.constant 1 : index
    %c3_615 = arith.constant 3 : index
    %c2_616 = arith.constant 2 : index
    %1177 = vector.load %arg11[%c1_614, %c3_615, %c2_616] : memref<4x17x128xf32, #tpu.memory_space<vmem>>, vector<1x14x124xf32>
    %1178 = vector.shape_cast %1177 : vector<1x14x124xf32> to vector<14x124xf32>
    %1179 = vector.broadcast %1176 : f32 to vector<14x124xf32>
    %1180 = arith.mulf %1178, %1179 : vector<14x124xf32>
    %1181 = arith.addf %1175, %1180 : vector<14x124xf32>
    %c31_617 = arith.constant 31 : index
    %1182 = memref.load %arg5[%c31_617] : memref<128xf32, #tpu.memory_space<smem>>
    %c1_618 = arith.constant 1 : index
    %c3_619 = arith.constant 3 : index
    %c3_620 = arith.constant 3 : index
    %1183 = vector.load %arg11[%c1_618, %c3_619, %c3_620] : memref<4x17x128xf32, #tpu.memory_space<vmem>>, vector<1x14x124xf32>
    %1184 = vector.shape_cast %1183 : vector<1x14x124xf32> to vector<14x124xf32>
    %1185 = vector.broadcast %1182 : f32 to vector<14x124xf32>
    %1186 = arith.mulf %1184, %1185 : vector<14x124xf32>
    %1187 = arith.addf %1181, %1186 : vector<14x124xf32>
    %c32_621 = arith.constant 32 : index
    %1188 = memref.load %arg5[%c32_621] : memref<128xf32, #tpu.memory_space<smem>>
    %c2_622 = arith.constant 2 : index
    %c0_623 = arith.constant 0 : index
    %c0_624 = arith.constant 0 : index
    %1189 = vector.load %arg11[%c2_622, %c0_623, %c0_624] : memref<4x17x128xf32, #tpu.memory_space<vmem>>, vector<1x14x124xf32>
    %1190 = vector.shape_cast %1189 : vector<1x14x124xf32> to vector<14x124xf32>
    %1191 = vector.broadcast %1188 : f32 to vector<14x124xf32>
    %1192 = arith.mulf %1190, %1191 : vector<14x124xf32>
    %1193 = arith.addf %1187, %1192 : vector<14x124xf32>
    %c33_625 = arith.constant 33 : index
    %1194 = memref.load %arg5[%c33_625] : memref<128xf32, #tpu.memory_space<smem>>
    %c2_626 = arith.constant 2 : index
    %c0_627 = arith.constant 0 : index
    %c1_628 = arith.constant 1 : index
    %1195 = vector.load %arg11[%c2_626, %c0_627, %c1_628] : memref<4x17x128xf32, #tpu.memory_space<vmem>>, vector<1x14x124xf32>
    %1196 = vector.shape_cast %1195 : vector<1x14x124xf32> to vector<14x124xf32>
    %1197 = vector.broadcast %1194 : f32 to vector<14x124xf32>
    %1198 = arith.mulf %1196, %1197 : vector<14x124xf32>
    %1199 = arith.addf %1193, %1198 : vector<14x124xf32>
    %c34_629 = arith.constant 34 : index
    %1200 = memref.load %arg5[%c34_629] : memref<128xf32, #tpu.memory_space<smem>>
    %c2_630 = arith.constant 2 : index
    %c0_631 = arith.constant 0 : index
    %c2_632 = arith.constant 2 : index
    %1201 = vector.load %arg11[%c2_630, %c0_631, %c2_632] : memref<4x17x128xf32, #tpu.memory_space<vmem>>, vector<1x14x124xf32>
    %1202 = vector.shape_cast %1201 : vector<1x14x124xf32> to vector<14x124xf32>
    %1203 = vector.broadcast %1200 : f32 to vector<14x124xf32>
    %1204 = arith.mulf %1202, %1203 : vector<14x124xf32>
    %1205 = arith.addf %1199, %1204 : vector<14x124xf32>
    %c35_633 = arith.constant 35 : index
    %1206 = memref.load %arg5[%c35_633] : memref<128xf32, #tpu.memory_space<smem>>
    %c2_634 = arith.constant 2 : index
    %c0_635 = arith.constant 0 : index
    %c3_636 = arith.constant 3 : index
    %1207 = vector.load %arg11[%c2_634, %c0_635, %c3_636] : memref<4x17x128xf32, #tpu.memory_space<vmem>>, vector<1x14x124xf32>
    %1208 = vector.shape_cast %1207 : vector<1x14x124xf32> to vector<14x124xf32>
    %1209 = vector.broadcast %1206 : f32 to vector<14x124xf32>
    %1210 = arith.mulf %1208, %1209 : vector<14x124xf32>
    %1211 = arith.addf %1205, %1210 : vector<14x124xf32>
    %c36_637 = arith.constant 36 : index
    %1212 = memref.load %arg5[%c36_637] : memref<128xf32, #tpu.memory_space<smem>>
    %c2_638 = arith.constant 2 : index
    %c1_639 = arith.constant 1 : index
    %c0_640 = arith.constant 0 : index
    %1213 = vector.load %arg11[%c2_638, %c1_639, %c0_640] : memref<4x17x128xf32, #tpu.memory_space<vmem>>, vector<1x14x124xf32>
    %1214 = vector.shape_cast %1213 : vector<1x14x124xf32> to vector<14x124xf32>
    %1215 = vector.broadcast %1212 : f32 to vector<14x124xf32>
    %1216 = arith.mulf %1214, %1215 : vector<14x124xf32>
    %1217 = arith.addf %1211, %1216 : vector<14x124xf32>
    %c37_641 = arith.constant 37 : index
    %1218 = memref.load %arg5[%c37_641] : memref<128xf32, #tpu.memory_space<smem>>
    %c2_642 = arith.constant 2 : index
    %c1_643 = arith.constant 1 : index
    %c1_644 = arith.constant 1 : index
    %1219 = vector.load %arg11[%c2_642, %c1_643, %c1_644] : memref<4x17x128xf32, #tpu.memory_space<vmem>>, vector<1x14x124xf32>
    %1220 = vector.shape_cast %1219 : vector<1x14x124xf32> to vector<14x124xf32>
    %1221 = vector.broadcast %1218 : f32 to vector<14x124xf32>
    %1222 = arith.mulf %1220, %1221 : vector<14x124xf32>
    %1223 = arith.addf %1217, %1222 : vector<14x124xf32>
    %c38_645 = arith.constant 38 : index
    %1224 = memref.load %arg5[%c38_645] : memref<128xf32, #tpu.memory_space<smem>>
    %c2_646 = arith.constant 2 : index
    %c1_647 = arith.constant 1 : index
    %c2_648 = arith.constant 2 : index
    %1225 = vector.load %arg11[%c2_646, %c1_647, %c2_648] : memref<4x17x128xf32, #tpu.memory_space<vmem>>, vector<1x14x124xf32>
    %1226 = vector.shape_cast %1225 : vector<1x14x124xf32> to vector<14x124xf32>
    %1227 = vector.broadcast %1224 : f32 to vector<14x124xf32>
    %1228 = arith.mulf %1226, %1227 : vector<14x124xf32>
    %1229 = arith.addf %1223, %1228 : vector<14x124xf32>
    %c39_649 = arith.constant 39 : index
    %1230 = memref.load %arg5[%c39_649] : memref<128xf32, #tpu.memory_space<smem>>
    %c2_650 = arith.constant 2 : index
    %c1_651 = arith.constant 1 : index
    %c3_652 = arith.constant 3 : index
    %1231 = vector.load %arg11[%c2_650, %c1_651, %c3_652] : memref<4x17x128xf32, #tpu.memory_space<vmem>>, vector<1x14x124xf32>
    %1232 = vector.shape_cast %1231 : vector<1x14x124xf32> to vector<14x124xf32>
    %1233 = vector.broadcast %1230 : f32 to vector<14x124xf32>
    %1234 = arith.mulf %1232, %1233 : vector<14x124xf32>
    %1235 = arith.addf %1229, %1234 : vector<14x124xf32>
    %c40_653 = arith.constant 40 : index
    %1236 = memref.load %arg5[%c40_653] : memref<128xf32, #tpu.memory_space<smem>>
    %c2_654 = arith.constant 2 : index
    %c2_655 = arith.constant 2 : index
    %c0_656 = arith.constant 0 : index
    %1237 = vector.load %arg11[%c2_654, %c2_655, %c0_656] : memref<4x17x128xf32, #tpu.memory_space<vmem>>, vector<1x14x124xf32>
    %1238 = vector.shape_cast %1237 : vector<1x14x124xf32> to vector<14x124xf32>
    %1239 = vector.broadcast %1236 : f32 to vector<14x124xf32>
    %1240 = arith.mulf %1238, %1239 : vector<14x124xf32>
    %1241 = arith.addf %1235, %1240 : vector<14x124xf32>
    %c41_657 = arith.constant 41 : index
    %1242 = memref.load %arg5[%c41_657] : memref<128xf32, #tpu.memory_space<smem>>
    %c2_658 = arith.constant 2 : index
    %c2_659 = arith.constant 2 : index
    %c1_660 = arith.constant 1 : index
    %1243 = vector.load %arg11[%c2_658, %c2_659, %c1_660] : memref<4x17x128xf32, #tpu.memory_space<vmem>>, vector<1x14x124xf32>
    %1244 = vector.shape_cast %1243 : vector<1x14x124xf32> to vector<14x124xf32>
    %1245 = vector.broadcast %1242 : f32 to vector<14x124xf32>
    %1246 = arith.mulf %1244, %1245 : vector<14x124xf32>
    %1247 = arith.addf %1241, %1246 : vector<14x124xf32>
    %c42_661 = arith.constant 42 : index
    %1248 = memref.load %arg5[%c42_661] : memref<128xf32, #tpu.memory_space<smem>>
    %c2_662 = arith.constant 2 : index
    %c2_663 = arith.constant 2 : index
    %c2_664 = arith.constant 2 : index
    %1249 = vector.load %arg11[%c2_662, %c2_663, %c2_664] : memref<4x17x128xf32, #tpu.memory_space<vmem>>, vector<1x14x124xf32>
    %1250 = vector.shape_cast %1249 : vector<1x14x124xf32> to vector<14x124xf32>
    %1251 = vector.broadcast %1248 : f32 to vector<14x124xf32>
    %1252 = arith.mulf %1250, %1251 : vector<14x124xf32>
    %1253 = arith.addf %1247, %1252 : vector<14x124xf32>
    %c43_665 = arith.constant 43 : index
    %1254 = memref.load %arg5[%c43_665] : memref<128xf32, #tpu.memory_space<smem>>
    %c2_666 = arith.constant 2 : index
    %c2_667 = arith.constant 2 : index
    %c3_668 = arith.constant 3 : index
    %1255 = vector.load %arg11[%c2_666, %c2_667, %c3_668] : memref<4x17x128xf32, #tpu.memory_space<vmem>>, vector<1x14x124xf32>
    %1256 = vector.shape_cast %1255 : vector<1x14x124xf32> to vector<14x124xf32>
    %1257 = vector.broadcast %1254 : f32 to vector<14x124xf32>
    %1258 = arith.mulf %1256, %1257 : vector<14x124xf32>
    %1259 = arith.addf %1253, %1258 : vector<14x124xf32>
    %c44_669 = arith.constant 44 : index
    %1260 = memref.load %arg5[%c44_669] : memref<128xf32, #tpu.memory_space<smem>>
    %c2_670 = arith.constant 2 : index
    %c3_671 = arith.constant 3 : index
    %c0_672 = arith.constant 0 : index
    %1261 = vector.load %arg11[%c2_670, %c3_671, %c0_672] : memref<4x17x128xf32, #tpu.memory_space<vmem>>, vector<1x14x124xf32>
    %1262 = vector.shape_cast %1261 : vector<1x14x124xf32> to vector<14x124xf32>
    %1263 = vector.broadcast %1260 : f32 to vector<14x124xf32>
    %1264 = arith.mulf %1262, %1263 : vector<14x124xf32>
    %1265 = arith.addf %1259, %1264 : vector<14x124xf32>
    %c45_673 = arith.constant 45 : index
    %1266 = memref.load %arg5[%c45_673] : memref<128xf32, #tpu.memory_space<smem>>
    %c2_674 = arith.constant 2 : index
    %c3_675 = arith.constant 3 : index
    %c1_676 = arith.constant 1 : index
    %1267 = vector.load %arg11[%c2_674, %c3_675, %c1_676] : memref<4x17x128xf32, #tpu.memory_space<vmem>>, vector<1x14x124xf32>
    %1268 = vector.shape_cast %1267 : vector<1x14x124xf32> to vector<14x124xf32>
    %1269 = vector.broadcast %1266 : f32 to vector<14x124xf32>
    %1270 = arith.mulf %1268, %1269 : vector<14x124xf32>
    %1271 = arith.addf %1265, %1270 : vector<14x124xf32>
    %c46_677 = arith.constant 46 : index
    %1272 = memref.load %arg5[%c46_677] : memref<128xf32, #tpu.memory_space<smem>>
    %c2_678 = arith.constant 2 : index
    %c3_679 = arith.constant 3 : index
    %c2_680 = arith.constant 2 : index
    %1273 = vector.load %arg11[%c2_678, %c3_679, %c2_680] : memref<4x17x128xf32, #tpu.memory_space<vmem>>, vector<1x14x124xf32>
    %1274 = vector.shape_cast %1273 : vector<1x14x124xf32> to vector<14x124xf32>
    %1275 = vector.broadcast %1272 : f32 to vector<14x124xf32>
    %1276 = arith.mulf %1274, %1275 : vector<14x124xf32>
    %1277 = arith.addf %1271, %1276 : vector<14x124xf32>
    %c47_681 = arith.constant 47 : index
    %1278 = memref.load %arg5[%c47_681] : memref<128xf32, #tpu.memory_space<smem>>
    %c2_682 = arith.constant 2 : index
    %c3_683 = arith.constant 3 : index
    %c3_684 = arith.constant 3 : index
    %1279 = vector.load %arg11[%c2_682, %c3_683, %c3_684] : memref<4x17x128xf32, #tpu.memory_space<vmem>>, vector<1x14x124xf32>
    %1280 = vector.shape_cast %1279 : vector<1x14x124xf32> to vector<14x124xf32>
    %1281 = vector.broadcast %1278 : f32 to vector<14x124xf32>
    %1282 = arith.mulf %1280, %1281 : vector<14x124xf32>
    %1283 = arith.addf %1277, %1282 : vector<14x124xf32>
    %c48_685 = arith.constant 48 : index
    %1284 = memref.load %arg5[%c48_685] : memref<128xf32, #tpu.memory_space<smem>>
    %c3_686 = arith.constant 3 : index
    %c0_687 = arith.constant 0 : index
    %c0_688 = arith.constant 0 : index
    %1285 = vector.load %arg11[%c3_686, %c0_687, %c0_688] : memref<4x17x128xf32, #tpu.memory_space<vmem>>, vector<1x14x124xf32>
    %1286 = vector.shape_cast %1285 : vector<1x14x124xf32> to vector<14x124xf32>
    %1287 = vector.broadcast %1284 : f32 to vector<14x124xf32>
    %1288 = arith.mulf %1286, %1287 : vector<14x124xf32>
    %1289 = arith.addf %1283, %1288 : vector<14x124xf32>
    %c49_689 = arith.constant 49 : index
    %1290 = memref.load %arg5[%c49_689] : memref<128xf32, #tpu.memory_space<smem>>
    %c3_690 = arith.constant 3 : index
    %c0_691 = arith.constant 0 : index
    %c1_692 = arith.constant 1 : index
    %1291 = vector.load %arg11[%c3_690, %c0_691, %c1_692] : memref<4x17x128xf32, #tpu.memory_space<vmem>>, vector<1x14x124xf32>
    %1292 = vector.shape_cast %1291 : vector<1x14x124xf32> to vector<14x124xf32>
    %1293 = vector.broadcast %1290 : f32 to vector<14x124xf32>
    %1294 = arith.mulf %1292, %1293 : vector<14x124xf32>
    %1295 = arith.addf %1289, %1294 : vector<14x124xf32>
    %c50_693 = arith.constant 50 : index
    %1296 = memref.load %arg5[%c50_693] : memref<128xf32, #tpu.memory_space<smem>>
    %c3_694 = arith.constant 3 : index
    %c0_695 = arith.constant 0 : index
    %c2_696 = arith.constant 2 : index
    %1297 = vector.load %arg11[%c3_694, %c0_695, %c2_696] : memref<4x17x128xf32, #tpu.memory_space<vmem>>, vector<1x14x124xf32>
    %1298 = vector.shape_cast %1297 : vector<1x14x124xf32> to vector<14x124xf32>
    %1299 = vector.broadcast %1296 : f32 to vector<14x124xf32>
    %1300 = arith.mulf %1298, %1299 : vector<14x124xf32>
    %1301 = arith.addf %1295, %1300 : vector<14x124xf32>
    %c51_697 = arith.constant 51 : index
    %1302 = memref.load %arg5[%c51_697] : memref<128xf32, #tpu.memory_space<smem>>
    %c3_698 = arith.constant 3 : index
    %c0_699 = arith.constant 0 : index
    %c3_700 = arith.constant 3 : index
    %1303 = vector.load %arg11[%c3_698, %c0_699, %c3_700] : memref<4x17x128xf32, #tpu.memory_space<vmem>>, vector<1x14x124xf32>
    %1304 = vector.shape_cast %1303 : vector<1x14x124xf32> to vector<14x124xf32>
    %1305 = vector.broadcast %1302 : f32 to vector<14x124xf32>
    %1306 = arith.mulf %1304, %1305 : vector<14x124xf32>
    %1307 = arith.addf %1301, %1306 : vector<14x124xf32>
    %c52_701 = arith.constant 52 : index
    %1308 = memref.load %arg5[%c52_701] : memref<128xf32, #tpu.memory_space<smem>>
    %c3_702 = arith.constant 3 : index
    %c1_703 = arith.constant 1 : index
    %c0_704 = arith.constant 0 : index
    %1309 = vector.load %arg11[%c3_702, %c1_703, %c0_704] : memref<4x17x128xf32, #tpu.memory_space<vmem>>, vector<1x14x124xf32>
    %1310 = vector.shape_cast %1309 : vector<1x14x124xf32> to vector<14x124xf32>
    %1311 = vector.broadcast %1308 : f32 to vector<14x124xf32>
    %1312 = arith.mulf %1310, %1311 : vector<14x124xf32>
    %1313 = arith.addf %1307, %1312 : vector<14x124xf32>
    %c53_705 = arith.constant 53 : index
    %1314 = memref.load %arg5[%c53_705] : memref<128xf32, #tpu.memory_space<smem>>
    %c3_706 = arith.constant 3 : index
    %c1_707 = arith.constant 1 : index
    %c1_708 = arith.constant 1 : index
    %1315 = vector.load %arg11[%c3_706, %c1_707, %c1_708] : memref<4x17x128xf32, #tpu.memory_space<vmem>>, vector<1x14x124xf32>
    %1316 = vector.shape_cast %1315 : vector<1x14x124xf32> to vector<14x124xf32>
    %1317 = vector.broadcast %1314 : f32 to vector<14x124xf32>
    %1318 = arith.mulf %1316, %1317 : vector<14x124xf32>
    %1319 = arith.addf %1313, %1318 : vector<14x124xf32>
    %c54_709 = arith.constant 54 : index
    %1320 = memref.load %arg5[%c54_709] : memref<128xf32, #tpu.memory_space<smem>>
    %c3_710 = arith.constant 3 : index
    %c1_711 = arith.constant 1 : index
    %c2_712 = arith.constant 2 : index
    %1321 = vector.load %arg11[%c3_710, %c1_711, %c2_712] : memref<4x17x128xf32, #tpu.memory_space<vmem>>, vector<1x14x124xf32>
    %1322 = vector.shape_cast %1321 : vector<1x14x124xf32> to vector<14x124xf32>
    %1323 = vector.broadcast %1320 : f32 to vector<14x124xf32>
    %1324 = arith.mulf %1322, %1323 : vector<14x124xf32>
    %1325 = arith.addf %1319, %1324 : vector<14x124xf32>
    %c55_713 = arith.constant 55 : index
    %1326 = memref.load %arg5[%c55_713] : memref<128xf32, #tpu.memory_space<smem>>
    %c3_714 = arith.constant 3 : index
    %c1_715 = arith.constant 1 : index
    %c3_716 = arith.constant 3 : index
    %1327 = vector.load %arg11[%c3_714, %c1_715, %c3_716] : memref<4x17x128xf32, #tpu.memory_space<vmem>>, vector<1x14x124xf32>
    %1328 = vector.shape_cast %1327 : vector<1x14x124xf32> to vector<14x124xf32>
    %1329 = vector.broadcast %1326 : f32 to vector<14x124xf32>
    %1330 = arith.mulf %1328, %1329 : vector<14x124xf32>
    %1331 = arith.addf %1325, %1330 : vector<14x124xf32>
    %c56_717 = arith.constant 56 : index
    %1332 = memref.load %arg5[%c56_717] : memref<128xf32, #tpu.memory_space<smem>>
    %c3_718 = arith.constant 3 : index
    %c2_719 = arith.constant 2 : index
    %c0_720 = arith.constant 0 : index
    %1333 = vector.load %arg11[%c3_718, %c2_719, %c0_720] : memref<4x17x128xf32, #tpu.memory_space<vmem>>, vector<1x14x124xf32>
    %1334 = vector.shape_cast %1333 : vector<1x14x124xf32> to vector<14x124xf32>
    %1335 = vector.broadcast %1332 : f32 to vector<14x124xf32>
    %1336 = arith.mulf %1334, %1335 : vector<14x124xf32>
    %1337 = arith.addf %1331, %1336 : vector<14x124xf32>
    %c57_721 = arith.constant 57 : index
    %1338 = memref.load %arg5[%c57_721] : memref<128xf32, #tpu.memory_space<smem>>
    %c3_722 = arith.constant 3 : index
    %c2_723 = arith.constant 2 : index
    %c1_724 = arith.constant 1 : index
    %1339 = vector.load %arg11[%c3_722, %c2_723, %c1_724] : memref<4x17x128xf32, #tpu.memory_space<vmem>>, vector<1x14x124xf32>
    %1340 = vector.shape_cast %1339 : vector<1x14x124xf32> to vector<14x124xf32>
    %1341 = vector.broadcast %1338 : f32 to vector<14x124xf32>
    %1342 = arith.mulf %1340, %1341 : vector<14x124xf32>
    %1343 = arith.addf %1337, %1342 : vector<14x124xf32>
    %c58_725 = arith.constant 58 : index
    %1344 = memref.load %arg5[%c58_725] : memref<128xf32, #tpu.memory_space<smem>>
    %c3_726 = arith.constant 3 : index
    %c2_727 = arith.constant 2 : index
    %c2_728 = arith.constant 2 : index
    %1345 = vector.load %arg11[%c3_726, %c2_727, %c2_728] : memref<4x17x128xf32, #tpu.memory_space<vmem>>, vector<1x14x124xf32>
    %1346 = vector.shape_cast %1345 : vector<1x14x124xf32> to vector<14x124xf32>
    %1347 = vector.broadcast %1344 : f32 to vector<14x124xf32>
    %1348 = arith.mulf %1346, %1347 : vector<14x124xf32>
    %1349 = arith.addf %1343, %1348 : vector<14x124xf32>
    %c59_729 = arith.constant 59 : index
    %1350 = memref.load %arg5[%c59_729] : memref<128xf32, #tpu.memory_space<smem>>
    %c3_730 = arith.constant 3 : index
    %c2_731 = arith.constant 2 : index
    %c3_732 = arith.constant 3 : index
    %1351 = vector.load %arg11[%c3_730, %c2_731, %c3_732] : memref<4x17x128xf32, #tpu.memory_space<vmem>>, vector<1x14x124xf32>
    %1352 = vector.shape_cast %1351 : vector<1x14x124xf32> to vector<14x124xf32>
    %1353 = vector.broadcast %1350 : f32 to vector<14x124xf32>
    %1354 = arith.mulf %1352, %1353 : vector<14x124xf32>
    %1355 = arith.addf %1349, %1354 : vector<14x124xf32>
    %c60_733 = arith.constant 60 : index
    %1356 = memref.load %arg5[%c60_733] : memref<128xf32, #tpu.memory_space<smem>>
    %c3_734 = arith.constant 3 : index
    %c3_735 = arith.constant 3 : index
    %c0_736 = arith.constant 0 : index
    %1357 = vector.load %arg11[%c3_734, %c3_735, %c0_736] : memref<4x17x128xf32, #tpu.memory_space<vmem>>, vector<1x14x124xf32>
    %1358 = vector.shape_cast %1357 : vector<1x14x124xf32> to vector<14x124xf32>
    %1359 = vector.broadcast %1356 : f32 to vector<14x124xf32>
    %1360 = arith.mulf %1358, %1359 : vector<14x124xf32>
    %1361 = arith.addf %1355, %1360 : vector<14x124xf32>
    %c61_737 = arith.constant 61 : index
    %1362 = memref.load %arg5[%c61_737] : memref<128xf32, #tpu.memory_space<smem>>
    %c3_738 = arith.constant 3 : index
    %c3_739 = arith.constant 3 : index
    %c1_740 = arith.constant 1 : index
    %1363 = vector.load %arg11[%c3_738, %c3_739, %c1_740] : memref<4x17x128xf32, #tpu.memory_space<vmem>>, vector<1x14x124xf32>
    %1364 = vector.shape_cast %1363 : vector<1x14x124xf32> to vector<14x124xf32>
    %1365 = vector.broadcast %1362 : f32 to vector<14x124xf32>
    %1366 = arith.mulf %1364, %1365 : vector<14x124xf32>
    %1367 = arith.addf %1361, %1366 : vector<14x124xf32>
    %c62_741 = arith.constant 62 : index
    %1368 = memref.load %arg5[%c62_741] : memref<128xf32, #tpu.memory_space<smem>>
    %c3_742 = arith.constant 3 : index
    %c3_743 = arith.constant 3 : index
    %c2_744 = arith.constant 2 : index
    %1369 = vector.load %arg11[%c3_742, %c3_743, %c2_744] : memref<4x17x128xf32, #tpu.memory_space<vmem>>, vector<1x14x124xf32>
    %1370 = vector.shape_cast %1369 : vector<1x14x124xf32> to vector<14x124xf32>
    %1371 = vector.broadcast %1368 : f32 to vector<14x124xf32>
    %1372 = arith.mulf %1370, %1371 : vector<14x124xf32>
    %1373 = arith.addf %1367, %1372 : vector<14x124xf32>
    %c63_745 = arith.constant 63 : index
    %1374 = memref.load %arg5[%c63_745] : memref<128xf32, #tpu.memory_space<smem>>
    %c3_746 = arith.constant 3 : index
    %c3_747 = arith.constant 3 : index
    %c3_748 = arith.constant 3 : index
    %1375 = vector.load %arg11[%c3_746, %c3_747, %c3_748] : memref<4x17x128xf32, #tpu.memory_space<vmem>>, vector<1x14x124xf32>
    %1376 = vector.shape_cast %1375 : vector<1x14x124xf32> to vector<14x124xf32>
    %1377 = vector.broadcast %1374 : f32 to vector<14x124xf32>
    %1378 = arith.mulf %1376, %1377 : vector<14x124xf32>
    %1379 = arith.addf %1373, %1378 : vector<14x124xf32>
    %c0_749 = arith.constant 0 : index
    %1380 = memref.load %arg6[%c0_749] : memref<2xf32, #tpu.memory_space<smem>>
    %1381 = vector.broadcast %1380 : f32 to vector<14x124xf32>
    %1382 = arith.addf %1379, %1381 : vector<14x124xf32>
    %cst_750 = arith.constant 0.000000e+00 : f32
    %1383 = vector.broadcast %cst_750 : f32 to vector<14x124xf32>
    %1384 = arith.minimumf %1382, %1383 : vector<14x124xf32>
    %1385 = math.absf %1382 : vector<14x124xf32>
    %cst_751 = arith.constant 0.000000e+00 : f32
    %1386 = vector.broadcast %cst_751 : f32 to vector<14x124xf32>
    %1387 = arith.subf %1386, %1385 : vector<14x124xf32>
    %1388 = math.exp %1387 : vector<14x124xf32>
    %cst_752 = arith.constant 1.000000e+00 : f32
    %1389 = vector.broadcast %cst_752 : f32 to vector<14x124xf32>
    %1390 = arith.addf %1389, %1388 : vector<14x124xf32>
    %1391 = math.log %1390 : vector<14x124xf32>
    %1392 = arith.subf %1384, %1391 : vector<14x124xf32>
    %c0_753 = arith.constant 0 : index
    %c0_754 = arith.constant 0 : index
    %c0_755 = arith.constant 0 : index
    %c0_756 = arith.constant 0 : index
    %1393 = vector.load %arg9[%c0_753, %c0_754, %c0_755, %c0_756] : memref<1x2x14x128xf32, #tpu.memory_space<vmem>>, vector<1x1x14x124xf32>
    %1394 = vector.shape_cast %1393 : vector<1x1x14x124xf32> to vector<14x124xf32>
    %1395 = vector.shape_cast %1392 : vector<14x124xf32> to vector<1x1x14x124xf32>
    tpu.vector_store %arg9[%c0_753, %c0_754, %c0_755, %c0_756], %1395 {strides = array<i32>} : memref<1x2x14x128xf32, #tpu.memory_space<vmem>>, vector<1x1x14x124xf32>,
    %c64_757 = arith.constant 64 : index
    %1396 = memref.load %arg5[%c64_757] : memref<128xf32, #tpu.memory_space<smem>>
    %c0_758 = arith.constant 0 : index
    %c0_759 = arith.constant 0 : index
    %c0_760 = arith.constant 0 : index
    %1397 = vector.load %arg11[%c0_758, %c0_759, %c0_760] : memref<4x17x128xf32, #tpu.memory_space<vmem>>, vector<1x14x124xf32>
    %1398 = vector.shape_cast %1397 : vector<1x14x124xf32> to vector<14x124xf32>
    %1399 = vector.broadcast %1396 : f32 to vector<14x124xf32>
    %1400 = arith.mulf %1398, %1399 : vector<14x124xf32>
    %c65_761 = arith.constant 65 : index
    %1401 = memref.load %arg5[%c65_761] : memref<128xf32, #tpu.memory_space<smem>>
    %c0_762 = arith.constant 0 : index
    %c0_763 = arith.constant 0 : index
    %c1_764 = arith.constant 1 : index
    %1402 = vector.load %arg11[%c0_762, %c0_763, %c1_764] : memref<4x17x128xf32, #tpu.memory_space<vmem>>, vector<1x14x124xf32>
    %1403 = vector.shape_cast %1402 : vector<1x14x124xf32> to vector<14x124xf32>
    %1404 = vector.broadcast %1401 : f32 to vector<14x124xf32>
    %1405 = arith.mulf %1403, %1404 : vector<14x124xf32>
    %1406 = arith.addf %1400, %1405 : vector<14x124xf32>
    %c66_765 = arith.constant 66 : index
    %1407 = memref.load %arg5[%c66_765] : memref<128xf32, #tpu.memory_space<smem>>
    %c0_766 = arith.constant 0 : index
    %c0_767 = arith.constant 0 : index
    %c2_768 = arith.constant 2 : index
    %1408 = vector.load %arg11[%c0_766, %c0_767, %c2_768] : memref<4x17x128xf32, #tpu.memory_space<vmem>>, vector<1x14x124xf32>
    %1409 = vector.shape_cast %1408 : vector<1x14x124xf32> to vector<14x124xf32>
    %1410 = vector.broadcast %1407 : f32 to vector<14x124xf32>
    %1411 = arith.mulf %1409, %1410 : vector<14x124xf32>
    %1412 = arith.addf %1406, %1411 : vector<14x124xf32>
    %c67_769 = arith.constant 67 : index
    %1413 = memref.load %arg5[%c67_769] : memref<128xf32, #tpu.memory_space<smem>>
    %c0_770 = arith.constant 0 : index
    %c0_771 = arith.constant 0 : index
    %c3_772 = arith.constant 3 : index
    %1414 = vector.load %arg11[%c0_770, %c0_771, %c3_772] : memref<4x17x128xf32, #tpu.memory_space<vmem>>, vector<1x14x124xf32>
    %1415 = vector.shape_cast %1414 : vector<1x14x124xf32> to vector<14x124xf32>
    %1416 = vector.broadcast %1413 : f32 to vector<14x124xf32>
    %1417 = arith.mulf %1415, %1416 : vector<14x124xf32>
    %1418 = arith.addf %1412, %1417 : vector<14x124xf32>
    %c68_773 = arith.constant 68 : index
    %1419 = memref.load %arg5[%c68_773] : memref<128xf32, #tpu.memory_space<smem>>
    %c0_774 = arith.constant 0 : index
    %c1_775 = arith.constant 1 : index
    %c0_776 = arith.constant 0 : index
    %1420 = vector.load %arg11[%c0_774, %c1_775, %c0_776] : memref<4x17x128xf32, #tpu.memory_space<vmem>>, vector<1x14x124xf32>
    %1421 = vector.shape_cast %1420 : vector<1x14x124xf32> to vector<14x124xf32>
    %1422 = vector.broadcast %1419 : f32 to vector<14x124xf32>
    %1423 = arith.mulf %1421, %1422 : vector<14x124xf32>
    %1424 = arith.addf %1418, %1423 : vector<14x124xf32>
    %c69_777 = arith.constant 69 : index
    %1425 = memref.load %arg5[%c69_777] : memref<128xf32, #tpu.memory_space<smem>>
    %c0_778 = arith.constant 0 : index
    %c1_779 = arith.constant 1 : index
    %c1_780 = arith.constant 1 : index
    %1426 = vector.load %arg11[%c0_778, %c1_779, %c1_780] : memref<4x17x128xf32, #tpu.memory_space<vmem>>, vector<1x14x124xf32>
    %1427 = vector.shape_cast %1426 : vector<1x14x124xf32> to vector<14x124xf32>
    %1428 = vector.broadcast %1425 : f32 to vector<14x124xf32>
    %1429 = arith.mulf %1427, %1428 : vector<14x124xf32>
    %1430 = arith.addf %1424, %1429 : vector<14x124xf32>
    %c70_781 = arith.constant 70 : index
    %1431 = memref.load %arg5[%c70_781] : memref<128xf32, #tpu.memory_space<smem>>
    %c0_782 = arith.constant 0 : index
    %c1_783 = arith.constant 1 : index
    %c2_784 = arith.constant 2 : index
    %1432 = vector.load %arg11[%c0_782, %c1_783, %c2_784] : memref<4x17x128xf32, #tpu.memory_space<vmem>>, vector<1x14x124xf32>
    %1433 = vector.shape_cast %1432 : vector<1x14x124xf32> to vector<14x124xf32>
    %1434 = vector.broadcast %1431 : f32 to vector<14x124xf32>
    %1435 = arith.mulf %1433, %1434 : vector<14x124xf32>
    %1436 = arith.addf %1430, %1435 : vector<14x124xf32>
    %c71_785 = arith.constant 71 : index
    %1437 = memref.load %arg5[%c71_785] : memref<128xf32, #tpu.memory_space<smem>>
    %c0_786 = arith.constant 0 : index
    %c1_787 = arith.constant 1 : index
    %c3_788 = arith.constant 3 : index
    %1438 = vector.load %arg11[%c0_786, %c1_787, %c3_788] : memref<4x17x128xf32, #tpu.memory_space<vmem>>, vector<1x14x124xf32>
    %1439 = vector.shape_cast %1438 : vector<1x14x124xf32> to vector<14x124xf32>
    %1440 = vector.broadcast %1437 : f32 to vector<14x124xf32>
    %1441 = arith.mulf %1439, %1440 : vector<14x124xf32>
    %1442 = arith.addf %1436, %1441 : vector<14x124xf32>
    %c72_789 = arith.constant 72 : index
    %1443 = memref.load %arg5[%c72_789] : memref<128xf32, #tpu.memory_space<smem>>
    %c0_790 = arith.constant 0 : index
    %c2_791 = arith.constant 2 : index
    %c0_792 = arith.constant 0 : index
    %1444 = vector.load %arg11[%c0_790, %c2_791, %c0_792] : memref<4x17x128xf32, #tpu.memory_space<vmem>>, vector<1x14x124xf32>
    %1445 = vector.shape_cast %1444 : vector<1x14x124xf32> to vector<14x124xf32>
    %1446 = vector.broadcast %1443 : f32 to vector<14x124xf32>
    %1447 = arith.mulf %1445, %1446 : vector<14x124xf32>
    %1448 = arith.addf %1442, %1447 : vector<14x124xf32>
    %c73_793 = arith.constant 73 : index
    %1449 = memref.load %arg5[%c73_793] : memref<128xf32, #tpu.memory_space<smem>>
    %c0_794 = arith.constant 0 : index
    %c2_795 = arith.constant 2 : index
    %c1_796 = arith.constant 1 : index
    %1450 = vector.load %arg11[%c0_794, %c2_795, %c1_796] : memref<4x17x128xf32, #tpu.memory_space<vmem>>, vector<1x14x124xf32>
    %1451 = vector.shape_cast %1450 : vector<1x14x124xf32> to vector<14x124xf32>
    %1452 = vector.broadcast %1449 : f32 to vector<14x124xf32>
    %1453 = arith.mulf %1451, %1452 : vector<14x124xf32>
    %1454 = arith.addf %1448, %1453 : vector<14x124xf32>
    %c74_797 = arith.constant 74 : index
    %1455 = memref.load %arg5[%c74_797] : memref<128xf32, #tpu.memory_space<smem>>
    %c0_798 = arith.constant 0 : index
    %c2_799 = arith.constant 2 : index
    %c2_800 = arith.constant 2 : index
    %1456 = vector.load %arg11[%c0_798, %c2_799, %c2_800] : memref<4x17x128xf32, #tpu.memory_space<vmem>>, vector<1x14x124xf32>
    %1457 = vector.shape_cast %1456 : vector<1x14x124xf32> to vector<14x124xf32>
    %1458 = vector.broadcast %1455 : f32 to vector<14x124xf32>
    %1459 = arith.mulf %1457, %1458 : vector<14x124xf32>
    %1460 = arith.addf %1454, %1459 : vector<14x124xf32>
    %c75_801 = arith.constant 75 : index
    %1461 = memref.load %arg5[%c75_801] : memref<128xf32, #tpu.memory_space<smem>>
    %c0_802 = arith.constant 0 : index
    %c2_803 = arith.constant 2 : index
    %c3_804 = arith.constant 3 : index
    %1462 = vector.load %arg11[%c0_802, %c2_803, %c3_804] : memref<4x17x128xf32, #tpu.memory_space<vmem>>, vector<1x14x124xf32>
    %1463 = vector.shape_cast %1462 : vector<1x14x124xf32> to vector<14x124xf32>
    %1464 = vector.broadcast %1461 : f32 to vector<14x124xf32>
    %1465 = arith.mulf %1463, %1464 : vector<14x124xf32>
    %1466 = arith.addf %1460, %1465 : vector<14x124xf32>
    %c76_805 = arith.constant 76 : index
    %1467 = memref.load %arg5[%c76_805] : memref<128xf32, #tpu.memory_space<smem>>
    %c0_806 = arith.constant 0 : index
    %c3_807 = arith.constant 3 : index
    %c0_808 = arith.constant 0 : index
    %1468 = vector.load %arg11[%c0_806, %c3_807, %c0_808] : memref<4x17x128xf32, #tpu.memory_space<vmem>>, vector<1x14x124xf32>
    %1469 = vector.shape_cast %1468 : vector<1x14x124xf32> to vector<14x124xf32>
    %1470 = vector.broadcast %1467 : f32 to vector<14x124xf32>
    %1471 = arith.mulf %1469, %1470 : vector<14x124xf32>
    %1472 = arith.addf %1466, %1471 : vector<14x124xf32>
    %c77_809 = arith.constant 77 : index
    %1473 = memref.load %arg5[%c77_809] : memref<128xf32, #tpu.memory_space<smem>>
    %c0_810 = arith.constant 0 : index
    %c3_811 = arith.constant 3 : index
    %c1_812 = arith.constant 1 : index
    %1474 = vector.load %arg11[%c0_810, %c3_811, %c1_812] : memref<4x17x128xf32, #tpu.memory_space<vmem>>, vector<1x14x124xf32>
    %1475 = vector.shape_cast %1474 : vector<1x14x124xf32> to vector<14x124xf32>
    %1476 = vector.broadcast %1473 : f32 to vector<14x124xf32>
    %1477 = arith.mulf %1475, %1476 : vector<14x124xf32>
    %1478 = arith.addf %1472, %1477 : vector<14x124xf32>
    %c78_813 = arith.constant 78 : index
    %1479 = memref.load %arg5[%c78_813] : memref<128xf32, #tpu.memory_space<smem>>
    %c0_814 = arith.constant 0 : index
    %c3_815 = arith.constant 3 : index
    %c2_816 = arith.constant 2 : index
    %1480 = vector.load %arg11[%c0_814, %c3_815, %c2_816] : memref<4x17x128xf32, #tpu.memory_space<vmem>>, vector<1x14x124xf32>
    %1481 = vector.shape_cast %1480 : vector<1x14x124xf32> to vector<14x124xf32>
    %1482 = vector.broadcast %1479 : f32 to vector<14x124xf32>
    %1483 = arith.mulf %1481, %1482 : vector<14x124xf32>
    %1484 = arith.addf %1478, %1483 : vector<14x124xf32>
    %c79_817 = arith.constant 79 : index
    %1485 = memref.load %arg5[%c79_817] : memref<128xf32, #tpu.memory_space<smem>>
    %c0_818 = arith.constant 0 : index
    %c3_819 = arith.constant 3 : index
    %c3_820 = arith.constant 3 : index
    %1486 = vector.load %arg11[%c0_818, %c3_819, %c3_820] : memref<4x17x128xf32, #tpu.memory_space<vmem>>, vector<1x14x124xf32>
    %1487 = vector.shape_cast %1486 : vector<1x14x124xf32> to vector<14x124xf32>
    %1488 = vector.broadcast %1485 : f32 to vector<14x124xf32>
    %1489 = arith.mulf %1487, %1488 : vector<14x124xf32>
    %1490 = arith.addf %1484, %1489 : vector<14x124xf32>
    %c80_821 = arith.constant 80 : index
    %1491 = memref.load %arg5[%c80_821] : memref<128xf32, #tpu.memory_space<smem>>
    %c1_822 = arith.constant 1 : index
    %c0_823 = arith.constant 0 : index
    %c0_824 = arith.constant 0 : index
    %1492 = vector.load %arg11[%c1_822, %c0_823, %c0_824] : memref<4x17x128xf32, #tpu.memory_space<vmem>>, vector<1x14x124xf32>
    %1493 = vector.shape_cast %1492 : vector<1x14x124xf32> to vector<14x124xf32>
    %1494 = vector.broadcast %1491 : f32 to vector<14x124xf32>
    %1495 = arith.mulf %1493, %1494 : vector<14x124xf32>
    %1496 = arith.addf %1490, %1495 : vector<14x124xf32>
    %c81_825 = arith.constant 81 : index
    %1497 = memref.load %arg5[%c81_825] : memref<128xf32, #tpu.memory_space<smem>>
    %c1_826 = arith.constant 1 : index
    %c0_827 = arith.constant 0 : index
    %c1_828 = arith.constant 1 : index
    %1498 = vector.load %arg11[%c1_826, %c0_827, %c1_828] : memref<4x17x128xf32, #tpu.memory_space<vmem>>, vector<1x14x124xf32>
    %1499 = vector.shape_cast %1498 : vector<1x14x124xf32> to vector<14x124xf32>
    %1500 = vector.broadcast %1497 : f32 to vector<14x124xf32>
    %1501 = arith.mulf %1499, %1500 : vector<14x124xf32>
    %1502 = arith.addf %1496, %1501 : vector<14x124xf32>
    %c82_829 = arith.constant 82 : index
    %1503 = memref.load %arg5[%c82_829] : memref<128xf32, #tpu.memory_space<smem>>
    %c1_830 = arith.constant 1 : index
    %c0_831 = arith.constant 0 : index
    %c2_832 = arith.constant 2 : index
    %1504 = vector.load %arg11[%c1_830, %c0_831, %c2_832] : memref<4x17x128xf32, #tpu.memory_space<vmem>>, vector<1x14x124xf32>
    %1505 = vector.shape_cast %1504 : vector<1x14x124xf32> to vector<14x124xf32>
    %1506 = vector.broadcast %1503 : f32 to vector<14x124xf32>
    %1507 = arith.mulf %1505, %1506 : vector<14x124xf32>
    %1508 = arith.addf %1502, %1507 : vector<14x124xf32>
    %c83_833 = arith.constant 83 : index
    %1509 = memref.load %arg5[%c83_833] : memref<128xf32, #tpu.memory_space<smem>>
    %c1_834 = arith.constant 1 : index
    %c0_835 = arith.constant 0 : index
    %c3_836 = arith.constant 3 : index
    %1510 = vector.load %arg11[%c1_834, %c0_835, %c3_836] : memref<4x17x128xf32, #tpu.memory_space<vmem>>, vector<1x14x124xf32>
    %1511 = vector.shape_cast %1510 : vector<1x14x124xf32> to vector<14x124xf32>
    %1512 = vector.broadcast %1509 : f32 to vector<14x124xf32>
    %1513 = arith.mulf %1511, %1512 : vector<14x124xf32>
    %1514 = arith.addf %1508, %1513 : vector<14x124xf32>
    %c84_837 = arith.constant 84 : index
    %1515 = memref.load %arg5[%c84_837] : memref<128xf32, #tpu.memory_space<smem>>
    %c1_838 = arith.constant 1 : index
    %c1_839 = arith.constant 1 : index
    %c0_840 = arith.constant 0 : index
    %1516 = vector.load %arg11[%c1_838, %c1_839, %c0_840] : memref<4x17x128xf32, #tpu.memory_space<vmem>>, vector<1x14x124xf32>
    %1517 = vector.shape_cast %1516 : vector<1x14x124xf32> to vector<14x124xf32>
    %1518 = vector.broadcast %1515 : f32 to vector<14x124xf32>
    %1519 = arith.mulf %1517, %1518 : vector<14x124xf32>
    %1520 = arith.addf %1514, %1519 : vector<14x124xf32>
    %c85_841 = arith.constant 85 : index
    %1521 = memref.load %arg5[%c85_841] : memref<128xf32, #tpu.memory_space<smem>>
    %c1_842 = arith.constant 1 : index
    %c1_843 = arith.constant 1 : index
    %c1_844 = arith.constant 1 : index
    %1522 = vector.load %arg11[%c1_842, %c1_843, %c1_844] : memref<4x17x128xf32, #tpu.memory_space<vmem>>, vector<1x14x124xf32>
    %1523 = vector.shape_cast %1522 : vector<1x14x124xf32> to vector<14x124xf32>
    %1524 = vector.broadcast %1521 : f32 to vector<14x124xf32>
    %1525 = arith.mulf %1523, %1524 : vector<14x124xf32>
    %1526 = arith.addf %1520, %1525 : vector<14x124xf32>
    %c86_845 = arith.constant 86 : index
    %1527 = memref.load %arg5[%c86_845] : memref<128xf32, #tpu.memory_space<smem>>
    %c1_846 = arith.constant 1 : index
    %c1_847 = arith.constant 1 : index
    %c2_848 = arith.constant 2 : index
    %1528 = vector.load %arg11[%c1_846, %c1_847, %c2_848] : memref<4x17x128xf32, #tpu.memory_space<vmem>>, vector<1x14x124xf32>
    %1529 = vector.shape_cast %1528 : vector<1x14x124xf32> to vector<14x124xf32>
    %1530 = vector.broadcast %1527 : f32 to vector<14x124xf32>
    %1531 = arith.mulf %1529, %1530 : vector<14x124xf32>
    %1532 = arith.addf %1526, %1531 : vector<14x124xf32>
    %c87_849 = arith.constant 87 : index
    %1533 = memref.load %arg5[%c87_849] : memref<128xf32, #tpu.memory_space<smem>>
    %c1_850 = arith.constant 1 : index
    %c1_851 = arith.constant 1 : index
    %c3_852 = arith.constant 3 : index
    %1534 = vector.load %arg11[%c1_850, %c1_851, %c3_852] : memref<4x17x128xf32, #tpu.memory_space<vmem>>, vector<1x14x124xf32>
    %1535 = vector.shape_cast %1534 : vector<1x14x124xf32> to vector<14x124xf32>
    %1536 = vector.broadcast %1533 : f32 to vector<14x124xf32>
    %1537 = arith.mulf %1535, %1536 : vector<14x124xf32>
    %1538 = arith.addf %1532, %1537 : vector<14x124xf32>
    %c88_853 = arith.constant 88 : index
    %1539 = memref.load %arg5[%c88_853] : memref<128xf32, #tpu.memory_space<smem>>
    %c1_854 = arith.constant 1 : index
    %c2_855 = arith.constant 2 : index
    %c0_856 = arith.constant 0 : index
    %1540 = vector.load %arg11[%c1_854, %c2_855, %c0_856] : memref<4x17x128xf32, #tpu.memory_space<vmem>>, vector<1x14x124xf32>
    %1541 = vector.shape_cast %1540 : vector<1x14x124xf32> to vector<14x124xf32>
    %1542 = vector.broadcast %1539 : f32 to vector<14x124xf32>
    %1543 = arith.mulf %1541, %1542 : vector<14x124xf32>
    %1544 = arith.addf %1538, %1543 : vector<14x124xf32>
    %c89_857 = arith.constant 89 : index
    %1545 = memref.load %arg5[%c89_857] : memref<128xf32, #tpu.memory_space<smem>>
    %c1_858 = arith.constant 1 : index
    %c2_859 = arith.constant 2 : index
    %c1_860 = arith.constant 1 : index
    %1546 = vector.load %arg11[%c1_858, %c2_859, %c1_860] : memref<4x17x128xf32, #tpu.memory_space<vmem>>, vector<1x14x124xf32>
    %1547 = vector.shape_cast %1546 : vector<1x14x124xf32> to vector<14x124xf32>
    %1548 = vector.broadcast %1545 : f32 to vector<14x124xf32>
    %1549 = arith.mulf %1547, %1548 : vector<14x124xf32>
    %1550 = arith.addf %1544, %1549 : vector<14x124xf32>
    %c90_861 = arith.constant 90 : index
    %1551 = memref.load %arg5[%c90_861] : memref<128xf32, #tpu.memory_space<smem>>
    %c1_862 = arith.constant 1 : index
    %c2_863 = arith.constant 2 : index
    %c2_864 = arith.constant 2 : index
    %1552 = vector.load %arg11[%c1_862, %c2_863, %c2_864] : memref<4x17x128xf32, #tpu.memory_space<vmem>>, vector<1x14x124xf32>
    %1553 = vector.shape_cast %1552 : vector<1x14x124xf32> to vector<14x124xf32>
    %1554 = vector.broadcast %1551 : f32 to vector<14x124xf32>
    %1555 = arith.mulf %1553, %1554 : vector<14x124xf32>
    %1556 = arith.addf %1550, %1555 : vector<14x124xf32>
    %c91_865 = arith.constant 91 : index
    %1557 = memref.load %arg5[%c91_865] : memref<128xf32, #tpu.memory_space<smem>>
    %c1_866 = arith.constant 1 : index
    %c2_867 = arith.constant 2 : index
    %c3_868 = arith.constant 3 : index
    %1558 = vector.load %arg11[%c1_866, %c2_867, %c3_868] : memref<4x17x128xf32, #tpu.memory_space<vmem>>, vector<1x14x124xf32>
    %1559 = vector.shape_cast %1558 : vector<1x14x124xf32> to vector<14x124xf32>
    %1560 = vector.broadcast %1557 : f32 to vector<14x124xf32>
    %1561 = arith.mulf %1559, %1560 : vector<14x124xf32>
    %1562 = arith.addf %1556, %1561 : vector<14x124xf32>
    %c92_869 = arith.constant 92 : index
    %1563 = memref.load %arg5[%c92_869] : memref<128xf32, #tpu.memory_space<smem>>
    %c1_870 = arith.constant 1 : index
    %c3_871 = arith.constant 3 : index
    %c0_872 = arith.constant 0 : index
    %1564 = vector.load %arg11[%c1_870, %c3_871, %c0_872] : memref<4x17x128xf32, #tpu.memory_space<vmem>>, vector<1x14x124xf32>
    %1565 = vector.shape_cast %1564 : vector<1x14x124xf32> to vector<14x124xf32>
    %1566 = vector.broadcast %1563 : f32 to vector<14x124xf32>
    %1567 = arith.mulf %1565, %1566 : vector<14x124xf32>
    %1568 = arith.addf %1562, %1567 : vector<14x124xf32>
    %c93_873 = arith.constant 93 : index
    %1569 = memref.load %arg5[%c93_873] : memref<128xf32, #tpu.memory_space<smem>>
    %c1_874 = arith.constant 1 : index
    %c3_875 = arith.constant 3 : index
    %c1_876 = arith.constant 1 : index
    %1570 = vector.load %arg11[%c1_874, %c3_875, %c1_876] : memref<4x17x128xf32, #tpu.memory_space<vmem>>, vector<1x14x124xf32>
    %1571 = vector.shape_cast %1570 : vector<1x14x124xf32> to vector<14x124xf32>
    %1572 = vector.broadcast %1569 : f32 to vector<14x124xf32>
    %1573 = arith.mulf %1571, %1572 : vector<14x124xf32>
    %1574 = arith.addf %1568, %1573 : vector<14x124xf32>
    %c94_877 = arith.constant 94 : index
    %1575 = memref.load %arg5[%c94_877] : memref<128xf32, #tpu.memory_space<smem>>
    %c1_878 = arith.constant 1 : index
    %c3_879 = arith.constant 3 : index
    %c2_880 = arith.constant 2 : index
    %1576 = vector.load %arg11[%c1_878, %c3_879, %c2_880] : memref<4x17x128xf32, #tpu.memory_space<vmem>>, vector<1x14x124xf32>
    %1577 = vector.shape_cast %1576 : vector<1x14x124xf32> to vector<14x124xf32>
    %1578 = vector.broadcast %1575 : f32 to vector<14x124xf32>
    %1579 = arith.mulf %1577, %1578 : vector<14x124xf32>
    %1580 = arith.addf %1574, %1579 : vector<14x124xf32>
    %c95_881 = arith.constant 95 : index
    %1581 = memref.load %arg5[%c95_881] : memref<128xf32, #tpu.memory_space<smem>>
    %c1_882 = arith.constant 1 : index
    %c3_883 = arith.constant 3 : index
    %c3_884 = arith.constant 3 : index
    %1582 = vector.load %arg11[%c1_882, %c3_883, %c3_884] : memref<4x17x128xf32, #tpu.memory_space<vmem>>, vector<1x14x124xf32>
    %1583 = vector.shape_cast %1582 : vector<1x14x124xf32> to vector<14x124xf32>
    %1584 = vector.broadcast %1581 : f32 to vector<14x124xf32>
    %1585 = arith.mulf %1583, %1584 : vector<14x124xf32>
    %1586 = arith.addf %1580, %1585 : vector<14x124xf32>
    %c96_885 = arith.constant 96 : index
    %1587 = memref.load %arg5[%c96_885] : memref<128xf32, #tpu.memory_space<smem>>
    %c2_886 = arith.constant 2 : index
    %c0_887 = arith.constant 0 : index
    %c0_888 = arith.constant 0 : index
    %1588 = vector.load %arg11[%c2_886, %c0_887, %c0_888] : memref<4x17x128xf32, #tpu.memory_space<vmem>>, vector<1x14x124xf32>
    %1589 = vector.shape_cast %1588 : vector<1x14x124xf32> to vector<14x124xf32>
    %1590 = vector.broadcast %1587 : f32 to vector<14x124xf32>
    %1591 = arith.mulf %1589, %1590 : vector<14x124xf32>
    %1592 = arith.addf %1586, %1591 : vector<14x124xf32>
    %c97_889 = arith.constant 97 : index
    %1593 = memref.load %arg5[%c97_889] : memref<128xf32, #tpu.memory_space<smem>>
    %c2_890 = arith.constant 2 : index
    %c0_891 = arith.constant 0 : index
    %c1_892 = arith.constant 1 : index
    %1594 = vector.load %arg11[%c2_890, %c0_891, %c1_892] : memref<4x17x128xf32, #tpu.memory_space<vmem>>, vector<1x14x124xf32>
    %1595 = vector.shape_cast %1594 : vector<1x14x124xf32> to vector<14x124xf32>
    %1596 = vector.broadcast %1593 : f32 to vector<14x124xf32>
    %1597 = arith.mulf %1595, %1596 : vector<14x124xf32>
    %1598 = arith.addf %1592, %1597 : vector<14x124xf32>
    %c98_893 = arith.constant 98 : index
    %1599 = memref.load %arg5[%c98_893] : memref<128xf32, #tpu.memory_space<smem>>
    %c2_894 = arith.constant 2 : index
    %c0_895 = arith.constant 0 : index
    %c2_896 = arith.constant 2 : index
    %1600 = vector.load %arg11[%c2_894, %c0_895, %c2_896] : memref<4x17x128xf32, #tpu.memory_space<vmem>>, vector<1x14x124xf32>
    %1601 = vector.shape_cast %1600 : vector<1x14x124xf32> to vector<14x124xf32>
    %1602 = vector.broadcast %1599 : f32 to vector<14x124xf32>
    %1603 = arith.mulf %1601, %1602 : vector<14x124xf32>
    %1604 = arith.addf %1598, %1603 : vector<14x124xf32>
    %c99_897 = arith.constant 99 : index
    %1605 = memref.load %arg5[%c99_897] : memref<128xf32, #tpu.memory_space<smem>>
    %c2_898 = arith.constant 2 : index
    %c0_899 = arith.constant 0 : index
    %c3_900 = arith.constant 3 : index
    %1606 = vector.load %arg11[%c2_898, %c0_899, %c3_900] : memref<4x17x128xf32, #tpu.memory_space<vmem>>, vector<1x14x124xf32>
    %1607 = vector.shape_cast %1606 : vector<1x14x124xf32> to vector<14x124xf32>
    %1608 = vector.broadcast %1605 : f32 to vector<14x124xf32>
    %1609 = arith.mulf %1607, %1608 : vector<14x124xf32>
    %1610 = arith.addf %1604, %1609 : vector<14x124xf32>
    %c100_901 = arith.constant 100 : index
    %1611 = memref.load %arg5[%c100_901] : memref<128xf32, #tpu.memory_space<smem>>
    %c2_902 = arith.constant 2 : index
    %c1_903 = arith.constant 1 : index
    %c0_904 = arith.constant 0 : index
    %1612 = vector.load %arg11[%c2_902, %c1_903, %c0_904] : memref<4x17x128xf32, #tpu.memory_space<vmem>>, vector<1x14x124xf32>
    %1613 = vector.shape_cast %1612 : vector<1x14x124xf32> to vector<14x124xf32>
    %1614 = vector.broadcast %1611 : f32 to vector<14x124xf32>
    %1615 = arith.mulf %1613, %1614 : vector<14x124xf32>
    %1616 = arith.addf %1610, %1615 : vector<14x124xf32>
    %c101_905 = arith.constant 101 : index
    %1617 = memref.load %arg5[%c101_905] : memref<128xf32, #tpu.memory_space<smem>>
    %c2_906 = arith.constant 2 : index
    %c1_907 = arith.constant 1 : index
    %c1_908 = arith.constant 1 : index
    %1618 = vector.load %arg11[%c2_906, %c1_907, %c1_908] : memref<4x17x128xf32, #tpu.memory_space<vmem>>, vector<1x14x124xf32>
    %1619 = vector.shape_cast %1618 : vector<1x14x124xf32> to vector<14x124xf32>
    %1620 = vector.broadcast %1617 : f32 to vector<14x124xf32>
    %1621 = arith.mulf %1619, %1620 : vector<14x124xf32>
    %1622 = arith.addf %1616, %1621 : vector<14x124xf32>
    %c102_909 = arith.constant 102 : index
    %1623 = memref.load %arg5[%c102_909] : memref<128xf32, #tpu.memory_space<smem>>
    %c2_910 = arith.constant 2 : index
    %c1_911 = arith.constant 1 : index
    %c2_912 = arith.constant 2 : index
    %1624 = vector.load %arg11[%c2_910, %c1_911, %c2_912] : memref<4x17x128xf32, #tpu.memory_space<vmem>>, vector<1x14x124xf32>
    %1625 = vector.shape_cast %1624 : vector<1x14x124xf32> to vector<14x124xf32>
    %1626 = vector.broadcast %1623 : f32 to vector<14x124xf32>
    %1627 = arith.mulf %1625, %1626 : vector<14x124xf32>
    %1628 = arith.addf %1622, %1627 : vector<14x124xf32>
    %c103_913 = arith.constant 103 : index
    %1629 = memref.load %arg5[%c103_913] : memref<128xf32, #tpu.memory_space<smem>>
    %c2_914 = arith.constant 2 : index
    %c1_915 = arith.constant 1 : index
    %c3_916 = arith.constant 3 : index
    %1630 = vector.load %arg11[%c2_914, %c1_915, %c3_916] : memref<4x17x128xf32, #tpu.memory_space<vmem>>, vector<1x14x124xf32>
    %1631 = vector.shape_cast %1630 : vector<1x14x124xf32> to vector<14x124xf32>
    %1632 = vector.broadcast %1629 : f32 to vector<14x124xf32>
    %1633 = arith.mulf %1631, %1632 : vector<14x124xf32>
    %1634 = arith.addf %1628, %1633 : vector<14x124xf32>
    %c104_917 = arith.constant 104 : index
    %1635 = memref.load %arg5[%c104_917] : memref<128xf32, #tpu.memory_space<smem>>
    %c2_918 = arith.constant 2 : index
    %c2_919 = arith.constant 2 : index
    %c0_920 = arith.constant 0 : index
    %1636 = vector.load %arg11[%c2_918, %c2_919, %c0_920] : memref<4x17x128xf32, #tpu.memory_space<vmem>>, vector<1x14x124xf32>
    %1637 = vector.shape_cast %1636 : vector<1x14x124xf32> to vector<14x124xf32>
    %1638 = vector.broadcast %1635 : f32 to vector<14x124xf32>
    %1639 = arith.mulf %1637, %1638 : vector<14x124xf32>
    %1640 = arith.addf %1634, %1639 : vector<14x124xf32>
    %c105_921 = arith.constant 105 : index
    %1641 = memref.load %arg5[%c105_921] : memref<128xf32, #tpu.memory_space<smem>>
    %c2_922 = arith.constant 2 : index
    %c2_923 = arith.constant 2 : index
    %c1_924 = arith.constant 1 : index
    %1642 = vector.load %arg11[%c2_922, %c2_923, %c1_924] : memref<4x17x128xf32, #tpu.memory_space<vmem>>, vector<1x14x124xf32>
    %1643 = vector.shape_cast %1642 : vector<1x14x124xf32> to vector<14x124xf32>
    %1644 = vector.broadcast %1641 : f32 to vector<14x124xf32>
    %1645 = arith.mulf %1643, %1644 : vector<14x124xf32>
    %1646 = arith.addf %1640, %1645 : vector<14x124xf32>
    %c106_925 = arith.constant 106 : index
    %1647 = memref.load %arg5[%c106_925] : memref<128xf32, #tpu.memory_space<smem>>
    %c2_926 = arith.constant 2 : index
    %c2_927 = arith.constant 2 : index
    %c2_928 = arith.constant 2 : index
    %1648 = vector.load %arg11[%c2_926, %c2_927, %c2_928] : memref<4x17x128xf32, #tpu.memory_space<vmem>>, vector<1x14x124xf32>
    %1649 = vector.shape_cast %1648 : vector<1x14x124xf32> to vector<14x124xf32>
    %1650 = vector.broadcast %1647 : f32 to vector<14x124xf32>
    %1651 = arith.mulf %1649, %1650 : vector<14x124xf32>
    %1652 = arith.addf %1646, %1651 : vector<14x124xf32>
    %c107_929 = arith.constant 107 : index
    %1653 = memref.load %arg5[%c107_929] : memref<128xf32, #tpu.memory_space<smem>>
    %c2_930 = arith.constant 2 : index
    %c2_931 = arith.constant 2 : index
    %c3_932 = arith.constant 3 : index
    %1654 = vector.load %arg11[%c2_930, %c2_931, %c3_932] : memref<4x17x128xf32, #tpu.memory_space<vmem>>, vector<1x14x124xf32>
    %1655 = vector.shape_cast %1654 : vector<1x14x124xf32> to vector<14x124xf32>
    %1656 = vector.broadcast %1653 : f32 to vector<14x124xf32>
    %1657 = arith.mulf %1655, %1656 : vector<14x124xf32>
    %1658 = arith.addf %1652, %1657 : vector<14x124xf32>
    %c108_933 = arith.constant 108 : index
    %1659 = memref.load %arg5[%c108_933] : memref<128xf32, #tpu.memory_space<smem>>
    %c2_934 = arith.constant 2 : index
    %c3_935 = arith.constant 3 : index
    %c0_936 = arith.constant 0 : index
    %1660 = vector.load %arg11[%c2_934, %c3_935, %c0_936] : memref<4x17x128xf32, #tpu.memory_space<vmem>>, vector<1x14x124xf32>
    %1661 = vector.shape_cast %1660 : vector<1x14x124xf32> to vector<14x124xf32>
    %1662 = vector.broadcast %1659 : f32 to vector<14x124xf32>
    %1663 = arith.mulf %1661, %1662 : vector<14x124xf32>
    %1664 = arith.addf %1658, %1663 : vector<14x124xf32>
    %c109_937 = arith.constant 109 : index
    %1665 = memref.load %arg5[%c109_937] : memref<128xf32, #tpu.memory_space<smem>>
    %c2_938 = arith.constant 2 : index
    %c3_939 = arith.constant 3 : index
    %c1_940 = arith.constant 1 : index
    %1666 = vector.load %arg11[%c2_938, %c3_939, %c1_940] : memref<4x17x128xf32, #tpu.memory_space<vmem>>, vector<1x14x124xf32>
    %1667 = vector.shape_cast %1666 : vector<1x14x124xf32> to vector<14x124xf32>
    %1668 = vector.broadcast %1665 : f32 to vector<14x124xf32>
    %1669 = arith.mulf %1667, %1668 : vector<14x124xf32>
    %1670 = arith.addf %1664, %1669 : vector<14x124xf32>
    %c110_941 = arith.constant 110 : index
    %1671 = memref.load %arg5[%c110_941] : memref<128xf32, #tpu.memory_space<smem>>
    %c2_942 = arith.constant 2 : index
    %c3_943 = arith.constant 3 : index
    %c2_944 = arith.constant 2 : index
    %1672 = vector.load %arg11[%c2_942, %c3_943, %c2_944] : memref<4x17x128xf32, #tpu.memory_space<vmem>>, vector<1x14x124xf32>
    %1673 = vector.shape_cast %1672 : vector<1x14x124xf32> to vector<14x124xf32>
    %1674 = vector.broadcast %1671 : f32 to vector<14x124xf32>
    %1675 = arith.mulf %1673, %1674 : vector<14x124xf32>
    %1676 = arith.addf %1670, %1675 : vector<14x124xf32>
    %c111_945 = arith.constant 111 : index
    %1677 = memref.load %arg5[%c111_945] : memref<128xf32, #tpu.memory_space<smem>>
    %c2_946 = arith.constant 2 : index
    %c3_947 = arith.constant 3 : index
    %c3_948 = arith.constant 3 : index
    %1678 = vector.load %arg11[%c2_946, %c3_947, %c3_948] : memref<4x17x128xf32, #tpu.memory_space<vmem>>, vector<1x14x124xf32>
    %1679 = vector.shape_cast %1678 : vector<1x14x124xf32> to vector<14x124xf32>
    %1680 = vector.broadcast %1677 : f32 to vector<14x124xf32>
    %1681 = arith.mulf %1679, %1680 : vector<14x124xf32>
    %1682 = arith.addf %1676, %1681 : vector<14x124xf32>
    %c112_949 = arith.constant 112 : index
    %1683 = memref.load %arg5[%c112_949] : memref<128xf32, #tpu.memory_space<smem>>
    %c3_950 = arith.constant 3 : index
    %c0_951 = arith.constant 0 : index
    %c0_952 = arith.constant 0 : index
    %1684 = vector.load %arg11[%c3_950, %c0_951, %c0_952] : memref<4x17x128xf32, #tpu.memory_space<vmem>>, vector<1x14x124xf32>
    %1685 = vector.shape_cast %1684 : vector<1x14x124xf32> to vector<14x124xf32>
    %1686 = vector.broadcast %1683 : f32 to vector<14x124xf32>
    %1687 = arith.mulf %1685, %1686 : vector<14x124xf32>
    %1688 = arith.addf %1682, %1687 : vector<14x124xf32>
    %c113_953 = arith.constant 113 : index
    %1689 = memref.load %arg5[%c113_953] : memref<128xf32, #tpu.memory_space<smem>>
    %c3_954 = arith.constant 3 : index
    %c0_955 = arith.constant 0 : index
    %c1_956 = arith.constant 1 : index
    %1690 = vector.load %arg11[%c3_954, %c0_955, %c1_956] : memref<4x17x128xf32, #tpu.memory_space<vmem>>, vector<1x14x124xf32>
    %1691 = vector.shape_cast %1690 : vector<1x14x124xf32> to vector<14x124xf32>
    %1692 = vector.broadcast %1689 : f32 to vector<14x124xf32>
    %1693 = arith.mulf %1691, %1692 : vector<14x124xf32>
    %1694 = arith.addf %1688, %1693 : vector<14x124xf32>
    %c114_957 = arith.constant 114 : index
    %1695 = memref.load %arg5[%c114_957] : memref<128xf32, #tpu.memory_space<smem>>
    %c3_958 = arith.constant 3 : index
    %c0_959 = arith.constant 0 : index
    %c2_960 = arith.constant 2 : index
    %1696 = vector.load %arg11[%c3_958, %c0_959, %c2_960] : memref<4x17x128xf32, #tpu.memory_space<vmem>>, vector<1x14x124xf32>
    %1697 = vector.shape_cast %1696 : vector<1x14x124xf32> to vector<14x124xf32>
    %1698 = vector.broadcast %1695 : f32 to vector<14x124xf32>
    %1699 = arith.mulf %1697, %1698 : vector<14x124xf32>
    %1700 = arith.addf %1694, %1699 : vector<14x124xf32>
    %c115_961 = arith.constant 115 : index
    %1701 = memref.load %arg5[%c115_961] : memref<128xf32, #tpu.memory_space<smem>>
    %c3_962 = arith.constant 3 : index
    %c0_963 = arith.constant 0 : index
    %c3_964 = arith.constant 3 : index
    %1702 = vector.load %arg11[%c3_962, %c0_963, %c3_964] : memref<4x17x128xf32, #tpu.memory_space<vmem>>, vector<1x14x124xf32>
    %1703 = vector.shape_cast %1702 : vector<1x14x124xf32> to vector<14x124xf32>
    %1704 = vector.broadcast %1701 : f32 to vector<14x124xf32>
    %1705 = arith.mulf %1703, %1704 : vector<14x124xf32>
    %1706 = arith.addf %1700, %1705 : vector<14x124xf32>
    %c116_965 = arith.constant 116 : index
    %1707 = memref.load %arg5[%c116_965] : memref<128xf32, #tpu.memory_space<smem>>
    %c3_966 = arith.constant 3 : index
    %c1_967 = arith.constant 1 : index
    %c0_968 = arith.constant 0 : index
    %1708 = vector.load %arg11[%c3_966, %c1_967, %c0_968] : memref<4x17x128xf32, #tpu.memory_space<vmem>>, vector<1x14x124xf32>
    %1709 = vector.shape_cast %1708 : vector<1x14x124xf32> to vector<14x124xf32>
    %1710 = vector.broadcast %1707 : f32 to vector<14x124xf32>
    %1711 = arith.mulf %1709, %1710 : vector<14x124xf32>
    %1712 = arith.addf %1706, %1711 : vector<14x124xf32>
    %c117_969 = arith.constant 117 : index
    %1713 = memref.load %arg5[%c117_969] : memref<128xf32, #tpu.memory_space<smem>>
    %c3_970 = arith.constant 3 : index
    %c1_971 = arith.constant 1 : index
    %c1_972 = arith.constant 1 : index
    %1714 = vector.load %arg11[%c3_970, %c1_971, %c1_972] : memref<4x17x128xf32, #tpu.memory_space<vmem>>, vector<1x14x124xf32>
    %1715 = vector.shape_cast %1714 : vector<1x14x124xf32> to vector<14x124xf32>
    %1716 = vector.broadcast %1713 : f32 to vector<14x124xf32>
    %1717 = arith.mulf %1715, %1716 : vector<14x124xf32>
    %1718 = arith.addf %1712, %1717 : vector<14x124xf32>
    %c118_973 = arith.constant 118 : index
    %1719 = memref.load %arg5[%c118_973] : memref<128xf32, #tpu.memory_space<smem>>
    %c3_974 = arith.constant 3 : index
    %c1_975 = arith.constant 1 : index
    %c2_976 = arith.constant 2 : index
    %1720 = vector.load %arg11[%c3_974, %c1_975, %c2_976] : memref<4x17x128xf32, #tpu.memory_space<vmem>>, vector<1x14x124xf32>
    %1721 = vector.shape_cast %1720 : vector<1x14x124xf32> to vector<14x124xf32>
    %1722 = vector.broadcast %1719 : f32 to vector<14x124xf32>
    %1723 = arith.mulf %1721, %1722 : vector<14x124xf32>
    %1724 = arith.addf %1718, %1723 : vector<14x124xf32>
    %c119_977 = arith.constant 119 : index
    %1725 = memref.load %arg5[%c119_977] : memref<128xf32, #tpu.memory_space<smem>>
    %c3_978 = arith.constant 3 : index
    %c1_979 = arith.constant 1 : index
    %c3_980 = arith.constant 3 : index
    %1726 = vector.load %arg11[%c3_978, %c1_979, %c3_980] : memref<4x17x128xf32, #tpu.memory_space<vmem>>, vector<1x14x124xf32>
    %1727 = vector.shape_cast %1726 : vector<1x14x124xf32> to vector<14x124xf32>
    %1728 = vector.broadcast %1725 : f32 to vector<14x124xf32>
    %1729 = arith.mulf %1727, %1728 : vector<14x124xf32>
    %1730 = arith.addf %1724, %1729 : vector<14x124xf32>
    %c120_981 = arith.constant 120 : index
    %1731 = memref.load %arg5[%c120_981] : memref<128xf32, #tpu.memory_space<smem>>
    %c3_982 = arith.constant 3 : index
    %c2_983 = arith.constant 2 : index
    %c0_984 = arith.constant 0 : index
    %1732 = vector.load %arg11[%c3_982, %c2_983, %c0_984] : memref<4x17x128xf32, #tpu.memory_space<vmem>>, vector<1x14x124xf32>
    %1733 = vector.shape_cast %1732 : vector<1x14x124xf32> to vector<14x124xf32>
    %1734 = vector.broadcast %1731 : f32 to vector<14x124xf32>
    %1735 = arith.mulf %1733, %1734 : vector<14x124xf32>
    %1736 = arith.addf %1730, %1735 : vector<14x124xf32>
    %c121_985 = arith.constant 121 : index
    %1737 = memref.load %arg5[%c121_985] : memref<128xf32, #tpu.memory_space<smem>>
    %c3_986 = arith.constant 3 : index
    %c2_987 = arith.constant 2 : index
    %c1_988 = arith.constant 1 : index
    %1738 = vector.load %arg11[%c3_986, %c2_987, %c1_988] : memref<4x17x128xf32, #tpu.memory_space<vmem>>, vector<1x14x124xf32>
    %1739 = vector.shape_cast %1738 : vector<1x14x124xf32> to vector<14x124xf32>
    %1740 = vector.broadcast %1737 : f32 to vector<14x124xf32>
    %1741 = arith.mulf %1739, %1740 : vector<14x124xf32>
    %1742 = arith.addf %1736, %1741 : vector<14x124xf32>
    %c122_989 = arith.constant 122 : index
    %1743 = memref.load %arg5[%c122_989] : memref<128xf32, #tpu.memory_space<smem>>
    %c3_990 = arith.constant 3 : index
    %c2_991 = arith.constant 2 : index
    %c2_992 = arith.constant 2 : index
    %1744 = vector.load %arg11[%c3_990, %c2_991, %c2_992] : memref<4x17x128xf32, #tpu.memory_space<vmem>>, vector<1x14x124xf32>
    %1745 = vector.shape_cast %1744 : vector<1x14x124xf32> to vector<14x124xf32>
    %1746 = vector.broadcast %1743 : f32 to vector<14x124xf32>
    %1747 = arith.mulf %1745, %1746 : vector<14x124xf32>
    %1748 = arith.addf %1742, %1747 : vector<14x124xf32>
    %c123_993 = arith.constant 123 : index
    %1749 = memref.load %arg5[%c123_993] : memref<128xf32, #tpu.memory_space<smem>>
    %c3_994 = arith.constant 3 : index
    %c2_995 = arith.constant 2 : index
    %c3_996 = arith.constant 3 : index
    %1750 = vector.load %arg11[%c3_994, %c2_995, %c3_996] : memref<4x17x128xf32, #tpu.memory_space<vmem>>, vector<1x14x124xf32>
    %1751 = vector.shape_cast %1750 : vector<1x14x124xf32> to vector<14x124xf32>
    %1752 = vector.broadcast %1749 : f32 to vector<14x124xf32>
    %1753 = arith.mulf %1751, %1752 : vector<14x124xf32>
    %1754 = arith.addf %1748, %1753 : vector<14x124xf32>
    %c124_997 = arith.constant 124 : index
    %1755 = memref.load %arg5[%c124_997] : memref<128xf32, #tpu.memory_space<smem>>
    %c3_998 = arith.constant 3 : index
    %c3_999 = arith.constant 3 : index
    %c0_1000 = arith.constant 0 : index
    %1756 = vector.load %arg11[%c3_998, %c3_999, %c0_1000] : memref<4x17x128xf32, #tpu.memory_space<vmem>>, vector<1x14x124xf32>
    %1757 = vector.shape_cast %1756 : vector<1x14x124xf32> to vector<14x124xf32>
    %1758 = vector.broadcast %1755 : f32 to vector<14x124xf32>
    %1759 = arith.mulf %1757, %1758 : vector<14x124xf32>
    %1760 = arith.addf %1754, %1759 : vector<14x124xf32>
    %c125_1001 = arith.constant 125 : index
    %1761 = memref.load %arg5[%c125_1001] : memref<128xf32, #tpu.memory_space<smem>>
    %c3_1002 = arith.constant 3 : index
    %c3_1003 = arith.constant 3 : index
    %c1_1004 = arith.constant 1 : index
    %1762 = vector.load %arg11[%c3_1002, %c3_1003, %c1_1004] : memref<4x17x128xf32, #tpu.memory_space<vmem>>, vector<1x14x124xf32>
    %1763 = vector.shape_cast %1762 : vector<1x14x124xf32> to vector<14x124xf32>
    %1764 = vector.broadcast %1761 : f32 to vector<14x124xf32>
    %1765 = arith.mulf %1763, %1764 : vector<14x124xf32>
    %1766 = arith.addf %1760, %1765 : vector<14x124xf32>
    %c126_1005 = arith.constant 126 : index
    %1767 = memref.load %arg5[%c126_1005] : memref<128xf32, #tpu.memory_space<smem>>
    %c3_1006 = arith.constant 3 : index
    %c3_1007 = arith.constant 3 : index
    %c2_1008 = arith.constant 2 : index
    %1768 = vector.load %arg11[%c3_1006, %c3_1007, %c2_1008] : memref<4x17x128xf32, #tpu.memory_space<vmem>>, vector<1x14x124xf32>
    %1769 = vector.shape_cast %1768 : vector<1x14x124xf32> to vector<14x124xf32>
    %1770 = vector.broadcast %1767 : f32 to vector<14x124xf32>
    %1771 = arith.mulf %1769, %1770 : vector<14x124xf32>
    %1772 = arith.addf %1766, %1771 : vector<14x124xf32>
    %c127_1009 = arith.constant 127 : index
    %1773 = memref.load %arg5[%c127_1009] : memref<128xf32, #tpu.memory_space<smem>>
    %c3_1010 = arith.constant 3 : index
    %c3_1011 = arith.constant 3 : index
    %c3_1012 = arith.constant 3 : index
    %1774 = vector.load %arg11[%c3_1010, %c3_1011, %c3_1012] : memref<4x17x128xf32, #tpu.memory_space<vmem>>, vector<1x14x124xf32>
    %1775 = vector.shape_cast %1774 : vector<1x14x124xf32> to vector<14x124xf32>
    %1776 = vector.broadcast %1773 : f32 to vector<14x124xf32>
    %1777 = arith.mulf %1775, %1776 : vector<14x124xf32>
    %1778 = arith.addf %1772, %1777 : vector<14x124xf32>
    %c1_1013 = arith.constant 1 : index
    %1779 = memref.load %arg6[%c1_1013] : memref<2xf32, #tpu.memory_space<smem>>
    %1780 = vector.broadcast %1779 : f32 to vector<14x124xf32>
    %1781 = arith.addf %1778, %1780 : vector<14x124xf32>
    %cst_1014 = arith.constant 0.000000e+00 : f32
    %1782 = vector.broadcast %cst_1014 : f32 to vector<14x124xf32>
    %1783 = arith.minimumf %1781, %1782 : vector<14x124xf32>
    %1784 = math.absf %1781 : vector<14x124xf32>
    %cst_1015 = arith.constant 0.000000e+00 : f32
    %1785 = vector.broadcast %cst_1015 : f32 to vector<14x124xf32>
    %1786 = arith.subf %1785, %1784 : vector<14x124xf32>
    %1787 = math.exp %1786 : vector<14x124xf32>
    %cst_1016 = arith.constant 1.000000e+00 : f32
    %1788 = vector.broadcast %cst_1016 : f32 to vector<14x124xf32>
    %1789 = arith.addf %1788, %1787 : vector<14x124xf32>
    %1790 = math.log %1789 : vector<14x124xf32>
    %1791 = arith.subf %1783, %1790 : vector<14x124xf32>
    %c0_1017 = arith.constant 0 : index
    %c1_1018 = arith.constant 1 : index
    %c0_1019 = arith.constant 0 : index
    %c0_1020 = arith.constant 0 : index
    %1792 = vector.load %arg9[%c0_1017, %c1_1018, %c0_1019, %c0_1020] : memref<1x2x14x128xf32, #tpu.memory_space<vmem>>, vector<1x1x14x124xf32>
    %1793 = vector.shape_cast %1792 : vector<1x1x14x124xf32> to vector<14x124xf32>
    %1794 = vector.shape_cast %1791 : vector<14x124xf32> to vector<1x1x14x124xf32>
    tpu.vector_store %arg9[%c0_1017, %c1_1018, %c0_1019, %c0_1020], %1794 {strides = array<i32>} : memref<1x2x14x128xf32, #tpu.memory_space<vmem>>, vector<1x1x14x124xf32>,
    return
  }
  func.func @transform_0(%arg0: i32, %arg1: memref<32xf32, #tpu.memory_space<smem>>, %arg2: memref<8xf32, #tpu.memory_space<smem>>, %arg3: memref<128xf32, #tpu.memory_space<smem>>, %arg4: memref<4xf32, #tpu.memory_space<smem>>, %arg5: memref<128xf32, #tpu.memory_space<smem>>, %arg6: memref<2xf32, #tpu.memory_space<smem>>) -> (i32, i32, i32, i32) {
    %c0_i32 = arith.constant 0 : i32
    %c0_i32_0 = arith.constant 0 : i32
    %c0_i32_1 = arith.constant 0 : i32
    %c0_i32_2 = arith.constant 0 : i32
    return %arg0, %c0_i32, %c0_i32_0, %c0_i32_1 : i32, i32, i32, i32
  }
  func.func @transform_1(%arg0: i32, %arg1: memref<32xf32, #tpu.memory_space<smem>>, %arg2: memref<8xf32, #tpu.memory_space<smem>>, %arg3: memref<128xf32, #tpu.memory_space<smem>>, %arg4: memref<4xf32, #tpu.memory_space<smem>>, %arg5: memref<128xf32, #tpu.memory_space<smem>>, %arg6: memref<2xf32, #tpu.memory_space<smem>>) -> (i32, i32) {
    %c0_i32 = arith.constant 0 : i32
    %c0_i32_0 = arith.constant 0 : i32
    %c0_i32_1 = arith.constant 0 : i32
    return %c0_i32, %c0_i32_0 : i32, i32
  }
  func.func @transform_2(%arg0: i32, %arg1: memref<32xf32, #tpu.memory_space<smem>>, %arg2: memref<8xf32, #tpu.memory_space<smem>>, %arg3: memref<128xf32, #tpu.memory_space<smem>>, %arg4: memref<4xf32, #tpu.memory_space<smem>>, %arg5: memref<128xf32, #tpu.memory_space<smem>>, %arg6: memref<2xf32, #tpu.memory_space<smem>>) -> (i32, i32, i32, i32) {
    %c0_i32 = arith.constant 0 : i32
    %c0_i32_0 = arith.constant 0 : i32
    %c0_i32_1 = arith.constant 0 : i32
    %c0_i32_2 = arith.constant 0 : i32
    return %arg0, %c0_i32, %c0_i32_0, %c0_i32_1 : i32, i32, i32, i32
  }
}

</mosaic_0001>

<bundles_post_ra>
// kernel: decoder_track_e_forward.1
= control target key start
LH: loop header
LB: loop body
LE: loop exit
PB: predicated region body
PF: predicated region fallthrough
CT: control target
= control target key end

     0   :  { %s7147_s0 = inlined_call_operand.vmem [shape: f32[32], index: 0, kind: input, shape index: {}]   ;;  %s7148_s6 = inlined_call_operand.vmem [shape: f32[2,4,18,128], index: 6, kind: input, shape index: {}]   ;;  %s7149_s7 = inlined_call_operand.vmem [shape: f32[18,128], index: 7, kind: input, shape index: {}]   ;;  %s7150_s8 = inlined_call_operand.vmem [shape: f32[2,2,14,128], index: 8, kind: output, shape index: {}]   ;;  %s7151_s1 = inlined_call_operand.vmem [shape: f32[8], index: 1, kind: input, shape index: {}]   ;;  %s7152_s2 = inlined_call_operand.vmem [shape: f32[128], index: 2, kind: input, shape index: {}]   ;;  %s7153_s3 = inlined_call_operand.vmem [shape: f32[4], index: 3, kind: input, shape index: {}]   ;;  %s7154_s4 = inlined_call_operand.vmem [shape: f32[128], index: 4, kind: input, shape index: {}]   ;;  %s7155_s5 = inlined_call_operand.vmem [shape: f32[2], index: 5, kind: input, shape index: {}]  }
   0x1   :  { %s13_s29 = sshll.u32 %s7147_s0, 4  ;;  %s17_s10 = sshll.u32 %s7151_s1, 4  ;;  %s14_s29 = int_to_ptr.vmem [resolvable:$true] %s13_s29  ;;  %s18_s10 = int_to_ptr.vmem [resolvable:$true] %s17_s10 }
   0x2   :  { %s4691_s11 = scalar_lea.vmem %s14_s29, 16  ;;  %p4696_p1 = scmp.lt.s32.totalorder %s14_s29, %s14_s29 }
   0x3   :  { %p4692_p0 = scmp.ne.s32.totalorder %s14_s29, %s4691_s11  ;;  %p4697_p2 = scmp.lt.s32.totalorder %s4691_s11, %s4691_s11 }
   0x5   :  { %p4698_p3 = por %p4697_p2, %p4696_p1 }
   0x7   :  { %p4699_p4 = pnand %p4698_p3, %p4692_p0 }
   0x9   :  { %4702 = shalt.err (!%p4699_p4)  }
   0xa   :  { %s4773_s12 = smov [#allocation5]   ;;  %s4703_s13 = scalar_lea.vmem %s18_s10, 16 }
   0xb   :  { %16 = dma.vmem_to_smem %s14_s29, 16, %s4773_s12, [#allocation4] }
   0xc   :  { %p4704_p5 = scmp.ne.s32.totalorder %s18_s10, %s4703_s13  ;;  %p4708_p6 = scmp.lt.s32.totalorder %s18_s10, %s18_s10 }
   0xd   :  { %p4709_p7 = scmp.lt.s32.totalorder %s4703_s13, %s4703_s13 }
   0xf   :  { %p4710_p8 = por %p4709_p7, %p4708_p6 }
  0x11   :  { %p4711_p9 = pnand %p4710_p8, %p4704_p5 }
  0x13   :  { %4714 = shalt.err (!%p4711_p9)  }
  0x14   :  { %s4774_s0 = smov [#allocation6]   ;;  %s21_s15 = sshll.u32 %s7152_s2, 4  ;;  %s22_s15 = int_to_ptr.vmem [resolvable:$true] %s21_s15 }
  0x15   :  { %20 = dma.vmem_to_smem %s18_s10, 16, %s4774_s0, [#allocation4] }
  0x16   :  { %s25_s18 = sshll.u32 %s7153_s3, 4  ;;  %s4715_s19 = scalar_lea.vmem %s22_s15, 16  ;;  %s26_s18 = int_to_ptr.vmem [resolvable:$true] %s25_s18 }
  0x17   :  { %p4716_p10 = scmp.ne.s32.totalorder %s22_s15, %s4715_s19  ;;  %p4720_p11 = scmp.lt.s32.totalorder %s22_s15, %s22_s15 }
  0x18   :  { %p4721_p12 = scmp.lt.s32.totalorder %s4715_s19, %s4715_s19 }
  0x1a   :  { %p4722_p13 = por %p4721_p12, %p4720_p11 }
  0x1c   :  { %p4723_p0 = pnand %p4722_p13, %p4716_p10 }
  0x1e   :  { %4726 = shalt.err (!%p4723_p0)  }
  0x1f   :  { %s4775_s20 = smov [#allocation7]   ;;  %s4727_s21 = scalar_lea.vmem %s26_s18, 16 }
  0x20   :  { %24 = dma.vmem_to_smem %s22_s15, 16, %s4775_s20, [#allocation4] }
  0x21   :  { %p4728_p1 = scmp.ne.s32.totalorder %s26_s18, %s4727_s21  ;;  %p4732_p2 = scmp.lt.s32.totalorder %s26_s18, %s26_s18 }
  0x22   :  { %p4733_p3 = scmp.lt.s32.totalorder %s4727_s21, %s4727_s21 }
  0x24   :  { %p4734_p4 = por %p4733_p3, %p4732_p2 }
  0x26   :  { %p4735_p5 = pnand %p4734_p4, %p4728_p1 }
  0x28   :  { %4738 = shalt.err (!%p4735_p5)  }
  0x29   :  { %s4776_s2 = smov [#allocation8]   ;;  %s29_s23 = sshll.u32 %s7154_s4, 4  ;;  %s30_s23 = int_to_ptr.vmem [resolvable:$true] %s29_s23 }
  0x2a   :  { %28 = dma.vmem_to_smem %s26_s18, 16, %s4776_s2, [#allocation4] }
  0x2b   :  { %s33_s26 = sshll.u32 %s7155_s5, 4  ;;  %s4739_s27 = scalar_lea.vmem %s30_s23, 16  ;;  %s34_s26 = int_to_ptr.vmem [resolvable:$true] %s33_s26 }
  0x2c   :  { %p4740_p6 = scmp.ne.s32.totalorder %s30_s23, %s4739_s27  ;;  %p4744_p7 = scmp.lt.s32.totalorder %s30_s23, %s30_s23 }
  0x2d   :  { %p4745_p8 = scmp.lt.s32.totalorder %s4739_s27, %s4739_s27 }
  0x2f   :  { %p4746_p9 = por %p4745_p8, %p4744_p7 }
  0x31   :  { %p4747_p10 = pnand %p4746_p9, %p4740_p6 }
  0x33   :  { %4750 = shalt.err (!%p4747_p10)  }
  0x34   :  { %s4777_s28 = smov [#allocation9]   ;;  %s4751_s29 = scalar_lea.vmem %s34_s26, 16 }
  0x35   :  { %32 = dma.vmem_to_smem %s30_s23, 16, %s4777_s28, [#allocation4] }
  0x36   :  { %p4752_p11 = scmp.ne.s32.totalorder %s34_s26, %s4751_s29  ;;  %p4756_p12 = scmp.lt.s32.totalorder %s34_s26, %s34_s26 }
  0x37   :  { %p4757_p13 = scmp.lt.s32.totalorder %s4751_s29, %s4751_s29 }
  0x39   :  { %p4758_p0 = por %p4757_p13, %p4756_p12 }
  0x3b   :  { %p4759_p1 = pnand %p4758_p0, %p4752_p11 }
  0x3d   :  { %4762 = shalt.err (!%p4759_p1)  }
  0x3e   :  { %s4778_s4 = smov [#allocation10]  }
  0x3f   :  { %36 = dma.vmem_to_smem %s34_s26, 16, %s4778_s4, [#allocation4] }
  0x40   :  { %4767 = dma.done.wait [#allocation4], 96 }
  0x41   :  { %4768 = vsyncadd [#allocation4], 4294967200 }
  0x42   :  { %38 = sfence }
  0x43   :  { %s4845_s5 = smov 0  }
  0x44 LB: > { %s4268_s30 = sadd.s32 4294967295, %s4771_s5   ;;  %p4272_p2 = scmp.ge.s32.totalorder %s4771_s5, 1  ;;  %s4771_s5 = sphi %s4845_s5, %s44_s5  }
  0x45   : > { %p144_p3 = scmp.lt.s32.totalorder %s4771_s5, 3 }
  0x47   : > { %p145_p4 = pnand %p4272_p2, %p144_p3 }
  0x49   : > { %148 = sbr.rel (%p145_p4) target bundleno = 1030 (0x406), region = 28 }
  0x50   : > { %p166_p5 = scmp.lt.s32.totalorder %s4268_s30, 1  ;;  %s194_s9 = sld [smem:[#allocation5]]  ;;  %v4909_v43 = vld [vmem:[%s7149_s7 + $0x10] sm:$0x3]  ;;  %v4921_v52 = vld [vmem:[%s7149_s7] sm:$0xff]  ;;  %v4932_v60 = vld [vmem:[%s7149_s7 + $0x8] sm:$0xff] }
  0x51   : > { %s4285_s10 = sld [smem:[#allocation5 + $0x1]]  ;;  %s4286_s11 = sld [smem:[#allocation5 + $0x2]]  ;;  %vm1046_vm0 = vcmask 1039360   ;;  %vm1049_vm1 = vcmask 1032192   ;;  %vm3386_vm2 = vcmask 1014784   ;;  %vm3388_vm3 = vcmask 1012736  }
  0x52   : > { %s7218_s30 = smov (!%p166_p5, %s4268_s30), 1  ;;  %s4287_s12 = sld [smem:[#allocation5 + $0x3]] }
  0x53   : > { %s4586_s13 = smul.u32 96, %s7218_s30  ;;  %s4856_s0 = sld [smem:[#allocation6]] }
  0x54   : > { %s4288_s16 = sld [smem:[#allocation5 + $0x4]]  ;;  %s4289_s17 = sld [smem:[#allocation5 + $0x5]] }
  0x55   : > { %s170_s15 = scalar_lea.vmem %s7148_s6, %s4586_s13  ;;  %s4290_s18 = sld [smem:[#allocation5 + $0x6]] }
  0x56   : > { %v195_v0 = vstv %s194_s9  ;;  %v4861_v1 = vld [vmem:[%s170_s15 + $0x10] sm:$0x3]  ;;  %v4863_v2 = vld [vmem:[%s170_s15 + $0x28] sm:$0x3]  ;;  %v4865_v3 = vld [vmem:[%s170_s15 + $0x40] sm:$0x3] }
  0x57   : > { %v200_v4 = vstv %s4285_s10  ;;  %v4867_v5 = vld [vmem:[%s170_s15 + $0x58] sm:$0x3]  ;;  %v198_v6 = vmul.f32 %v195_v0, %v4861_v1  ;;  %v208_v8 = vstv %s4286_s11  ;;  %v4871_v9 = vld [vmem:[%s170_s15] sm:$0xff]  ;;  %s4291_s19 = sld [smem:[#allocation5 + $0x7]]  ;;  %s4889_s20 = sld [smem:[#allocation7 + $0x2]] }
  0x58   : > { %v203_v7 = vmul.f32 %v4863_v2, %v200_v4  ;;  %v4873_v10 = vld [vmem:[%s170_s15 + $0x18] sm:$0xff]  ;;  %v211_v11 = vmul.f32 %v4865_v3, %v208_v8  ;;  %v216_v12 = vstv %s4287_s12  ;;  %v4876_v13 = vld [vmem:[%s170_s15 + $0x30] sm:$0xff]  ;;  %v4878_v14 = vld [vmem:[%s170_s15 + $0x48] sm:$0xff]  ;;  %v196_v15 = vmul.f32 %v195_v0, %v4871_v9  ;;  %s4901_s21 = sld [smem:[#allocation6 + $0x1]]  ;;  %s4904_s2 = sld [smem:[#allocation5 + $0x8]] }
  0x59   : > { %v219_v17 = vmul.f32 %v4867_v5, %v216_v12  ;;  %v201_v18 = vmul.f32 %v4873_v10, %v200_v4  ;;  %v4883_v19 = vld [vmem:[%s170_s15 + $0x8] sm:$0xff]  ;;  %v4885_v20 = vld [vmem:[%s170_s15 + $0x20] sm:$0xff]  ;;  %v4887_v21 = vld [vmem:[%s170_s15 + $0x38] sm:$0xff]  ;;  %v209_v22 = vmul.f32 %v4876_v13, %v208_v8  ;;  %v217_v23 = vmul.f32 %v4878_v14, %v216_v12  ;;  %s4913_s23 = sld [smem:[#allocation5 + $0x9]]  ;;  %s4915_s24 = sld [smem:[#allocation5 + $0xa]] }
  0x5a   : > { %v206_v16 = vadd.f32 %v203_v7, %v198_v6  ;;  %v4893_v24 = vld [vmem:[%s170_s15 + $0x50] sm:$0xff]  ;;  %v197_v25 = vmul.f32 %v195_v0, %v4883_v19  ;;  %v202_v28 = vmul.f32 %v4885_v20, %v200_v4  ;;  %v210_v29 = vmul.f32 %v4887_v21, %v208_v8  ;;  %s4927_s27 = sld [smem:[#allocation5 + $0xb]]  ;;  %s4934_s4 = sld [smem:[#allocation7]] }
  0x5b   : > { %v204_v27 = vadd.f32 %v201_v18, %v196_v15  ;;  %v224_v30 = vstv %s4856_s0  ;;  %v218_v31 = vmul.f32 %v4893_v24, %v216_v12  ;;  %v238_v35 = vstv %s4288_s16  ;;  %s4942_s9 = sld [smem:[#allocation7 + $0x12]]  ;;  %s4779_s11 = smov 127  }
  0x5c   : > { %v214_v26 = vadd.f32 %v211_v11, %v206_v16  ;;  %v205_v34 = vadd.f32 %v202_v28, %v197_v25  ;;  %v240_v36 = vmul.f32 %v238_v35, %v4883_v19  ;;  %v243_v37 = vstv %s4289_s17  ;;  %s4945_s10 = sld [smem:[#allocation6 + $0x2]]  ;;  %s4963_s12 = sld [smem:[#allocation5 + $0xc]] }
  0x5d   : > { %v212_v33 = vadd.f32 %v209_v22, %v204_v27  ;;  %v251_v38 = vstv %s4290_s18  ;;  %v245_v42 = vmul.f32 %v4885_v20, %v243_v37  ;;  %v259_v45 = vstv %s4291_s19  ;;  %s4969_s13 = sld [smem:[#allocation5 + $0xd]]  ;;  %s4971_s0 = sld [smem:[#allocation5 + $0xe]] }
  0x5e   : > { %v222_v32 = vadd.f32 %v219_v17, %v214_v26  ;;  %v213_v41 = vadd.f32 %v210_v29, %v205_v34  ;;  %v253_v44 = vmul.f32 %v4887_v21, %v251_v38  ;;  %v239_v46 = vmul.f32 %v238_v35, %v4871_v9  ;;  %s4989_s1 = sld [smem:[#allocation5 + $0xf]]  ;;  %s4997_s14 = sld [smem:[#allocation7 + $0x10]] }
  0x5f   : > { %v220_v40 = vadd.f32 %v217_v23, %v212_v33  ;;  %v248_v50 = vadd.f32 %v245_v42, %v240_v36  ;;  %v554_v51 = vstv %s4889_s20  ;;  %v261_v53 = vmul.f32 %v4893_v24, %v259_v45  ;;  %s5010_s15 = sld [smem:[#allocation7 + $0x22]]  ;;  %s5012_s16 = sld [smem:[#allocation6 + $0x3]] }
  0x60   : > { %v227_v39 = vadd.f32 %v224_v30, %v222_v32  ;;  %v221_v49 = vadd.f32 %v218_v31, %v213_v41  ;;  %v244_v54 = vmul.f32 %v4873_v10, %v243_v37  ;;  %v252_v55 = vmul.f32 %v4876_v13, %v251_v38  ;;  %s5031_s17 = sld [smem:[#allocation5 + $0x10]]  ;;  %s5038_s18 = sld [smem:[#allocation5 + $0x11]] }
  0x61   : > { %v225_v48 = vadd.f32 %v224_v30, %v220_v40  ;;  %v256_v59 = vadd.f32 %v253_v44, %v248_v50  ;;  %v260_v62 = vmul.f32 %v4878_v14, %v259_v45  ;;  %v241_v63 = vmul.f32 %v238_v35, %v4861_v1  ;;  %s5040_s19 = sld [smem:[#allocation5 + $0x12]]  ;;  %s5056_s20 = sld [smem:[#allocation5 + $0x13]] }
  0x62   : > { %v230_v47 = vmax.f32 %v227_v39, 0.0  ;;  %v226_v58 = vadd.f32 %v224_v30, %v221_v49  ;;  %v247_v61 = vadd.f32 %v244_v54, %v239_v46  ;;  %v246_v0 = vmul.f32 %v4863_v2, %v243_v37  ;;  %s5089_s3 = sld [smem:[#allocation6 + $0x4]]  ;;  %s5125_s25 = sld [smem:[#allocation5 + $0x17]] }
  0x63   : > { %v228_v57 = vmax.f32 %v225_v48, 0.0  ;;  %v264_v7 = vadd.f32 %v261_v53, %v256_v59  ;;  %v254_v8 = vmul.f32 %v4865_v3, %v251_v38  ;;  %v267_v11 = vstv %s4901_s21  ;;  %s5075_s21 = sld [smem:[#allocation7 + $0x20]]  ;;  %s5102_s22 = sld [smem:[#allocation5 + $0x14]] }
  0x64   : > { %v233_v56 = vmul.f32 %v230_v47, %v4909_v43  ;;  %v229_v6 = vmax.f32 %v226_v58, 0.0  ;;  %v255_v12 = vadd.f32 %v252_v55, %v247_v61  ;;  %v249_v15 = vadd.f32 %v246_v0, %v241_v63  ;;  %s5134_s26 = sld [smem:[#allocation7 + $0x30]]  ;;  %s5160_s28 = sld [smem:[#allocation6 + $0x5]] }
  0x65   : > { %v4940_v4 = vmul.f32 %v228_v57, %v4921_v52  ;;  %v262_v16 = vmul.f32 %v4867_v5, %v259_v45  ;;  %v269_v22 = vadd.f32 %v267_v11, %v264_v7  ;;  %v282_v23 = vstv %s4904_s2  ;;  %s5081_s2 = sld [smem:[#allocation7 + $0x32]]  ;;  %s5164_s29 = sld [smem:[#allocation5 + $0x18]] }
  0x66   : > { %236 = vst [vmem:[#allocation2 + $0x10] sm:$0x3] %v233_v56  ;;  %v4952_v18 = vmul.f32 %v229_v6, %v4932_v60  ;;  %v263_v25 = vadd.f32 %v260_v62, %v255_v12  ;;  %v257_v26 = vadd.f32 %v254_v8, %v249_v15  ;;  %v284_v27 = vmul.f32 %v282_v23, %v4883_v19 }
  0x67   : > { %234 = vst [vmem:[#allocation2] sm:$0xff] %v4940_v4  ;;  %v555_v17 = vmul.f32 %v554_v51, %v4940_v4  ;;  %v287_v28 = vstv %s4913_s23  ;;  %v272_v30 = vmax.f32 %v269_v22, 0.0  ;;  %v295_v32 = vstv %s4915_s24  ;;  %s5108_s23 = sld [smem:[#allocation5 + $0x15]]  ;;  %s5110_s24 = sld [smem:[#allocation5 + $0x16]] }
  0x68   : > { %235 = vst [vmem:[#allocation2 + $0x8] sm:$0xff] %v4952_v18  ;;  %v556_v29 = vmul.f32 %v554_v51, %v4952_v18  ;;  %v289_v31 = vmul.f32 %v4885_v20, %v287_v28  ;;  %v268_v33 = vadd.f32 %v267_v11, %v263_v25  ;;  %v265_v34 = vadd.f32 %v262_v16, %v257_v26 }
  0x69   : > { %561 = vrot.lane.b32.xlu0 %v555_v17, %s4779_s11  ;;  %v297_v35 = vmul.f32 %v4887_v21, %v295_v32  ;;  %v4966_v36 = vmul.f32 %v272_v30, %v4932_v60  ;;  %v303_v38 = vstv %s4927_s27  ;;  %v283_v45 = vmul.f32 %v282_v23, %v4871_v9  ;;  %s5153_s27 = sld [smem:[#allocation7 + $0x42]] }
  0x6a   : > { %v292_v37 = vadd.f32 %v289_v31, %v284_v27  ;;  %v271_v41 = vmax.f32 %v268_v33, 0.0  ;;  %v270_v42 = vadd.f32 %v267_v11, %v265_v34  ;;  %v305_v44 = vmul.f32 %v4893_v24, %v303_v38 }
  0x6b   : > { %v585_v47 = vstv %s4934_s4  ;;  %279 = vst [vmem:[#allocation2 + $0x20] sm:$0xff] %v4966_v36  ;;  %v4984_v48 = vstv %s4942_s9  ;;  %v4987_v49 = vstv %s4945_s10  ;;  %v288_v55 = vmul.f32 %v4873_v10, %v287_v28  ;;  %s5172_s4 = sld [smem:[#allocation5 + $0x19]]  ;;  %s5175_s9 = sld [smem:[#allocation5 + $0x1a]] }
  0x6c   : > { %v4992_v50 = vmul.f32 %v271_v41, %v4921_v52  ;;  %v273_v53 = vmax.f32 %v270_v42, 0.0  ;;  %v300_v54 = vadd.f32 %v297_v35, %v292_v37  ;;  %v296_v56 = vmul.f32 %v4876_v13, %v295_v32  ;;  %s5177_s10 = sld [smem:[#allocation5 + $0x1b]] }
  0x6d   : > { %v4973_v39 = vld [vmem:[#allocation2 + $0x10] sm:$0x1]  ;;  %v4975_v40 = vld [vmem:[#allocation2 + $0x11] sm:$0x1]  ;;  %563 = vrot.lane.b32.xlu0 %v556_v29, %s4779_s11  ;;  %v304_v57 = vmul.f32 %v4878_v14, %v303_v38  ;;  %v285_v58 = vmul.f32 %v282_v23, %v4861_v1  ;;  %v291_v6 = vadd.f32 %v288_v55, %v283_v45  ;;  %v290_v11 = vmul.f32 %v4863_v2, %v287_v28 }
  0x6e   : > { %v557_v46 = vmul.f32 %v554_v51, %v4973_v39  ;;  %v588_v51 = vmul.f32 %v585_v47, %v4975_v40  ;;  %278 = vst [vmem:[#allocation2 + $0x18] sm:$0xff] %v4992_v50  ;;  %v617_v62 = vmul.f32 %v4984_v48, %v4992_v50  ;;  %v276_v63 = vmul.f32 %v273_v53, %v4909_v43 }
  0x6f   : > { %v5002_v59 = vld [vmem:[#allocation2 + $0x1] sm:$0xff]  ;;  %v5004_v61 = vld [vmem:[#allocation2 + $0x9] sm:$0xff]  ;;  %v308_v0 = vadd.f32 %v305_v44, %v300_v54  ;;  %v298_v12 = vmul.f32 %v4865_v3, %v295_v32  ;;  %v299_v16 = vadd.f32 %v296_v56, %v291_v6  ;;  %v306_v17 = vmul.f32 %v4867_v5, %v303_v38 }
  0x70   : > { %565 = vrot.lane.b32.xlu1 %v557_v46, %s4779_s11  ;;  %v586_v7 = vmul.f32 %v585_v47, %v5002_v59  ;;  %v587_v8 = vmul.f32 %v585_v47, %v5004_v61  ;;  %280 = vst [vmem:[#allocation2 + $0x28] sm:$0x3] %v276_v63  ;;  %v326_v22 = vstv %s4963_s12  ;;  %v293_v23 = vadd.f32 %v290_v11, %v285_v58  ;;  %s5201_s12 = sld [smem:[#allocation7 + $0x40]] }
  0x71   : > { %v313_v15 = vadd.f32 %v4987_v49, %v308_v0  ;;  %v328_v25 = vmul.f32 %v326_v22, %v4883_v19  ;;  %v331_v26 = vstv %s4969_s13  ;;  %v339_v27 = vstv %s4971_s0  ;;  %s5225_s13 = sld [smem:[#allocation6 + $0x6]]  ;;  %s5229_s0 = sld [smem:[#allocation5 + $0x1c]] }
  0x72   : > { %594 = vrot.lane.b32.xlu0 %v587_v8, %s4779_s11  ;;  %v307_v29 = vadd.f32 %v304_v57, %v299_v16  ;;  %v333_v30 = vmul.f32 %v4885_v20, %v331_v26  ;;  %v341_v31 = vmul.f32 %v4887_v21, %v339_v27  ;;  %v618_v32 = vmul.f32 %v4984_v48, %v4966_v36 }
  0x73   : > { %v316_v28 = vmax.f32 %v313_v15, 0.0  ;;  %v301_v33 = vadd.f32 %v298_v12, %v293_v23  ;;  %v347_v34 = vstv %s4989_s1  ;;  %v647_v44 = vstv %s4997_s14  ;;  %s5235_s1 = sld [smem:[#allocation5 + $0x1d]]  ;;  %s5237_s14 = sld [smem:[#allocation5 + $0x1e]] }
  0x74   : > { %592 = vrot.lane.b32.xlu1 %v586_v7, %s4779_s11  ;;  %v312_v37 = vadd.f32 %v4987_v49, %v307_v29  ;;  %v336_v38 = vadd.f32 %v333_v30, %v328_v25  ;;  %v349_v41 = vmul.f32 %v4893_v24, %v347_v34  ;;  %v327_v46 = vmul.f32 %v326_v22, %v4871_v9 }
  0x75   : > { %v5034_v35 = vmul.f32 %v316_v28, %v4932_v60  ;;  %v5044_v42 = vld [vmem:[#allocation2 + $0x19] sm:$0xff]  ;;  %v309_v45 = vadd.f32 %v306_v17, %v301_v33  ;;  %v332_v47 = vmul.f32 %v4873_v10, %v331_v26  ;;  %v5051_v53 = vstv %s5010_s15  ;;  %s5246_s15 = sld [smem:[#allocation5 + $0x1f]] }
  0x76   : > { %623 = vrot.lane.b32.xlu0 %v617_v62, %s4779_s11  ;;  %v315_v54 = vmax.f32 %v312_v37, 0.0  ;;  %v344_v55 = vadd.f32 %v341_v31, %v336_v38  ;;  %v5054_v56 = vstv %s5012_s16  ;;  %v340_v0 = vmul.f32 %v4876_v13, %v339_v27  ;;  %s5257_s16 = sld [smem:[#allocation7 + $0x52]] }
  0x77   : > { %323 = vst [vmem:[#allocation2 + $0x38] sm:$0xff] %v5034_v35  ;;  %v5060_v57 = vld [vmem:[#allocation2 + $0x29] sm:$0x1]  ;;  %v5062_v58 = vld [vmem:[#allocation2 + $0x21] sm:$0xff]  ;;  %v314_v62 = vadd.f32 %v4987_v49, %v309_v45  ;;  %v335_v63 = vadd.f32 %v332_v47, %v327_v46  ;;  %v348_v6 = vmul.f32 %v4878_v14, %v347_v34  ;;  %v648_v7 = vmul.f32 %v647_v44, %v5044_v42 }
  0x78   : > { %596 = vrot.lane.b32.xlu1 %v588_v51, %s4779_s11  ;;  %v5058_v51 = vld [vmem:[#allocation2 + $0x28] sm:$0x1]  ;;  %v650_v11 = vmul.f32 %v647_v44, %v5060_v57  ;;  %v5072_v12 = vmul.f32 %v315_v54, %v4921_v52  ;;  %v352_v15 = vadd.f32 %v349_v41, %v344_v55  ;;  %v329_v17 = vmul.f32 %v326_v22, %v4861_v1 }
  0x79   : > { %v619_v8 = vmul.f32 %v4984_v48, %v5058_v51  ;;  %v317_v49 = vmax.f32 %v314_v62, 0.0  ;;  %v343_v16 = vadd.f32 %v340_v0, %v335_v63  ;;  %v649_v48 = vmul.f32 %v647_v44, %v5062_v58 }
  0x7a   : > { %322 = vst [vmem:[#allocation2 + $0x30] sm:$0xff] %v5072_v12  ;;  %v334_v23 = vmul.f32 %v4863_v2, %v331_v26  ;;  %v342_v25 = vmul.f32 %v4865_v3, %v339_v27  ;;  %v350_v28 = vmul.f32 %v4867_v5, %v347_v34  ;;  %v357_v30 = vadd.f32 %v5054_v56, %v352_v15 }
  0x7b   : > { %627 = vrot.lane.b32.xlu0 %v619_v8, %s4779_s11  ;;  %v320_v29 = vmul.f32 %v317_v49, %v4909_v43  ;;  %v351_v22 = vadd.f32 %v348_v6, %v343_v16  ;;  %v370_v31 = vstv %s5031_s17  ;;  %v375_v37 = vstv %s5038_s18  ;;  %s5284_s17 = sld [smem:[#allocation6 + $0x7]]  ;;  %s5297_s18 = sld [smem:[#allocation7 + $0x50]] }
  0x7c   : > { %625 = vrot.lane.b32.xlu1 %v618_v32, %s4779_s11  ;;  %v337_v32 = vadd.f32 %v334_v23, %v329_v17  ;;  %v372_v33 = vmul.f32 %v370_v31, %v4883_v19  ;;  %v383_v38 = vstv %s5040_s19  ;;  %v360_v26 = vmax.f32 %v357_v30, 0.0  ;;  %s4347_s19 = sld [smem:[#allocation7 + $0x62]] }
  0x7d   : > { %324 = vst [vmem:[#allocation2 + $0x40] sm:$0x3] %v320_v29  ;;  %v356_v27 = vadd.f32 %v5054_v56, %v351_v22  ;;  %v377_v34 = vmul.f32 %v4885_v20, %v375_v37  ;;  %v385_v41 = vmul.f32 %v4887_v21, %v383_v38  ;;  %v679_v44 = vmul.f32 %v5051_v53, %v5072_v12 }
  0x7e   : > { %v345_v45 = vadd.f32 %v342_v25, %v337_v32  ;;  %v391_v46 = vstv %s5056_s20  ;;  %v5105_v47 = vmul.f32 %v360_v26, %v4932_v60  ;;  %v371_v0 = vmul.f32 %v370_v31, %v4871_v9  ;;  %s4349_s20 = sld [smem:[#allocation7 + $0x60]] }
  0x7f   : > { %656 = vrot.lane.b32.xlu0 %v649_v48, %s4779_s11  ;;  %v359_v54 = vmax.f32 %v356_v27, 0.0  ;;  %v380_v55 = vadd.f32 %v377_v34, %v372_v33  ;;  %v393_v62 = vmul.f32 %v4893_v24, %v391_v46  ;;  %v376_v6 = vmul.f32 %v4873_v10, %v375_v37 }
  0x80   : > { %654 = vrot.lane.b32.xlu1 %v648_v7, %s4779_s11  ;;  %v353_v63 = vadd.f32 %v350_v28, %v345_v45  ;;  %v384_v7 = vmul.f32 %v4876_v13, %v383_v38  ;;  %v680_v8 = vmul.f32 %v5051_v53, %v5034_v35  ;;  %v709_v15 = vstv %s5075_s21  ;;  %367 = vst [vmem:[#allocation2 + $0x50] sm:$0xff] %v5105_v47  ;;  %s4351_s21 = sld [smem:[#allocation7 + $0x72]] }
  0x81   : > { %v5118_v49 = vld [vmem:[#allocation2 + $0x31] sm:$0xff]  ;;  %v5123_v16 = vmul.f32 %v359_v54, %v4921_v52  ;;  %v388_v17 = vadd.f32 %v385_v41, %v380_v55  ;;  %v5129_v48 = vstv %s5081_s2  ;;  %v379_v23 = vadd.f32 %v376_v6, %v371_v0  ;;  %s4353_s2 = sld [smem:[#allocation7 + $0x70]] }
  0x82   : > { %v392_v25 = vmul.f32 %v4878_v14, %v391_v46  ;;  %v399_v29 = vstv %s5089_s3  ;;  %v373_v30 = vmul.f32 %v370_v31, %v4861_v1  ;;  %v378_v22 = vmul.f32 %v4863_v2, %v375_v37  ;;  %s4355_s3 = sld [smem:[#allocation7 + $0x6]] }
  0x83   : > { %685 = vrot.lane.b32.xlu0 %v679_v44, %s4779_s11  ;;  %366 = vst [vmem:[#allocation2 + $0x48] sm:$0xff] %v5123_v16  ;;  %v396_v28 = vadd.f32 %v393_v62, %v388_v17  ;;  %v710_v32 = vmul.f32 %v709_v15, %v5118_v49  ;;  %v387_v27 = vadd.f32 %v384_v7, %v379_v23  ;;  %v419_v0 = vstv %s5108_s23  ;;  %s4359_s23 = sld [smem:[#allocation7 + $0x16]] }
  0x84   : > { %658 = vrot.lane.b32.xlu1 %v650_v11, %s4779_s11  ;;  %v358_v11 = vadd.f32 %v5054_v56, %v353_v63  ;;  %v5140_v33 = vld [vmem:[#allocation2 + $0x40] sm:$0x1]  ;;  %v386_v34 = vmul.f32 %v4865_v3, %v383_v38  ;;  %v394_v44 = vmul.f32 %v4867_v5, %v391_v46  ;;  %v5150_v45 = vld [vmem:[#allocation2 + $0x41] sm:$0x1]  ;;  %v381_v62 = vadd.f32 %v378_v22, %v373_v30 }
  0x85   : > { %7181 = vst [vmem:[#allocation12_spill] sm:$0xff] %v5140_v33  ;;  %v5142_v26 = vld [vmem:[#allocation2 + $0x39] sm:$0xff]  ;;  %v681_v31 = vmul.f32 %v5051_v53, %v5140_v33  ;;  %v401_v41 = vadd.f32 %v399_v29, %v396_v28  ;;  %7182 = vst [vmem:[#allocation13_spill] sm:$0xff] %v5150_v45  ;;  %v395_v55 = vadd.f32 %v392_v25, %v387_v27  ;;  %v414_v38 = vstv %s5102_s22  ;;  %s4357_s22 = sld [smem:[#allocation7 + $0x4]] }
  0x86   : > { %v361_v56 = vmax.f32 %v358_v11, 0.0  ;;  %v711_v37 = vmul.f32 %v709_v15, %v5142_v26  ;;  %v416_v53 = vmul.f32 %v414_v38, %v4883_v19  ;;  %v427_v6 = vstv %s5110_s24  ;;  %s4323_s24 = sld [smem:[#allocation7 + $0x3]] }
  0x87   : > { %689 = vrot.lane.b32.xlu0 %v681_v31, %s4779_s11  ;;  %v404_v63 = vmax.f32 %v401_v41, 0.0  ;;  %v400_v46 = vadd.f32 %v399_v29, %v395_v55  ;;  %v389_v7 = vadd.f32 %v386_v34, %v381_v62  ;;  %v429_v17 = vmul.f32 %v4887_v21, %v427_v6 }
  0x88   : > { %687 = vrot.lane.b32.xlu1 %v680_v8, %s4779_s11  ;;  %v364_v54 = vmul.f32 %v361_v56, %v4909_v43  ;;  %v421_v8 = vmul.f32 %v4885_v20, %v419_v0  ;;  %v712_v11 = vmul.f32 %v709_v15, %v5150_v45  ;;  %v435_v25 = vstv %s5125_s25  ;;  %s4361_s25 = sld [smem:[#allocation7 + $0x14]] }
  0x89   : > { %v5169_v23 = vmul.f32 %v404_v63, %v4932_v60  ;;  %v403_v28 = vmax.f32 %v400_v46, 0.0  ;;  %v397_v30 = vadd.f32 %v394_v44, %v389_v7  ;;  %v437_v56 = vmul.f32 %v4893_v24, %v435_v25 }
  0x8a   : > { %368 = vst [vmem:[#allocation2 + $0x58] sm:$0x3] %v364_v54  ;;  %v424_v22 = vadd.f32 %v421_v8, %v416_v53  ;;  %v741_v15 = vmul.f32 %v5129_v48, %v5123_v16  ;;  %v415_v27 = vmul.f32 %v414_v38, %v4871_v9  ;;  %v420_v34 = vmul.f32 %v4873_v10, %v419_v0  ;;  %v5186_v31 = vld [vmem:[#allocation2 + $0x49] sm:$0xff] }
  0x8b   : > { %7183 = vst [vmem:[#allocation14_spill] sm:$0xff] %v5169_v23  ;;  %718 = vrot.lane.b32.xlu0 %v711_v37, %s4779_s11  ;;  %411 = vst [vmem:[#allocation2 + $0x68] sm:$0xff] %v5169_v23  ;;  %v5189_v41 = vmul.f32 %v403_v28, %v4921_v52  ;;  %v402_v44 = vadd.f32 %v399_v29, %v397_v30  ;;  %v428_v37 = vmul.f32 %v4876_v13, %v427_v6 }
  0x8c   : > { %716 = vrot.lane.b32.xlu1 %v710_v32, %s4779_s11  ;;  %v771_v32 = vstv %s5134_s26  ;;  %v432_v54 = vadd.f32 %v429_v17, %v424_v22  ;;  %v742_v55 = vmul.f32 %v5129_v48, %v5105_v47  ;;  %v423_v62 = vadd.f32 %v420_v34, %v415_v27  ;;  %s4325_s26 = sld [smem:[#allocation7 + $0x1]] }
  0x8d   : > { %7184 = vst [vmem:[#allocation15_spill] sm:$0xff] %v5189_v41  ;;  %v436_v63 = vmul.f32 %v4878_v14, %v435_v25  ;;  %v417_v53 = vmul.f32 %v414_v38, %v4861_v1  ;;  %v5198_v46 = vstv %s5153_s27  ;;  %410 = vst [vmem:[#allocation2 + $0x60] sm:$0xff] %v5189_v41  ;;  %v405_v29 = vmax.f32 %v402_v44, 0.0  ;;  %s4363_s27 = sld [smem:[#allocation7 + $0x26]] }
  0x8e   : > { %v440_v7 = vadd.f32 %v437_v56, %v432_v54  ;;  %v422_v8 = vmul.f32 %v4863_v2, %v419_v0  ;;  %v772_v17 = vmul.f32 %v771_v32, %v5186_v31  ;;  %v443_v38 = vstv %s5160_s28  ;;  %s4326_s28 = sld [smem:[#allocation7 + $0x13]] }
  0x8f   : > { %747 = vrot.lane.b32.xlu0 %v741_v15, %s4779_s11  ;;  %v431_v30 = vadd.f32 %v428_v37, %v423_v62  ;;  %v430_v22 = vmul.f32 %v4865_v3, %v427_v6  ;;  %v408_v0 = vmul.f32 %v405_v29, %v4909_v43  ;;  %v438_v15 = vmul.f32 %v4867_v5, %v435_v25 }
  0x90   : > { %720 = vrot.lane.b32.xlu1 %v712_v11, %s4779_s11  ;;  %v458_v27 = vstv %s5164_s29  ;;  %v445_v44 = vadd.f32 %v443_v38, %v440_v7  ;;  %v425_v45 = vadd.f32 %v422_v8, %v417_v53  ;;  %v463_v6 = vstv %s5172_s4  ;;  %s4365_s29 = sld [smem:[#allocation7 + $0x24]]  ;;  %s4328_s4 = sld [smem:[#allocation7 + $0x11]] }
  0x91   : > { %v5206_v11 = vld [vmem:[#allocation2 + $0x58] sm:$0x1]  ;;  %v5218_v34 = vld [vmem:[#allocation2 + $0x59] sm:$0x1]  ;;  %v439_v54 = vadd.f32 %v436_v63, %v431_v30  ;;  %v460_v37 = vmul.f32 %v458_v27, %v4883_v19  ;;  %412 = vst [vmem:[#allocation2 + $0x70] sm:$0x3] %v408_v0  ;;  %v471_v33 = vstv %s5175_s9  ;;  %v465_v7 = vmul.f32 %v4885_v20, %v463_v6 }
  0x92   : > { %7185 = vst [vmem:[#allocation16_spill] sm:$0xff] %v5206_v11  ;;  %v5208_v28 = vld [vmem:[#allocation2 + $0x51] sm:$0xff]  ;;  %v743_v56 = vmul.f32 %v5129_v48, %v5206_v11  ;;  %7186 = vst [vmem:[#allocation17_spill] sm:$0xff] %v5218_v34  ;;  %v479_v48 = vstv %s5177_s10  ;;  %v448_v25 = vmax.f32 %v445_v44, 0.0  ;;  %v433_v29 = vadd.f32 %v430_v22, %v425_v45  ;;  %s4367_s9 = sld [smem:[#allocation7 + $0x36]]  ;;  %s5433_s10 = sld [smem:[#allocation7 + $0x23]] }
  0x93   : > { %v773_v62 = vmul.f32 %v771_v32, %v5208_v28  ;;  %v774_v63 = vmul.f32 %v771_v32, %v5218_v34  ;;  %v473_v53 = vmul.f32 %v4887_v21, %v471_v33  ;;  %v481_v8 = vmul.f32 %v4893_v24, %v479_v48 }
  0x94   : > { %749 = vrot.lane.b32.xlu1 %v742_v55, %s4779_s11  ;;  %751 = vrot.lane.b32.xlu0 %v743_v56, %s4779_s11  ;;  %v444_v55 = vadd.f32 %v443_v38, %v439_v54  ;;  %v459_v30 = vmul.f32 %v458_v27, %v4871_v9  ;;  %v5241_v45 = vmul.f32 %v448_v25, %v4932_v60  ;;  %v833_v44 = vstv %s5201_s12  ;;  %v5251_v11 = vld [vmem:[#allocation2 + $0x61] sm:$0xff]  ;;  %s4369_s12 = sld [smem:[#allocation7 + $0x34]] }
  0x95   : > { %v441_v56 = vadd.f32 %v438_v15, %v433_v29  ;;  %v468_v0 = vadd.f32 %v465_v7, %v460_v37  ;;  %v464_v32 = vmul.f32 %v4873_v10, %v463_v6  ;;  %v472_v54 = vmul.f32 %v4876_v13, %v471_v33  ;;  %7187 = vst [vmem:[#allocation18_spill] sm:$0xff] %v5251_v11 }
  0x96   : > { %v447_v22 = vmax.f32 %v444_v55, 0.0  ;;  %v803_v34 = vmul.f32 %v5198_v46, %v5189_v41  ;;  %455 = vst [vmem:[#allocation2 + $0x80] sm:$0xff] %v5241_v45  ;;  %v480_v55 = vmul.f32 %v4878_v14, %v479_v48  ;;  %v466_v29 = vmul.f32 %v4863_v2, %v463_v6 }
  0x97   : > { %v446_v15 = vadd.f32 %v443_v38, %v441_v56  ;;  %v476_v37 = vadd.f32 %v473_v53, %v468_v0  ;;  %v467_v25 = vadd.f32 %v464_v32, %v459_v30  ;;  %v804_v7 = vmul.f32 %v5198_v46, %v5169_v23 }
  0x98   : > { %778 = vrot.lane.b32.xlu1 %v772_v17, %s4779_s11  ;;  %780 = vrot.lane.b32.xlu0 %v773_v62, %s4779_s11  ;;  %v5255_v17 = vmul.f32 %v447_v22, %v4921_v52  ;;  %v461_v62 = vmul.f32 %v458_v27, %v4861_v1  ;;  %v5265_v41 = vld [vmem:[#allocation2 + $0x70] sm:$0x1]  ;;  %v474_v30 = vmul.f32 %v4865_v3, %v471_v33  ;;  %v502_v33 = vstv %s5229_s0  ;;  %s4371_s0 = sld [smem:[#allocation7 + $0x46]] }
  0x99   : > { %v449_v38 = vmax.f32 %v446_v15, 0.0  ;;  %v484_v53 = vadd.f32 %v481_v8, %v476_v37  ;;  %v834_v27 = vmul.f32 %v833_v44, %v5251_v11  ;;  %v805_v6 = vmul.f32 %v5198_v46, %v5265_v41  ;;  %v5274_v56 = vld [vmem:[#allocation2 + $0x69] sm:$0xff] }
  0x9a   : > { %454 = vst [vmem:[#allocation2 + $0x78] sm:$0xff] %v5255_v17  ;;  %v475_v22 = vadd.f32 %v472_v54, %v467_v25  ;;  %v469_v23 = vadd.f32 %v466_v29, %v461_v62  ;;  %v482_v15 = vmul.f32 %v4867_v5, %v479_v48  ;;  %v507_v37 = vstv %s5235_s1  ;;  %v5286_v62 = vld [vmem:[#allocation2 + $0x71] sm:$0x1]  ;;  %s4334_s1 = sld [smem:[#allocation7 + $0x33]] }
  0x9b   : > { %v452_v0 = vmul.f32 %v449_v38, %v4909_v43  ;;  %v515_v11 = vstv %s5237_s14  ;;  %v509_v25 = vmul.f32 %v4885_v20, %v507_v37  ;;  %v835_v48 = vmul.f32 %v833_v44, %v5274_v56  ;;  %s4373_s14 = sld [smem:[#allocation7 + $0x44]] }
  0x9c   : > { %782 = vrot.lane.b32.xlu1 %v774_v63, %s4779_s11  ;;  %v487_v63 = vstv %s5225_s13  ;;  %809 = vrot.lane.b32.xlu0 %v803_v34, %s4779_s11  ;;  %v483_v8 = vadd.f32 %v480_v55, %v475_v22  ;;  %v477_v54 = vadd.f32 %v474_v30, %v469_v23  ;;  %v504_v34 = vmul.f32 %v502_v33, %v4883_v19  ;;  %s4332_s13 = sld [smem:[#allocation7 + $0x21]] }
  0x9d   : > { %v489_v32 = vadd.f32 %v487_v63, %v484_v53  ;;  %456 = vst [vmem:[#allocation2 + $0x88] sm:$0x3] %v452_v0  ;;  %v517_v29 = vmul.f32 %v4887_v21, %v515_v11  ;;  %v523_v38 = vstv %s5246_s15  ;;  %v864_v20 = vstv %s5257_s16  ;;  %s4336_s15 = sld [smem:[#allocation7 + $0x31]]  ;;  %s4375_s16 = sld [smem:[#allocation7 + $0x56]] }
  0x9e   : > { %v488_v55 = vadd.f32 %v487_v63, %v483_v8  ;;  %v485_v23 = vadd.f32 %v482_v15, %v477_v54  ;;  %v512_v53 = vadd.f32 %v509_v25, %v504_v34  ;;  %v525_v19 = vmul.f32 %v4893_v24, %v523_v38 }
  0x9f   : > { %v492_v46 = vmax.f32 %v489_v32, 0.0  ;;  %v503_v22 = vmul.f32 %v502_v33, %v4871_v9  ;;  %v508_v0 = vmul.f32 %v4873_v10, %v507_v37  ;;  %v836_v21 = vmul.f32 %v833_v44, %v5286_v62 }
  0xa0   : > { %811 = vrot.lane.b32.xlu1 %v804_v7, %s4779_s11  ;;  %813 = vrot.lane.b32.xlu0 %v805_v6, %s4779_s11  ;;  %v491_v30 = vmax.f32 %v488_v55, 0.0  ;;  %v490_v6 = vadd.f32 %v487_v63, %v485_v23  ;;  %v520_v32 = vadd.f32 %v517_v29, %v512_v53  ;;  %v516_v8 = vmul.f32 %v4876_v13, %v515_v11 }
  0xa1   : > { %v5293_v7 = vmul.f32 %v492_v46, %v4932_v60  ;;  %v511_v24 = vadd.f32 %v508_v0, %v503_v22  ;;  %v524_v46 = vmul.f32 %v4878_v14, %v523_v38  ;;  %v865_v9 = vmul.f32 %v864_v20, %v5255_v17  ;;  %v5321_v55 = vld [vmem:[#allocation2 + $0x79] sm:$0xff] }
  0xa2   : > { %v5305_v15 = vmul.f32 %v491_v30, %v4921_v52  ;;  %v493_v10 = vmax.f32 %v490_v6, 0.0  ;;  %v505_v44 = vmul.f32 %v502_v33, %v4861_v1  ;;  %v510_v13 = vmul.f32 %v4863_v2, %v507_v37 }
  0xa3   : > { %499 = vst [vmem:[#allocation2 + $0x98] sm:$0xff] %v5293_v7  ;;  %v519_v63 = vadd.f32 %v516_v8, %v511_v24  ;;  %v518_v34 = vmul.f32 %v4865_v3, %v515_v11  ;;  %v866_v14 = vmul.f32 %v864_v20, %v5241_v45  ;;  %v526_v23 = vmul.f32 %v4867_v5, %v523_v38 }
  0xa4   : > { %840 = vrot.lane.b32.xlu1 %v834_v27, %s4779_s11  ;;  %842 = vrot.lane.b32.xlu0 %v835_v48, %s4779_s11  ;;  %v528_v27 = vadd.f32 %v525_v19, %v520_v32  ;;  %v5312_v54 = vld [vmem:[#allocation2 + $0x88] sm:$0x1]  ;;  %498 = vst [vmem:[#allocation2 + $0x90] sm:$0xff] %v5305_v15  ;;  %v496_v25 = vmul.f32 %v493_v10, %v4909_v43  ;;  %v531_v48 = vstv %s5284_s17  ;;  %v895_v3 = vstv %s5297_s18  ;;  %v5331_v22 = vld [vmem:[#allocation2 + $0x89] sm:$0x1]  ;;  %s5480_s17 = sld [smem:[#allocation7 + $0x43]] }
  0xa5   : > { %v527_v33 = vadd.f32 %v524_v46, %v519_v63  ;;  %v513_v29 = vadd.f32 %v510_v13, %v505_v44  ;;  %v867_v2 = vmul.f32 %v864_v20, %v5312_v54  ;;  %v5327_v11 = vld [vmem:[#allocation2 + $0x81] sm:$0xff]  ;;  %v896_v30 = vmul.f32 %v895_v3, %v5321_v55  ;;  %s5490_s18 = sld [smem:[#allocation7 + $0x54]] }
  0xa6   : > { %v533_v1 = vadd.f32 %v531_v48, %v528_v27  ;;  %500 = vst [vmem:[#allocation2 + $0xa0] sm:$0x3] %v496_v25  ;;  %v897_v20 = vmul.f32 %v895_v3, %v5327_v11  ;;  %v898_v24 = vmul.f32 %v895_v3, %v5331_v22  ;;  %v957_v44 = vstv %s4349_s20  ;;  %s4379_s20 = sld [smem:[#allocation7 + $0x66]] }
  0xa7   : > { %v532_v53 = vadd.f32 %v531_v48, %v527_v33  ;;  %v521_v19 = vadd.f32 %v518_v34, %v513_v29 }
  0xa8   : > { %844 = vrot.lane.b32.xlu1 %v836_v21, %s4779_s11  ;;  %871 = vrot.lane.b32.xlu0 %v865_v9, %s4779_s11  ;;  %v536_v37 = vmax.f32 %v533_v1, 0.0  ;;  %v926_v21 = vstv %s4347_s19  ;;  %s4340_s19 = sld [smem:[#allocation7 + $0x41]] }
  0xa9   : > { %v535_v5 = vmax.f32 %v532_v53, 0.0  ;;  %v529_v38 = vadd.f32 %v526_v23, %v521_v19  ;;  %v927_v8 = vmul.f32 %v926_v21, %v5305_v15 }
  0xaa   : > { %v5334_v0 = vmul.f32 %v536_v37, %v4932_v60 }
  0xab   : > { %v5340_v6 = vmul.f32 %v535_v5, %v4921_v52  ;;  %v534_v32 = vadd.f32 %v531_v48, %v529_v38  ;;  %v928_v52 = vmul.f32 %v926_v21, %v5293_v7  ;;  %v5352_v10 = vld [vmem:[#allocation2 + $0x91] sm:$0xff] }
  0xac   : > { %873 = vrot.lane.b32.xlu1 %v866_v14, %s4779_s11  ;;  %875 = vrot.lane.b32.xlu0 %v867_v2, %s4779_s11  ;;  %543 = vst [vmem:[#allocation2 + $0xb0] sm:$0xff] %v5334_v0  ;;  %v958_v13 = vmul.f32 %v957_v44, %v5352_v10  ;;  %v988_v14 = vstv %s4351_s21  ;;  %v1019_v2 = vstv %s4353_s2  ;;  %s5507_s21 = sld [smem:[#allocation7 + $0x53]]  ;;  %s5518_s2 = sld [smem:[#allocation7 + $0x64]] }
  0xad   : > { %542 = vst [vmem:[#allocation2 + $0xa8] sm:$0xff] %v5340_v6  ;;  %v537_v60 = vmax.f32 %v534_v32, 0.0  ;;  %v5347_v46 = vld [vmem:[#allocation2 + $0xa0] sm:$0x1]  ;;  %v5360_v34 = vld [vmem:[#allocation2 + $0xa1] sm:$0x1]  ;;  %v989_v48 = vmul.f32 %v988_v14, %v5340_v6  ;;  %v990_v33 = vmul.f32 %v988_v14, %v5334_v0 }
  0xae   : > { %v929_v27 = vmul.f32 %v926_v21, %v5347_v46  ;;  %v5356_v63 = vld [vmem:[#allocation2 + $0x99] sm:$0xff]  ;;  %v960_v25 = vmul.f32 %v957_v44, %v5360_v34 }
  0xaf   : > { %v540_v9 = vmul.f32 %v537_v60, %v4909_v43  ;;  %v959_v43 = vmul.f32 %v957_v44, %v5356_v63 }
  0xb0   : > { %902 = vrot.lane.b32.xlu1 %v896_v30, %s4779_s11  ;;  %904 = vrot.lane.b32.xlu0 %v897_v20, %s4779_s11  ;;  %v1060_v30 = vstv %s4355_s3  ;;  %v5388_v20 = vld [vmem:[#allocation2 + $0x10] sm:$0x1]  ;;  %s4344_s3 = sld [smem:[#allocation7 + $0x51]] }
  0xb1   : > { %544 = vst [vmem:[#allocation2 + $0xb8] sm:$0x3] %v540_v9  ;;  %v1061_v38 = vmul.f32 %v1060_v30, %v4940_v4  ;;  %v1062_v21 = vmul.f32 %v1060_v30, %v4952_v18  ;;  %v1063_v32 = vmul.f32 %v1060_v30, %v5388_v20 }
  0xb4   : > { %906 = vrot.lane.b32.xlu1 %v898_v24, %s4779_s11  ;;  %933 = vrot.lane.b32.xlu0 %v927_v8, %s4779_s11  ;;  %v5372_v29 = vld [vmem:[#allocation2 + $0xa9] sm:$0xff]  ;;  %v1091_v24 = vstv %s4357_s22  ;;  %v5396_v8 = vld [vmem:[#allocation2 + $0x11] sm:$0x1]  ;;  %s4383_s22 = sld [smem:[#allocation7 + $0x76]] }
  0xb5   : > { %v1020_v37 = vmul.f32 %v1019_v2, %v5372_v29  ;;  %v1092_v60 = vmul.f32 %v1091_v24, %v5002_v59  ;;  %v1093_v9 = vmul.f32 %v1091_v24, %v5004_v61 }
  0xb8   : > { %935 = vrot.lane.b32.xlu1 %v928_v52, %s4779_s11  ;;  %937 = vrot.lane.b32.xlu0 %v929_v27, %s4779_s11  ;;  %v5368_v1 = vld [vmem:[#allocation2 + $0xb8] sm:$0x1]  ;;  %v5380_v53 = vld [vmem:[#allocation2 + $0xb9] sm:$0x1]  ;;  %v1122_v52 = vstv %s4359_s23  ;;  %v1094_v27 = vmul.f32 %v1091_v24, %v5396_v8  ;;  %s5535_s23 = sld [smem:[#allocation7 + $0x63]] }
  0xb9   : > { %v991_v23 = vmul.f32 %v988_v14, %v5368_v1  ;;  %v5376_v3 = vld [vmem:[#allocation2 + $0xb1] sm:$0xff]  ;;  %v1022_v5 = vmul.f32 %v1019_v2, %v5380_v53  ;;  %v1123_v44 = vmul.f32 %v1122_v52, %v4992_v50  ;;  %v1124_v14 = vmul.f32 %v1122_v52, %v4966_v36 }
  0xba   : > { %v1021_v19 = vmul.f32 %v1019_v2, %v5376_v3 }
  0xbc   : > { %964 = vrot.lane.b32.xlu1 %v958_v13, %s4779_s11  ;;  %966 = vrot.lane.b32.xlu0 %v959_v43, %s4779_s11  ;;  %v5404_v13 = vld [vmem:[#allocation2 + $0x28] sm:$0x1]  ;;  %v549_v43 = vstv %s4323_s24  ;;  %s5546_s24 = sld [smem:[#allocation7 + $0x74]] }
  0xbd   : > { %v551_v30 = vmul.f32 %v549_v43, %v4952_v18 }
  0xc0   : > { %968 = vrot.lane.b32.xlu1 %v960_v25, %s4779_s11  ;;  %995 = vrot.lane.b32.xlu0 %v989_v48, %s4779_s11  ;;  %v1125_v25 = vmul.f32 %v1122_v52, %v5404_v13  ;;  %v550_v48 = vmul.f32 %v549_v43, %v4940_v4 }
  0xc4   : > { %997 = vrot.lane.b32.xlu1 %v990_v33, %s4779_s11  ;;  %999 = vrot.lane.b32.xlu0 %v991_v23, %s4779_s11  ;;  %v1153_v33 = vstv %s4361_s25  ;;  %s4348_s25 = sld [smem:[#allocation7 + $0x61]] }
  0xc5   : > { %v1154_v23 = vmul.f32 %v1153_v33, %v5044_v42 }
  0xc8   : > { %1026 = vrot.lane.b32.xlu1 %v1020_v37, %s4779_s11  ;;  %1028 = vrot.lane.b32.xlu0 %v1021_v19, %s4779_s11  ;;  %v577_v37 = vstv %s4325_s26  ;;  %v5413_v19 = vld [vmem:[#allocation2 + $0x29] sm:$0x1]  ;;  %s4388_s26 = sld [smem:[#allocation7 + $0xa]] }
  0xc9   : > { %v579_v4 = vmul.f32 %v577_v37, %v5004_v61  ;;  %v1156_v24 = vmul.f32 %v1153_v33, %v5413_v19 }
  0xcc   : > { %1030 = vrot.lane.b32.xlu1 %v1022_v5, %s4779_s11  ;;  %1067 = vrot.lane.b32.xlu0 %v1061_v38, %s4779_s11  ;;  %v1155_v5 = vmul.f32 %v1153_v33, %v5062_v58 }
  0xd0   : > { %1069 = vrot.lane.b32.xlu1 %v1062_v21, %s4779_s11  ;;  %1071 = vrot.lane.b32.xlu0 %v1063_v32, %s4779_s11  ;;  %v578_v21 = vmul.f32 %v577_v37, %v5002_v59  ;;  %v1184_v32 = vstv %s4363_s27  ;;  %s5563_s27 = sld [smem:[#allocation7 + $0x73]] }
  0xd1   : > { %v1186_v61 = vmul.f32 %v1184_v32, %v5034_v35 }
  0xd4   : > { %1098 = vrot.lane.b32.xlu1 %v1092_v60, %s4779_s11  ;;  %1100 = vrot.lane.b32.xlu0 %v1093_v9, %s4779_s11  ;;  %v552_v9 = vmul.f32 %v549_v43, %v4973_v39  ;;  %v580_v39 = vmul.f32 %v577_v37, %v4975_v40 }
  0xd8   : > { %1102 = vrot.lane.b32.xlu1 %v1094_v27, %s4779_s11  ;;  %1129 = vrot.lane.b32.xlu0 %v1123_v44, %s4779_s11  ;;  %v1185_v27 = vmul.f32 %v1184_v32, %v5072_v12  ;;  %v608_v44 = vstv %s4326_s28  ;;  %s5576_s28 = sld [smem:[#allocation7 + $0x8]] }
  0xd9   : > { %v609_v43 = vmul.f32 %v608_v44, %v4992_v50  ;;  %v5438_v50 = vld [vmem:[#allocation2 + $0x41] sm:$0x1] }
  0xdb   : > { %v562_v2 = vpop.permute.xlu0 %561 }
  0xdc   : > { %1131 = vrot.lane.b32.xlu1 %v1124_v14, %s4779_s11  ;;  %1133 = vrot.lane.b32.xlu0 %v1125_v25, %s4779_s11  ;;  %v570_v38 = vadd.f32 %v562_v2, %v550_v48  ;;  %v5425_v25 = vld [vmem:[#allocation2 + $0x40] sm:$0x1] }
  0xdd   : > { %v1187_v2 = vmul.f32 %v1184_v32, %v5425_v25 }
  0xde   : > { %v581_v59 = vadd.f32 %v578_v21, %v570_v38  ;;  %v1215_v38 = vstv %s4365_s29  ;;  %v610_v21 = vmul.f32 %v608_v44, %v4966_v36  ;;  %s5584_s29 = sld [smem:[#allocation7 + $0x71]] }
  0xdf   : > { %v564_v60 = vpop.permute.xlu0 %563 }
  0xe0   : > { %1160 = vrot.lane.b32.xlu1 %v1154_v23, %s4779_s11  ;;  %v571_v52 = vadd.f32 %v564_v60, %v551_v30  ;;  %1162 = vrot.lane.b32.xlu0 %v1155_v5, %s4779_s11 }
  0xe2   : > { %v566_v18 = vpop.permute.xlu1 %565  ;;  %v582_v14 = vadd.f32 %v579_v4, %v571_v52  ;;  %v1216_v4 = vmul.f32 %v1215_v38, %v5118_v49  ;;  %v639_v52 = vstv %s4328_s4  ;;  %s5592_s4 = sld [smem:[#allocation7 + $0x1a]] }
  0xe3   : > { %v572_v48 = vadd.f32 %v566_v18, %v552_v9  ;;  %v1217_v9 = vmul.f32 %v1215_v38, %v5142_v26 }
  0xe4   : > { %1164 = vrot.lane.b32.xlu1 %v1156_v24, %s4779_s11  ;;  %1191 = vrot.lane.b32.xlu0 %v1185_v27, %s4779_s11  ;;  %v595_v23 = vpop.permute.xlu0 %594  ;;  %v611_v24 = vmul.f32 %v608_v44, %v5058_v51  ;;  %v1246_v27 = vstv %s4367_s9  ;;  %v640_v51 = vmul.f32 %v639_v52, %v5044_v42  ;;  %s1038_s9 = sld [smem:[#allocation8]] }
  0xe5   : > { %v602_v5 = vadd.f32 %v595_v23, %v582_v14  ;;  %v583_v40 = vadd.f32 %v580_v39, %v572_v48  ;;  %v1247_v39 = vmul.f32 %v1246_v27, %v5123_v16  ;;  %v1248_v42 = vmul.f32 %v1246_v27, %v5105_v47 }
  0xe6   : > { %v593_v33 = vpop.permute.xlu1 %592 }
  0xe7   : > { %v601_v30 = vadd.f32 %v593_v33, %v581_v59  ;;  %v613_v36 = vadd.f32 %v610_v21, %v602_v5  ;;  %v1218_v59 = vmul.f32 %v1215_v38, %v5438_v50  ;;  %v670_v33 = vstv %s5433_s10  ;;  %s5613_s10 = sld [smem:[#allocation7 + $0x7]] }
  0xe8   : > { %1193 = vrot.lane.b32.xlu1 %v1186_v61, %s4779_s11  ;;  %1195 = vrot.lane.b32.xlu0 %v1187_v2, %s4779_s11  ;;  %v624_v32 = vpop.permute.xlu0 %623  ;;  %v641_v61 = vmul.f32 %v639_v52, %v5062_v58  ;;  %v671_v21 = vmul.f32 %v670_v33, %v5072_v12  ;;  %v5461_v12 = vld [vmem:[#allocation2 + $0x59] sm:$0x1] }
  0xe9   : > { %v612_v37 = vadd.f32 %v609_v43, %v601_v30  ;;  %v642_v43 = vmul.f32 %v639_v52, %v5060_v57  ;;  %v5451_v30 = vld [vmem:[#allocation2 + $0x58] sm:$0x1] }
  0xea   : > { %v597_v60 = vpop.permute.xlu1 %596  ;;  %v1249_v57 = vmul.f32 %v1246_v27, %v5451_v30 }
  0xeb   : > { %v603_v18 = vadd.f32 %v597_v60, %v583_v40  ;;  %v632_v14 = vadd.f32 %v624_v32, %v612_v37  ;;  %v1277_v60 = vstv %s4369_s12  ;;  %s5618_s12 = sld [smem:[#allocation7 + $0x18]] }
  0xec   : > { %1222 = vrot.lane.b32.xlu1 %v1216_v4, %s4779_s11  ;;  %1224 = vrot.lane.b32.xlu0 %v1217_v9, %s4779_s11  ;;  %v1278_v32 = vmul.f32 %v1277_v60, %v5186_v31  ;;  %v701_v9 = vstv %s4332_s13  ;;  %v1279_v27 = vmul.f32 %v1277_v60, %v5208_v28  ;;  %s5620_s13 = sld [smem:[#allocation7 + $0x5]] }
  0xed   : > { %v614_v44 = vadd.f32 %v611_v24, %v603_v18  ;;  %v628_v2 = vpop.permute.xlu0 %627  ;;  %v643_v38 = vadd.f32 %v640_v51, %v632_v14  ;;  %v672_v18 = vmul.f32 %v670_v33, %v5034_v35  ;;  %v702_v35 = vmul.f32 %v701_v9, %v5118_v49 }
  0xee   : > { %v626_v48 = vpop.permute.xlu1 %625 }
  0xef   : > { %v633_v23 = vadd.f32 %v626_v48, %v613_v36  ;;  %v634_v5 = vadd.f32 %v628_v2, %v614_v44  ;;  %v1308_v48 = vstv %s4371_s0  ;;  %s5633_s0 = sld [smem:[#allocation7 + $0x2a]] }
  0xf0   : > { %1226 = vrot.lane.b32.xlu1 %v1218_v59, %s4779_s11  ;;  %1253 = vrot.lane.b32.xlu0 %v1247_v39, %s4779_s11  ;;  %v7188_v59 = vld [vmem:[#allocation12_spill] sm:$0xff]  ;;  %v1280_v39 = vmul.f32 %v1277_v60, %v5461_v12 }
  0xf1   : > { %v644_v58 = vadd.f32 %v641_v61, %v633_v23  ;;  %v645_v40 = vadd.f32 %v642_v43, %v634_v5  ;;  %v657_v24 = vpop.permute.xlu0 %656  ;;  %v673_v14 = vmul.f32 %v670_v33, %v7188_v59  ;;  %v703_v33 = vmul.f32 %v701_v9, %v5142_v26 }
  0xf2   : > { %v655_v4 = vpop.permute.xlu1 %654 }
  0xf3   : > { %v663_v37 = vadd.f32 %v655_v4, %v643_v38  ;;  %v664_v52 = vadd.f32 %v657_v24, %v644_v58  ;;  %v732_v58 = vstv %s4334_s1  ;;  %v7190_v4 = vld [vmem:[#allocation13_spill] sm:$0xff]  ;;  %s5642_s1 = sld [smem:[#allocation7 + $0x17]] }
  0xf4   : > { %1255 = vrot.lane.b32.xlu1 %v1248_v42, %s4779_s11  ;;  %1257 = vrot.lane.b32.xlu0 %v1249_v57, %s4779_s11  ;;  %v7189_v42 = vld [vmem:[#allocation15_spill] sm:$0xff]  ;;  %v5473_v57 = vld [vmem:[#allocation2 + $0x70] sm:$0x1] }
  0xf5   : > { %v674_v36 = vadd.f32 %v671_v21, %v663_v37  ;;  %v686_v61 = vpop.permute.xlu0 %685  ;;  %v675_v43 = vadd.f32 %v672_v18, %v664_v52  ;;  %v1309_v38 = vmul.f32 %v1308_v48, %v7189_v42  ;;  %v7191_v37 = vld [vmem:[#allocation14_spill] sm:$0xff]  ;;  %v733_v52 = vmul.f32 %v732_v58, %v5123_v16 }
  0xf6   : > { %v659_v51 = vpop.permute.xlu1 %658  ;;  %v1310_v24 = vmul.f32 %v1308_v48, %v7191_v37  ;;  %v5485_v16 = vld [vmem:[#allocation2 + $0x71] sm:$0x1] }
  0xf7   : > { %v665_v44 = vadd.f32 %v659_v51, %v645_v40  ;;  %v694_v23 = vadd.f32 %v686_v61, %v674_v36  ;;  %v704_v40 = vmul.f32 %v701_v9, %v7190_v4  ;;  %v1311_v36 = vmul.f32 %v1308_v48, %v5473_v57 }
  0xf8   : > { %1284 = vrot.lane.b32.xlu1 %v1278_v32, %s4779_s11  ;;  %1286 = vrot.lane.b32.xlu0 %v1279_v27, %s4779_s11  ;;  %v7192_v27 = vld [vmem:[#allocation18_spill] sm:$0xff]  ;;  %v734_v61 = vmul.f32 %v732_v58, %v5105_v47 }
  0xf9   : > { %v676_v2 = vadd.f32 %v673_v14, %v665_v44  ;;  %v690_v49 = vpop.permute.xlu0 %689  ;;  %v705_v60 = vadd.f32 %v702_v35, %v694_v23  ;;  %v1339_v14 = vstv %s4373_s14  ;;  %v7193_v23 = vld [vmem:[#allocation16_spill] sm:$0xff]  ;;  %s5657_s14 = sld [smem:[#allocation7 + $0x28]] }
  0xfa   : > { %v688_v5 = vpop.permute.xlu1 %687  ;;  %v1340_v44 = vmul.f32 %v1339_v14, %v7192_v27 }
  0xfb   : > { %v695_v21 = vadd.f32 %v688_v5, %v675_v43  ;;  %v696_v26 = vadd.f32 %v690_v49, %v676_v2  ;;  %v763_v43 = vstv %s4336_s15  ;;  %v735_v2 = vmul.f32 %v732_v58, %v7193_v23  ;;  %s5668_s15 = sld [smem:[#allocation7 + $0x15]] }
  0xfc   : > { %1288 = vrot.lane.b32.xlu1 %v1280_v39, %s4779_s11  ;;  %1315 = vrot.lane.b32.xlu0 %v1309_v38, %s4779_s11  ;;  %v1370_v38 = vstv %s4375_s16  ;;  %v764_v4 = vmul.f32 %v763_v43, %v5186_v31  ;;  %v1401_v23 = vstv %s5490_s18  ;;  %s5674_s16 = sld [smem:[#allocation7 + $0x3a]]  ;;  %s5699_s18 = sld [smem:[#allocation7 + $0x38]] }
  0xfd   : > { %v706_v32 = vadd.f32 %v703_v33, %v695_v21  ;;  %v707_v59 = vadd.f32 %v704_v40, %v696_v26  ;;  %v719_v51 = vpop.permute.xlu0 %718  ;;  %v1341_v33 = vmul.f32 %v1339_v14, %v5274_v56  ;;  %v1342_v21 = vmul.f32 %v1339_v14, %v5485_v16 }
  0xfe   : > { %v717_v18 = vpop.permute.xlu1 %716  ;;  %v1371_v26 = vmul.f32 %v1370_v38, %v5255_v17 }
  0xff   : > { %v725_v9 = vadd.f32 %v717_v18, %v705_v60  ;;  %v726_v39 = vadd.f32 %v719_v51, %v706_v32  ;;  %v794_v32 = vstv %s5480_s17  ;;  %v7194_v18 = vld [vmem:[#allocation17_spill] sm:$0xff]  ;;  %s5683_s17 = sld [smem:[#allocation7 + $0x27]] }
 0x100   : > { %1317 = vrot.lane.b32.xlu1 %v1310_v24, %s4779_s11  ;;  %1319 = vrot.lane.b32.xlu0 %v1311_v36, %s4779_s11  ;;  %v765_v24 = vmul.f32 %v763_v43, %v5208_v28  ;;  %v766_v36 = vmul.f32 %v763_v43, %v7194_v18 }
 0x101   : > { %v736_v35 = vadd.f32 %v733_v52, %v725_v9  ;;  %v748_v47 = vpop.permute.xlu0 %747  ;;  %v737_v40 = vadd.f32 %v734_v61, %v726_v39  ;;  %v5500_v9 = vld [vmem:[#allocation2 + $0x88] sm:$0x1] }
 0x102   : > { %v721_v48 = vpop.permute.xlu1 %720  ;;  %v1373_v39 = vmul.f32 %v1370_v38, %v5500_v9 }
 0x103   : > { %v727_v5 = vadd.f32 %v721_v48, %v707_v59  ;;  %v756_v49 = vadd.f32 %v748_v47, %v736_v35  ;;  %v1372_v59 = vmul.f32 %v1370_v38, %v5241_v45  ;;  %v1402_v48 = vmul.f32 %v1401_v23, %v5321_v55 }
 0x104   : > { %1346 = vrot.lane.b32.xlu1 %v1340_v44, %s4779_s11  ;;  %1348 = vrot.lane.b32.xlu0 %v1341_v33, %s4779_s11  ;;  %v795_v44 = vmul.f32 %v794_v32, %v7189_v42  ;;  %v796_v33 = vmul.f32 %v794_v32, %v7191_v37  ;;  %v5513_v42 = vld [vmem:[#allocation2 + $0x89] sm:$0x1] }
 0x105   : > { %v738_v58 = vadd.f32 %v735_v2, %v727_v5  ;;  %v767_v28 = vadd.f32 %v764_v4, %v756_v49  ;;  %v797_v4 = vmul.f32 %v794_v32, %v5265_v41 }
 0x106   : > { %v750_v60 = vpop.permute.xlu1 %749  ;;  %v752_v31 = vpop.permute.xlu0 %751 }
 0x107   : > { %v757_v52 = vadd.f32 %v750_v60, %v737_v40  ;;  %v758_v14 = vadd.f32 %v752_v31, %v738_v58  ;;  %v1403_v40 = vmul.f32 %v1401_v23, %v5327_v11  ;;  %v1432_v58 = vstv %s4379_s20  ;;  %s5713_s20 = sld [smem:[#allocation7 + $0x4a]] }
 0x108   : > { %1350 = vrot.lane.b32.xlu1 %v1342_v21, %s4779_s11  ;;  %1377 = vrot.lane.b32.xlu0 %v1371_v26, %s4779_s11  ;;  %v825_v21 = vstv %s4340_s19  ;;  %v856_v31 = vstv %s5507_s21  ;;  %s5705_s19 = sld [smem:[#allocation7 + $0x25]]  ;;  %s5721_s21 = sld [smem:[#allocation7 + $0x37]] }
 0x109   : > { %v768_v51 = vadd.f32 %v765_v24, %v757_v52  ;;  %v769_v43 = vadd.f32 %v766_v36, %v758_v14  ;;  %v1404_v24 = vmul.f32 %v1401_v23, %v5513_v42  ;;  %v826_v60 = vmul.f32 %v825_v21, %v7192_v27  ;;  %v5528_v14 = vld [vmem:[#allocation2 + $0xa0] sm:$0x1] }
 0x10a   : > { %v779_v61 = vpop.permute.xlu1 %778  ;;  %v781_v2 = vpop.permute.xlu0 %780  ;;  %v827_v32 = vmul.f32 %v825_v21, %v5274_v56  ;;  %v1433_v36 = vmul.f32 %v1432_v58, %v5305_v15 }
 0x10b   : > { %v787_v35 = vadd.f32 %v779_v61, %v767_v28  ;;  %v788_v5 = vadd.f32 %v781_v2, %v768_v51  ;;  %v828_v28 = vmul.f32 %v825_v21, %v5286_v62  ;;  %v1434_v51 = vmul.f32 %v1432_v58, %v5293_v7 }
 0x10c   : > { %1379 = vrot.lane.b32.xlu1 %v1372_v59, %s4779_s11  ;;  %1381 = vrot.lane.b32.xlu0 %v1373_v39, %s4779_s11  ;;  %v857_v39 = vmul.f32 %v856_v31, %v5255_v17  ;;  %v1463_v2 = vstv %s5518_s2  ;;  %v5541_v17 = vld [vmem:[#allocation2 + $0xa1] sm:$0x1]  ;;  %s5737_s2 = sld [smem:[#allocation7 + $0x48]] }
 0x10d   : > { %v798_v47 = vadd.f32 %v795_v44, %v787_v35  ;;  %v799_v26 = vadd.f32 %v796_v33, %v788_v5  ;;  %v1464_v33 = vmul.f32 %v1463_v2, %v5352_v10  ;;  %v858_v5 = vmul.f32 %v856_v31, %v5241_v45 }
 0x10e   : > { %v783_v38 = vpop.permute.xlu1 %782  ;;  %v810_v37 = vpop.permute.xlu0 %809 }
 0x10f   : > { %v789_v49 = vadd.f32 %v783_v38, %v769_v43  ;;  %v818_v52 = vadd.f32 %v810_v37, %v798_v47  ;;  %v1435_v43 = vmul.f32 %v1432_v58, %v5528_v14  ;;  %v859_v38 = vmul.f32 %v856_v31, %v5312_v54 }
 0x110   : > { %1408 = vrot.lane.b32.xlu1 %v1402_v48, %s4779_s11  ;;  %1410 = vrot.lane.b32.xlu0 %v1403_v40, %s4779_s11  ;;  %v1494_v37 = vstv %s4383_s22  ;;  %s5751_s22 = sld [smem:[#allocation7 + $0x5a]] }
 0x111   : > { %v800_v41 = vadd.f32 %v797_v4, %v789_v49  ;;  %v829_v56 = vadd.f32 %v826_v60, %v818_v52  ;;  %v887_v4 = vstv %s4344_s3  ;;  %v1465_v49 = vmul.f32 %v1463_v2, %v5356_v63  ;;  %s5743_s3 = sld [smem:[#allocation7 + $0x35]] }
 0x112   : > { %v812_v18 = vpop.permute.xlu1 %811  ;;  %v814_v27 = vpop.permute.xlu0 %813  ;;  %v888_v60 = vmul.f32 %v887_v4, %v5321_v55 }
 0x113   : > { %v819_v59 = vadd.f32 %v812_v18, %v799_v26  ;;  %v820_v44 = vadd.f32 %v814_v27, %v800_v41  ;;  %v889_v41 = vmul.f32 %v887_v4, %v5327_v11  ;;  %v1495_v18 = vmul.f32 %v1494_v37, %v5340_v6 }
 0x114   : > { %1412 = vrot.lane.b32.xlu1 %v1404_v24, %s4779_s11  ;;  %1439 = vrot.lane.b32.xlu0 %v1433_v36, %s4779_s11  ;;  %v1466_v24 = vmul.f32 %v1463_v2, %v5541_v17  ;;  %v918_v36 = vstv %s5535_s23  ;;  %v1496_v27 = vmul.f32 %v1494_v37, %v5334_v0  ;;  %s5759_s23 = sld [smem:[#allocation7 + $0x47]] }
 0x115   : > { %v830_v61 = vadd.f32 %v827_v32, %v819_v59  ;;  %v831_v23 = vadd.f32 %v828_v28, %v820_v44  ;;  %v890_v59 = vmul.f32 %v887_v4, %v5331_v22  ;;  %v5556_v28 = vld [vmem:[#allocation2 + $0xb8] sm:$0x1]  ;;  %v919_v44 = vmul.f32 %v918_v36, %v5305_v15  ;;  %v5569_v15 = vld [vmem:[#allocation2 + $0xb9] sm:$0x1] }
 0x116   : > { %v841_v35 = vpop.permute.xlu1 %840  ;;  %v843_v48 = vpop.permute.xlu0 %842  ;;  %v920_v2 = vmul.f32 %v918_v36, %v5293_v7 }
 0x117   : > { %v849_v62 = vadd.f32 %v841_v35, %v829_v56  ;;  %v850_v47 = vadd.f32 %v843_v48, %v830_v61 }
 0x118   : > { %1441 = vrot.lane.b32.xlu1 %v1434_v51, %s4779_s11  ;;  %1443 = vrot.lane.b32.xlu0 %v1435_v43, %s4779_s11  ;;  %v1525_v43 = vstv %s5546_s24  ;;  %s5775_s24 = sld [smem:[#allocation7 + $0x58]] }
 0x119   : > { %v860_v21 = vadd.f32 %v857_v39, %v849_v62  ;;  %v861_v26 = vadd.f32 %v858_v5, %v850_v47  ;;  %v1497_v39 = vmul.f32 %v1494_v37, %v5556_v28  ;;  %v949_v5 = vstv %s4348_s25  ;;  %s5781_s25 = sld [smem:[#allocation7 + $0x45]] }
 0x11a   : > { %v845_v40 = vpop.permute.xlu1 %844  ;;  %v872_v45 = vpop.permute.xlu0 %871  ;;  %v921_v47 = vmul.f32 %v918_v36, %v5347_v46  ;;  %v1527_v4 = vmul.f32 %v1525_v43, %v5376_v3  ;;  %v950_v37 = vmul.f32 %v949_v5, %v5352_v10  ;;  %v5590_v10 = vld [vmem:[#allocation2 + $0x10] sm:$0x1] }
 0x11b   : > { %v851_v58 = vadd.f32 %v845_v40, %v831_v23  ;;  %v880_v52 = vadd.f32 %v872_v45, %v860_v21  ;;  %v1526_v23 = vmul.f32 %v1525_v43, %v5372_v29  ;;  %v1565_v40 = vstv %s4388_s26  ;;  %s5789_s26 = sld [smem:[#allocation7 + $0x6a]] }
 0x11c   : > { %1470 = vrot.lane.b32.xlu1 %v1464_v33, %s4779_s11  ;;  %1472 = vrot.lane.b32.xlu0 %v1465_v49, %s4779_s11  ;;  %v5574_v49 = vld [vmem:[#allocation2] sm:$0xff] }
 0x11d   : > { %v862_v54 = vadd.f32 %v859_v38, %v851_v58  ;;  %v891_v11 = vadd.f32 %v888_v60, %v880_v52  ;;  %v1528_v58 = vmul.f32 %v1525_v43, %v5569_v15  ;;  %v5581_v60 = vld [vmem:[#allocation2 + $0x8] sm:$0xff] }
 0x11e   : > { %v874_v32 = vpop.permute.xlu1 %873  ;;  %v876_v55 = vpop.permute.xlu0 %875 }
 0x11f   : > { %v881_v31 = vadd.f32 %v874_v32, %v861_v26  ;;  %v882_v51 = vadd.f32 %v876_v55, %v862_v54  ;;  %v951_v26 = vmul.f32 %v949_v5, %v5356_v63  ;;  %v1566_v54 = vmul.f32 %v1565_v40, %v5574_v49 }
 0x120   : > { %1474 = vrot.lane.b32.xlu1 %v1466_v24, %s4779_s11  ;;  %1501 = vrot.lane.b32.xlu0 %v1495_v18, %s4779_s11  ;;  %v952_v18 = vmul.f32 %v949_v5, %v5360_v34  ;;  %v1567_v63 = vmul.f32 %v1565_v40, %v5581_v60  ;;  %v1568_v34 = vmul.f32 %v1565_v40, %v5590_v10 }
 0x121   : > { %v892_v56 = vadd.f32 %v889_v41, %v881_v31  ;;  %v893_v35 = vadd.f32 %v890_v59, %v882_v51  ;;  %v980_v41 = vstv %s5563_s27  ;;  %s5797_s27 = sld [smem:[#allocation7 + $0x57]] }
 0x122   : > { %v903_v61 = vpop.permute.xlu1 %902  ;;  %v905_v62 = vpop.permute.xlu0 %904  ;;  %v982_v43 = vmul.f32 %v980_v41, %v5334_v0 }
 0x123   : > { %v911_v22 = vadd.f32 %v903_v61, %v891_v11  ;;  %v912_v48 = vadd.f32 %v905_v62, %v892_v56  ;;  %v981_v11 = vmul.f32 %v980_v41, %v5340_v6  ;;  %v1596_v61 = vstv %s5576_s28  ;;  %s5813_s28 = sld [smem:[#allocation7 + $0x68]] }
 0x124   : > { %1503 = vrot.lane.b32.xlu1 %v1496_v27, %s4779_s11  ;;  %1505 = vrot.lane.b32.xlu0 %v1497_v39, %s4779_s11  ;;  %v5596_v27 = vld [vmem:[#allocation2 + $0x1] sm:$0xff]  ;;  %v5602_v39 = vld [vmem:[#allocation2 + $0x9] sm:$0xff] }
 0x125   : > { %v922_v33 = vadd.f32 %v919_v44, %v911_v22  ;;  %v923_v46 = vadd.f32 %v920_v2, %v912_v48  ;;  %v1011_v2 = vstv %s5584_s29  ;;  %v983_v48 = vmul.f32 %v980_v41, %v5368_v1  ;;  %s5819_s29 = sld [smem:[#allocation7 + $0x55]] }
 0x126   : > { %v907_v21 = vpop.permute.xlu1 %906  ;;  %v934_v7 = vpop.permute.xlu0 %933  ;;  %v1598_v5 = vmul.f32 %v1596_v61, %v5602_v39 }
 0x127   : > { %v913_v38 = vadd.f32 %v907_v21, %v893_v35  ;;  %v942_v45 = vadd.f32 %v934_v7, %v922_v33  ;;  %v1597_v35 = vmul.f32 %v1596_v61, %v5596_v27  ;;  %v1627_v21 = vstv %s5592_s4  ;;  %s5827_s4 = sld [smem:[#allocation7 + $0x7a]] }
 0x128   : > { %1532 = vrot.lane.b32.xlu1 %v1526_v23, %s4779_s11  ;;  %1534 = vrot.lane.b32.xlu0 %v1527_v4, %s4779_s11  ;;  %v5607_v23 = vld [vmem:[#allocation2 + $0x11] sm:$0x1]  ;;  %v5616_v4 = vld [vmem:[#allocation2 + $0x18] sm:$0xff] }
 0x129   : > { %v924_v24 = vadd.f32 %v921_v47, %v913_v38  ;;  %v953_v31 = vadd.f32 %v950_v37, %v942_v45  ;;  %v1599_v1 = vmul.f32 %v1596_v61, %v5607_v23  ;;  %v1012_v38 = vmul.f32 %v1011_v2, %v5372_v29  ;;  %v5625_v37 = vld [vmem:[#allocation2 + $0x20] sm:$0xff] }
 0x12a   : > { %v936_v52 = vpop.permute.xlu1 %935  ;;  %v938_v36 = vpop.permute.xlu0 %937 }
 0x12b   : > { %v943_v32 = vadd.f32 %v936_v52, %v923_v46  ;;  %v944_v59 = vadd.f32 %v938_v36, %v924_v24  ;;  %v1013_v46 = vmul.f32 %v1011_v2, %v5376_v3  ;;  %v1628_v24 = vmul.f32 %v1627_v21, %v5616_v4  ;;  %v5637_v36 = vld [vmem:[#allocation2 + $0x19] sm:$0xff] }
 0x12c   : > { %1536 = vrot.lane.b32.xlu1 %v1528_v58, %s4779_s11  ;;  %1572 = vrot.lane.b32.xlu0 %v1566_v54, %s4779_s11  ;;  %v1014_v52 = vmul.f32 %v1011_v2, %v5380_v53  ;;  %v5631_v54 = vld [vmem:[#allocation2 + $0x28] sm:$0x1]  ;;  %v1629_v3 = vmul.f32 %v1627_v21, %v5625_v37 }
 0x12d   : > { %v954_v55 = vadd.f32 %v951_v26, %v943_v32  ;;  %v955_v44 = vadd.f32 %v952_v18, %v944_v59  ;;  %v1630_v53 = vmul.f32 %v1627_v21, %v5631_v54  ;;  %v1055_v59 = vstv %s5613_s10  ;;  %s5851_s10 = sld [smem:[#allocation7 + $0x78]] }
 0x12e   : > { %v965_v51 = vpop.permute.xlu1 %964  ;;  %v967_v22 = vpop.permute.xlu0 %966 }
 0x12f   : > { %v973_v56 = vadd.f32 %v965_v51, %v953_v31  ;;  %v974_v62 = vadd.f32 %v967_v22, %v954_v55  ;;  %v1658_v51 = vstv %s5618_s12  ;;  %s5855_s12 = sld [smem:[#allocation7 + $0x65]] }
 0x130   : > { %1574 = vrot.lane.b32.xlu1 %v1567_v63, %s4779_s11  ;;  %1576 = vrot.lane.b32.xlu0 %v1568_v34, %s4779_s11  ;;  %v1039_v63 = vstv %s1038_s9  ;;  %v5645_v34 = vld [vmem:[#allocation2 + $0x21] sm:$0xff]  ;;  %v1659_v61 = vmul.f32 %v1658_v51, %v5637_v36  ;;  %s5835_s9 = sld [smem:[#allocation7 + $0x67]] }
 0x131   : > { %v984_v6 = vadd.f32 %v981_v11, %v973_v56  ;;  %v985_v40 = vadd.f32 %v982_v43, %v974_v62  ;;  %v1083_v56 = vstv %s5620_s13  ;;  %v4620_v43 = vld [vmem:[#allocation2] sm:$0xff]  ;;  %s5864_s13 = sld [smem:[#allocation7 + $0xe]] }
 0x132   : > { %v969_v33 = vpop.permute.xlu1 %968  ;;  %v996_v0 = vpop.permute.xlu0 %995  ;;  %v1056_v62 = vmul.f32 %v4620_v43, %v1055_v59 }
 0x133   : > { %v975_v47 = vadd.f32 %v969_v33, %v955_v44  ;;  %v1004_v7 = vadd.f32 %v996_v0, %v984_v6  ;;  %v5650_v6 = vld [vmem:[#allocation2 + $0x29] sm:$0x1] }
 0x134   : > { %1603 = vrot.lane.b32.xlu1 %v1597_v35, %s4779_s11  ;;  %1605 = vrot.lane.b32.xlu0 %v1598_v5, %s4779_s11  ;;  %v1660_v5 = vmul.f32 %v1658_v51, %v5645_v34 }
 0x135   : > { %v986_v58 = vadd.f32 %v983_v48, %v975_v47  ;;  %v1015_v41 = vadd.f32 %v1012_v38, %v1004_v7  ;;  %v4621_v48 = vld [vmem:[#allocation2 + $0x8] sm:$0xff]  ;;  %v5655_v7 = vld [vmem:[#allocation2 + $0x30] sm:$0xff] }
 0x136   : > { %v998_v45 = vpop.permute.xlu1 %997  ;;  %v1000_v29 = vpop.permute.xlu0 %999  ;;  %v1057_v33 = vmul.f32 %v4621_v48, %v1055_v59  ;;  %v4622_v47 = vld [vmem:[#allocation2 + $0x1] sm:$0xff]  ;;  %v1720_v48 = vstv %s5657_s14  ;;  %s5891_s14 = sld [smem:[#allocation7 + $0x75]] }
 0x137   : > { %v1005_v26 = vadd.f32 %v998_v45, %v985_v40  ;;  %v1006_v32 = vadd.f32 %v1000_v29, %v986_v58  ;;  %v1084_v21 = vmul.f32 %v4622_v47, %v1083_v56  ;;  %v1689_v40 = vstv %s5633_s0  ;;  %v5663_v29 = vld [vmem:[#allocation2 + $0x38] sm:$0xff]  ;;  %s5873_s0 = sld [smem:[#allocation7 + $0x77]] }
 0x138   : > { %1607 = vrot.lane.b32.xlu1 %v1599_v1, %s4779_s11  ;;  %1634 = vrot.lane.b32.xlu0 %v1628_v24, %s4779_s11  ;;  %v1058_v45 = vmul.f32 %v1055_v59, %v5388_v20  ;;  %v1086_v59 = vmul.f32 %v1083_v56, %v5396_v8 }
 0x139   : > { %v1016_v18 = vadd.f32 %v1013_v46, %v1005_v26  ;;  %v1017_v11 = vadd.f32 %v1014_v52, %v1006_v32  ;;  %v1661_v46 = vmul.f32 %v1658_v51, %v5650_v6  ;;  %v1691_v51 = vmul.f32 %v1689_v40, %v5663_v29 }
 0x13a   : > { %v1027_v31 = vpop.permute.xlu1 %1026  ;;  %v1029_v44 = vpop.permute.xlu0 %1028 }
 0x13b   : > { %v1035_v55 = vadd.f32 %v1027_v31, %v1015_v41  ;;  %v1036_v35 = vadd.f32 %v1029_v44, %v1016_v18  ;;  %v1690_v18 = vmul.f32 %v1689_v40, %v5655_v7  ;;  %v1114_v31 = vstv %s5642_s1  ;;  %s5887_s1 = sld [smem:[#allocation7 + $0xc]] }
 0x13c   : > { %1636 = vrot.lane.b32.xlu1 %v1629_v3, %s4779_s11  ;;  %1638 = vrot.lane.b32.xlu0 %v1630_v53, %s4779_s11  ;;  %v4623_v3 = vld [vmem:[#allocation2 + $0x9] sm:$0xff] }
 0x13d   : > { %v1040_v22 = vadd.f32 %v1039_v63, %v1035_v55  ;;  %v1041_v38 = vadd.f32 %v1039_v63, %v1036_v35  ;;  %v1085_v41 = vmul.f32 %v4623_v3, %v1083_v56  ;;  %v5672_v55 = vld [vmem:[#allocation2 + $0x40] sm:$0x1]  ;;  %v4624_v35 = vld [vmem:[#allocation2 + $0x18] sm:$0xff] }
 0x13e   : > { %v1031_v2 = vpop.permute.xlu1 %1030  ;;  %v1068_v58 = vpop.permute.xlu0 %1067  ;;  %v1115_v43 = vmul.f32 %v4624_v35, %v1114_v31  ;;  %v1692_v8 = vmul.f32 %v1689_v40, %v5672_v55 }
 0x13f   : > { %v1043_v0 = vmax.f32 %v1040_v22, 0.0  ;;  %v1037_v1 = vadd.f32 %v1031_v2, %v1017_v11  ;;  %v1044_v26 = vmax.f32 %v1041_v38, 0.0  ;;  %v1076_v52 = vadd.f32 %v1068_v58, %v1056_v62  ;;  %v5679_v22 = vld [vmem:[#allocation2 + $0x31] sm:$0xff]  ;;  %v5690_v58 = vld [vmem:[#allocation2 + $0x41] sm:$0x1] }
 0x140   : > { %1665 = vrot.lane.b32.xlu1 %v1659_v61, %s4779_s11  ;;  %1667 = vrot.lane.b32.xlu0 %v1660_v5, %s4779_s11  ;;  %v1721_v47 = vmul.f32 %v1720_v48, %v5679_v22 }
 0x141   : > { %1047 = vst.msk [vmem:[#allocation3] sm:$0xff] %vm1046_vm0, %v1043_v0  ;;  %v1042_v24 = vadd.f32 %v1039_v63, %v1037_v1  ;;  %1048 = vst.msk [vmem:[#allocation3 + $0x8] sm:$0xff] %vm1046_vm0, %v1044_v26  ;;  %v1087_v63 = vadd.f32 %v1084_v21, %v1076_v52  ;;  %v4625_v0 = vld [vmem:[#allocation2 + $0x20] sm:$0xff]  ;;  %v1751_v26 = vstv %s5674_s16  ;;  %v5697_v52 = vld [vmem:[#allocation2 + $0x48] sm:$0xff]  ;;  %s4386_s16 = sld [smem:[#allocation8 + $0x1]] }
 0x142   : > { %v1070_v32 = vpop.permute.xlu1 %1069  ;;  %v1072_v11 = vpop.permute.xlu0 %1071  ;;  %v1116_v1 = vmul.f32 %v4625_v0, %v1114_v31 }
 0x143   : > { %v1045_v53 = vmax.f32 %v1042_v24, 0.0  ;;  %v1077_v20 = vadd.f32 %v1070_v32, %v1057_v33  ;;  %v1078_v44 = vadd.f32 %v1072_v11, %v1058_v45  ;;  %v5686_v33 = vld [vmem:[#allocation2 + $0x39] sm:$0xff]  ;;  %v1145_v45 = vstv %s5668_s15  ;;  %v4627_v11 = vld [vmem:[#allocation2 + $0x21] sm:$0xff]  ;;  %s5898_s15 = sld [smem:[#allocation7 + $0x1e]] }
 0x144   : > { %1669 = vrot.lane.b32.xlu1 %v1661_v46, %s4779_s11  ;;  %1696 = vrot.lane.b32.xlu0 %v1690_v18, %s4779_s11  ;;  %v1722_v46 = vmul.f32 %v1720_v48, %v5686_v33  ;;  %v1117_v24 = vmul.f32 %v1114_v31, %v5404_v13  ;;  %v1723_v32 = vmul.f32 %v1720_v48, %v5690_v58 }
 0x145   : > { %1050 = vst.msk [vmem:[#allocation3 + $0x10] sm:$0x1] %vm1049_vm1, %v1045_v53  ;;  %v1088_v61 = vadd.f32 %v1085_v41, %v1077_v20  ;;  %v1089_v2 = vadd.f32 %v1086_v59, %v1078_v44  ;;  %v4626_v20 = vld [vmem:[#allocation2 + $0x19] sm:$0xff]  ;;  %v5703_v59 = vld [vmem:[#allocation2 + $0x50] sm:$0xff]  ;;  %v1147_v13 = vmul.f32 %v4627_v11, %v1145_v45  ;;  %v1752_v44 = vmul.f32 %v1751_v26, %v5697_v52 }
 0x146   : > { %v1099_v62 = vpop.permute.xlu1 %1098  ;;  %v1101_v5 = vpop.permute.xlu0 %1100 }
 0x147   : > { %v1107_v56 = vadd.f32 %v1099_v62, %v1087_v63  ;;  %v1108_v21 = vadd.f32 %v1101_v5, %v1088_v61  ;;  %v1146_v63 = vmul.f32 %v4626_v20, %v1145_v45  ;;  %v1176_v61 = vstv %s5683_s17  ;;  %v5711_v62 = vld [vmem:[#allocation2 + $0x58] sm:$0x1]  ;;  %v5728_v20 = vld [vmem:[#allocation2 + $0x59] sm:$0x1]  ;;  %s5914_s17 = sld [smem:[#allocation7 + $0xb]] }
 0x148   : > { %1698 = vrot.lane.b32.xlu1 %v1691_v51, %s4779_s11  ;;  %1700 = vrot.lane.b32.xlu0 %v1692_v8, %s4779_s11 }
 0x149   : > { %v1118_v38 = vadd.f32 %v1115_v43, %v1107_v56  ;;  %v1119_v18 = vadd.f32 %v1116_v1, %v1108_v21  ;;  %v1148_v43 = vmul.f32 %v1145_v45, %v5413_v19  ;;  %v1753_v56 = vmul.f32 %v1751_v26, %v5703_v59  ;;  %v4628_v21 = vld [vmem:[#allocation2 + $0x30] sm:$0xff] }
 0x14a   : > { %v1103_v40 = vpop.permute.xlu1 %1102  ;;  %v1130_v41 = vpop.permute.xlu0 %1129  ;;  %v1177_v0 = vmul.f32 %v4628_v21, %v1176_v61  ;;  %v1754_v19 = vmul.f32 %v1751_v26, %v5711_v62  ;;  %v5724_v45 = vld [vmem:[#allocation2 + $0x51] sm:$0xff]  ;;  %v1207_v26 = vstv %s5705_s19  ;;  %s4389_s19 = sld [smem:[#allocation7 + $0x9]] }
 0x14b   : > { %v1109_v3 = vadd.f32 %v1103_v40, %v1089_v2  ;;  %v1138_v53 = vadd.f32 %v1130_v41, %v1118_v38  ;;  %v4629_v41 = vld [vmem:[#allocation2 + $0x38] sm:$0xff] }
 0x14c   : > { %1727 = vrot.lane.b32.xlu1 %v1721_v47, %s4779_s11  ;;  %1729 = vrot.lane.b32.xlu0 %v1722_v46, %s4779_s11  ;;  %v5717_v47 = vld [vmem:[#allocation2 + $0x49] sm:$0xff]  ;;  %v1782_v46 = vstv %s5699_s18  ;;  %s5917_s18 = sld [smem:[#allocation7 + $0x1c]] }
 0x14d   : > { %v1120_v51 = vadd.f32 %v1117_v24, %v1109_v3  ;;  %v1149_v2 = vadd.f32 %v1146_v63, %v1138_v53  ;;  %v1783_v3 = vmul.f32 %v1782_v46, %v5717_v47  ;;  %v1179_v63 = vmul.f32 %v1176_v61, %v5425_v25 }
 0x14e   : > { %v1132_v31 = vpop.permute.xlu1 %1131  ;;  %v1134_v8 = vpop.permute.xlu0 %1133 }
 0x14f   : > { %v1139_v35 = vadd.f32 %v1132_v31, %v1119_v18  ;;  %v1140_v48 = vadd.f32 %v1134_v8, %v1120_v51  ;;  %v1813_v51 = vstv %s5713_s20  ;;  %v4630_v8 = vld [vmem:[#allocation2 + $0x31] sm:$0xff]  ;;  %s5923_s20 = sld [smem:[#allocation7 + $0x2e]] }
 0x150   : > { %1731 = vrot.lane.b32.xlu1 %v1723_v32, %s4779_s11  ;;  %1758 = vrot.lane.b32.xlu0 %v1752_v44, %s4779_s11  ;;  %v1178_v32 = vmul.f32 %v4629_v41, %v1176_v61  ;;  %v5735_v44 = vld [vmem:[#allocation2 + $0x60] sm:$0xff] }
 0x151   : > { %v1150_v5 = vadd.f32 %v1147_v13, %v1139_v35  ;;  %v1151_v40 = vadd.f32 %v1148_v43, %v1140_v48  ;;  %v1784_v13 = vmul.f32 %v1782_v46, %v5724_v45  ;;  %v1785_v43 = vmul.f32 %v1782_v46, %v5728_v20  ;;  %v5741_v48 = vld [vmem:[#allocation2 + $0x68] sm:$0xff]  ;;  %v5749_v46 = vld [vmem:[#allocation2 + $0x70] sm:$0x1] }
 0x152   : > { %v1161_v1 = vpop.permute.xlu1 %1160  ;;  %v1163_v24 = vpop.permute.xlu0 %1162 }
 0x153   : > { %v1169_v38 = vadd.f32 %v1161_v1, %v1149_v2  ;;  %v1170_v18 = vadd.f32 %v1163_v24, %v1150_v5  ;;  %v4631_v5 = vld [vmem:[#allocation2 + $0x39] sm:$0xff]  ;;  %v1814_v1 = vmul.f32 %v1813_v51, %v5735_v44 }
 0x154   : > { %1760 = vrot.lane.b32.xlu1 %v1753_v56, %s4779_s11  ;;  %1762 = vrot.lane.b32.xlu0 %v1754_v19, %s4779_s11  ;;  %v1208_v56 = vmul.f32 %v4630_v8, %v1207_v26  ;;  %v1209_v21 = vmul.f32 %v4631_v5, %v1207_v26  ;;  %v1238_v19 = vstv %s5721_s21  ;;  %s5933_s21 = sld [smem:[#allocation7 + $0x1b]] }
 0x155   : > { %v1180_v53 = vadd.f32 %v1177_v0, %v1169_v38  ;;  %v1181_v25 = vadd.f32 %v1178_v32, %v1170_v18 }
 0x156   : > { %v1165_v11 = vpop.permute.xlu1 %1164  ;;  %v1192_v35 = vpop.permute.xlu0 %1191 }
 0x157   : > { %v1171_v31 = vadd.f32 %v1165_v11, %v1151_v40  ;;  %v1200_v61 = vadd.f32 %v1192_v35, %v1180_v53  ;;  %v1210_v40 = vmul.f32 %v1207_v26, %v5438_v50  ;;  %v5755_v53 = vld [vmem:[#allocation2 + $0x61] sm:$0xff]  ;;  %v1816_v50 = vmul.f32 %v1813_v51, %v5749_v46 }
 0x158   : > { %1789 = vrot.lane.b32.xlu1 %v1783_v3, %s4779_s11  ;;  %1791 = vrot.lane.b32.xlu0 %v1784_v13, %s4779_s11  ;;  %v1815_v3 = vmul.f32 %v1813_v51, %v5741_v48  ;;  %v1844_v35 = vstv %s5737_s2  ;;  %v1269_v51 = vstv %s5743_s3  ;;  %s5946_s2 = sld [smem:[#allocation7 + $0x2c]]  ;;  %s5953_s3 = sld [smem:[#allocation7 + $0x19]] }
 0x159   : > { %v1182_v2 = vadd.f32 %v1179_v63, %v1171_v31  ;;  %v1211_v41 = vadd.f32 %v1208_v56, %v1200_v61  ;;  %v4632_v63 = vld [vmem:[#allocation2 + $0x48] sm:$0xff]  ;;  %v1845_v56 = vmul.f32 %v1844_v35, %v5755_v53 }
 0x15a   : > { %v1194_v0 = vpop.permute.xlu1 %1193  ;;  %v1196_v24 = vpop.permute.xlu0 %1195  ;;  %v1239_v11 = vmul.f32 %v4632_v63, %v1238_v19 }
 0x15b   : > { %v1201_v38 = vadd.f32 %v1194_v0, %v1181_v25  ;;  %v1202_v32 = vadd.f32 %v1196_v24, %v1182_v2  ;;  %v4633_v25 = vld [vmem:[#allocation2 + $0x50] sm:$0xff]  ;;  %v1241_v0 = vmul.f32 %v1238_v19, %v5451_v30  ;;  %v1875_v24 = vstv %s5751_s22  ;;  %s4433_s22 = sld [smem:[#allocation7 + $0x3e]] }
 0x15c   : > { %1793 = vrot.lane.b32.xlu1 %v1785_v43, %s4779_s11  ;;  %1820 = vrot.lane.b32.xlu0 %v1814_v1, %s4779_s11  ;;  %v5762_v43 = vld [vmem:[#allocation2 + $0x69] sm:$0xff]  ;;  %v1240_v61 = vmul.f32 %v4633_v25, %v1238_v19 }
 0x15d   : > { %v1212_v18 = vadd.f32 %v1209_v21, %v1201_v38  ;;  %v1213_v31 = vadd.f32 %v1210_v40, %v1202_v32  ;;  %v5766_v21 = vld [vmem:[#allocation2 + $0x71] sm:$0x1]  ;;  %v1846_v38 = vmul.f32 %v1844_v35, %v5762_v43 }
 0x15e   : > { %v1223_v13 = vpop.permute.xlu1 %1222  ;;  %v1225_v8 = vpop.permute.xlu0 %1224  ;;  %7195 = vst [vmem:[#allocation12_spill] sm:$0xff] %v5766_v21  ;;  %v1847_v32 = vmul.f32 %v1844_v35, %v5766_v21  ;;  %v1272_v35 = vmul.f32 %v1269_v51, %v5461_v12 }
 0x15f   : > { %v1231_v26 = vadd.f32 %v1223_v13, %v1211_v41  ;;  %v1232_v2 = vadd.f32 %v1225_v8, %v1212_v18  ;;  %v4634_v18 = vld [vmem:[#allocation2 + $0x49] sm:$0xff]  ;;  %v5779_v13 = vld [vmem:[#allocation2 + $0x80] sm:$0xff] }
 0x160   : > { %1822 = vrot.lane.b32.xlu1 %v1815_v3, %s4779_s11  ;;  %1824 = vrot.lane.b32.xlu0 %v1816_v50, %s4779_s11  ;;  %v5773_v3 = vld [vmem:[#allocation2 + $0x78] sm:$0xff]  ;;  %v1270_v63 = vmul.f32 %v4634_v18, %v1269_v51 }
 0x161   : > { %v1242_v5 = vadd.f32 %v1239_v11, %v1231_v26  ;;  %v1243_v30 = vadd.f32 %v1240_v61, %v1232_v2  ;;  %v4635_v50 = vld [vmem:[#allocation2 + $0x51] sm:$0xff]  ;;  %v1876_v8 = vmul.f32 %v1875_v24, %v5773_v3  ;;  %v1877_v2 = vmul.f32 %v1875_v24, %v5779_v13 }
 0x162   : > { %v1227_v1 = vpop.permute.xlu1 %1226  ;;  %v1254_v41 = vpop.permute.xlu0 %1253  ;;  %v1271_v26 = vmul.f32 %v4635_v50, %v1269_v51  ;;  %v1906_v50 = vstv %s5775_s24  ;;  %s4435_s24 = sld [smem:[#allocation7 + $0x3c]] }
 0x163   : > { %v1233_v40 = vadd.f32 %v1227_v1, %v1213_v31  ;;  %v1262_v19 = vadd.f32 %v1254_v41, %v1242_v5  ;;  %v5787_v1 = vld [vmem:[#allocation2 + $0x88] sm:$0x1]  ;;  %v4636_v41 = vld [vmem:[#allocation2 + $0x60] sm:$0xff] }
 0x164   : > { %1851 = vrot.lane.b32.xlu1 %v1845_v56, %s4779_s11  ;;  %1853 = vrot.lane.b32.xlu0 %v1846_v38, %s4779_s11  ;;  %v1300_v56 = vstv %s5759_s23  ;;  %7196 = vst [vmem:[#allocation15_spill] sm:$0xff] %v5787_v1  ;;  %v5793_v38 = vld [vmem:[#allocation2 + $0x79] sm:$0xff]  ;;  %v1878_v12 = vmul.f32 %v1875_v24, %v5787_v1  ;;  %v1331_v24 = vstv %s5781_s25  ;;  %v4639_v1 = vld [vmem:[#allocation2 + $0x69] sm:$0xff]  ;;  %s5968_s23 = sld [smem:[#allocation7 + $0x2b]]  ;;  %s4397_s25 = sld [smem:[#allocation7 + $0x29]] }
 0x165   : > { %v1244_v11 = vadd.f32 %v1241_v0, %v1233_v40  ;;  %v1273_v5 = vadd.f32 %v1270_v63, %v1262_v19  ;;  %v1301_v18 = vmul.f32 %v4636_v41, %v1300_v56  ;;  %v1907_v19 = vmul.f32 %v1906_v50, %v5793_v38 }
 0x166   : > { %v1256_v31 = vpop.permute.xlu1 %1255  ;;  %v1258_v61 = vpop.permute.xlu0 %1257  ;;  %v1303_v41 = vmul.f32 %v1300_v56, %v5473_v57 }
 0x167   : > { %v1263_v25 = vadd.f32 %v1256_v31, %v1243_v30  ;;  %v1264_v0 = vadd.f32 %v1258_v61, %v1244_v11  ;;  %v5800_v31 = vld [vmem:[#allocation2 + $0x81] sm:$0xff] }
 0x168   : > { %1855 = vrot.lane.b32.xlu1 %v1847_v32, %s4779_s11  ;;  %1882 = vrot.lane.b32.xlu0 %v1876_v8, %s4779_s11  ;;  %7197 = vst [vmem:[#allocation13_spill] sm:$0xff] %v5800_v31  ;;  %v4637_v11 = vld [vmem:[#allocation2 + $0x68] sm:$0xff] }
 0x169   : > { %v1274_v40 = vadd.f32 %v1271_v26, %v1263_v25  ;;  %v1275_v32 = vadd.f32 %v1272_v35, %v1264_v0  ;;  %v1302_v26 = vmul.f32 %v4637_v11, %v1300_v56  ;;  %v5804_v8 = vld [vmem:[#allocation2 + $0x89] sm:$0x1]  ;;  %v1908_v35 = vmul.f32 %v1906_v50, %v5800_v31 }
 0x16a   : > { %v1285_v30 = vpop.permute.xlu1 %1284  ;;  %v1287_v63 = vpop.permute.xlu0 %1286  ;;  %7198 = vst [vmem:[#allocation14_spill] sm:$0xff] %v5804_v8 }
 0x16b   : > { %v1293_v51 = vadd.f32 %v1285_v30, %v1273_v5  ;;  %v1294_v25 = vadd.f32 %v1287_v63, %v1274_v40  ;;  %v1937_v30 = vstv %s5789_s26  ;;  %s4437_s26 = sld [smem:[#allocation7 + $0x4e]] }
 0x16c   : > { %1884 = vrot.lane.b32.xlu1 %v1877_v2, %s4779_s11  ;;  %1886 = vrot.lane.b32.xlu0 %v1878_v12, %s4779_s11  ;;  %v5811_v2 = vld [vmem:[#allocation2 + $0x90] sm:$0xff]  ;;  %v5817_v12 = vld [vmem:[#allocation2 + $0x98] sm:$0xff] }
 0x16d   : > { %v1304_v61 = vadd.f32 %v1301_v18, %v1293_v51  ;;  %v1909_v18 = vmul.f32 %v1906_v50, %v5804_v8  ;;  %v4638_v51 = vld [vmem:[#allocation2 + $0x61] sm:$0xff]  ;;  %v1305_v57 = vadd.f32 %v1302_v26, %v1294_v25  ;;  %7199 = vst [vmem:[#allocation18_spill] sm:$0xff] %v5817_v12  ;;  %v1938_v21 = vmul.f32 %v1937_v30, %v5811_v2  ;;  %v5825_v8 = vld [vmem:[#allocation2 + $0xa0] sm:$0x1] }
 0x16e   : > { %v1289_v5 = vpop.permute.xlu1 %1288  ;;  %v1316_v40 = vpop.permute.xlu0 %1315  ;;  %v1332_v63 = vmul.f32 %v4638_v51, %v1331_v24  ;;  %v1334_v50 = vmul.f32 %v1331_v24, %v5485_v16  ;;  %7200 = vst [vmem:[#allocation16_spill] sm:$0xff] %v5825_v8  ;;  %v1940_v16 = vmul.f32 %v1937_v30, %v5825_v8 }
 0x16f   : > { %v1295_v0 = vadd.f32 %v1289_v5, %v1275_v32  ;;  %v1324_v56 = vadd.f32 %v1316_v40, %v1304_v61  ;;  %v1333_v32 = vmul.f32 %v4639_v1, %v1331_v24  ;;  %v1939_v1 = vmul.f32 %v1937_v30, %v5817_v12  ;;  %v5862_v12 = vld [vmem:[#allocation2 + $0xb8] sm:$0x1] }
 0x170   : > { %1913 = vrot.lane.b32.xlu1 %v1907_v19, %s4779_s11  ;;  %1915 = vrot.lane.b32.xlu0 %v1908_v35, %s4779_s11  ;;  %v1362_v19 = vstv %s5797_s27  ;;  %v5831_v35 = vld [vmem:[#allocation2 + $0x91] sm:$0xff]  ;;  %v1393_v30 = vstv %s5819_s29  ;;  %7204 = vst [vmem:[#allocation21_spill] sm:$0xff] %v5862_v12  ;;  %s5995_s27 = sld [smem:[#allocation7 + $0x3b]]  ;;  %s4401_s29 = sld [smem:[#allocation7 + $0x39]] }
 0x171   : > { %v1306_v11 = vadd.f32 %v1303_v41, %v1295_v0  ;;  %v1335_v25 = vadd.f32 %v1332_v63, %v1324_v56  ;;  %7201 = vst [vmem:[#allocation17_spill] sm:$0xff] %v5831_v35  ;;  %v4640_v0 = vld [vmem:[#allocation2 + $0x78] sm:$0xff]  ;;  %v4641_v56 = vld [vmem:[#allocation2 + $0x80] sm:$0xff] }
 0x172   : > { %v1318_v5 = vpop.permute.xlu1 %1317  ;;  %v1320_v26 = vpop.permute.xlu0 %1319  ;;  %v1363_v40 = vmul.f32 %v4640_v0, %v1362_v19  ;;  %v1365_v0 = vmul.f32 %v1362_v19, %v5500_v9 }
 0x173   : > { %v1325_v31 = vadd.f32 %v1318_v5, %v1305_v57  ;;  %v1326_v61 = vadd.f32 %v1320_v26, %v1306_v11  ;;  %v1968_v57 = vstv %s5813_s28  ;;  %v5838_v5 = vld [vmem:[#allocation2 + $0x99] sm:$0xff]  ;;  %v1364_v11 = vmul.f32 %v4641_v56, %v1362_v19  ;;  %v5857_v56 = vld [vmem:[#allocation2 + $0xb0] sm:$0xff]  ;;  %s4439_s28 = sld [smem:[#allocation7 + $0x4c]] }
 0x174   : > { %1917 = vrot.lane.b32.xlu1 %v1909_v18, %s4779_s11  ;;  %1944 = vrot.lane.b32.xlu0 %v1938_v21, %s4779_s11  ;;  %7202 = vst [vmem:[#allocation19_spill] sm:$0xff] %v5838_v5  ;;  %v1969_v63 = vmul.f32 %v1968_v57, %v5831_v35  ;;  %v5842_v21 = vld [vmem:[#allocation2 + $0xa1] sm:$0x1] }
 0x175   : > { %v1336_v41 = vadd.f32 %v1333_v32, %v1325_v31  ;;  %v1337_v18 = vadd.f32 %v1334_v50, %v1326_v61  ;;  %7203 = vst [vmem:[#allocation20_spill] sm:$0xff] %v5842_v21  ;;  %v1970_v50 = vmul.f32 %v1968_v57, %v5838_v5 }
 0x176   : > { %v1347_v51 = vpop.permute.xlu1 %1346  ;;  %v1349_v31 = vpop.permute.xlu0 %1348 }
 0x177   : > { %v1355_v24 = vadd.f32 %v1347_v51, %v1335_v25  ;;  %v1356_v32 = vadd.f32 %v1349_v31, %v1336_v41  ;;  %v1999_v51 = vstv %s5827_s4  ;;  %s4441_s4 = sld [smem:[#allocation7 + $0x5e]] }
 0x178   : > { %1946 = vrot.lane.b32.xlu1 %v1939_v1, %s4779_s11  ;;  %1948 = vrot.lane.b32.xlu0 %v1940_v16, %s4779_s11  ;;  %v5849_v1 = vld [vmem:[#allocation2 + $0xa8] sm:$0xff] }
 0x179   : > { %v1366_v26 = vadd.f32 %v1363_v40, %v1355_v24  ;;  %v1971_v40 = vmul.f32 %v1968_v57, %v5842_v21  ;;  %v4642_v24 = vld [vmem:[#allocation2 + $0x79] sm:$0xff]  ;;  %v1367_v9 = vadd.f32 %v1364_v11, %v1356_v32  ;;  %v2000_v5 = vmul.f32 %v1999_v51, %v5849_v1  ;;  %v5876_v21 = vld [vmem:[#allocation2 + $0xb1] sm:$0xff] }
 0x17a   : > { %v1351_v25 = vpop.permute.xlu1 %1350  ;;  %v1378_v41 = vpop.permute.xlu0 %1377  ;;  %v1394_v31 = vmul.f32 %v4642_v24, %v1393_v30  ;;  %v2001_v11 = vmul.f32 %v1999_v51, %v5857_v56  ;;  %v1396_v32 = vmul.f32 %v1393_v30, %v5513_v42 }
 0x17b   : > { %v1357_v61 = vadd.f32 %v1351_v25, %v1337_v18  ;;  %v1386_v19 = vadd.f32 %v1378_v41, %v1366_v26  ;;  %v4643_v18 = vld [vmem:[#allocation2 + $0x81] sm:$0xff]  ;;  %v4644_v41 = vld [vmem:[#allocation2 + $0x90] sm:$0xff] }
 0x17c   : > { %1975 = vrot.lane.b32.xlu1 %v1969_v63, %s4779_s11  ;;  %v1395_v25 = vmul.f32 %v4643_v18, %v1393_v30  ;;  %1977 = vrot.lane.b32.xlu0 %v1970_v50, %s4779_s11  ;;  %v1424_v63 = vstv %s5835_s9  ;;  %v5869_v50 = vld [vmem:[#allocation2 + $0xa9] sm:$0xff]  ;;  %v2030_v18 = vstv %s5851_s10  ;;  %v4645_v30 = vld [vmem:[#allocation2 + $0x98] sm:$0xff]  ;;  %s6020_s9 = sld [smem:[#allocation7 + $0x4b]]  ;;  %s4443_s10 = sld [smem:[#allocation7 + $0x5c]] }
 0x17d   : > { %v1368_v16 = vadd.f32 %v1365_v0, %v1357_v61  ;;  %v1397_v26 = vadd.f32 %v1394_v31, %v1386_v19  ;;  %v1426_v31 = vmul.f32 %v4645_v30, %v1424_v63  ;;  %v1455_v19 = vstv %s5855_s12  ;;  %s4405_s12 = sld [smem:[#allocation7 + $0x49]] }
 0x17e   : > { %v1380_v8 = vpop.permute.xlu1 %1379  ;;  %v1382_v57 = vpop.permute.xlu0 %1381 }
 0x17f   : > { %v1387_v35 = vadd.f32 %v1380_v8, %v1367_v9  ;;  %v1388_v0 = vadd.f32 %v1382_v57, %v1368_v16  ;;  %v1425_v8 = vmul.f32 %v4644_v41, %v1424_v63  ;;  %v2002_v9 = vmul.f32 %v1999_v51, %v5862_v12  ;;  %v5881_v57 = vld [vmem:[#allocation2 + $0xb9] sm:$0x1] }
 0x180   : > { %1979 = vrot.lane.b32.xlu1 %v1971_v40, %s4779_s11  ;;  %2006 = vrot.lane.b32.xlu0 %v2000_v5, %s4779_s11  ;;  %7205 = vst [vmem:[#allocation22_spill] sm:$0xff] %v5881_v57  ;;  %v1427_v51 = vmul.f32 %v1424_v63, %v5528_v14  ;;  %v2032_v41 = vmul.f32 %v2030_v18, %v5876_v21 }
 0x181   : > { %v1398_v61 = vadd.f32 %v1395_v25, %v1387_v35  ;;  %v2031_v35 = vmul.f32 %v2030_v18, %v5869_v50  ;;  %v1399_v16 = vadd.f32 %v1396_v32, %v1388_v0  ;;  %v2033_v32 = vmul.f32 %v2030_v18, %v5881_v57  ;;  %v4646_v0 = vld [vmem:[#allocation2 + $0x91] sm:$0xff] }
 0x182   : > { %v1409_v24 = vpop.permute.xlu1 %1408  ;;  %v1411_v42 = vpop.permute.xlu0 %1410 }
 0x183   : > { %v1417_v40 = vadd.f32 %v1409_v24, %v1397_v26  ;;  %v1418_v25 = vadd.f32 %v1411_v42, %v1398_v61  ;;  %v1456_v61 = vmul.f32 %v4646_v0, %v1455_v19 }
 0x184   : > { %2008 = vrot.lane.b32.xlu1 %v2001_v11, %s4779_s11  ;;  %2010 = vrot.lane.b32.xlu0 %v2002_v9, %s4779_s11  ;;  %v2070_v11 = vstv %s5864_s13  ;;  %v4647_v9 = vld [vmem:[#allocation2 + $0x99] sm:$0xff]  ;;  %s4445_s13 = sld [smem:[#allocation7 + $0x6e]] }
 0x185   : > { %v1428_v5 = vadd.f32 %v1425_v8, %v1417_v40  ;;  %v1429_v14 = vadd.f32 %v1426_v31, %v1418_v25  ;;  %v1457_v40 = vmul.f32 %v4647_v9, %v1455_v19  ;;  %v2072_v31 = vmul.f32 %v2070_v11, %v5581_v60 }
 0x186   : > { %v1413_v26 = vpop.permute.xlu1 %1412  ;;  %v1440_v30 = vpop.permute.xlu0 %1439  ;;  %v1458_v25 = vmul.f32 %v1455_v19, %v5541_v17  ;;  %v4649_v17 = vld [vmem:[#allocation2 + $0xb0] sm:$0xff] }
 0x187   : > { %v1419_v24 = vadd.f32 %v1413_v26, %v1399_v16  ;;  %v1448_v63 = vadd.f32 %v1440_v30, %v1428_v5  ;;  %v2071_v16 = vmul.f32 %v2070_v11, %v5574_v49  ;;  %v1486_v26 = vstv %s5873_s0  ;;  %s6045_s0 = sld [smem:[#allocation7 + $0x5b]] }
 0x188   : > { %2037 = vrot.lane.b32.xlu1 %v2031_v35, %s4779_s11  ;;  %2039 = vrot.lane.b32.xlu0 %v2032_v41, %s4779_s11  ;;  %v5896_v35 = vld [vmem:[#allocation2 + $0x10] sm:$0x1]  ;;  %v1488_v19 = vmul.f32 %v4649_v17, %v1486_v26  ;;  %v5925_v17 = vld [vmem:[#allocation2 + $0x28] sm:$0x1] }
 0x189   : > { %v1430_v8 = vadd.f32 %v1427_v51, %v1419_v24  ;;  %v1459_v5 = vadd.f32 %v1456_v61, %v1448_v63  ;;  %v4648_v24 = vld [vmem:[#allocation2 + $0xa8] sm:$0xff]  ;;  %v1517_v61 = vstv %s5891_s14  ;;  %s4409_s14 = sld [smem:[#allocation7 + $0x59]] }
 0x18a   : > { %v1442_v42 = vpop.permute.xlu1 %1441  ;;  %v1444_v18 = vpop.permute.xlu0 %1443  ;;  %v1487_v30 = vmul.f32 %v4648_v24, %v1486_v26 }
 0x18b   : > { %v1449_v12 = vadd.f32 %v1442_v42, %v1429_v14  ;;  %v1450_v51 = vadd.f32 %v1444_v18, %v1430_v8  ;;  %v2073_v14 = vmul.f32 %v2070_v11, %v5896_v35  ;;  %v2101_v42 = vstv %s5887_s1  ;;  %s4447_s1 = sld [smem:[#allocation7 + $0x6c]] }
 0x18c   : > { %2041 = vrot.lane.b32.xlu1 %v2033_v32, %s4779_s11  ;;  %2077 = vrot.lane.b32.xlu0 %v2071_v16, %s4779_s11  ;;  %v2102_v57 = vmul.f32 %v2101_v42, %v5596_v27  ;;  %v1489_v16 = vmul.f32 %v1486_v26, %v5556_v28  ;;  %v2103_v11 = vmul.f32 %v2101_v42, %v5602_v39 }
 0x18d   : > { %v1460_v41 = vadd.f32 %v1457_v40, %v1449_v12  ;;  %v1461_v63 = vadd.f32 %v1458_v25, %v1450_v51  ;;  %v5909_v40 = vld [vmem:[#allocation2 + $0x11] sm:$0x1] }
 0x18e   : > { %v1471_v0 = vpop.permute.xlu1 %1470  ;;  %v1473_v32 = vpop.permute.xlu0 %1472  ;;  %v2104_v51 = vmul.f32 %v2101_v42, %v5909_v40 }
 0x18f   : > { %v1479_v9 = vadd.f32 %v1471_v0, %v1459_v5  ;;  %v1480_v12 = vadd.f32 %v1473_v32, %v1460_v41  ;;  %v2132_v5 = vstv %s5898_s15  ;;  %v4650_v41 = vld [vmem:[#allocation2 + $0xa9] sm:$0xff]  ;;  %v4651_v0 = vld [vmem:[#allocation2 + $0xb1] sm:$0xff]  ;;  %s4449_s15 = sld [smem:[#allocation7 + $0x7e]] }
 0x190   : > { %2079 = vrot.lane.b32.xlu1 %v2072_v31, %s4779_s11  ;;  %2081 = vrot.lane.b32.xlu0 %v2073_v14, %s4779_s11  ;;  %v1518_v24 = vmul.f32 %v4650_v41, %v1517_v61  ;;  %v1519_v14 = vmul.f32 %v4651_v0, %v1517_v61  ;;  %v2133_v32 = vmul.f32 %v2132_v5, %v5616_v4 }
 0x191   : > { %v1490_v8 = vadd.f32 %v1487_v30, %v1479_v9  ;;  %v1491_v28 = vadd.f32 %v1488_v19, %v1480_v12  ;;  %v2134_v19 = vmul.f32 %v2132_v5, %v5625_v37 }
 0x192   : > { %v1475_v18 = vpop.permute.xlu1 %1474  ;;  %v1502_v25 = vpop.permute.xlu0 %1501 }
 0x193   : > { %v1481_v31 = vadd.f32 %v1475_v18, %v1461_v63  ;;  %v1510_v26 = vadd.f32 %v1502_v25, %v1490_v8  ;;  %v1520_v8 = vmul.f32 %v1517_v61, %v5569_v15  ;;  %v1545_v18 = vstv %s4386_s16  ;;  %s6070_s16 = sld [smem:[#allocation7 + $0x6b]] }
 0x194   : > { %2108 = vrot.lane.b32.xlu1 %v2102_v57, %s4779_s11  ;;  %2110 = vrot.lane.b32.xlu0 %v2103_v11, %s4779_s11  ;;  %v1560_v25 = vstv %s5914_s17  ;;  %s4451_s17 = sld [smem:[#allocation7 + $0x7c]] }
 0x195   : > { %v1492_v30 = vadd.f32 %v1489_v16, %v1481_v31  ;;  %v1521_v63 = vadd.f32 %v1518_v24, %v1510_v26  ;;  %v2135_v31 = vmul.f32 %v2132_v5, %v5925_v17  ;;  %v1588_v26 = vstv %s4389_s19  ;;  %s6092_s19 = sld [smem:[#allocation9 + $0x1]] }
 0x196   : > { %v1504_v9 = vpop.permute.xlu1 %1503  ;;  %v1506_v42 = vpop.permute.xlu0 %1505  ;;  %v1561_v0 = vmul.f32 %v1560_v25, %v5574_v49 }
 0x197   : > { %v1511_v57 = vadd.f32 %v1504_v9, %v1491_v28  ;;  %v1512_v12 = vadd.f32 %v1506_v42, %v1492_v30  ;;  %v1562_v9 = vmul.f32 %v1560_v25, %v5581_v60 }
 0x198   : > { %2112 = vrot.lane.b32.xlu1 %v2104_v51, %s4779_s11  ;;  %2139 = vrot.lane.b32.xlu0 %v2133_v32, %s4779_s11  ;;  %v2163_v51 = vstv %s5917_s18  ;;  %s4413_s18 = sld [smem:[#allocation7 + $0x69]] }
 0x199   : > { %v1522_v16 = vadd.f32 %v1519_v14, %v1511_v57  ;;  %v2164_v24 = vmul.f32 %v2163_v51, %v5637_v36  ;;  %v1523_v61 = vadd.f32 %v1520_v8, %v1512_v12  ;;  %v5939_v14 = vld [vmem:[#allocation2 + $0x29] sm:$0x1]  ;;  %v2165_v32 = vmul.f32 %v2163_v51, %v5645_v34 }
 0x19a   : > { %v1533_v11 = vpop.permute.xlu1 %1532  ;;  %v1535_v28 = vpop.permute.xlu0 %1534  ;;  %v2194_v57 = vstv %s5923_s20  ;;  %v2166_v12 = vmul.f32 %v2163_v51, %v5939_v14  ;;  %v1563_v8 = vmul.f32 %v1560_v25, %v5590_v10  ;;  %v1591_v25 = vmul.f32 %v1588_v26, %v5607_v23  ;;  %s6097_s20 = sld [smem:[#allocation7 + $0x7b]] }
 0x19b   : > { %v1541_v41 = vadd.f32 %v1533_v11, %v1521_v63  ;;  %v1542_v30 = vadd.f32 %v1535_v28, %v1522_v16  ;;  %v1589_v11 = vmul.f32 %v1588_v26, %v5596_v27  ;;  %v2195_v27 = vmul.f32 %v2194_v57, %v5655_v7 }
 0x19c   : > { %2141 = vrot.lane.b32.xlu1 %v2134_v19, %s4779_s11  ;;  %2143 = vrot.lane.b32.xlu0 %v2135_v31, %s4779_s11 }
 0x19d   : > { %v1546_v15 = vadd.f32 %v1545_v18, %v1541_v41  ;;  %v1547_v63 = vadd.f32 %v1545_v18, %v1542_v30  ;;  %v1590_v41 = vmul.f32 %v1588_v26, %v5602_v39 }
 0x19e   : > { %v1537_v5 = vpop.permute.xlu1 %1536  ;;  %v1573_v49 = vpop.permute.xlu0 %1572 }
 0x19f   : > { %v1549_v42 = vmax.f32 %v1546_v15, 0.0  ;;  %v1543_v19 = vadd.f32 %v1537_v5, %v1523_v61  ;;  %v1550_v16 = vmax.f32 %v1547_v63, 0.0  ;;  %v1581_v31 = vadd.f32 %v1573_v49, %v1561_v0 }
 0x1a0   : > { %2170 = vrot.lane.b32.xlu1 %v2164_v24, %s4779_s11  ;;  %2172 = vrot.lane.b32.xlu0 %v2165_v32, %s4779_s11  ;;  %v1619_v24 = vstv %s5933_s21  ;;  %v2196_v61 = vmul.f32 %v2194_v57, %v5663_v29  ;;  %s6102_s21 = sld [smem:[#allocation9 + $0x2]] }
 0x1a1   : > { %1553 = vst.msk [vmem:[#allocation3 + $0x18] sm:$0xff] %vm1046_vm0, %v1549_v42  ;;  %v1548_v60 = vadd.f32 %v1545_v18, %v1543_v19  ;;  %1554 = vst.msk [vmem:[#allocation3 + $0x20] sm:$0xff] %vm1046_vm0, %v1550_v16  ;;  %v1592_v10 = vadd.f32 %v1589_v11, %v1581_v31  ;;  %v5960_v18 = vld [vmem:[#allocation2 + $0x40] sm:$0x1]  ;;  %v1620_v5 = vmul.f32 %v1619_v24, %v5616_v4  ;;  %v2225_v42 = vstv %s5946_s2  ;;  %v5974_v4 = vld [vmem:[#allocation2 + $0x41] sm:$0x1] }
 0x1a2   : > { %v1575_v28 = vpop.permute.xlu1 %1574  ;;  %v1577_v39 = vpop.permute.xlu0 %1576  ;;  %v2197_v23 = vmul.f32 %v2194_v57, %v5960_v18  ;;  %v2226_v63 = vmul.f32 %v2225_v42, %v5679_v22  ;;  %v1621_v11 = vmul.f32 %v1619_v24, %v5625_v37  ;;  %v2227_v16 = vmul.f32 %v2225_v42, %v5686_v33  ;;  %s6113_s2 = sld [smem:[#allocation9 + $0x3]] }
 0x1a3   : > { %v1551_v15 = vmax.f32 %v1548_v60, 0.0  ;;  %v1582_v51 = vadd.f32 %v1575_v28, %v1562_v9  ;;  %v1583_v30 = vadd.f32 %v1577_v39, %v1563_v8  ;;  %v1650_v8 = vstv %s5953_s3  ;;  %s6115_s3 = sld [smem:[#allocation7 + $0x79]] }
 0x1a4   : > { %2174 = vrot.lane.b32.xlu1 %v2166_v12, %s4779_s11  ;;  %2201 = vrot.lane.b32.xlu0 %v2195_v27, %s4779_s11  ;;  %v1622_v60 = vmul.f32 %v1619_v24, %v5631_v54  ;;  %v2228_v37 = vmul.f32 %v2225_v42, %v5974_v4  ;;  %v1651_v27 = vmul.f32 %v1650_v8, %v5637_v36  ;;  %v1681_v39 = vstv %s5968_s23  ;;  %s6138_s23 = sld [smem:[#allocation9 + $0x6]] }
 0x1a5   : > { %1555 = vst.msk [vmem:[#allocation3 + $0x28] sm:$0x1] %vm1049_vm1, %v1551_v15  ;;  %v1593_v0 = vadd.f32 %v1590_v41, %v1582_v51  ;;  %v1594_v32 = vadd.f32 %v1591_v25, %v1583_v30  ;;  %v2256_v41 = vstv %s4433_s22  ;;  %v1652_v24 = vmul.f32 %v1650_v8, %v5645_v34  ;;  %v5987_v30 = vld [vmem:[#allocation2 + $0x58] sm:$0x1]  ;;  %s6128_s22 = sld [smem:[#allocation9 + $0x5]] }
 0x1a6   : > { %v1604_v9 = vpop.permute.xlu1 %1603  ;;  %v1606_v19 = vpop.permute.xlu0 %1605  ;;  %v2257_v25 = vmul.f32 %v2256_v41, %v5697_v52  ;;  %v2258_v36 = vmul.f32 %v2256_v41, %v5703_v59  ;;  %v2259_v42 = vmul.f32 %v2256_v41, %v5987_v30 }
 0x1a7   : > { %v1612_v26 = vadd.f32 %v1604_v9, %v1592_v10  ;;  %v1613_v49 = vadd.f32 %v1606_v19, %v1593_v0 }
 0x1a8   : > { %2203 = vrot.lane.b32.xlu1 %v2196_v61, %s4779_s11  ;;  %2205 = vrot.lane.b32.xlu0 %v2197_v23, %s4779_s11 }
 0x1a9   : > { %v1623_v12 = vadd.f32 %v1620_v5, %v1612_v26  ;;  %v1624_v15 = vadd.f32 %v1621_v11, %v1613_v49  ;;  %v1653_v5 = vmul.f32 %v1650_v8, %v5650_v6  ;;  %v1682_v26 = vmul.f32 %v1681_v39, %v5655_v7 }
 0x1aa   : > { %v1608_v57 = vpop.permute.xlu1 %1607  ;;  %v1635_v28 = vpop.permute.xlu0 %1634  ;;  %v1683_v6 = vmul.f32 %v1681_v39, %v5663_v29 }
 0x1ab   : > { %v1614_v31 = vadd.f32 %v1608_v57, %v1594_v32  ;;  %v1643_v51 = vadd.f32 %v1635_v28, %v1623_v12  ;;  %v1712_v12 = vstv %s4397_s25  ;;  %v6000_v57 = vld [vmem:[#allocation2 + $0x59] sm:$0x1]  ;;  %s4419_s25 = sld [smem:[#allocation8 + $0x2]] }
 0x1ac   : > { %2232 = vrot.lane.b32.xlu1 %v2226_v63, %s4779_s11  ;;  %2234 = vrot.lane.b32.xlu0 %v2227_v16, %s4779_s11  ;;  %v2287_v63 = vstv %s4435_s24  ;;  %v1684_v16 = vmul.f32 %v1681_v39, %v5672_v55  ;;  %v1743_v39 = vstv %s5995_s27  ;;  %s4780_s24 = smov 126   ;;  %s6149_s27 = sld [smem:[#allocation9 + $0x7]] }
 0x1ad   : > { %v1625_v54 = vadd.f32 %v1622_v60, %v1614_v31  ;;  %v1654_v9 = vadd.f32 %v1651_v27, %v1643_v51  ;;  %v2288_v49 = vmul.f32 %v2287_v63, %v5717_v47  ;;  %v2289_v41 = vmul.f32 %v2287_v63, %v5724_v45 }
 0x1ae   : > { %v1637_v10 = vpop.permute.xlu1 %1636  ;;  %v1639_v0 = vpop.permute.xlu0 %1638  ;;  %v2290_v27 = vmul.f32 %v2287_v63, %v6000_v57 }
 0x1af   : > { %v1644_v61 = vadd.f32 %v1637_v10, %v1624_v15  ;;  %v1645_v23 = vadd.f32 %v1639_v0, %v1625_v54  ;;  %v1713_v15 = vmul.f32 %v1712_v12, %v5679_v22  ;;  %v6012_v0 = vld [vmem:[#allocation2 + $0x70] sm:$0x1] }
 0x1b0   : > { %2236 = vrot.lane.b32.xlu1 %v2228_v37, %s4779_s11  ;;  %2263 = vrot.lane.b32.xlu0 %v2257_v25, %s4779_s11  ;;  %v2318_v37 = vstv %s4437_s26  ;;  %s6143_s26 = sld [smem:[#allocation7 + $0xf]] }
 0x1b1   : > { %v1655_v34 = vadd.f32 %v1652_v24, %v1644_v61  ;;  %v1656_v8 = vadd.f32 %v1653_v5, %v1645_v23  ;;  %v1714_v24 = vmul.f32 %v1712_v12, %v5686_v33  ;;  %v2319_v25 = vmul.f32 %v2318_v37, %v5735_v44 }
 0x1b2   : > { %v1666_v32 = vpop.permute.xlu1 %1665  ;;  %v1668_v11 = vpop.permute.xlu0 %1667  ;;  %v2320_v22 = vmul.f32 %v2318_v37, %v5741_v48  ;;  %v1715_v5 = vmul.f32 %v1712_v12, %v5690_v58  ;;  %v1745_v58 = vmul.f32 %v1743_v39, %v5703_v59 }
 0x1b3   : > { %v1674_v19 = vadd.f32 %v1666_v32, %v1654_v9  ;;  %v1675_v60 = vadd.f32 %v1668_v11, %v1655_v34  ;;  %v1744_v34 = vmul.f32 %v1743_v39, %v5697_v52  ;;  %v2321_v32 = vmul.f32 %v2318_v37, %v6012_v0 }
 0x1b4   : > { %2265 = vrot.lane.b32.xlu1 %v2258_v36, %s4779_s11  ;;  %2267 = vrot.lane.b32.xlu0 %v2259_v42, %s4779_s11 }
 0x1b5   : > { %v1685_v7 = vadd.f32 %v1682_v26, %v1674_v19  ;;  %v1686_v51 = vadd.f32 %v1683_v6, %v1675_v60  ;;  %v2349_v19 = vstv %s4439_s28  ;;  %v1746_v60 = vmul.f32 %v1743_v39, %v5711_v62  ;;  %s6151_s28 = sld [smem:[#allocation7 + $0xd]] }
 0x1b6   : > { %v1670_v31 = vpop.permute.xlu1 %1669  ;;  %v1697_v29 = vpop.permute.xlu0 %1696  ;;  %v2350_v11 = vmul.f32 %v2349_v19, %v5755_v53 }
 0x1b7   : > { %v1676_v28 = vadd.f32 %v1670_v31, %v1656_v8  ;;  %v1705_v54 = vadd.f32 %v1697_v29, %v1685_v7  ;;  %v6025_v8 = vld [vmem:[#allocation2 + $0x71] sm:$0x1] }
 0x1b8   : > { %2294 = vrot.lane.b32.xlu1 %v2288_v49, %s4779_s11  ;;  %2296 = vrot.lane.b32.xlu0 %v2289_v41, %s4779_s11  ;;  %v1774_v49 = vstv %s4401_s29  ;;  %v2380_v41 = vstv %s4441_s4  ;;  %s4781_s29 = smov 125   ;;  %s6163_s4 = sld [smem:[#allocation9 + $0x9]] }
 0x1b9   : > { %v1687_v55 = vadd.f32 %v1684_v16, %v1676_v28  ;;  %v1716_v9 = vadd.f32 %v1713_v15, %v1705_v54  ;;  %v2351_v16 = vmul.f32 %v2349_v19, %v5762_v43  ;;  %v2352_v28 = vmul.f32 %v2349_v19, %v6025_v8 }
 0x1ba   : > { %v1699_v10 = vpop.permute.xlu1 %1698  ;;  %v1701_v36 = vpop.permute.xlu0 %1700  ;;  %v1775_v37 = vmul.f32 %v1774_v49, %v5717_v47  ;;  %v1776_v15 = vmul.f32 %v1774_v49, %v5724_v45  ;;  %v2381_v54 = vmul.f32 %v2380_v41, %v5773_v3  ;;  %v2382_v47 = vmul.f32 %v2380_v41, %v5779_v13 }
 0x1bb   : > { %v1706_v61 = vadd.f32 %v1699_v10, %v1686_v51  ;;  %v1707_v23 = vadd.f32 %v1701_v36, %v1687_v55  ;;  %v1805_v55 = vstv %s6020_s9  ;;  %v6037_v10 = vld [vmem:[#allocation2 + $0x88] sm:$0x1]  ;;  %v1777_v39 = vmul.f32 %v1774_v49, %v5728_v20  ;;  %s6169_s9 = sld [smem:[#allocation7 + $0x1f]] }
 0x1bc   : > { %2298 = vrot.lane.b32.xlu1 %v2290_v27, %s4779_s11  ;;  %2325 = vrot.lane.b32.xlu0 %v2319_v25, %s4779_s11  ;;  %v1807_v20 = vmul.f32 %v1805_v55, %v5741_v48  ;;  %v7206_v49 = vld [vmem:[#allocation13_spill] sm:$0xff] }
 0x1bd   : > { %v1717_v33 = vadd.f32 %v1714_v24, %v1706_v61  ;;  %v1718_v6 = vadd.f32 %v1715_v5, %v1707_v23 }
 0x1be   : > { %v1728_v26 = vpop.permute.xlu1 %1727  ;;  %v1730_v63 = vpop.permute.xlu0 %1729 }
 0x1bf   : > { %v1736_v42 = vadd.f32 %v1728_v26, %v1716_v9  ;;  %v1737_v12 = vadd.f32 %v1730_v63, %v1717_v33  ;;  %v2383_v9 = vmul.f32 %v2380_v41, %v6037_v10  ;;  %v2411_v33 = vstv %s4443_s10  ;;  %v6050_v63 = vld [vmem:[#allocation2 + $0x89] sm:$0x1]  ;;  %s6175_s10 = sld [smem:[#allocation9 + $0xa]] }
 0x1c0   : > { %2327 = vrot.lane.b32.xlu1 %v2320_v22, %s4779_s11  ;;  %2329 = vrot.lane.b32.xlu0 %v2321_v32, %s4779_s11  ;;  %v1806_v22 = vmul.f32 %v1805_v55, %v5735_v44  ;;  %v2412_v26 = vmul.f32 %v2411_v33, %v5793_v38  ;;  %v1836_v32 = vstv %s4405_s12  ;;  %s6183_s12 = sld [smem:[#allocation9 + $0xb]] }
 0x1c1   : > { %v1747_v52 = vadd.f32 %v1744_v34, %v1736_v42  ;;  %v1748_v29 = vadd.f32 %v1745_v58, %v1737_v12  ;;  %v1838_v41 = vmul.f32 %v1836_v32, %v5762_v43 }
 0x1c2   : > { %v1732_v7 = vpop.permute.xlu1 %1731  ;;  %v1759_v59 = vpop.permute.xlu0 %1758 }
 0x1c3   : > { %v1738_v31 = vadd.f32 %v1732_v7, %v1718_v6  ;;  %v1767_v27 = vadd.f32 %v1759_v59, %v1747_v52  ;;  %v2413_v6 = vmul.f32 %v2411_v33, %v7206_v49  ;;  %v2442_v52 = vstv %s4445_s13  ;;  %s6188_s13 = sld [smem:[#allocation7 + $0x1d]] }
 0x1c4   : > { %2356 = vrot.lane.b32.xlu1 %v2350_v11, %s4779_s11  ;;  %2358 = vrot.lane.b32.xlu0 %v2351_v16, %s4779_s11  ;;  %v1808_v11 = vmul.f32 %v1805_v55, %v5749_v46  ;;  %v1837_v7 = vmul.f32 %v1836_v32, %v5755_v53  ;;  %v7207_v53 = vld [vmem:[#allocation18_spill] sm:$0xff] }
 0x1c5   : > { %v1749_v62 = vadd.f32 %v1746_v60, %v1738_v31  ;;  %v1778_v61 = vadd.f32 %v1775_v37, %v1767_v27  ;;  %v2414_v60 = vmul.f32 %v2411_v33, %v6050_v63  ;;  %v1867_v37 = vstv %s6045_s0  ;;  %v6062_v27 = vld [vmem:[#allocation2 + $0xa0] sm:$0x1]  ;;  %s6199_s0 = sld [smem:[#allocation9 + $0xd]] }
 0x1c6   : > { %v1761_v51 = vpop.permute.xlu1 %1760  ;;  %v1763_v25 = vpop.permute.xlu0 %1762 }
 0x1c7   : > { %v1768_v24 = vadd.f32 %v1761_v51, %v1748_v29  ;;  %v1769_v36 = vadd.f32 %v1763_v25, %v1749_v62  ;;  %v7208_v51 = vld [vmem:[#allocation12_spill] sm:$0xff]  ;;  %v1868_v25 = vmul.f32 %v1867_v37, %v5773_v3 }
 0x1c8   : > { %2360 = vrot.lane.b32.xlu1 %v2352_v28, %s4779_s11  ;;  %2387 = vrot.lane.b32.xlu0 %v2381_v54, %s4779_s11  ;;  %v2443_v28 = vmul.f32 %v2442_v52, %v5811_v2  ;;  %v1839_v54 = vmul.f32 %v1836_v32, %v7208_v51 }
 0x1c9   : > { %v1779_v45 = vadd.f32 %v1776_v15, %v1768_v24  ;;  %v1780_v42 = vadd.f32 %v1777_v39, %v1769_v36  ;;  %v2444_v15 = vmul.f32 %v2442_v52, %v7207_v53  ;;  %v2445_v39 = vmul.f32 %v2442_v52, %v6062_v27 }
 0x1ca   : > { %v1790_v5 = vpop.permute.xlu1 %1789  ;;  %v1792_v34 = vpop.permute.xlu0 %1791  ;;  %v2473_v36 = vstv %s4447_s1  ;;  %s6205_s1 = sld [smem:[#allocation7 + $0x2f]] }
 0x1cb   : > { %v1798_v23 = vadd.f32 %v1790_v5, %v1778_v61  ;;  %v1799_v19 = vadd.f32 %v1792_v34, %v1779_v45 }
 0x1cc   : > { %2389 = vrot.lane.b32.xlu1 %v2382_v47, %s4779_s11  ;;  %2391 = vrot.lane.b32.xlu0 %v2383_v9, %s4779_s11  ;;  %v1869_v9 = vmul.f32 %v1867_v37, %v5779_v13 }
 0x1cd   : > { %v1809_v44 = vadd.f32 %v1806_v22, %v1798_v23  ;;  %v1810_v16 = vadd.f32 %v1807_v20, %v1799_v19  ;;  %v7209_v22 = vld [vmem:[#allocation17_spill] sm:$0xff]  ;;  %v1898_v23 = vstv %s4409_s14  ;;  %v7210_v20 = vld [vmem:[#allocation15_spill] sm:$0xff]  ;;  %s6210_s14 = sld [smem:[#allocation9 + $0xe]] }
 0x1ce   : > { %v1794_v58 = vpop.permute.xlu1 %1793  ;;  %v1821_v48 = vpop.permute.xlu0 %1820  ;;  %v2474_v5 = vmul.f32 %v2473_v36, %v7209_v22  ;;  %v1870_v32 = vmul.f32 %v1867_v37, %v7210_v20  ;;  %v7211_v19 = vld [vmem:[#allocation19_spill] sm:$0xff]  ;;  %v7212_v37 = vld [vmem:[#allocation14_spill] sm:$0xff] }
 0x1cf   : > { %v1800_v12 = vadd.f32 %v1794_v58, %v1780_v42  ;;  %v1829_v31 = vadd.f32 %v1821_v48, %v1809_v44  ;;  %v2475_v44 = vmul.f32 %v2473_v36, %v7211_v19  ;;  %v2504_v58 = vstv %s4449_s15  ;;  %s6219_s15 = sld [smem:[#allocation9 + $0xf]] }
 0x1d0   : > { %2418 = vrot.lane.b32.xlu1 %v2412_v26, %s4779_s11  ;;  %2420 = vrot.lane.b32.xlu0 %v2413_v6, %s4779_s11  ;;  %v6075_v26 = vld [vmem:[#allocation2 + $0xa1] sm:$0x1] }
 0x1d1   : > { %v1811_v46 = vadd.f32 %v1808_v11, %v1800_v12  ;;  %v1840_v55 = vadd.f32 %v1837_v7, %v1829_v31  ;;  %v2476_v6 = vmul.f32 %v2473_v36, %v6075_v26  ;;  %v1899_v12 = vmul.f32 %v1898_v23, %v5793_v38 }
 0x1d2   : > { %v1823_v59 = vpop.permute.xlu1 %1822  ;;  %v1825_v62 = vpop.permute.xlu0 %1824  ;;  %v1900_v7 = vmul.f32 %v1898_v23, %v7206_v49  ;;  %v2505_v31 = vmul.f32 %v2504_v58, %v5849_v1  ;;  %v2506_v38 = vmul.f32 %v2504_v58, %v5857_v56 }
 0x1d3   : > { %v1830_v29 = vadd.f32 %v1823_v59, %v1810_v16  ;;  %v1831_v24 = vadd.f32 %v1825_v62, %v1811_v46  ;;  %v1929_v46 = vstv %s6070_s16  ;;  %v6087_v59 = vld [vmem:[#allocation2 + $0xb8] sm:$0x1]  ;;  %s6223_s16 = sld [smem:[#allocation7 + $0x2d]] }
 0x1d4   : > { %2422 = vrot.lane.b32.xlu1 %v2414_v60, %s4779_s11  ;;  %2449 = vrot.lane.b32.xlu0 %v2443_v28, %s4779_s11  ;;  %v1930_v51 = vmul.f32 %v1929_v46, %v5811_v2 }
 0x1d5   : > { %v1841_v43 = vadd.f32 %v1838_v41, %v1830_v29  ;;  %v1842_v33 = vadd.f32 %v1839_v54, %v1831_v24  ;;  %v1901_v29 = vmul.f32 %v1898_v23, %v7212_v37 }
 0x1d6   : > { %v1852_v47 = vpop.permute.xlu1 %1851  ;;  %v1854_v45 = vpop.permute.xlu0 %1853 }
 0x1d7   : > { %v1860_v61 = vadd.f32 %v1852_v47, %v1840_v55  ;;  %v1861_v34 = vadd.f32 %v1854_v45, %v1841_v43  ;;  %v2507_v55 = vmul.f32 %v2504_v58, %v6087_v59  ;;  %v2535_v43 = vstv %s4451_s17  ;;  %s6234_s17 = sld [smem:[#allocation9 + $0x11]] }
 0x1d8   : > { %2451 = vrot.lane.b32.xlu1 %v2444_v15, %s4779_s11  ;;  %2453 = vrot.lane.b32.xlu0 %v2445_v39, %s4779_s11  ;;  %v2536_v47 = vmul.f32 %v2535_v43, %v5869_v50  ;;  %v1931_v39 = vmul.f32 %v1929_v46, %v7207_v53 }
 0x1d9   : > { %v1871_v3 = vadd.f32 %v1868_v25, %v1860_v61  ;;  %v1872_v52 = vadd.f32 %v1869_v9, %v1861_v34  ;;  %v1960_v61 = vstv %s4413_s18  ;;  %v7213_v9 = vld [vmem:[#allocation16_spill] sm:$0xff]  ;;  %v2537_v34 = vmul.f32 %v2535_v43, %v5876_v21  ;;  %s6238_s18 = sld [smem:[#allocation7 + $0x3f]] }
 0x1da   : > { %v1856_v42 = vpop.permute.xlu1 %1855  ;;  %v1883_v13 = vpop.permute.xlu0 %1882  ;;  %v1932_v23 = vmul.f32 %v1929_v46, %v7213_v9  ;;  %v2587_v46 = vstv %s6102_s21  ;;  %v2623_v9 = vstv %s6128_s22  ;;  %s6256_s21 = sld [smem:[#allocation7 + $0x3d]]  ;;  %s6277_s22 = sld [smem:[#allocation9 + $0x16]] }
 0x1db   : > { %v1862_v11 = vadd.f32 %v1856_v42, %v1842_v33  ;;  %v1891_v48 = vadd.f32 %v1883_v13, %v1871_v3  ;;  %v2573_v42 = vstv %s6092_s19  ;;  %s6244_s19 = sld [smem:[#allocation9 + $0x12]] }
 0x1dc   : > { %2480 = vrot.lane.b32.xlu1 %v2474_v5, %s4779_s11  ;;  %2482 = vrot.lane.b32.xlu0 %v2475_v44, %s4779_s11  ;;  %v6104_v5 = vld [vmem:[#allocation2 + $0xb9] sm:$0x1]  ;;  %v6117_v44 = vld [vmem:[#allocation3] sm:$0xff] }
 0x1dd   : > { %v1873_v60 = vadd.f32 %v1870_v32, %v1862_v11  ;;  %v1902_v62 = vadd.f32 %v1899_v12, %v1891_v48  ;;  %v2538_v20 = vmul.f32 %v2535_v43, %v6104_v5  ;;  %v1961_v32 = vmul.f32 %v1960_v61, %v7209_v22  ;;  %v6122_v48 = vld [vmem:[#allocation3 + $0x8] sm:$0x3f] }
 0x1de   : > { %v1885_v16 = vpop.permute.xlu1 %1884  ;;  %v1887_v28 = vpop.permute.xlu0 %1886 }
 0x1df   : > { %v1892_v41 = vadd.f32 %v1885_v16, %v1872_v52  ;;  %v1893_v49 = vadd.f32 %v1887_v28, %v1873_v60  ;;  %v1991_v52 = vstv %s6097_s20  ;;  %v7214_v16 = vld [vmem:[#allocation20_spill] sm:$0xff]  ;;  %s6252_s20 = sld [smem:[#allocation9 + $0x13]] }
 0x1e0   : > { %2484 = vrot.lane.b32.xlu1 %v2476_v6, %s4779_s11  ;;  %2511 = vrot.lane.b32.xlu0 %v2505_v31, %s4779_s11  ;;  %v1962_v6 = vmul.f32 %v1960_v61, %v7211_v19  ;;  %v1963_v31 = vmul.f32 %v1960_v61, %v7214_v16  ;;  %v2589_v61 = vmul.f32 %v2587_v46, %v6122_v48 }
 0x1e1   : > { %v1903_v15 = vadd.f32 %v1900_v7, %v1892_v41  ;;  %v1904_v2 = vadd.f32 %v1901_v29, %v1893_v49  ;;  %v2574_v7 = vmul.f32 %v2573_v42, %v6117_v44  ;;  %v2575_v29 = vmul.f32 %v2573_v42, %v6122_v48 }
 0x1e2   : > { %v1914_v54 = vpop.permute.xlu1 %1913  ;;  %v1916_v25 = vpop.permute.xlu0 %1915 }
 0x1e3   : > { %v1922_v24 = vadd.f32 %v1914_v54, %v1902_v62  ;;  %v1923_v36 = vadd.f32 %v1916_v25, %v1903_v15  ;;  %v2588_v15 = vmul.f32 %v2587_v46, %v6117_v44  ;;  %v2601_v54 = vstv %s6113_s2  ;;  %v7215_v25 = vld [vmem:[#allocation21_spill] sm:$0xff]  ;;  %s6267_s2 = sld [smem:[#allocation9 + $0x15]] }
 0x1e4   : > { %2513 = vrot.lane.b32.xlu1 %v2506_v38, %s4779_s11  ;;  %2515 = vrot.lane.b32.xlu0 %v2507_v55, %s4779_s11  ;;  %v1992_v38 = vmul.f32 %v1991_v52, %v5849_v1  ;;  %v2022_v55 = vstv %s6115_s3  ;;  %s6271_s3 = sld [smem:[#allocation7 + $0x4f]] }
 0x1e5   : > { %v1933_v45 = vadd.f32 %v1930_v51, %v1922_v24  ;;  %v1934_v11 = vadd.f32 %v1931_v39, %v1923_v36  ;;  %v1993_v51 = vmul.f32 %v1991_v52, %v5857_v56  ;;  %v2602_v36 = vmul.f32 %v2601_v54, %v6117_v44 }
 0x1e6   : > { %v1918_v33 = vpop.permute.xlu1 %1917  ;;  %v1945_v53 = vpop.permute.xlu0 %1944 }
 0x1e7   : > { %v1924_v3 = vadd.f32 %v1918_v33, %v1904_v2  ;;  %v1953_v58 = vadd.f32 %v1945_v53, %v1933_v45  ;;  %v2023_v45 = vmul.f32 %v2022_v55, %v5869_v50  ;;  %v2024_v53 = vmul.f32 %v2022_v55, %v5876_v21  ;;  %v6158_v50 = vld [vmem:[#allocation3 + $0x9] sm:$0x3f] }
 0x1e8   : > { %2542 = vrot.lane.b32.xlu1 %v2536_v47, %s4779_s11  ;;  %2544 = vrot.lane.b32.xlu0 %v2537_v34, %s4779_s11  ;;  %v1994_v47 = vmul.f32 %v1991_v52, %v7215_v25  ;;  %v2625_v16 = vmul.f32 %v2623_v9, %v6158_v50 }
 0x1e9   : > { %v1935_v13 = vadd.f32 %v1932_v23, %v1924_v3  ;;  %v1964_v19 = vadd.f32 %v1961_v32, %v1953_v58  ;;  %v6153_v23 = vld [vmem:[#allocation3 + $0x1] sm:$0xff]  ;;  %v2603_v32 = vmul.f32 %v2601_v54, %v6122_v48 }
 0x1ea   : > { %v1947_v12 = vpop.permute.xlu1 %1946  ;;  %v1949_v60 = vpop.permute.xlu0 %1948  ;;  %v2624_v58 = vmul.f32 %v2623_v9, %v6153_v23 }
 0x1eb   : > { %v1954_v22 = vadd.f32 %v1947_v12, %v1934_v11  ;;  %v1955_v41 = vadd.f32 %v1949_v60, %v1935_v13  ;;  %v2637_v13 = vstv %s6138_s23  ;;  %v7216_v12 = vld [vmem:[#allocation22_spill] sm:$0xff]  ;;  %v2050_v60 = vstv %s4419_s25  ;;  %s6285_s23 = sld [smem:[#allocation9 + $0x17]]  ;;  %s6289_s25 = sld [smem:[#allocation7 + $0x4d]] }
 0x1ec   : > { %2546 = vrot.lane.b32.xlu1 %v2538_v20, %s4779_s11  ;;  %2578 = vrot.lane.b32.xlu0 %v2574_v7, %s4779_s11  ;;  %v2025_v52 = vmul.f32 %v2022_v55, %v7216_v12  ;;  %v2639_v54 = vmul.f32 %v2637_v13, %v6158_v50  ;;  %v4653_v55 = vld [vmem:[#allocation2 + $0x8] sm:$0xff] }
 0x1ed   : > { %v1965_v28 = vadd.f32 %v1962_v6, %v1954_v22  ;;  %v1966_v24 = vadd.f32 %v1963_v31, %v1955_v41  ;;  %v2065_v31 = vstv %s6143_s26  ;;  %v2638_v41 = vmul.f32 %v2637_v13, %v6153_v23  ;;  %v6194_v13 = vld [vmem:[#allocation3 + $0xa] sm:$0x3f]  ;;  %s6300_s26 = sld [smem:[#allocation9 + $0x19]] }
 0x1ee   : > { %v1976_v37 = vpop.permute.xlu1 %1975  ;;  %v1978_v49 = vpop.permute.xlu0 %1977 }
 0x1ef   : > { %v1984_v62 = vadd.f32 %v1976_v37, %v1964_v19  ;;  %v1985_v1 = vadd.f32 %v1978_v49, %v1965_v28  ;;  %v2651_v28 = vstv %s6149_s27  ;;  %v4652_v49 = vld [vmem:[#allocation2] sm:$0xff]  ;;  %s6304_s27 = sld [smem:[#allocation7 + $0x5f]] }
 0x1f0   : > { %2580 = vrot.lane.b32.xlu1 %v2575_v29, %s4779_s11  ;;  %2592 = vrot.lane.b32.xlu0 %v2588_v15, %s4780_s24  ;;  %v2066_v15 = vmul.f32 %v4652_v49, %v2065_v31 }
 0x1f1   : > { %v1995_v43 = vadd.f32 %v1992_v38, %v1984_v62  ;;  %v1996_v33 = vadd.f32 %v1993_v51, %v1985_v1  ;;  %v2093_v38 = vstv %s6151_s28  ;;  %s6310_s28 = sld [smem:[#allocation9 + $0x1a]] }
 0x1f2   : > { %v1980_v39 = vpop.permute.xlu1 %1979  ;;  %v2007_v2 = vpop.permute.xlu0 %2006 }
 0x1f3   : > { %v1986_v56 = vadd.f32 %v1980_v39, %v1966_v24  ;;  %v2015_v34 = vadd.f32 %v2007_v2, %v1995_v43  ;;  %v2067_v24 = vmul.f32 %v4653_v55, %v2065_v31  ;;  %v2068_v2 = vmul.f32 %v2065_v31, %v5896_v35 }
 0x1f4   : > { %2594 = vrot.lane.b32.xlu1 %v2589_v61, %s4780_s24  ;;  %2606 = vrot.lane.b32.xlu0 %v2602_v36, %s4781_s29  ;;  %v2673_v36 = vstv %s6163_s4  ;;  %v2124_v35 = vstv %s6169_s9  ;;  %s6318_s4 = sld [smem:[#allocation9 + $0x1b]]  ;;  %s6322_s9 = sld [smem:[#allocation7 + $0x5d]] }
 0x1f5   : > { %v1997_v3 = vadd.f32 %v1994_v47, %v1986_v56  ;;  %v2026_v21 = vadd.f32 %v2023_v45, %v2015_v34  ;;  %v4654_v47 = vld [vmem:[#allocation2 + $0x1] sm:$0xff]  ;;  %v2652_v56 = vmul.f32 %v2651_v28, %v6153_v23 }
 0x1f6   : > { %v2009_v20 = vpop.permute.xlu1 %2008  ;;  %v2011_v11 = vpop.permute.xlu0 %2010  ;;  %v2094_v39 = vmul.f32 %v4654_v47, %v2093_v38  ;;  %v6186_v34 = vld [vmem:[#allocation3 + $0x2] sm:$0xff] }
 0x1f7   : > { %v2016_v42 = vadd.f32 %v2009_v20, %v1996_v33  ;;  %v2017_v6 = vadd.f32 %v2011_v11, %v1997_v3  ;;  %v4655_v3 = vld [vmem:[#allocation2 + $0x9] sm:$0xff]  ;;  %v2674_v12 = vmul.f32 %v2673_v36, %v6186_v34 }
 0x1f8   : > { %2608 = vrot.lane.b32.xlu1 %v2603_v32, %s4781_s29  ;;  %2628 = vrot.lane.b32.xlu0 %v2624_v58, %s4779_s11  ;;  %v2653_v32 = vmul.f32 %v2651_v28, %v6158_v50 }
 0x1f9   : > { %v2027_v22 = vadd.f32 %v2024_v53, %v2016_v42  ;;  %v2028_v29 = vadd.f32 %v2025_v52, %v2017_v6  ;;  %v2095_v53 = vmul.f32 %v4655_v3, %v2093_v38  ;;  %v2186_v3 = vstv %s6205_s1  ;;  %s6355_s1 = sld [smem:[#allocation7 + $0x6d]] }
 0x1fa   : > { %v2038_v7 = vpop.permute.xlu1 %2037  ;;  %v2040_v19 = vpop.permute.xlu0 %2039 }
 0x1fb   : > { %v2046_v46 = vadd.f32 %v2038_v7, %v2026_v21  ;;  %v2047_v62 = vadd.f32 %v2040_v19, %v2027_v22  ;;  %v2096_v21 = vmul.f32 %v2093_v38, %v5909_v40  ;;  %v4656_v7 = vld [vmem:[#allocation2 + $0x18] sm:$0xff]  ;;  %v4657_v38 = vld [vmem:[#allocation2 + $0x20] sm:$0xff] }
 0x1fc   : > { %2630 = vrot.lane.b32.xlu1 %v2625_v16, %s4779_s11  ;;  %2642 = vrot.lane.b32.xlu0 %v2638_v41, %s4780_s24  ;;  %v2125_v16 = vmul.f32 %v4656_v7, %v2124_v35 }
 0x1fd   : > { %v2051_v37 = vadd.f32 %v2050_v60, %v2046_v46  ;;  %v2052_v25 = vadd.f32 %v2050_v60, %v2047_v62  ;;  %v2675_v46 = vmul.f32 %v2673_v36, %v6194_v13  ;;  %v4659_v36 = vld [vmem:[#allocation2 + $0x21] sm:$0xff] }
 0x1fe   : > { %v2042_v51 = vpop.permute.xlu1 %2041  ;;  %v2078_v61 = vpop.permute.xlu0 %2077 }
 0x1ff   : > { %v2054_v1 = vmax.f32 %v2051_v37, 0.0  ;;  %v2048_v43 = vadd.f32 %v2042_v51, %v2028_v29  ;;  %v2055_v9 = vmax.f32 %v2052_v25, 0.0  ;;  %v2086_v33 = vadd.f32 %v2078_v61, %v2066_v15  ;;  %v4658_v25 = vld [vmem:[#allocation2 + $0x19] sm:$0xff] }
 0x200   : > { %2644 = vrot.lane.b32.xlu1 %v2639_v54, %s4780_s24  ;;  %2656 = vrot.lane.b32.xlu0 %v2652_v56, %s4781_s29  ;;  %v2126_v37 = vmul.f32 %v4657_v38, %v2124_v35  ;;  %v2701_v29 = vstv %s6183_s12  ;;  %v2155_v15 = vstv %s6188_s13  ;;  %v2127_v51 = vmul.f32 %v2124_v35, %v5925_v17  ;;  %s6337_s12 = sld [smem:[#allocation7 + $0x6f]]  ;;  %s6343_s13 = sld [smem:[#allocation9 + $0x1e]] }
 0x201   : > { %2058 = vst.msk [vmem:[#allocation3 + $0x30] sm:$0xff] %vm1046_vm0, %v2054_v1  ;;  %v2053_v45 = vadd.f32 %v2050_v60, %v2048_v43  ;;  %2059 = vst.msk [vmem:[#allocation3 + $0x38] sm:$0xff] %vm1046_vm0, %v2055_v9  ;;  %v2097_v58 = vadd.f32 %v2094_v39, %v2086_v33  ;;  %v2687_v60 = vstv %s6175_s10  ;;  %v2702_v43 = vmul.f32 %v2701_v29, %v6186_v34  ;;  %s6333_s10 = sld [smem:[#allocation9 + $0x1d]] }
 0x202   : > { %v2080_v20 = vpop.permute.xlu1 %2079  ;;  %v2082_v6 = vpop.permute.xlu0 %2081  ;;  %v2688_v28 = vmul.f32 %v2687_v60, %v6186_v34  ;;  %v2689_v55 = vmul.f32 %v2687_v60, %v6194_v13  ;;  %v2156_v47 = vmul.f32 %v4658_v25, %v2155_v15  ;;  %v2723_v39 = vstv %s6199_s0  ;;  %v6254_v25 = vld [vmem:[#allocation3 + $0x18] sm:$0xff]  ;;  %s6351_s0 = sld [smem:[#allocation9 + $0x1f]] }
 0x203   : > { %v2056_v42 = vmax.f32 %v2053_v45, 0.0  ;;  %v2087_v11 = vadd.f32 %v2080_v20, %v2067_v24  ;;  %v2088_v52 = vadd.f32 %v2082_v6, %v2068_v2  ;;  %v6221_v2 = vld [vmem:[#allocation3 + $0x3] sm:$0xff]  ;;  %v2157_v45 = vmul.f32 %v4659_v36, %v2155_v15  ;;  %v6228_v20 = vld [vmem:[#allocation3 + $0xb] sm:$0x3f] }
 0x204   : > { %2658 = vrot.lane.b32.xlu1 %v2653_v32, %s4781_s29  ;;  %2678 = vrot.lane.b32.xlu0 %v2674_v12, %s4779_s11  ;;  %v2703_v33 = vmul.f32 %v2701_v29, %v6194_v13  ;;  %v2724_v35 = vmul.f32 %v2723_v39, %v6221_v2  ;;  %v4660_v12 = vld [vmem:[#allocation2 + $0x30] sm:$0xff]  ;;  %v2725_v60 = vmul.f32 %v2723_v39, %v6228_v20 }
 0x205   : > { %2060 = vst.msk [vmem:[#allocation3 + $0x40] sm:$0x1] %vm1049_vm1, %v2056_v42  ;;  %v2098_v22 = vadd.f32 %v2095_v53, %v2087_v11  ;;  %v2099_v19 = vadd.f32 %v2096_v21, %v2088_v52  ;;  %v2158_v42 = vmul.f32 %v2155_v15, %v5939_v14  ;;  %v2737_v11 = vstv %s6210_s14  ;;  %s6366_s14 = sld [smem:[#allocation9 + $0x21]] }
 0x206   : > { %v2109_v31 = vpop.permute.xlu1 %2108  ;;  %v2111_v41 = vpop.permute.xlu0 %2110  ;;  %v2187_v52 = vmul.f32 %v4660_v12, %v2186_v3 }
 0x207   : > { %v2117_v40 = vadd.f32 %v2109_v31, %v2097_v58  ;;  %v2118_v62 = vadd.f32 %v2111_v41, %v2098_v22  ;;  %v4661_v31 = vld [vmem:[#allocation2 + $0x38] sm:$0xff] }
 0x208   : > { %2680 = vrot.lane.b32.xlu1 %v2675_v46, %s4779_s11  ;;  %2692 = vrot.lane.b32.xlu0 %v2688_v28, %s4780_s24  ;;  %v2188_v46 = vmul.f32 %v4661_v31, %v2186_v3 }
 0x209   : > { %v2128_v49 = vadd.f32 %v2125_v16, %v2117_v40  ;;  %v2129_v61 = vadd.f32 %v2126_v37, %v2118_v62  ;;  %v2738_v16 = vmul.f32 %v2737_v11, %v6221_v2  ;;  %v2751_v40 = vstv %s6219_s15  ;;  %s6370_s15 = sld [smem:[#allocation7 + $0x7f]] }
 0x20a   : > { %v2113_v54 = vpop.permute.xlu1 %2112  ;;  %v2140_v1 = vpop.permute.xlu0 %2139  ;;  %v2217_v37 = vstv %s6223_s16  ;;  %v2739_v62 = vmul.f32 %v2737_v11, %v6228_v20  ;;  %v4664_v11 = vld [vmem:[#allocation2 + $0x48] sm:$0xff]  ;;  %s6376_s16 = sld [smem:[#allocation9 + $0x22]] }
 0x20b   : > { %v2119_v24 = vadd.f32 %v2113_v54, %v2099_v19  ;;  %v2148_v56 = vadd.f32 %v2140_v1, %v2128_v49  ;;  %v2189_v19 = vmul.f32 %v2186_v3, %v5960_v18  ;;  %v4662_v54 = vld [vmem:[#allocation2 + $0x31] sm:$0xff]  ;;  %v2220_v3 = vmul.f32 %v2217_v37, %v5974_v4 }
 0x20c   : > { %2694 = vrot.lane.b32.xlu1 %v2689_v55, %s4780_s24  ;;  %2706 = vrot.lane.b32.xlu0 %v2702_v43, %s4781_s29  ;;  %v2218_v18 = vmul.f32 %v4662_v54, %v2217_v37  ;;  %v2773_v55 = vstv %s6234_s17  ;;  %v6287_v54 = vld [vmem:[#allocation3 + $0x19] sm:$0xff]  ;;  %s6384_s17 = sld [smem:[#allocation9 + $0x23]] }
 0x20d   : > { %v2130_v17 = vadd.f32 %v2127_v51, %v2119_v24  ;;  %v2159_v58 = vadd.f32 %v2156_v47, %v2148_v56  ;;  %v2752_v51 = vmul.f32 %v2751_v40, %v6221_v2  ;;  %v4663_v47 = vld [vmem:[#allocation2 + $0x39] sm:$0xff]  ;;  %v2753_v56 = vmul.f32 %v2751_v40, %v6228_v20 }
 0x20e   : > { %v2142_v9 = vpop.permute.xlu1 %2141  ;;  %v2144_v32 = vpop.permute.xlu0 %2143  ;;  %v2219_v39 = vmul.f32 %v4663_v47, %v2217_v37  ;;  %v2279_v40 = vstv %s6256_s21  ;;  %s4452_s21 = sld [smem:[#allocation8 + $0x3]] }
 0x20f   : > { %v2149_v53 = vadd.f32 %v2142_v9, %v2129_v61  ;;  %v2150_v21 = vadd.f32 %v2144_v32, %v2130_v17  ;;  %v2248_v17 = vstv %s6238_s18  ;;  %s6386_s18 = sld [smem:[#allocation7 + $0x7d]] }
 0x210   : > { %2708 = vrot.lane.b32.xlu1 %v2703_v33, %s4781_s29  ;;  %2728 = vrot.lane.b32.xlu0 %v2724_v35, %s4779_s11  ;;  %v2774_v33 = vmul.f32 %v2773_v55, %v6254_v25 }
 0x211   : > { %v2160_v6 = vadd.f32 %v2157_v45, %v2149_v53  ;;  %v2161_v41 = vadd.f32 %v2158_v42, %v2150_v21  ;;  %v6261_v45 = vld [vmem:[#allocation3 + $0x20] sm:$0x3f]  ;;  %v2787_v53 = vstv %s6244_s19  ;;  %s6399_s19 = sld [smem:[#allocation9 + $0x25]] }
 0x212   : > { %v2171_v22 = vpop.permute.xlu1 %2170  ;;  %v2173_v14 = vpop.permute.xlu0 %2172 }
 0x213   : > { %v2179_v7 = vadd.f32 %v2171_v22, %v2159_v58  ;;  %v2180_v28 = vadd.f32 %v2173_v14, %v2160_v6  ;;  %v2249_v58 = vmul.f32 %v4664_v11, %v2248_v17  ;;  %v2775_v6 = vmul.f32 %v2773_v55, %v6261_v45  ;;  %v4665_v22 = vld [vmem:[#allocation2 + $0x50] sm:$0xff] }
 0x214   : > { %2730 = vrot.lane.b32.xlu1 %v2725_v60, %s4779_s11  ;;  %2742 = vrot.lane.b32.xlu0 %v2738_v16, %s4780_s24  ;;  %v2250_v60 = vmul.f32 %v4665_v22, %v2248_v17  ;;  %v2251_v14 = vmul.f32 %v2248_v17, %v5987_v30  ;;  %v2282_v17 = vmul.f32 %v2279_v40, %v6000_v57 }
 0x215   : > { %v2190_v38 = vadd.f32 %v2187_v52, %v2179_v7  ;;  %v2191_v24 = vadd.f32 %v2188_v46, %v2180_v28  ;;  %v2788_v52 = vmul.f32 %v2787_v53, %v6254_v25  ;;  %v2801_v7 = vstv %s6252_s20  ;;  %s6407_s20 = sld [smem:[#allocation9 + $0x26]] }
 0x216   : > { %v2175_v29 = vpop.permute.xlu1 %2174  ;;  %v2202_v15 = vpop.permute.xlu0 %2201  ;;  %v2802_v37 = vmul.f32 %v2801_v7, %v6254_v25 }
 0x217   : > { %v2181_v49 = vadd.f32 %v2175_v29, %v2161_v41  ;;  %v2210_v1 = vadd.f32 %v2202_v15, %v2190_v38  ;;  %v2789_v41 = vmul.f32 %v2787_v53, %v6261_v45  ;;  %v4666_v29 = vld [vmem:[#allocation2 + $0x49] sm:$0xff]  ;;  %v4668_v53 = vld [vmem:[#allocation2 + $0x60] sm:$0xff] }
 0x218   : > { %2744 = vrot.lane.b32.xlu1 %v2739_v62, %s4780_s24  ;;  %2756 = vrot.lane.b32.xlu0 %v2752_v51, %s4781_s29  ;;  %v2280_v30 = vmul.f32 %v4666_v29, %v2279_v40  ;;  %v2823_v62 = vstv %s6267_s2  ;;  %v6320_v29 = vld [vmem:[#allocation3 + $0x1a] sm:$0xff]  ;;  %s6417_s2 = sld [smem:[#allocation9 + $0x27]] }
 0x219   : > { %v2192_v43 = vadd.f32 %v2189_v19, %v2181_v49  ;;  %v2221_v32 = vadd.f32 %v2218_v18, %v2210_v1  ;;  %v4667_v18 = vld [vmem:[#allocation2 + $0x51] sm:$0xff]  ;;  %v2803_v1 = vmul.f32 %v2801_v7, %v6261_v45  ;;  %v2341_v7 = vstv %s6289_s25  ;;  %s6438_s25 = sld [smem:[#allocation9 + $0x4]] }
 0x21a   : > { %v2204_v61 = vpop.permute.xlu1 %2203  ;;  %v2206_v9 = vpop.permute.xlu0 %2205  ;;  %v2281_v55 = vmul.f32 %v4667_v18, %v2279_v40 }
 0x21b   : > { %v2211_v36 = vadd.f32 %v2204_v61, %v2191_v24  ;;  %v2212_v35 = vadd.f32 %v2206_v9, %v2192_v43  ;;  %v2310_v43 = vstv %s6271_s3  ;;  %s6423_s3 = sld [smem:[#allocation9]] }
 0x21c   : > { %2758 = vrot.lane.b32.xlu1 %v2753_v56, %s4781_s29  ;;  %2778 = vrot.lane.b32.xlu0 %v2774_v33, %s4779_s11  ;;  %v2824_v56 = vmul.f32 %v2823_v62, %v6287_v54 }
 0x21d   : > { %v2222_v42 = vadd.f32 %v2219_v39, %v2211_v36  ;;  %v2223_v16 = vadd.f32 %v2220_v3, %v2212_v35  ;;  %v6294_v39 = vld [vmem:[#allocation3 + $0x21] sm:$0x3f]  ;;  %v2837_v36 = vstv %s6277_s22  ;;  %s6429_s22 = sld [smem:[#allocation9 + $0x29]] }
 0x21e   : > { %v2233_v21 = vpop.permute.xlu1 %2232  ;;  %v2235_v4 = vpop.permute.xlu0 %2234 }
 0x21f   : > { %v2241_v12 = vadd.f32 %v2233_v21, %v2221_v32  ;;  %v2242_v31 = vadd.f32 %v2235_v4, %v2222_v42  ;;  %v2311_v32 = vmul.f32 %v4668_v53, %v2310_v43  ;;  %v2825_v42 = vmul.f32 %v2823_v62, %v6294_v39  ;;  %v4669_v21 = vld [vmem:[#allocation2 + $0x68] sm:$0xff] }
 0x220   : > { %2780 = vrot.lane.b32.xlu1 %v2775_v6, %s4779_s11  ;;  %2792 = vrot.lane.b32.xlu0 %v2788_v52, %s4780_s24  ;;  %v2312_v6 = vmul.f32 %v4669_v21, %v2310_v43  ;;  %v2313_v4 = vmul.f32 %v2310_v43, %v6012_v0  ;;  %v2344_v43 = vmul.f32 %v2341_v7, %v6025_v8 }
 0x221   : > { %v2252_v46 = vadd.f32 %v2249_v58, %v2241_v12  ;;  %v2253_v49 = vadd.f32 %v2250_v60, %v2242_v31  ;;  %v2838_v58 = vmul.f32 %v2837_v36, %v6287_v54  ;;  %v2851_v12 = vstv %s6285_s23  ;;  %s6436_s23 = sld [smem:[#allocation9 + $0x2a]] }
 0x222   : > { %v2237_v19 = vpop.permute.xlu1 %2236  ;;  %v2264_v38 = vpop.permute.xlu0 %2263  ;;  %v2852_v40 = vmul.f32 %v2851_v12, %v6287_v54 }
 0x223   : > { %v2243_v28 = vadd.f32 %v2237_v19, %v2223_v16  ;;  %v2272_v15 = vadd.f32 %v2264_v38, %v2252_v46  ;;  %v2839_v16 = vmul.f32 %v2837_v36, %v6294_v39  ;;  %v4670_v19 = vld [vmem:[#allocation2 + $0x61] sm:$0xff]  ;;  %v4672_v36 = vld [vmem:[#allocation2 + $0x78] sm:$0xff] }
 0x224   : > { %2794 = vrot.lane.b32.xlu1 %v2789_v41, %s4780_s24  ;;  %2806 = vrot.lane.b32.xlu0 %v2802_v37, %s4781_s29  ;;  %v2342_v0 = vmul.f32 %v4670_v19, %v2341_v7  ;;  %v2873_v41 = vstv %s6300_s26  ;;  %v6353_v19 = vld [vmem:[#allocation3 + $0x1b] sm:$0xff]  ;;  %s6449_s26 = sld [smem:[#allocation9 + $0x2b]] }
 0x225   : > { %v2254_v51 = vadd.f32 %v2251_v14, %v2243_v28  ;;  %v2283_v9 = vadd.f32 %v2280_v30, %v2272_v15  ;;  %v4671_v30 = vld [vmem:[#allocation2 + $0x69] sm:$0xff]  ;;  %v2853_v15 = vmul.f32 %v2851_v12, %v6294_v39  ;;  %v2403_v12 = vstv %s6322_s9  ;;  %s6483_s9 = sld [smem:[#allocation9 + $0x2f]] }
 0x226   : > { %v2266_v24 = vpop.permute.xlu1 %2265  ;;  %v2268_v61 = vpop.permute.xlu0 %2267  ;;  %v2343_v62 = vmul.f32 %v4671_v30, %v2341_v7 }
 0x227   : > { %v2273_v47 = vadd.f32 %v2266_v24, %v2253_v49  ;;  %v2274_v33 = vadd.f32 %v2268_v61, %v2254_v51  ;;  %v2372_v51 = vstv %s6304_s27  ;;  %s6462_s27 = sld [smem:[#allocation9 + $0x2d]] }
 0x228   : > { %2808 = vrot.lane.b32.xlu1 %v2803_v1, %s4781_s29  ;;  %2828 = vrot.lane.b32.xlu0 %v2824_v56, %s4779_s11  ;;  %v2874_v1 = vmul.f32 %v2873_v41, %v6320_v29 }
 0x229   : > { %v2284_v3 = vadd.f32 %v2281_v55, %v2273_v47  ;;  %v2285_v52 = vadd.f32 %v2282_v17, %v2274_v33  ;;  %v6327_v55 = vld [vmem:[#allocation3 + $0x22] sm:$0x3f]  ;;  %v2887_v47 = vstv %s6310_s28  ;;  %s6471_s28 = sld [smem:[#allocation9 + $0x2e]] }
 0x22a   : > { %v2295_v35 = vpop.permute.xlu1 %2294  ;;  %v2297_v57 = vpop.permute.xlu0 %2296 }
 0x22b   : > { %v2303_v11 = vadd.f32 %v2295_v35, %v2283_v9  ;;  %v2304_v22 = vadd.f32 %v2297_v57, %v2284_v3  ;;  %v2373_v9 = vmul.f32 %v4672_v36, %v2372_v51  ;;  %v2875_v3 = vmul.f32 %v2873_v41, %v6327_v55  ;;  %v4673_v35 = vld [vmem:[#allocation2 + $0x80] sm:$0xff] }
 0x22c   : > { %2830 = vrot.lane.b32.xlu1 %v2825_v42, %s4779_s11  ;;  %2842 = vrot.lane.b32.xlu0 %v2838_v58, %s4780_s24  ;;  %v2374_v42 = vmul.f32 %v4673_v35, %v2372_v51  ;;  %v2375_v57 = vmul.f32 %v2372_v51, %v6037_v10  ;;  %v2406_v51 = vmul.f32 %v2403_v12, %v6050_v63 }
 0x22d   : > { %v2314_v60 = vadd.f32 %v2311_v32, %v2303_v11  ;;  %v2315_v28 = vadd.f32 %v2312_v6, %v2304_v22  ;;  %v2888_v32 = vmul.f32 %v2887_v47, %v6320_v29  ;;  %v2901_v11 = vstv %s6318_s4  ;;  %s6475_s4 = sld [smem:[#allocation9 + $0x8]] }
 0x22e   : > { %v2299_v14 = vpop.permute.xlu1 %2298  ;;  %v2326_v46 = vpop.permute.xlu0 %2325  ;;  %v2902_v7 = vmul.f32 %v2901_v11, %v6320_v29 }
 0x22f   : > { %v2305_v31 = vadd.f32 %v2299_v14, %v2285_v52  ;;  %v2334_v38 = vadd.f32 %v2326_v46, %v2314_v60  ;;  %v2889_v52 = vmul.f32 %v2887_v47, %v6327_v55  ;;  %v4674_v14 = vld [vmem:[#allocation2 + $0x79] sm:$0xff]  ;;  %v4676_v47 = vld [vmem:[#allocation2 + $0x90] sm:$0xff] }
 0x230   : > { %2844 = vrot.lane.b32.xlu1 %v2839_v16, %s4780_s24  ;;  %2856 = vrot.lane.b32.xlu0 %v2852_v40, %s4781_s29  ;;  %v2404_v10 = vmul.f32 %v4674_v14, %v2403_v12  ;;  %v2923_v16 = vstv %s6333_s10  ;;  %v6388_v14 = vld [vmem:[#allocation3 + $0x30] sm:$0xff]  ;;  %s6492_s10 = sld [smem:[#allocation9 + $0x31]] }
 0x231   : > { %v2316_v37 = vadd.f32 %v2313_v4, %v2305_v31  ;;  %v2345_v61 = vadd.f32 %v2342_v0, %v2334_v38  ;;  %v4675_v0 = vld [vmem:[#allocation2 + $0x81] sm:$0xff]  ;;  %v2903_v38 = vmul.f32 %v2901_v11, %v6327_v55  ;;  %v2465_v11 = vstv %s6355_s1  ;;  %s6522_s1 = sld [smem:[#allocation9 + $0x35]] }
 0x232   : > { %v2328_v49 = vpop.permute.xlu1 %2327  ;;  %v2330_v24 = vpop.permute.xlu0 %2329  ;;  %v2405_v41 = vmul.f32 %v4675_v0, %v2403_v12 }
 0x233   : > { %v2335_v18 = vadd.f32 %v2328_v49, %v2315_v28  ;;  %v2336_v56 = vadd.f32 %v2330_v24, %v2316_v37  ;;  %v2434_v37 = vstv %s6337_s12  ;;  %s6501_s12 = sld [smem:[#allocation9 + $0x32]] }
 0x234   : > { %2858 = vrot.lane.b32.xlu1 %v2853_v15, %s4781_s29  ;;  %2878 = vrot.lane.b32.xlu0 %v2874_v1, %s4779_s11  ;;  %v2924_v15 = vmul.f32 %v2923_v16, %v6353_v19 }
 0x235   : > { %v2346_v17 = vadd.f32 %v2343_v62, %v2335_v18  ;;  %v2347_v58 = vadd.f32 %v2344_v43, %v2336_v56  ;;  %v6360_v62 = vld [vmem:[#allocation3 + $0x23] sm:$0x3f]  ;;  %v2937_v18 = vstv %s6343_s13  ;;  %s6505_s13 = sld [smem:[#allocation9 + $0xc]] }
 0x236   : > { %v2357_v33 = vpop.permute.xlu1 %2356  ;;  %v2359_v8 = vpop.permute.xlu0 %2358 }
 0x237   : > { %v2365_v53 = vadd.f32 %v2357_v33, %v2345_v61  ;;  %v2366_v21 = vadd.f32 %v2359_v8, %v2346_v17  ;;  %v2435_v61 = vmul.f32 %v4676_v47, %v2434_v37  ;;  %v2925_v17 = vmul.f32 %v2923_v16, %v6360_v62  ;;  %v4677_v33 = vld [vmem:[#allocation2 + $0x98] sm:$0xff] }
 0x238   : > { %2880 = vrot.lane.b32.xlu1 %v2875_v3, %s4779_s11  ;;  %2892 = vrot.lane.b32.xlu0 %v2888_v32, %s4780_s24  ;;  %v2436_v3 = vmul.f32 %v4677_v33, %v2434_v37  ;;  %v2437_v8 = vmul.f32 %v2434_v37, %v6062_v27  ;;  %v2468_v37 = vmul.f32 %v2465_v11, %v6075_v26 }
 0x239   : > { %v2376_v6 = vadd.f32 %v2373_v9, %v2365_v53  ;;  %v2377_v31 = vadd.f32 %v2374_v42, %v2366_v21  ;;  %v2938_v9 = vmul.f32 %v2937_v18, %v6353_v19  ;;  %v2951_v53 = vstv %s6351_s0  ;;  %s6513_s0 = sld [smem:[#allocation9 + $0x33]] }
 0x23a   : > { %v2361_v4 = vpop.permute.xlu1 %2360  ;;  %v2388_v60 = vpop.permute.xlu0 %2387  ;;  %v2952_v12 = vmul.f32 %v2951_v53, %v6353_v19 }
 0x23b   : > { %v2367_v22 = vadd.f32 %v2361_v4, %v2347_v58  ;;  %v2396_v46 = vadd.f32 %v2388_v60, %v2376_v6  ;;  %v2939_v58 = vmul.f32 %v2937_v18, %v6360_v62  ;;  %v4678_v4 = vld [vmem:[#allocation2 + $0x91] sm:$0xff]  ;;  %v4680_v18 = vld [vmem:[#allocation2 + $0xa8] sm:$0xff] }
 0x23c   : > { %2894 = vrot.lane.b32.xlu1 %v2889_v52, %s4780_s24  ;;  %2906 = vrot.lane.b32.xlu0 %v2902_v7, %s4781_s29  ;;  %v2466_v27 = vmul.f32 %v4678_v4, %v2465_v11  ;;  %v2973_v52 = vstv %s6366_s14  ;;  %s6531_s14 = sld [smem:[#allocation9 + $0x36]] }
 0x23d   : > { %v2378_v40 = vadd.f32 %v2375_v57, %v2367_v22  ;;  %v2407_v24 = vadd.f32 %v2404_v10, %v2396_v46  ;;  %v4679_v10 = vld [vmem:[#allocation2 + $0x99] sm:$0xff]  ;;  %v2953_v46 = vmul.f32 %v2951_v53, %v6360_v62 }
 0x23e   : > { %v2390_v28 = vpop.permute.xlu1 %2389  ;;  %v2392_v49 = vpop.permute.xlu0 %2391  ;;  %v2467_v16 = vmul.f32 %v4679_v10, %v2465_v11  ;;  %v6421_v10 = vld [vmem:[#allocation3 + $0x39] sm:$0x3f] }
 0x23f   : > { %v2397_v30 = vadd.f32 %v2390_v28, %v2377_v31  ;;  %v2398_v1 = vadd.f32 %v2392_v49, %v2378_v40  ;;  %v2496_v40 = vstv %s6370_s15  ;;  %s6535_s15 = sld [smem:[#allocation9 + $0x10]] }
 0x240   : > { %2908 = vrot.lane.b32.xlu1 %v2903_v38, %s4781_s29  ;;  %2928 = vrot.lane.b32.xlu0 %v2924_v15, %s4779_s11  ;;  %v2974_v38 = vmul.f32 %v2973_v52, %v6388_v14  ;;  %v2499_v53 = vmul.f32 %v2496_v40, %v6087_v59  ;;  %v6415_v59 = vld [vmem:[#allocation3 + $0x31] sm:$0xff] }
 0x241   : > { %v2408_v43 = vadd.f32 %v2405_v41, %v2397_v30  ;;  %v2409_v32 = vadd.f32 %v2406_v51, %v2398_v1  ;;  %v6393_v41 = vld [vmem:[#allocation3 + $0x38] sm:$0x3f]  ;;  %v2987_v30 = vstv %s6376_s16  ;;  %s6543_s16 = sld [smem:[#allocation9 + $0x41]] }
 0x242   : > { %v2419_v56 = vpop.permute.xlu1 %2418  ;;  %v2421_v63 = vpop.permute.xlu0 %2420  ;;  %v2988_v26 = vmul.f32 %v2987_v30, %v6388_v14 }
 0x243   : > { %v2427_v36 = vadd.f32 %v2419_v56, %v2407_v24  ;;  %v2428_v35 = vadd.f32 %v2421_v63, %v2408_v43  ;;  %v2497_v24 = vmul.f32 %v4680_v18, %v2496_v40  ;;  %v2975_v43 = vmul.f32 %v2973_v52, %v6393_v41  ;;  %v4681_v56 = vld [vmem:[#allocation2 + $0xb0] sm:$0xff] }
 0x244   : > { %2930 = vrot.lane.b32.xlu1 %v2925_v17, %s4779_s11  ;;  %2942 = vrot.lane.b32.xlu0 %v2938_v9, %s4780_s24  ;;  %v2498_v17 = vmul.f32 %v4681_v56, %v2496_v40  ;;  %v2527_v63 = vstv %s6386_s18  ;;  %s6561_s18 = sld [smem:[#allocation9 + $0x43]] }
 0x245   : > { %v2438_v42 = vadd.f32 %v2435_v61, %v2427_v36  ;;  %v2439_v22 = vadd.f32 %v2436_v3, %v2428_v35  ;;  %v3001_v36 = vstv %s6384_s17  ;;  %s6552_s17 = sld [smem:[#allocation9 + $0x42]] }
 0x246   : > { %v2423_v57 = vpop.permute.xlu1 %2422  ;;  %v2450_v6 = vpop.permute.xlu0 %2449  ;;  %v3002_v11 = vmul.f32 %v3001_v36, %v6388_v14 }
 0x247   : > { %v2429_v21 = vadd.f32 %v2423_v57, %v2409_v32  ;;  %v2458_v60 = vadd.f32 %v2450_v6, %v2438_v42  ;;  %v2989_v32 = vmul.f32 %v2987_v30, %v6393_v41  ;;  %v4682_v57 = vld [vmem:[#allocation2 + $0xa9] sm:$0xff] }
 0x248   : > { %2944 = vrot.lane.b32.xlu1 %v2939_v58, %s4780_s24  ;;  %2956 = vrot.lane.b32.xlu0 %v2952_v12, %s4781_s29  ;;  %v2528_v58 = vmul.f32 %v4682_v57, %v2527_v63  ;;  %v6455_v57 = vld [vmem:[#allocation3 + $0x3a] sm:$0x3f] }
 0x249   : > { %v2440_v7 = vadd.f32 %v2437_v8, %v2429_v21  ;;  %v2469_v49 = vadd.f32 %v2466_v27, %v2458_v60  ;;  %v3023_v21 = vstv %s6399_s19  ;;  %v4683_v27 = vld [vmem:[#allocation2 + $0xb1] sm:$0xff]  ;;  %v3003_v60 = vmul.f32 %v3001_v36, %v6393_v41  ;;  %s6565_s19 = sld [smem:[#allocation9 + $0x14]] }
 0x24a   : > { %v2452_v31 = vpop.permute.xlu1 %2451  ;;  %v2454_v28 = vpop.permute.xlu0 %2453  ;;  %v2529_v52 = vmul.f32 %v4683_v27, %v2527_v63  ;;  %v2569_v36 = vstv %s6423_s3  ;;  %s6595_s3 = sld [smem:[#allocation9 + $0x18]] }
 0x24b   : > { %v2459_v0 = vadd.f32 %v2452_v31, %v2439_v22  ;;  %v2460_v15 = vadd.f32 %v2454_v28, %v2440_v7  ;;  %v3024_v31 = vmul.f32 %v3023_v21, %v6415_v59  ;;  %v2530_v28 = vmul.f32 %v2527_v63, %v6104_v5 }
 0x24c   : > { %2958 = vrot.lane.b32.xlu1 %v2953_v46, %s4781_s29  ;;  %2978 = vrot.lane.b32.xlu0 %v2974_v38, %s4779_s11  ;;  %v3037_v46 = vstv %s6407_s20  ;;  %v3051_v5 = vstv %s6417_s2  ;;  %s6575_s20 = sld [smem:[#allocation9 + $0x45]]  ;;  %s6591_s2 = sld [smem:[#allocation9 + $0x47]] }
 0x24d   : > { %v2470_v51 = vadd.f32 %v2467_v16, %v2459_v0  ;;  %v2471_v9 = vadd.f32 %v2468_v37, %v2460_v15  ;;  %v2555_v37 = vstv %s4452_s21  ;;  %v3038_v18 = vmul.f32 %v3037_v46, %v6415_v59  ;;  %s6582_s21 = sld [smem:[#allocation9 + $0x46]] }
 0x24e   : > { %v2481_v1 = vpop.permute.xlu1 %2480  ;;  %v2483_v61 = vpop.permute.xlu0 %2482 }
 0x24f   : > { %v2489_v47 = vadd.f32 %v2481_v1, %v2469_v49  ;;  %v2490_v33 = vadd.f32 %v2483_v61, %v2470_v51  ;;  %v3025_v49 = vmul.f32 %v3023_v21, %v6421_v10  ;;  %v3039_v61 = vmul.f32 %v3037_v46, %v6421_v10 }
 0x250   : > { %2980 = vrot.lane.b32.xlu1 %v2975_v43, %s4779_s11  ;;  %2992 = vrot.lane.b32.xlu0 %v2988_v26, %s4780_s24 }
 0x251   : > { %v2500_v3 = vadd.f32 %v2497_v24, %v2489_v47  ;;  %v2501_v6 = vadd.f32 %v2498_v17, %v2490_v33 }
 0x252   : > { %v2485_v8 = vpop.permute.xlu1 %2484  ;;  %v2512_v42 = vpop.permute.xlu0 %2511 }
 0x253   : > { %v2491_v35 = vadd.f32 %v2485_v8, %v2471_v9  ;;  %v2520_v12 = vadd.f32 %v2512_v42, %v2500_v3  ;;  %v3052_v9 = vmul.f32 %v3051_v5, %v6415_v59  ;;  %v6447_v8 = vld [vmem:[#allocation3 + $0x32] sm:$0xff]  ;;  %v2570_v42 = vmul.f32 %v2569_v36, %v6117_v44 }
 0x254   : > { %2994 = vrot.lane.b32.xlu1 %v2989_v32, %s4780_s24  ;;  %3006 = vrot.lane.b32.xlu0 %v3002_v11, %s4781_s29  ;;  %v2617_v44 = vstv %s6438_s25  ;;  %s6623_s25 = sld [smem:[#allocation9 + $0x4b]] }
 0x255   : > { %v2502_v4 = vadd.f32 %v2499_v53, %v2491_v35  ;;  %v2531_v40 = vadd.f32 %v2528_v58, %v2520_v12  ;;  %v3073_v53 = vstv %s6429_s22  ;;  %v3053_v35 = vmul.f32 %v3051_v5, %v6421_v10  ;;  %s6605_s22 = sld [smem:[#allocation9 + $0x49]] }
 0x256   : > { %v2514_v22 = vpop.permute.xlu1 %2513  ;;  %v2516_v16 = vpop.permute.xlu0 %2515  ;;  %v3074_v21 = vmul.f32 %v3073_v53, %v6447_v8 }
 0x257   : > { %v2521_v7 = vadd.f32 %v2514_v22, %v2501_v6  ;;  %v2522_v0 = vadd.f32 %v2516_v16, %v2502_v4  ;;  %v2571_v6 = vmul.f32 %v2569_v36, %v6122_v48  ;;  %v3087_v4 = vstv %s6436_s23  ;;  %s6612_s23 = sld [smem:[#allocation9 + $0x4a]] }
 0x258   : > { %3008 = vrot.lane.b32.xlu1 %v3003_v60, %s4781_s29  ;;  %3028 = vrot.lane.b32.xlu0 %v3024_v31, %s4779_s11  ;;  %v3088_v48 = vmul.f32 %v3087_v4, %v6447_v8  ;;  %v2618_v16 = vmul.f32 %v2617_v44, %v6153_v23 }
 0x259   : > { %v2532_v38 = vadd.f32 %v2529_v52, %v2521_v7  ;;  %v2533_v1 = vadd.f32 %v2530_v28, %v2522_v0  ;;  %v3075_v52 = vmul.f32 %v3073_v53, %v6455_v57  ;;  %v3089_v28 = vmul.f32 %v3087_v4, %v6455_v57 }
 0x25a   : > { %v2543_v30 = vpop.permute.xlu1 %2542  ;;  %v2545_v51 = vpop.permute.xlu0 %2544 }
 0x25b   : > { %v2551_v15 = vadd.f32 %v2543_v30, %v2531_v40  ;;  %v2552_v43 = vadd.f32 %v2545_v51, %v2532_v38  ;;  %v3101_v40 = vstv %s6449_s26  ;;  %v2619_v38 = vmul.f32 %v2617_v44, %v6158_v50  ;;  %v6487_v50 = vld [vmem:[#allocation3 + $0x3b] sm:$0x3f]  ;;  %s6627_s26 = sld [smem:[#allocation9 + $0x1c]] }
 0x25c   : > { %3030 = vrot.lane.b32.xlu1 %v3025_v49, %s4779_s11  ;;  %3042 = vrot.lane.b32.xlu0 %v3038_v18, %s4780_s24  ;;  %v3102_v49 = vmul.f32 %v3101_v40, %v6447_v8  ;;  %v3123_v51 = vstv %s6462_s27  ;;  %v6481_v18 = vld [vmem:[#allocation3 + $0x33] sm:$0xff]  ;;  %v3173_v44 = vstv %s6492_s10  ;;  %s6635_s27 = sld [smem:[#allocation9 + $0x4d]]  ;;  %s6665_s10 = sld [smem:[#allocation9 + $0x51]] }
 0x25d   : > { %v2556_v24 = vadd.f32 %v2555_v37, %v2551_v15  ;;  %v2557_v17 = vadd.f32 %v2555_v37, %v2552_v43  ;;  %v3124_v5 = vmul.f32 %v3123_v51, %v6481_v18 }
 0x25e   : > { %v2547_v47 = vpop.permute.xlu1 %2546  ;;  %v2579_v63 = vpop.permute.xlu0 %2578 }
 0x25f   : > { %v2559_v26 = vmax.f32 %v2556_v24, 0.0  ;;  %v2553_v56 = vadd.f32 %v2547_v47, %v2533_v1  ;;  %v2560_v3 = vmax.f32 %v2557_v17, 0.0  ;;  %v2584_v12 = vadd.f32 %v2579_v63, %v2570_v42 }
 0x260   : > { %3044 = vrot.lane.b32.xlu1 %v3039_v61, %s4780_s24  ;;  %3056 = vrot.lane.b32.xlu0 %v3052_v9, %s4781_s29  ;;  %v3103_v1 = vmul.f32 %v3101_v40, %v6455_v57  ;;  %v3137_v61 = vstv %s6471_s28  ;;  %v2667_v17 = vstv %s6475_s4  ;;  %s6642_s28 = sld [smem:[#allocation9 + $0x4e]]  ;;  %s6653_s4 = sld [smem:[#allocation9 + $0x4f]] }
 0x261   : > { %2563 = vst.msk [vmem:[#allocation3 + $0x48] sm:$0xff] %vm1046_vm0, %v2559_v26  ;;  %v2558_v33 = vadd.f32 %v2555_v37, %v2553_v56  ;;  %2564 = vst.msk [vmem:[#allocation3 + $0x50] sm:$0xff] %vm1046_vm0, %v2560_v3  ;;  %v3125_v56 = vmul.f32 %v3123_v51, %v6487_v50  ;;  %v2668_v53 = vmul.f32 %v2667_v17, %v6186_v34  ;;  %v2717_v40 = vstv %s6505_s13  ;;  %s6683_s13 = sld [smem:[#allocation9 + $0x53]] }
 0x262   : > { %v2581_v32 = vpop.permute.xlu1 %2580  ;;  %v2593_v58 = vpop.permute.xlu0 %2592 }
 0x263   : > { %v2561_v11 = vmax.f32 %v2558_v33, 0.0  ;;  %v2585_v22 = vadd.f32 %v2581_v32, %v2571_v6  ;;  %v2598_v60 = vadd.f32 %v2593_v58, %v2584_v12  ;;  %v3138_v33 = vmul.f32 %v3137_v61, %v6481_v18 }
 0x264   : > { %3058 = vrot.lane.b32.xlu1 %v3053_v35, %s4781_s29  ;;  %3078 = vrot.lane.b32.xlu0 %v3074_v21, %s4779_s11  ;;  %v3151_v35 = vstv %s6483_s9  ;;  %v2669_v58 = vmul.f32 %v2667_v17, %v6194_v13  ;;  %s6657_s9 = sld [smem:[#allocation9 + $0x20]] }
 0x265   : > { %2565 = vst.msk [vmem:[#allocation3 + $0x58] sm:$0x1] %vm1049_vm1, %v2561_v11  ;;  %v3139_v11 = vmul.f32 %v3137_v61, %v6487_v50  ;;  %v3152_v34 = vmul.f32 %v3151_v35, %v6481_v18 }
 0x266   : > { %v2595_v27 = vpop.permute.xlu1 %2594  ;;  %v2607_v7 = vpop.permute.xlu0 %2606 }
 0x267   : > { %v2599_v31 = vadd.f32 %v2595_v27, %v2585_v22  ;;  %v2612_v46 = vadd.f32 %v2607_v7, %v2598_v60  ;;  %v3153_v22 = vmul.f32 %v3151_v35, %v6487_v50  ;;  %v2767_v35 = vstv %s6535_s15  ;;  %s6713_s15 = sld [smem:[#allocation9 + $0x57]] }
 0x268   : > { %3080 = vrot.lane.b32.xlu1 %v3075_v52, %s4779_s11  ;;  %3092 = vrot.lane.b32.xlu0 %v3088_v48, %s4780_s24  ;;  %v6511_v27 = vld [vmem:[#allocation3 + $0x48] sm:$0xff]  ;;  %v6517_v13 = vld [vmem:[#allocation3 + $0x50] sm:$0x3f] }
 0x269   : > { %v2620_v30 = vadd.f32 %v2618_v16, %v2612_v46  ;;  %v3174_v7 = vmul.f32 %v3173_v44, %v6511_v27  ;;  %v3187_v16 = vstv %s6501_s12  ;;  %v3175_v46 = vmul.f32 %v3173_v44, %v6517_v13  ;;  %s6672_s12 = sld [smem:[#allocation9 + $0x52]] }
 0x26a   : > { %v2609_v0 = vpop.permute.xlu1 %2608  ;;  %v2629_v23 = vpop.permute.xlu0 %2628 }
 0x26b   : > { %v2613_v37 = vadd.f32 %v2609_v0, %v2599_v31  ;;  %v2634_v47 = vadd.f32 %v2629_v23, %v2620_v30  ;;  %v2718_v23 = vmul.f32 %v2717_v40, %v6221_v2 }
 0x26c   : > { %3094 = vrot.lane.b32.xlu1 %v3089_v28, %s4780_s24  ;;  %3106 = vrot.lane.b32.xlu0 %v3102_v49, %s4781_s29 }
 0x26d   : > { %v2621_v15 = vadd.f32 %v2619_v38, %v2613_v37  ;;  %v3188_v37 = vmul.f32 %v3187_v16, %v6511_v27 }
 0x26e   : > { %v2631_v24 = vpop.permute.xlu1 %2630  ;;  %v2643_v43 = vpop.permute.xlu0 %2642 }
 0x26f   : > { %v2635_v36 = vadd.f32 %v2631_v24, %v2621_v15  ;;  %v2648_v63 = vadd.f32 %v2643_v43, %v2634_v47  ;;  %v3201_v15 = vstv %s6513_s0  ;;  %v3189_v24 = vmul.f32 %v3187_v16, %v6517_v13  ;;  %v6571_v16 = vld [vmem:[#allocation3] sm:$0xff]  ;;  %s6687_s0 = sld [smem:[#allocation9 + $0x24]] }
 0x270   : > { %3108 = vrot.lane.b32.xlu1 %v3103_v1, %s4781_s29  ;;  %3128 = vrot.lane.b32.xlu0 %v3124_v5, %s4779_s11  ;;  %v2719_v1 = vmul.f32 %v2717_v40, %v6228_v20  ;;  %v3202_v2 = vmul.f32 %v3201_v15, %v6511_v27  ;;  %v6547_v20 = vld [vmem:[#allocation3 + $0x51] sm:$0x3f]  ;;  %v3411_v40 = vstv %s6552_s17  ;;  %s6725_s17 = sld [smem:[#allocation9 + $0x59]] }
 0x272   : > { %v2645_v26 = vpop.permute.xlu1 %2644  ;;  %v2657_v9 = vpop.permute.xlu0 %2656 }
 0x273   : > { %v2649_v3 = vadd.f32 %v2645_v26, %v2635_v36  ;;  %v2662_v32 = vadd.f32 %v2657_v9, %v2648_v63  ;;  %v3223_v26 = vstv %s6522_s1  ;;  %v3203_v36 = vmul.f32 %v3201_v15, %v6517_v13  ;;  %s6695_s1 = sld [smem:[#allocation9 + $0x55]] }
 0x274   : > { %3130 = vrot.lane.b32.xlu1 %v3125_v56, %s4779_s11  ;;  %3142 = vrot.lane.b32.xlu0 %v3138_v33, %s4780_s24  ;;  %v6541_v56 = vld [vmem:[#allocation3 + $0x49] sm:$0xff]  ;;  %v2817_v15 = vstv %s6565_s19  ;;  %s6743_s19 = sld [smem:[#allocation9 + $0x5b]] }
 0x275   : > { %v2670_v6 = vadd.f32 %v2668_v53, %v2662_v32  ;;  %v3224_v9 = vmul.f32 %v3223_v26, %v6541_v56  ;;  %v3225_v32 = vmul.f32 %v3223_v26, %v6547_v20 }
 0x276   : > { %v2659_v42 = vpop.permute.xlu1 %2658  ;;  %v2679_v12 = vpop.permute.xlu0 %2678 }
 0x277   : > { %v2663_v21 = vadd.f32 %v2659_v42, %v2649_v3  ;;  %v2684_v48 = vadd.f32 %v2679_v12, %v2670_v6  ;;  %v3237_v3 = vstv %s6531_s14  ;;  %v2768_v12 = vmul.f32 %v2767_v35, %v6254_v25  ;;  %s6702_s14 = sld [smem:[#allocation9 + $0x56]] }
 0x278   : > { %3144 = vrot.lane.b32.xlu1 %v3139_v11, %s4780_s24  ;;  %3156 = vrot.lane.b32.xlu0 %v3152_v34, %s4781_s29 }
 0x279   : > { %v2671_v4 = vadd.f32 %v2669_v58, %v2663_v21  ;;  %v3238_v21 = vmul.f32 %v3237_v3, %v6541_v56 }
 0x27a   : > { %v2681_v52 = vpop.permute.xlu1 %2680  ;;  %v2693_v60 = vpop.permute.xlu0 %2692 }
 0x27b   : > { %v2685_v0 = vadd.f32 %v2681_v52, %v2671_v4  ;;  %v2698_v28 = vadd.f32 %v2693_v60, %v2684_v48  ;;  %v3397_v4 = vstv %s6543_s16  ;;  %v3239_v52 = vmul.f32 %v3237_v3, %v6547_v20  ;;  %v6601_v3 = vld [vmem:[#allocation3 + $0x1] sm:$0xff]  ;;  %s6717_s16 = sld [smem:[#allocation9 + $0x28]] }
 0x27c   : > { %3158 = vrot.lane.b32.xlu1 %v3153_v22, %s4781_s29  ;;  %3178 = vrot.lane.b32.xlu0 %v3174_v7, %s4779_s11  ;;  %v6567_v22 = vld [vmem:[#allocation3 + $0x8] sm:$0x3f]  ;;  %v2769_v7 = vmul.f32 %v2767_v35, %v6261_v45  ;;  %v3461_v35 = vstv %s6582_s21  ;;  %s6755_s21 = sld [smem:[#allocation9 + $0x5d]] }
 0x27e   : > { %v2695_v31 = vpop.permute.xlu1 %2694  ;;  %v2707_v38 = vpop.permute.xlu0 %2706 }
 0x27f   : > { %v2699_v30 = vadd.f32 %v2695_v31, %v2685_v0  ;;  %v2712_v49 = vadd.f32 %v2707_v38, %v2698_v28  ;;  %v3398_v31 = vmul.f32 %v6571_v16, %v3397_v4  ;;  %v3399_v28 = vmul.f32 %v3397_v4, %v6567_v22 }
 0x280   : > { %3180 = vrot.lane.b32.xlu1 %v3175_v46, %s4779_s11  ;;  %3192 = vrot.lane.b32.xlu0 %v3188_v37, %s4780_s24  ;;  %v3412_v38 = vmul.f32 %v6571_v16, %v3411_v40  ;;  %v2867_v4 = vstv %s6595_s3  ;;  %s6773_s3 = sld [smem:[#allocation9 + $0x5f]] }
 0x281   : > { %v2720_v5 = vadd.f32 %v2718_v23, %v2712_v49  ;;  %v3413_v49 = vmul.f32 %v3411_v40, %v6567_v22  ;;  %v6621_v40 = vld [vmem:[#allocation3 + $0x2] sm:$0xff] }
 0x282   : > { %v2709_v51 = vpop.permute.xlu1 %2708  ;;  %v2729_v47 = vpop.permute.xlu0 %2728 }
 0x283   : > { %v2713_v43 = vadd.f32 %v2709_v51, %v2699_v30  ;;  %v2734_v33 = vadd.f32 %v2729_v47, %v2720_v5  ;;  %v3425_v30 = vstv %s6561_s18  ;;  %v2818_v47 = vmul.f32 %v2817_v15, %v6287_v54  ;;  %s6732_s18 = sld [smem:[#allocation9 + $0x5a]] }
 0x284   : > { %3194 = vrot.lane.b32.xlu1 %v3189_v24, %s4780_s24  ;;  %3206 = vrot.lane.b32.xlu0 %v3202_v2, %s4781_s29 }
 0x285   : > { %v2721_v61 = vadd.f32 %v2719_v1, %v2713_v43  ;;  %v3426_v43 = vmul.f32 %v6571_v16, %v3425_v30 }
 0x286   : > { %v2731_v17 = vpop.permute.xlu1 %2730  ;;  %v2743_v63 = vpop.permute.xlu0 %2742 }
 0x287   : > { %v2735_v42 = vadd.f32 %v2731_v17, %v2721_v61  ;;  %v2748_v11 = vadd.f32 %v2743_v63, %v2734_v33  ;;  %v3447_v61 = vstv %s6575_s20  ;;  %v3427_v17 = vmul.f32 %v3425_v30, %v6567_v22  ;;  %v6630_v30 = vld [vmem:[#allocation3 + $0xa] sm:$0x3f]  ;;  %s6747_s20 = sld [smem:[#allocation9 + $0x2c]] }
 0x288   : > { %3208 = vrot.lane.b32.xlu1 %v3203_v36, %s4781_s29  ;;  %3228 = vrot.lane.b32.xlu0 %v3224_v9, %s4779_s11  ;;  %v6597_v36 = vld [vmem:[#allocation3 + $0x9] sm:$0x3f]  ;;  %v2819_v63 = vmul.f32 %v2817_v15, %v6294_v39  ;;  %v3511_v15 = vstv %s6612_s23  ;;  %s6785_s23 = sld [smem:[#allocation9 + $0x61]] }
 0x28a   : > { %v2745_v53 = vpop.permute.xlu1 %2744  ;;  %v2757_v58 = vpop.permute.xlu0 %2756 }
 0x28b   : > { %v2749_v6 = vadd.f32 %v2745_v53, %v2735_v42  ;;  %v2762_v34 = vadd.f32 %v2757_v58, %v2748_v11  ;;  %v3448_v53 = vmul.f32 %v6601_v3, %v3447_v61  ;;  %v3449_v11 = vmul.f32 %v3447_v61, %v6597_v36 }
 0x28c   : > { %3230 = vrot.lane.b32.xlu1 %v3225_v32, %s4779_s11  ;;  %3242 = vrot.lane.b32.xlu0 %v3238_v21, %s4780_s24  ;;  %v3462_v58 = vmul.f32 %v6601_v3, %v3461_v35  ;;  %v2917_v61 = vstv %s6627_s26  ;;  %s6803_s26 = sld [smem:[#allocation9 + $0x63]] }
 0x28d   : > { %v2770_v48 = vadd.f32 %v2768_v12, %v2762_v34  ;;  %v3463_v34 = vmul.f32 %v3461_v35, %v6597_v36  ;;  %v6651_v35 = vld [vmem:[#allocation3 + $0x3] sm:$0xff] }
 0x28e   : > { %v2759_v44 = vpop.permute.xlu1 %2758  ;;  %v2779_v25 = vpop.permute.xlu0 %2778 }
 0x28f   : > { %v2763_v60 = vadd.f32 %v2759_v44, %v2749_v6  ;;  %v2784_v37 = vadd.f32 %v2779_v25, %v2770_v48  ;;  %v3475_v6 = vstv %s6591_s2  ;;  %s6762_s2 = sld [smem:[#allocation9 + $0x5e]] }
 0x290   : > { %3244 = vrot.lane.b32.xlu1 %v3239_v52, %s4780_s24  ;;  %3402 = vrot.lane.b32.xlu0 %v3398_v31, %s4779_s11  ;;  %v2868_v31 = vmul.f32 %v2867_v4, %v6320_v29 }
 0x291   : > { %v2771_v46 = vadd.f32 %v2769_v7, %v2763_v60  ;;  %v3476_v7 = vmul.f32 %v6601_v3, %v3475_v6 }
 0x292   : > { %v2781_v0 = vpop.permute.xlu1 %2780  ;;  %v2793_v45 = vpop.permute.xlu0 %2792 }
 0x293   : > { %v2785_v51 = vadd.f32 %v2781_v0, %v2771_v46  ;;  %v2798_v24 = vadd.f32 %v2793_v45, %v2784_v37  ;;  %v3497_v46 = vstv %s6605_s22  ;;  %s6777_s22 = sld [smem:[#allocation9 + $0x30]] }
 0x294   : > { %3404 = vrot.lane.b32.xlu1 %v3399_v28, %s4779_s11  ;;  %3416 = vrot.lane.b32.xlu0 %v3412_v38, %s4780_s24  ;;  %v3477_v28 = vmul.f32 %v3475_v6, %v6597_v36  ;;  %v2869_v38 = vmul.f32 %v2867_v4, %v6327_v55  ;;  %v6660_v6 = vld [vmem:[#allocation3 + $0xb] sm:$0x3f]  ;;  %v3561_v4 = vstv %s6642_s28  ;;  %s6815_s28 = sld [smem:[#allocation9 + $0x65]] }
 0x296   : > { %v2795_v23 = vpop.permute.xlu1 %2794  ;;  %v2807_v1 = vpop.permute.xlu0 %2806 }
 0x297   : > { %v2799_v5 = vadd.f32 %v2795_v23, %v2785_v51  ;;  %v2812_v2 = vadd.f32 %v2807_v1, %v2798_v24  ;;  %v3498_v23 = vmul.f32 %v3497_v46, %v6621_v40  ;;  %v3499_v24 = vmul.f32 %v3497_v46, %v6630_v30 }
 0x298   : > { %3418 = vrot.lane.b32.xlu1 %v3413_v49, %s4780_s24  ;;  %3430 = vrot.lane.b32.xlu0 %v3426_v43, %s4781_s29  ;;  %v3512_v1 = vmul.f32 %v3511_v15, %v6621_v40  ;;  %v2967_v46 = vstv %s6657_s9  ;;  %s6833_s9 = sld [smem:[#allocation9 + $0x67]] }
 0x299   : > { %v2820_v33 = vadd.f32 %v2818_v47, %v2812_v2  ;;  %v3513_v2 = vmul.f32 %v3511_v15, %v6630_v30  ;;  %v6681_v15 = vld [vmem:[#allocation3 + $0x18] sm:$0xff] }
 0x29a   : > { %v2809_v26 = vpop.permute.xlu1 %2808  ;;  %v2829_v54 = vpop.permute.xlu0 %2828 }
 0x29b   : > { %v2813_v9 = vadd.f32 %v2809_v26, %v2799_v5  ;;  %v2834_v21 = vadd.f32 %v2829_v54, %v2820_v33  ;;  %v3525_v5 = vstv %s6623_s25  ;;  %s6792_s25 = sld [smem:[#allocation9 + $0x62]] }
 0x29c   : > { %3432 = vrot.lane.b32.xlu1 %v3427_v17, %s4781_s29  ;;  %3452 = vrot.lane.b32.xlu0 %v3448_v53, %s4779_s11  ;;  %v2918_v53 = vmul.f32 %v2917_v61, %v6353_v19 }
 0x29d   : > { %v2821_v32 = vadd.f32 %v2819_v63, %v2813_v9  ;;  %v3526_v9 = vmul.f32 %v3525_v5, %v6621_v40 }
 0x29e   : > { %v2831_v42 = vpop.permute.xlu1 %2830  ;;  %v2843_v39 = vpop.permute.xlu0 %2842 }
 0x29f   : > { %v2835_v44 = vadd.f32 %v2831_v42, %v2821_v32  ;;  %v2848_v52 = vadd.f32 %v2843_v39, %v2834_v21  ;;  %v3547_v32 = vstv %s6635_s27  ;;  %s6807_s27 = sld [smem:[#allocation9 + $0x34]] }
 0x2a0   : > { %3454 = vrot.lane.b32.xlu1 %v3449_v11, %s4779_s11  ;;  %3466 = vrot.lane.b32.xlu0 %v3462_v58, %s4780_s24  ;;  %v3527_v11 = vmul.f32 %v3525_v5, %v6630_v30  ;;  %v2919_v58 = vmul.f32 %v2917_v61, %v6360_v62  ;;  %v6690_v5 = vld [vmem:[#allocation3 + $0x20] sm:$0x3f]  ;;  %v3611_v61 = vstv %s6672_s12  ;;  %s6851_s12 = sld [smem:[#allocation9 + $0x69]] }
 0x2a2   : > { %v2845_v12 = vpop.permute.xlu1 %2844  ;;  %v2857_v60 = vpop.permute.xlu0 %2856 }
 0x2a3   : > { %v2849_v48 = vadd.f32 %v2845_v12, %v2835_v44  ;;  %v2862_v25 = vadd.f32 %v2857_v60, %v2848_v52  ;;  %v3548_v12 = vmul.f32 %v3547_v32, %v6651_v35  ;;  %v3549_v52 = vmul.f32 %v3547_v32, %v6660_v6 }
 0x2a4   : > { %3468 = vrot.lane.b32.xlu1 %v3463_v34, %s4780_s24  ;;  %3480 = vrot.lane.b32.xlu0 %v3476_v7, %s4781_s29  ;;  %v3562_v60 = vmul.f32 %v3561_v4, %v6651_v35  ;;  %v3017_v32 = vstv %s6687_s0  ;;  %s6864_s0 = sld [smem:[#allocation9 + $0x44]] }
 0x2a5   : > { %v2870_v37 = vadd.f32 %v2868_v31, %v2862_v25  ;;  %v3563_v31 = vmul.f32 %v3561_v4, %v6660_v6  ;;  %v6711_v4 = vld [vmem:[#allocation3 + $0x19] sm:$0xff] }
 0x2a6   : > { %v2859_v0 = vpop.permute.xlu1 %2858  ;;  %v2879_v29 = vpop.permute.xlu0 %2878 }
 0x2a7   : > { %v2863_v45 = vadd.f32 %v2859_v0, %v2849_v48  ;;  %v2884_v43 = vadd.f32 %v2879_v29, %v2870_v37  ;;  %v3575_v48 = vstv %s6653_s4  ;;  %s6822_s4 = sld [smem:[#allocation9 + $0x66]] }
 0x2a8   : > { %3482 = vrot.lane.b32.xlu1 %v3477_v28, %s4781_s29  ;;  %3502 = vrot.lane.b32.xlu0 %v3498_v23, %s4779_s11  ;;  %v2968_v23 = vmul.f32 %v2967_v46, %v6388_v14 }
 0x2a9   : > { %v2871_v49 = vadd.f32 %v2869_v38, %v2863_v45  ;;  %v3576_v38 = vmul.f32 %v3575_v48, %v6651_v35 }
 0x2aa   : > { %v2881_v51 = vpop.permute.xlu1 %2880  ;;  %v2893_v55 = vpop.permute.xlu0 %2892 }
 0x2ab   : > { %v2885_v26 = vadd.f32 %v2881_v51, %v2871_v49  ;;  %v2898_v17 = vadd.f32 %v2893_v55, %v2884_v43  ;;  %v3597_v49 = vstv %s6665_s10  ;;  %s6842_s10 = sld [smem:[#allocation9 + $0x40]] }
 0x2ac   : > { %3504 = vrot.lane.b32.xlu1 %v3499_v24, %s4779_s11  ;;  %3516 = vrot.lane.b32.xlu0 %v3512_v1, %s4780_s24  ;;  %v3577_v24 = vmul.f32 %v3575_v48, %v6660_v6  ;;  %v2969_v1 = vmul.f32 %v2967_v46, %v6393_v41  ;;  %v6720_v48 = vld [vmem:[#allocation3 + $0x21] sm:$0x3f]  ;;  %v3661_v46 = vstv %s6702_s14  ;;  %s6887_s14 = sld [smem:[#allocation9 + $0x6d]] }
 0x2ae   : > { %v2895_v47 = vpop.permute.xlu1 %2894  ;;  %v2907_v63 = vpop.permute.xlu0 %2906 }
 0x2af   : > { %v2899_v33 = vadd.f32 %v2895_v47, %v2885_v26  ;;  %v2912_v54 = vadd.f32 %v2907_v63, %v2898_v17  ;;  %v3598_v47 = vmul.f32 %v3597_v49, %v6681_v15  ;;  %v3599_v17 = vmul.f32 %v3597_v49, %v6690_v5 }
 0x2b0   : > { %3518 = vrot.lane.b32.xlu1 %v3513_v2, %s4780_s24  ;;  %3530 = vrot.lane.b32.xlu0 %v3526_v9, %s4781_s29  ;;  %v3612_v63 = vmul.f32 %v3611_v61, %v6681_v15  ;;  %v3067_v49 = vstv %s6717_s16  ;;  %s6900_s16 = sld [smem:[#allocation9 + $0x48]] }
 0x2b1   : > { %v2920_v21 = vadd.f32 %v2918_v53, %v2912_v54  ;;  %v3613_v53 = vmul.f32 %v3611_v61, %v6690_v5  ;;  %v6741_v61 = vld [vmem:[#allocation3 + $0x1a] sm:$0xff] }
 0x2b2   : > { %v2909_v42 = vpop.permute.xlu1 %2908  ;;  %v2929_v19 = vpop.permute.xlu0 %2928 }
 0x2b3   : > { %v2913_v39 = vadd.f32 %v2909_v42, %v2899_v33  ;;  %v2934_v7 = vadd.f32 %v2929_v19, %v2920_v21  ;;  %v3625_v33 = vstv %s6683_s13  ;;  %s6862_s13 = sld [smem:[#allocation9 + $0x6a]] }
 0x2b4   : > { %3532 = vrot.lane.b32.xlu1 %v3527_v11, %s4781_s29  ;;  %3552 = vrot.lane.b32.xlu0 %v3548_v12, %s4779_s11  ;;  %v3018_v12 = vmul.f32 %v3017_v32, %v6415_v59 }
 0x2b5   : > { %v2921_v34 = vadd.f32 %v2919_v58, %v2913_v39  ;;  %v3626_v58 = vmul.f32 %v3625_v33, %v6681_v15 }
 0x2b6   : > { %v2931_v44 = vpop.permute.xlu1 %2930  ;;  %v2943_v62 = vpop.permute.xlu0 %2942 }
 0x2b7   : > { %v2935_v0 = vadd.f32 %v2931_v44, %v2921_v34  ;;  %v2948_v28 = vadd.f32 %v2943_v62, %v2934_v7  ;;  %v3647_v34 = vstv %s6695_s1  ;;  %s6874_s1 = sld [smem:[#allocation9 + $0x6b]] }
 0x2b8   : > { %3554 = vrot.lane.b32.xlu1 %v3549_v52, %s4779_s11  ;;  %3566 = vrot.lane.b32.xlu0 %v3562_v60, %s4780_s24  ;;  %v3627_v52 = vmul.f32 %v3625_v33, %v6690_v5  ;;  %v3019_v60 = vmul.f32 %v3017_v32, %v6421_v10  ;;  %v6750_v33 = vld [vmem:[#allocation3 + $0x22] sm:$0x3f]  ;;  %v3711_v32 = vstv %s6732_s18  ;;  %s6917_s18 = sld [smem:[#allocation9 + $0x71]] }
 0x2ba   : > { %v2945_v25 = vpop.permute.xlu1 %2944  ;;  %v2957_v45 = vpop.permute.xlu0 %2956 }
 0x2bb   : > { %v2949_v37 = vadd.f32 %v2945_v25, %v2935_v0  ;;  %v2962_v29 = vadd.f32 %v2957_v45, %v2948_v28  ;;  %v3648_v25 = vmul.f32 %v3647_v34, %v6711_v4  ;;  %v3649_v28 = vmul.f32 %v3647_v34, %v6720_v48 }
 0x2bc   : > { %3568 = vrot.lane.b32.xlu1 %v3563_v31, %s4780_s24  ;;  %3580 = vrot.lane.b32.xlu0 %v3576_v38, %s4781_s29  ;;  %v3662_v45 = vmul.f32 %v3661_v46, %v6711_v4  ;;  %v3117_v34 = vstv %s6747_s20  ;;  %s6930_s20 = sld [smem:[#allocation9 + $0x4c]] }
 0x2bd   : > { %v2970_v43 = vadd.f32 %v2968_v23, %v2962_v29  ;;  %v3663_v23 = vmul.f32 %v3661_v46, %v6720_v48  ;;  %v6771_v46 = vld [vmem:[#allocation3 + $0x1b] sm:$0xff] }
 0x2be   : > { %v2959_v51 = vpop.permute.xlu1 %2958  ;;  %v2979_v14 = vpop.permute.xlu0 %2978 }
 0x2bf   : > { %v2963_v55 = vadd.f32 %v2959_v51, %v2949_v37  ;;  %v2984_v9 = vadd.f32 %v2979_v14, %v2970_v43  ;;  %v3675_v37 = vstv %s6713_s15  ;;  %s6896_s15 = sld [smem:[#allocation9 + $0x6e]] }
 0x2c0   : > { %3582 = vrot.lane.b32.xlu1 %v3577_v24, %s4781_s29  ;;  %3602 = vrot.lane.b32.xlu0 %v3598_v47, %s4779_s11  ;;  %v3068_v47 = vmul.f32 %v3067_v49, %v6447_v8 }
 0x2c1   : > { %v2971_v2 = vadd.f32 %v2969_v1, %v2963_v55  ;;  %v3676_v1 = vmul.f32 %v3675_v37, %v6711_v4 }
 0x2c2   : > { %v2981_v26 = vpop.permute.xlu1 %2980  ;;  %v2993_v41 = vpop.permute.xlu0 %2992 }
 0x2c3   : > { %v2985_v42 = vadd.f32 %v2981_v26, %v2971_v2  ;;  %v2998_v11 = vadd.f32 %v2993_v41, %v2984_v9  ;;  %v3697_v2 = vstv %s6725_s17  ;;  %s6906_s17 = sld [smem:[#allocation9 + $0x6f]] }
 0x2c4   : > { %3604 = vrot.lane.b32.xlu1 %v3599_v17, %s4779_s11  ;;  %3616 = vrot.lane.b32.xlu0 %v3612_v63, %s4780_s24  ;;  %v3677_v17 = vmul.f32 %v3675_v37, %v6720_v48  ;;  %v3069_v63 = vmul.f32 %v3067_v49, %v6455_v57  ;;  %v6780_v37 = vld [vmem:[#allocation3 + $0x23] sm:$0x3f]  ;;  %v3761_v49 = vstv %s6762_s2  ;;  %s6947_s2 = sld [smem:[#allocation9 + $0x75]] }
 0x2c6   : > { %v2995_v54 = vpop.permute.xlu1 %2994  ;;  %v3007_v39 = vpop.permute.xlu0 %3006 }
 0x2c7   : > { %v2999_v21 = vadd.f32 %v2995_v54, %v2985_v42  ;;  %v3012_v19 = vadd.f32 %v3007_v39, %v2998_v11  ;;  %v3698_v54 = vmul.f32 %v3697_v2, %v6741_v61  ;;  %v3699_v11 = vmul.f32 %v3697_v2, %v6750_v33 }
 0x2c8   : > { %3618 = vrot.lane.b32.xlu1 %v3613_v53, %s4780_s24  ;;  %3630 = vrot.lane.b32.xlu0 %v3626_v58, %s4781_s29  ;;  %v3712_v39 = vmul.f32 %v3711_v32, %v6741_v61  ;;  %v3167_v2 = vstv %s6777_s22  ;;  %s6960_s22 = sld [smem:[#allocation9 + $0x50]] }
 0x2c9   : > { %v3020_v7 = vadd.f32 %v3018_v12, %v3012_v19  ;;  %v3713_v12 = vmul.f32 %v3711_v32, %v6750_v33  ;;  %v6801_v32 = vld [vmem:[#allocation3 + $0x30] sm:$0xff] }
 0x2ca   : > { %v3009_v44 = vpop.permute.xlu1 %3008  ;;  %v3029_v59 = vpop.permute.xlu0 %3028 }
 0x2cb   : > { %v3013_v62 = vadd.f32 %v3009_v44, %v2999_v21  ;;  %v3034_v38 = vadd.f32 %v3029_v59, %v3020_v7  ;;  %v3725_v21 = vstv %s6743_s19  ;;  %s6926_s19 = sld [smem:[#allocation9 + $0x72]] }
 0x2cc   : > { %3632 = vrot.lane.b32.xlu1 %v3627_v52, %s4781_s29  ;;  %3652 = vrot.lane.b32.xlu0 %v3648_v25, %s4779_s11  ;;  %v3118_v25 = vmul.f32 %v3117_v34, %v6481_v18 }
 0x2cd   : > { %v3021_v31 = vadd.f32 %v3019_v60, %v3013_v62  ;;  %v3726_v60 = vmul.f32 %v3725_v21, %v6741_v61 }
 0x2ce   : > { %v3031_v0 = vpop.permute.xlu1 %3030  ;;  %v3043_v10 = vpop.permute.xlu0 %3042 }
 0x2cf   : > { %v3035_v51 = vadd.f32 %v3031_v0, %v3021_v31  ;;  %v3048_v24 = vadd.f32 %v3043_v10, %v3034_v38  ;;  %v3747_v31 = vstv %s6755_s21  ;;  %s6936_s21 = sld [smem:[#allocation9 + $0x73]] }
 0x2d0   : > { %3654 = vrot.lane.b32.xlu1 %v3649_v28, %s4779_s11  ;;  %3666 = vrot.lane.b32.xlu0 %v3662_v45, %s4780_s24  ;;  %v3727_v28 = vmul.f32 %v3725_v21, %v6750_v33  ;;  %v3119_v45 = vmul.f32 %v3117_v34, %v6487_v50  ;;  %v6810_v21 = vld [vmem:[#allocation3 + $0x38] sm:$0x3f]  ;;  %v3811_v34 = vstv %s6792_s25  ;;  %s6977_s25 = sld [smem:[#allocation9 + $0x77]] }
 0x2d2   : > { %v3045_v29 = vpop.permute.xlu1 %3044  ;;  %v3057_v55 = vpop.permute.xlu0 %3056 }
 0x2d3   : > { %v3049_v43 = vadd.f32 %v3045_v29, %v3035_v51  ;;  %v3062_v14 = vadd.f32 %v3057_v55, %v3048_v24  ;;  %v3748_v29 = vmul.f32 %v3747_v31, %v6771_v46  ;;  %v3749_v24 = vmul.f32 %v3747_v31, %v6780_v37 }
 0x2d4   : > { %3668 = vrot.lane.b32.xlu1 %v3663_v23, %s4780_s24  ;;  %3680 = vrot.lane.b32.xlu0 %v3676_v1, %s4781_s29  ;;  %v3762_v55 = vmul.f32 %v3761_v49, %v6771_v46  ;;  %v3217_v31 = vstv %s6807_s27  ;;  %s6990_s27 = sld [smem:[#allocation9 + $0x54]] }
 0x2d5   : > { %v3070_v9 = vadd.f32 %v3068_v47, %v3062_v14  ;;  %v3763_v47 = vmul.f32 %v3761_v49, %v6780_v37  ;;  %v6831_v49 = vld [vmem:[#allocation3 + $0x31] sm:$0xff] }
 0x2d6   : > { %v3059_v26 = vpop.permute.xlu1 %3058  ;;  %v3079_v8 = vpop.permute.xlu0 %3078 }
 0x2d7   : > { %v3063_v41 = vadd.f32 %v3059_v26, %v3049_v43  ;;  %v3084_v58 = vadd.f32 %v3079_v8, %v3070_v9  ;;  %v3775_v43 = vstv %s6773_s3  ;;  %s6956_s3 = sld [smem:[#allocation9 + $0x76]] }
 0x2d8   : > { %3682 = vrot.lane.b32.xlu1 %v3677_v17, %s4781_s29  ;;  %3702 = vrot.lane.b32.xlu0 %v3698_v54, %s4779_s11  ;;  %v3168_v54 = vmul.f32 %v3167_v2, %v6511_v27 }
 0x2d9   : > { %v3071_v53 = vadd.f32 %v3069_v63, %v3063_v41  ;;  %v3776_v63 = vmul.f32 %v3775_v43, %v6771_v46 }
 0x2da   : > { %v3081_v42 = vpop.permute.xlu1 %3080  ;;  %v3093_v57 = vpop.permute.xlu0 %3092 }
 0x2db   : > { %v3085_v44 = vadd.f32 %v3081_v42, %v3071_v53  ;;  %v3098_v52 = vadd.f32 %v3093_v57, %v3084_v58  ;;  %v3797_v53 = vstv %s6785_s23  ;;  %s6966_s23 = sld [smem:[#allocation9 + $0x37]] }
 0x2dc   : > { %3704 = vrot.lane.b32.xlu1 %v3699_v11, %s4779_s11  ;;  %3716 = vrot.lane.b32.xlu0 %v3712_v39, %s4780_s24  ;;  %v3777_v11 = vmul.f32 %v3775_v43, %v6780_v37  ;;  %v3169_v39 = vmul.f32 %v3167_v2, %v6517_v13  ;;  %v6840_v43 = vld [vmem:[#allocation3 + $0x39] sm:$0x3f]  ;;  %v3861_v2 = vstv %s6822_s4  ;;  %s7004_s4 = sld [smem:[#allocation9 + $0x3a]] }
 0x2de   : > { %v3095_v19 = vpop.permute.xlu1 %3094  ;;  %v3107_v62 = vpop.permute.xlu0 %3106 }
 0x2df   : > { %v3099_v7 = vadd.f32 %v3095_v19, %v3085_v44  ;;  %v3112_v59 = vadd.f32 %v3107_v62, %v3098_v52  ;;  %v3798_v19 = vmul.f32 %v3797_v53, %v6801_v32  ;;  %v3799_v52 = vmul.f32 %v3797_v53, %v6810_v21 }
 0x2e0   : > { %3718 = vrot.lane.b32.xlu1 %v3713_v12, %s4780_s24  ;;  %3730 = vrot.lane.b32.xlu0 %v3726_v60, %s4781_s29  ;;  %v3812_v62 = vmul.f32 %v3811_v34, %v6801_v32 }
 0x2e1   : > { %v3120_v38 = vadd.f32 %v3118_v25, %v3112_v59  ;;  %v3813_v25 = vmul.f32 %v3811_v34, %v6810_v21 }
 0x2e2   : > { %v3109_v0 = vpop.permute.xlu1 %3108  ;;  %v3129_v18 = vpop.permute.xlu0 %3128 }
 0x2e3   : > { %v3113_v10 = vadd.f32 %v3109_v0, %v3099_v7  ;;  %v3134_v1 = vadd.f32 %v3129_v18, %v3120_v38  ;;  %v3825_v7 = vstv %s6803_s26  ;;  %s6986_s26 = sld [smem:[#allocation9 + $0x39]] }
 0x2e4   : > { %3732 = vrot.lane.b32.xlu1 %v3727_v28, %s4781_s29  ;;  %3752 = vrot.lane.b32.xlu0 %v3748_v29, %s4779_s11  ;;  %v3218_v29 = vmul.f32 %v3217_v31, %v6541_v56 }
 0x2e5   : > { %v3121_v23 = vadd.f32 %v3119_v45, %v3113_v10  ;;  %v3826_v45 = vmul.f32 %v3825_v7, %v6801_v32 }
 0x2e6   : > { %v3131_v51 = vpop.permute.xlu1 %3130  ;;  %v3143_v50 = vpop.permute.xlu0 %3142 }
 0x2e7   : > { %v3135_v26 = vadd.f32 %v3131_v51, %v3121_v23  ;;  %v3148_v17 = vadd.f32 %v3143_v50, %v3134_v1  ;;  %v3847_v23 = vstv %s6815_s28  ;;  %s6996_s28 = sld [smem:[#allocation9 + $0x79]] }
 0x2e8   : > { %3754 = vrot.lane.b32.xlu1 %v3749_v24, %s4779_s11  ;;  %3766 = vrot.lane.b32.xlu0 %v3762_v55, %s4780_s24  ;;  %v3827_v24 = vmul.f32 %v3825_v7, %v6810_v21  ;;  %v3219_v55 = vmul.f32 %v3217_v31, %v6547_v20 }
 0x2ea   : > { %v3145_v14 = vpop.permute.xlu1 %3144  ;;  %v3157_v41 = vpop.permute.xlu0 %3156 }
 0x2eb   : > { %v3149_v9 = vadd.f32 %v3145_v14, %v3135_v26  ;;  %v3162_v8 = vadd.f32 %v3157_v41, %v3148_v17  ;;  %v3848_v14 = vmul.f32 %v3847_v23, %v6831_v49  ;;  %v3849_v26 = vmul.f32 %v3847_v23, %v6840_v43 }
 0x2ec   : > { %3768 = vrot.lane.b32.xlu1 %v3763_v47, %s4780_s24  ;;  %3780 = vrot.lane.b32.xlu0 %v3776_v63, %s4781_s29  ;;  %v3862_v41 = vmul.f32 %v3861_v2, %v6831_v49  ;;  %v3875_v63 = vstv %s6833_s9  ;;  %s7015_s9 = sld [smem:[#allocation9 + $0x7a]] }
 0x2ed   : > { %v3170_v58 = vadd.f32 %v3168_v54, %v3162_v8  ;;  %v3863_v8 = vmul.f32 %v3861_v2, %v6840_v43  ;;  %v3393_v54 = vstv %s6842_s10  ;;  %v6910_v2 = vld [vmem:[#allocation3 + $0x3b] sm:$0x3f]  ;;  %s7019_s10 = sld [smem:[#allocation9 + $0x58]] }
 0x2ee   : > { %v3159_v42 = vpop.permute.xlu1 %3158  ;;  %v3179_v27 = vpop.permute.xlu0 %3178 }
 0x2ef   : > { %v3163_v57 = vadd.f32 %v3159_v42, %v3149_v9  ;;  %v3184_v60 = vadd.f32 %v3179_v27, %v3170_v58  ;;  %v3876_v42 = vmul.f32 %v3875_v63, %v6831_v49  ;;  %v3394_v58 = vmul.f32 %v6571_v16, %v3393_v54  ;;  %v6879_v27 = vld [vmem:[#allocation3 + $0x3a] sm:$0x3f] }
 0x2f0   : > { %3782 = vrot.lane.b32.xlu1 %v3777_v11, %s4781_s29  ;;  %3802 = vrot.lane.b32.xlu0 %v3798_v19, %s4779_s11  ;;  %v3897_v11 = vstv %s6851_s12  ;;  %s7027_s12 = sld [smem:[#allocation9 + $0x3b]] }
 0x2f1   : > { %v3171_v12 = vadd.f32 %v3169_v39, %v3163_v57  ;;  %v3877_v39 = vmul.f32 %v3875_v63, %v6840_v43  ;;  %v3899_v16 = vmul.f32 %v3897_v11, %v6879_v27 }
 0x2f2   : > { %v3181_v44 = vpop.permute.xlu1 %3180  ;;  %v3193_v13 = vpop.permute.xlu0 %3192 }
 0x2f3   : > { %v3185_v0 = vadd.f32 %v3181_v44, %v3171_v12  ;;  %v3198_v28 = vadd.f32 %v3193_v13, %v3184_v60  ;;  %v6882_v12 = vld [vmem:[#allocation3 + $0x32] sm:$0xff]  ;;  %v3395_v44 = vmul.f32 %v3393_v54, %v6567_v22  ;;  %v3911_v13 = vstv %s6862_s13  ;;  %s7034_s13 = sld [smem:[#allocation9 + $0x7b]] }
 0x2f4   : > { %3804 = vrot.lane.b32.xlu1 %v3799_v52, %s4779_s11  ;;  %3816 = vrot.lane.b32.xlu0 %v3812_v62, %s4780_s24  ;;  %v3898_v34 = vmul.f32 %v6882_v12, %v3897_v11  ;;  %v3441_v62 = vstv %s6864_s0  ;;  %v3912_v31 = vmul.f32 %v6882_v12, %v3911_v13  ;;  %s7043_s0 = sld [smem:[#allocation9 + $0x3d]] }
 0x2f5   : > { %v3442_v22 = vmul.f32 %v6601_v3, %v3441_v62 }
 0x2f6   : > { %v3195_v59 = vpop.permute.xlu1 %3194  ;;  %v3207_v10 = vpop.permute.xlu0 %3206 }
 0x2f7   : > { %v3199_v38 = vadd.f32 %v3195_v59, %v3185_v0  ;;  %v3212_v18 = vadd.f32 %v3207_v10, %v3198_v28  ;;  %v3925_v10 = vstv %s6874_s1  ;;  %s7047_s1 = sld [smem:[#allocation9 + $0x5c]] }
 0x2f8   : > { %3818 = vrot.lane.b32.xlu1 %v3813_v25, %s4780_s24  ;;  %3830 = vrot.lane.b32.xlu0 %v3826_v45, %s4781_s29 }
 0x2f9   : > { %v6838_v1 = vadd.f32 %v3218_v29, %v3212_v18  ;;  %v3443_v18 = vmul.f32 %v3441_v62, %v6597_v36 }
 0x2fa   : > { %v3209_v51 = vpop.permute.xlu1 %3208  ;;  %v6845_v56 = vpop.permute.xlu0 %3228 }
 0x2fb   : > { %v3213_v50 = vadd.f32 %v3209_v51, %v3199_v38  ;;  %v3913_v38 = vmul.f32 %v3911_v13, %v6879_v27  ;;  %v3926_v51 = vmul.f32 %v6882_v12, %v3925_v10 }
 0x2fc   : > { %3832 = vrot.lane.b32.xlu1 %v3827_v24, %s4781_s29  ;;  %3852 = vrot.lane.b32.xlu0 %v3848_v14, %s4779_s11  ;;  %v3927_v14 = vmul.f32 %v3925_v10, %v6879_v27  ;;  %v6940_v10 = vld [vmem:[#allocation3 + $0x50] sm:$0x3f] }
 0x2fd   : > { %v6848_v47 = vadd.f32 %v3219_v55, %v3213_v50  ;;  %v3947_v50 = vstv %s6887_s14  ;;  %s7053_s14 = sld [smem:[#allocation9 + $0x7d]] }
 0x2fe   : > { %v6853_v20 = vpop.permute.xlu1 %3230  ;;  %v6858_v17 = vpop.permute.xlu0 %3242 }
 0x300   : > { %3854 = vrot.lane.b32.xlu1 %v3849_v26, %s4779_s11  ;;  %3866 = vrot.lane.b32.xlu0 %v3862_v41, %s4780_s24  ;;  %v6913_v26 = vld [vmem:[#allocation3 + $0x33] sm:$0xff] }
 0x301   : > { %v3948_v41 = vmul.f32 %v6913_v26, %v3947_v50 }
 0x302   : > { %v6866_v9 = vpop.permute.xlu1 %3244  ;;  %v3403_v53 = vpop.permute.xlu0 %3402 }
 0x303   : > { %v3408_v52 = vadd.f32 %v3403_v53, %v3394_v58  ;;  %v3949_v53 = vmul.f32 %v3947_v50, %v6910_v2 }
 0x304   : > { %3868 = vrot.lane.b32.xlu1 %v3863_v8, %s4780_s24  ;;  %3880 = vrot.lane.b32.xlu0 %v3876_v42, %s4781_s29  ;;  %v3961_v8 = vstv %s6896_s15  ;;  %v3491_v42 = vstv %s6900_s16  ;;  %s7062_s15 = sld [smem:[#allocation9 + $0x3e]] }
 0x305   : > { %v3962_v58 = vmul.f32 %v6913_v26, %v3961_v8  ;;  %v3963_v62 = vmul.f32 %v3961_v8, %v6910_v2  ;;  %s7073_s16 = sld [smem:[#allocation9 + $0x7e]] }
 0x306   : > { %v3405_v57 = vpop.permute.xlu1 %3404  ;;  %v3417_v19 = vpop.permute.xlu0 %3416 }
 0x307   : > { %v3409_v7 = vadd.f32 %v3405_v57, %v3395_v44  ;;  %v3422_v59 = vadd.f32 %v3417_v19, %v3408_v52  ;;  %v3975_v52 = vstv %s6906_s17  ;;  %s7077_s17 = sld [smem:[#allocation9 + $0x60]] }
 0x308   : > { %3882 = vrot.lane.b32.xlu1 %v3877_v39, %s4781_s29  ;;  %3902 = vrot.lane.b32.xlu0 %v3898_v34, %s4779_s11  ;;  %v3492_v34 = vmul.f32 %v3491_v42, %v6621_v40  ;;  %v3976_v40 = vmul.f32 %v6913_v26, %v3975_v52 }
 0x30a   : > { %v3419_v60 = vpop.permute.xlu1 %3418  ;;  %v3431_v25 = vpop.permute.xlu0 %3430 }
 0x30b   : > { %v3423_v0 = vadd.f32 %v3419_v60, %v3409_v7  ;;  %v3436_v28 = vadd.f32 %v3431_v25, %v3422_v59  ;;  %v3493_v60 = vmul.f32 %v3491_v42, %v6630_v30 }
 0x30c   : > { %3904 = vrot.lane.b32.xlu1 %v3899_v16, %s4779_s11  ;;  %3916 = vrot.lane.b32.xlu0 %v3912_v31, %s4780_s24 }
 0x30d   : > { %v3444_v23 = vadd.f32 %v3442_v22, %v3436_v28  ;;  %v3997_v22 = vstv %s6917_s18  ;;  %v3977_v28 = vmul.f32 %v3975_v52, %v6910_v2  ;;  %v6970_v52 = vld [vmem:[#allocation3 + $0x51] sm:$0x3f]  ;;  %s7085_s18 = sld [smem:[#allocation9 + $0x3f]] }
 0x30e   : > { %v3433_v45 = vpop.permute.xlu1 %3432  ;;  %v3453_v3 = vpop.permute.xlu0 %3452 }
 0x30f   : > { %v3437_v29 = vadd.f32 %v3433_v45, %v3423_v0  ;;  %v3458_v63 = vadd.f32 %v3453_v3, %v3444_v23  ;;  %v4011_v23 = vstv %s6926_s19  ;;  %s7092_s19 = sld [smem:[#allocation9 + $0x7f]] }
 0x310   : > { %3918 = vrot.lane.b32.xlu1 %v3913_v38, %s4780_s24  ;;  %3930 = vrot.lane.b32.xlu0 %v3926_v51, %s4781_s29  ;;  %v6943_v38 = vld [vmem:[#allocation3 + $0x48] sm:$0xff]  ;;  %v3999_v51 = vmul.f32 %v3997_v22, %v6940_v10 }
 0x311   : > { %v3445_v24 = vadd.f32 %v3443_v18, %v3437_v29  ;;  %v3998_v18 = vmul.f32 %v6943_v38, %v3997_v22 }
 0x312   : > { %v3455_v55 = vpop.permute.xlu1 %3454  ;;  %v3467_v36 = vpop.permute.xlu0 %3466 }
 0x313   : > { %v3459_v11 = vadd.f32 %v3455_v55, %v3445_v24  ;;  %v3472_v57 = vadd.f32 %v3467_v36, %v3458_v63  ;;  %v3541_v24 = vstv %s6930_s20  ;;  %v4025_v63 = vstv %s6936_s21  ;;  %s4564_s20 = sld [smem:[#allocation9 + $0x70]]  ;;  %s4568_s21 = sld [smem:[#allocation9 + $0x74]] }
 0x314   : > { %3932 = vrot.lane.b32.xlu1 %v3927_v14, %s4781_s29  ;;  %3952 = vrot.lane.b32.xlu0 %v3948_v41, %s4779_s11  ;;  %v4012_v14 = vmul.f32 %v6943_v38, %v4011_v23  ;;  %v3542_v36 = vmul.f32 %v3541_v24, %v6651_v35  ;;  %v4026_v35 = vmul.f32 %v6943_v38, %v4025_v63 }
 0x316   : > { %v3469_v54 = vpop.permute.xlu1 %3468  ;;  %v3481_v39 = vpop.permute.xlu0 %3480 }
 0x317   : > { %v3473_v19 = vadd.f32 %v3469_v54, %v3459_v11  ;;  %v3486_v44 = vadd.f32 %v3481_v39, %v3472_v57  ;;  %v4013_v54 = vmul.f32 %v4011_v23, %v6940_v10 }
 0x318   : > { %3954 = vrot.lane.b32.xlu1 %v3949_v53, %s4779_s11  ;;  %3966 = vrot.lane.b32.xlu0 %v3962_v58, %s4780_s24  ;;  %v3543_v53 = vmul.f32 %v3541_v24, %v6660_v6 }
 0x319   : > { %v3494_v7 = vadd.f32 %v3492_v34, %v3486_v44  ;;  %v4027_v44 = vmul.f32 %v4025_v63, %v6940_v10 }
 0x31a   : > { %v3483_v13 = vpop.permute.xlu1 %3482  ;;  %v3503_v59 = vpop.permute.xlu0 %3502 }
 0x31b   : > { %v3487_v16 = vadd.f32 %v3483_v13, %v3473_v19  ;;  %v3508_v31 = vadd.f32 %v3503_v59, %v3494_v7  ;;  %v4047_v19 = vstv %s6947_s2  ;;  %v4061_v7 = vstv %s6956_s3  ;;  %s4508_s2 = sld [smem:[#allocation9 + $0x38]] }
 0x31c   : > { %3968 = vrot.lane.b32.xlu1 %v3963_v62, %s4780_s24  ;;  %3980 = vrot.lane.b32.xlu0 %v3976_v40, %s4781_s29  ;;  %v6973_v62 = vld [vmem:[#allocation3 + $0x49] sm:$0xff]  ;;  %v4049_v40 = vmul.f32 %v4047_v19, %v6970_v52  ;;  %s4572_s3 = sld [smem:[#allocation9 + $0x78]] }
 0x31d   : > { %v3495_v25 = vadd.f32 %v3493_v60, %v3487_v16  ;;  %v4048_v60 = vmul.f32 %v6973_v62, %v4047_v19  ;;  %v7009_v19 = vld [vmem:[#allocation3 + $0x52] sm:$0x3f] }
 0x31e   : > { %v3505_v0 = vpop.permute.xlu1 %3504  ;;  %v3517_v45 = vpop.permute.xlu0 %3516 }
 0x31f   : > { %v3509_v30 = vadd.f32 %v3505_v0, %v3495_v25  ;;  %v3522_v29 = vadd.f32 %v3517_v45, %v3508_v31  ;;  %v3591_v25 = vstv %s6960_s22  ;;  %v4062_v0 = vmul.f32 %v6973_v62, %v4061_v7  ;;  %s4512_s22 = sld [smem:[#allocation9 + $0x3c]] }
 0x320   : > { %3982 = vrot.lane.b32.xlu1 %v3977_v28, %s4781_s29  ;;  %4002 = vrot.lane.b32.xlu0 %v3998_v18, %s4779_s11  ;;  %v3592_v28 = vmul.f32 %v3591_v25, %v6681_v15  ;;  %v3251_v45 = vstv %s6966_s23  ;;  %v3593_v23 = vmul.f32 %v3591_v25, %v6690_v5  ;;  %s4576_s23 = sld [smem:[#allocation9 + $0x7c]] }
 0x321   : > { %v3252_v24 = vmul.f32 %v6973_v62, %v3251_v45 }
 0x322   : > { %v3519_v3 = vpop.permute.xlu1 %3518  ;;  %v3531_v55 = vpop.permute.xlu0 %3530 }
 0x323   : > { %v3523_v50 = vadd.f32 %v3519_v3, %v3509_v30  ;;  %v3536_v41 = vadd.f32 %v3531_v55, %v3522_v29  ;;  %v4063_v29 = vmul.f32 %v4061_v7, %v6970_v52 }
 0x324   : > { %4004 = vrot.lane.b32.xlu1 %v3999_v51, %s4779_s11  ;;  %4016 = vrot.lane.b32.xlu0 %v4012_v14, %s4780_s24  ;;  %v4075_v14 = vstv %s6977_s25  ;;  %s3364_s25 = sld [smem:[#allocation10]] }
 0x325   : > { %v3544_v11 = vadd.f32 %v3542_v36, %v3536_v41  ;;  %v4690_v41 = vld [vmem:[#allocation3 + $0x51] sm:$0x3f] }
 0x326   : > { %v3533_v8 = vpop.permute.xlu1 %3532  ;;  %v3553_v57 = vpop.permute.xlu0 %3552  ;;  %v3253_v63 = vmul.f32 %v4690_v41, %v3251_v45 }
 0x327   : > { %v3537_v42 = vadd.f32 %v3533_v8, %v3523_v50  ;;  %v3558_v58 = vadd.f32 %v3553_v57, %v3544_v11  ;;  %v7002_v11 = vld [vmem:[#allocation3 + $0x4a] sm:$0xff] }
 0x328   : > { %4018 = vrot.lane.b32.xlu1 %v4013_v54, %s4780_s24  ;;  %4030 = vrot.lane.b32.xlu0 %v4026_v35, %s4781_s29  ;;  %v4076_v54 = vmul.f32 %v6973_v62, %v4075_v14  ;;  %v4077_v35 = vmul.f32 %v4075_v14, %v6970_v52 }
 0x329   : > { %v3545_v39 = vadd.f32 %v3543_v53, %v3537_v42  ;;  %v3273_v42 = vstv %s6986_s26  ;;  %s4580_s26 = sld [smem:[#allocation10 + $0x1]] }
 0x32a   : > { %v3555_v34 = vpop.permute.xlu1 %3554  ;;  %v3567_v13 = vpop.permute.xlu0 %3566  ;;  %v3275_v7 = vmul.f32 %v3273_v42, %v7009_v19 }
 0x32b   : > { %v3559_v6 = vadd.f32 %v3555_v34, %v3545_v39  ;;  %v3572_v16 = vadd.f32 %v3567_v13, %v3558_v58  ;;  %v3641_v39 = vstv %s6990_s27  ;;  %s4585_s27 = sshll.u32 %s7218_s30, 5 }
 0x32c   : > { %4032 = vrot.lane.b32.xlu1 %v4027_v44, %s4781_s29  ;;  %4052 = vrot.lane.b32.xlu0 %v4048_v60, %s4779_s11  ;;  %v3274_v44 = vmul.f32 %v3273_v42, %v7002_v11  ;;  %v4097_v60 = vstv %s6996_s28 }
 0x32e   : > { %v3569_v59 = vpop.permute.xlu1 %3568  ;;  %v3581_v22 = vpop.permute.xlu0 %3580 }
 0x32f   : > { %v3573_v31 = vadd.f32 %v3569_v59, %v3559_v6  ;;  %v3586_v30 = vadd.f32 %v3581_v22, %v3572_v16  ;;  %v3642_v6 = vmul.f32 %v3641_v39, %v6711_v4  ;;  %v3643_v59 = vmul.f32 %v3641_v39, %v6720_v48 }
 0x330   : > { %4054 = vrot.lane.b32.xlu1 %v4049_v40, %s4779_s11  ;;  %4066 = vrot.lane.b32.xlu0 %v4062_v0, %s4780_s24  ;;  %v4098_v22 = vmul.f32 %v4097_v60, %v7002_v11 }
 0x331   : > { %v3594_v51 = vadd.f32 %v3592_v28, %v3586_v30  ;;  %v3287_v30 = vstv %s7004_s4 }
 0x332   : > { %v3583_v18 = vpop.permute.xlu1 %3582  ;;  %v3603_v15 = vpop.permute.xlu0 %3602 }
 0x333   : > { %v3587_v3 = vadd.f32 %v3583_v18, %v3573_v31  ;;  %v3608_v55 = vadd.f32 %v3603_v15, %v3594_v51  ;;  %v7022_v31 = vld [vmem:[#allocation3 + $0x52] sm:$0x3f]  ;;  %v4111_v51 = vstv %s7015_s9  ;;  %s175_s9 = scalar_lea.vmem %s7150_s8, %s4585_s27 }
 0x334   : > { %4068 = vrot.lane.b32.xlu1 %v4063_v29, %s4780_s24  ;;  %3256 = vrot.lane.b32.xlu0 %v3252_v24, %s4781_s29  ;;  %v4099_v18 = vmul.f32 %v4097_v60, %v7022_v31  ;;  %v3289_v24 = vmul.f32 %v3287_v30, %v7009_v19 }
 0x335   : > { %v3595_v50 = vadd.f32 %v3593_v23, %v3587_v3  ;;  %v3288_v23 = vmul.f32 %v3287_v30, %v7002_v11 }
 0x336   : > { %v3605_v36 = vpop.permute.xlu1 %3604  ;;  %v3617_v8 = vpop.permute.xlu0 %3616 }
 0x337   : > { %v3609_v5 = vadd.f32 %v3605_v36, %v3595_v50  ;;  %v3622_v53 = vadd.f32 %v3617_v8, %v3608_v55  ;;  %v3691_v50 = vstv %s7019_s10  ;;  %v4112_v36 = vmul.f32 %v4111_v51, %v7002_v11 }
 0x338   : > { %3258 = vrot.lane.b32.xlu1 %v3253_v63, %s4781_s29  ;;  %4080 = vrot.lane.b32.xlu0 %v4076_v54, %s4781_s29  ;;  %v3692_v63 = vmul.f32 %v3691_v50, %v6741_v61  ;;  %v4113_v54 = vmul.f32 %v4111_v51, %v7022_v31  ;;  %v3693_v42 = vmul.f32 %v3691_v50, %v6750_v33 }
 0x33a   : > { %v3619_v57 = vpop.permute.xlu1 %3618  ;;  %v3631_v34 = vpop.permute.xlu0 %3630 }
 0x33b   : > { %v3623_v58 = vadd.f32 %v3619_v57, %v3609_v5  ;;  %v3636_v13 = vadd.f32 %v3631_v34, %v3622_v53  ;;  %v3301_v5 = vstv %s7027_s12  ;;  %v4125_v34 = vstv %s7034_s13 }
 0x33c   : > { %4082 = vrot.lane.b32.xlu1 %v4077_v35, %s4781_s29  ;;  %3278 = vrot.lane.b32.xlu0 %v3274_v44, %s4779_s11  ;;  %v3302_v61 = vmul.f32 %v3301_v5, %v7002_v11  ;;  %v4126_v60 = vmul.f32 %v4125_v34, %v7002_v11 }
 0x33d   : > { %v3644_v25 = vadd.f32 %v3642_v6, %v3636_v13  ;;  %v3303_v6 = vmul.f32 %v3301_v5, %v7009_v19 }
 0x33e   : > { %v3633_v16 = vpop.permute.xlu1 %3632  ;;  %v3653_v4 = vpop.permute.xlu0 %3652 }
 0x33f   : > { %v3637_v40 = vadd.f32 %v3633_v16, %v3623_v58  ;;  %v3658_v28 = vadd.f32 %v3653_v4, %v3644_v25  ;;  %v4127_v25 = vmul.f32 %v4125_v34, %v7022_v31  ;;  %v3741_v4 = vstv %s7047_s1 }
 0x340   : > { %3280 = vrot.lane.b32.xlu1 %v3275_v7, %s4779_s11  ;;  %4102 = vrot.lane.b32.xlu0 %v4098_v22, %s4779_s11  ;;  %v3323_v7 = vstv %s7043_s0  ;;  %v3743_v51 = vmul.f32 %v3741_v4, %v6780_v37 }
 0x341   : > { %v3645_v0 = vadd.f32 %v3643_v59, %v3637_v40  ;;  %v7060_v59 = vld [vmem:[#allocation3 + $0x4b] sm:$0xff] }
 0x342   : > { %v3655_v45 = vpop.permute.xlu1 %3654  ;;  %v3667_v29 = vpop.permute.xlu0 %3666  ;;  %v3324_v30 = vmul.f32 %v3323_v7, %v7060_v59 }
 0x343   : > { %v3659_v48 = vadd.f32 %v3655_v45, %v3645_v0  ;;  %v3672_v3 = vadd.f32 %v3667_v29, %v3658_v28  ;;  %v7067_v0 = vld [vmem:[#allocation3 + $0x53] sm:$0x3f] }
 0x344   : > { %4104 = vrot.lane.b32.xlu1 %v4099_v18, %s4779_s11  ;;  %3292 = vrot.lane.b32.xlu0 %v3288_v23, %s4780_s24  ;;  %v3742_v18 = vmul.f32 %v3741_v4, %v6771_v46  ;;  %v3325_v23 = vmul.f32 %v3323_v7, %v7067_v0 }
 0x346   : > { %v3669_v15 = vpop.permute.xlu1 %3668  ;;  %v3681_v14 = vpop.permute.xlu0 %3680 }
 0x347   : > { %v3673_v55 = vadd.f32 %v3669_v15, %v3659_v48  ;;  %v3686_v41 = vadd.f32 %v3681_v14, %v3672_v3  ;;  %v4147_v48 = vstv %s7053_s14 }
 0x348   : > { %3294 = vrot.lane.b32.xlu1 %v3289_v24, %s4780_s24  ;;  %4116 = vrot.lane.b32.xlu0 %v4112_v36, %s4780_s24  ;;  %v7080_v24 = vld [vmem:[#allocation3 + $0x53] sm:$0x3f]  ;;  %v4148_v50 = vmul.f32 %v4147_v48, %v7060_v59  ;;  %v3337_v36 = vstv %s7062_s15 }
 0x349   : > { %v3694_v57 = vadd.f32 %v3692_v63, %v3686_v41  ;;  %v4149_v63 = vmul.f32 %v4147_v48, %v7080_v24 }
 0x34a   : > { %v3683_v8 = vpop.permute.xlu1 %3682  ;;  %v3703_v35 = vpop.permute.xlu0 %3702 }
 0x34b   : > { %v3687_v53 = vadd.f32 %v3683_v8, %v3673_v55  ;;  %v3708_v58 = vadd.f32 %v3703_v35, %v3694_v57  ;;  %v3338_v8 = vmul.f32 %v3337_v36, %v7060_v59  ;;  %v3791_v57 = vstv %s7077_s17 }
 0x34c   : > { %4118 = vrot.lane.b32.xlu1 %v4113_v54, %s4780_s24  ;;  %3306 = vrot.lane.b32.xlu0 %v3302_v61, %s4781_s29  ;;  %v4161_v54 = vstv %s7073_s16 }
 0x34d   : > { %v3695_v39 = vadd.f32 %v3693_v42, %v3687_v53  ;;  %v3339_v42 = vmul.f32 %v3337_v36, %v7067_v0 }
 0x34e   : > { %v3705_v44 = vpop.permute.xlu1 %3704  ;;  %v3717_v33 = vpop.permute.xlu0 %3716 }
 0x34f   : > { %v3709_v13 = vadd.f32 %v3705_v44, %v3695_v39  ;;  %v3722_v16 = vadd.f32 %v3717_v33, %v3708_v58  ;;  %v4162_v39 = vmul.f32 %v4161_v54, %v7060_v59  ;;  %v3792_v44 = vmul.f32 %v3791_v57, %v6801_v32 }
 0x350   : > { %3308 = vrot.lane.b32.xlu1 %v3303_v6, %s4781_s29  ;;  %4130 = vrot.lane.b32.xlu0 %v4126_v60, %s4781_s29  ;;  %v3351_v6 = vstv %s7085_s18  ;;  %v4163_v33 = vmul.f32 %v4161_v54, %v7080_v24 }
 0x351   : > { %v3353_v32 = vmul.f32 %v3351_v6, %v7067_v0 }
 0x352   : > { %v3719_v40 = vpop.permute.xlu1 %3718  ;;  %v3731_v28 = vpop.permute.xlu0 %3730 }
 0x353   : > { %v3723_v22 = vadd.f32 %v3719_v40, %v3709_v13  ;;  %v3736_v45 = vadd.f32 %v3731_v28, %v3722_v16  ;;  %v3793_v16 = vmul.f32 %v3791_v57, %v6810_v21 }
 0x354   : > { %4132 = vrot.lane.b32.xlu1 %v4127_v25, %s4781_s29  ;;  %3328 = vrot.lane.b32.xlu0 %v3324_v30, %s4779_s11  ;;  %v3352_v25 = vmul.f32 %v3351_v6, %v7060_v59 }
 0x355   : > { %v3744_v15 = vadd.f32 %v3742_v18, %v3736_v45 }
 0x356   : > { %v3733_v29 = vpop.permute.xlu1 %3732  ;;  %v3753_v46 = vpop.permute.xlu0 %3752 }
 0x357   : > { %v3737_v3 = vadd.f32 %v3733_v29, %v3723_v22  ;;  %v3758_v14 = vadd.f32 %v3753_v46, %v3744_v15  ;;  %v4175_v22 = vstv %s7092_s19 }
 0x358   : > { %3330 = vrot.lane.b32.xlu1 %v3325_v23, %s4779_s11  ;;  %4152 = vrot.lane.b32.xlu0 %v4148_v50, %s4779_s11  ;;  %v4176_v45 = vmul.f32 %v4175_v22, %v7060_v59  ;;  %v4177_v48 = vmul.f32 %v4175_v22, %v7080_v24 }
 0x359   : > { %v3745_v55 = vadd.f32 %v3743_v51, %v3737_v3 }
 0x35a   : > { %v3755_v41 = vpop.permute.xlu1 %3754  ;;  %v3767_v5 = vpop.permute.xlu0 %3766 }
 0x35b   : > { %v3759_v37 = vadd.f32 %v3755_v41, %v3745_v55  ;;  %v3772_v35 = vadd.f32 %v3767_v5, %v3758_v14 }
 0x35c   : > { %4154 = vrot.lane.b32.xlu1 %v4149_v63, %s4779_s11  ;;  %3342 = vrot.lane.b32.xlu0 %v3338_v8, %s4780_s24  ;;  %s4552_s11 = sld [smem:[#allocation9 + $0x64]] }
 0x35e   : > { %v3769_v53 = vpop.permute.xlu1 %3768  ;;  %v3781_v61 = vpop.permute.xlu0 %3780 }
 0x35f   : > { %v3773_v58 = vadd.f32 %v3769_v53, %v3759_v37  ;;  %v3786_v34 = vadd.f32 %v3781_v61, %v3772_v35 }
 0x360   : > { %3344 = vrot.lane.b32.xlu1 %v3339_v42, %s4780_s24  ;;  %4166 = vrot.lane.b32.xlu0 %v4162_v39, %s4780_s24 }
 0x361   : > { %v3794_v7 = vadd.f32 %v3792_v44, %v3786_v34 }
 0x362   : > { %v3783_v13 = vpop.permute.xlu1 %3782  ;;  %v3803_v40 = vpop.permute.xlu0 %3802  ;;  %v3841_v29 = vstv %s4552_s11 }
 0x363   : > { %v3787_v60 = vadd.f32 %v3783_v13, %v3773_v58  ;;  %v3808_v18 = vadd.f32 %v3803_v40, %v3794_v7  ;;  %v3842_v50 = vmul.f32 %v3841_v29, %v6831_v49  ;;  %v3843_v36 = vmul.f32 %v3841_v29, %v6840_v43 }
 0x364   : > { %4168 = vrot.lane.b32.xlu1 %v4163_v33, %s4780_s24  ;;  %3356 = vrot.lane.b32.xlu0 %v3352_v25, %s4781_s29  ;;  %s4556_s24 = sld [smem:[#allocation9 + $0x68]] }
 0x365   : > { %v3795_v4 = vadd.f32 %v3793_v16, %v3787_v60 }
 0x366   : > { %v3805_v28 = vpop.permute.xlu1 %3804  ;;  %v3817_v30 = vpop.permute.xlu0 %3816 }
 0x367   : > { %v3809_v23 = vadd.f32 %v3805_v28, %v3795_v4  ;;  %v3822_v3 = vadd.f32 %v3817_v30, %v3808_v18 }
 0x368   : > { %3358 = vrot.lane.b32.xlu1 %v3353_v32, %s4781_s29  ;;  %4180 = vrot.lane.b32.xlu0 %v4176_v45, %s4781_s29 }
 0x36a   : > { %v3819_v21 = vpop.permute.xlu1 %3818  ;;  %v3831_v51 = vpop.permute.xlu0 %3830  ;;  %v3891_v42 = vstv %s4556_s24 }
 0x36b   : > { %v3823_v15 = vadd.f32 %v3819_v21, %v3809_v23  ;;  %v3836_v46 = vadd.f32 %v3831_v51, %v3822_v3  ;;  %v3892_v49 = vmul.f32 %v6882_v12, %v3891_v42  ;;  %v3893_v43 = vmul.f32 %v3891_v42, %v6879_v27 }
 0x36c   : > { %4182 = vrot.lane.b32.xlu1 %v4177_v48, %s4781_s29  ;;  %s4560_s29 = sld [smem:[#allocation9 + $0x6c]] }
 0x36d   : > { %v3844_v41 = vadd.f32 %v3842_v50, %v3836_v46  ;;  %v3991_v46 = vstv %s4564_s20 }
 0x36e   : > { %v3833_v55 = vpop.permute.xlu1 %3832  ;;  %v3853_v63 = vpop.permute.xlu0 %3852 }
 0x36f   : > { %v3837_v14 = vadd.f32 %v3833_v55, %v3823_v15  ;;  %v3858_v54 = vadd.f32 %v3853_v63, %v3844_v41 }
 0x371   : > { %v3845_v37 = vadd.f32 %v3843_v36, %v3837_v14 }
 0x372   : > { %v3855_v5 = vpop.permute.xlu1 %3854  ;;  %v3867_v8 = vpop.permute.xlu0 %3866  ;;  %v3941_v25 = vstv %s4560_s29 }
 0x373   : > { %v3859_v57 = vadd.f32 %v3855_v5, %v3845_v37  ;;  %v3872_v35 = vadd.f32 %v3867_v8, %v3858_v54  ;;  %v3942_v12 = vmul.f32 %v6913_v26, %v3941_v25  ;;  %v3943_v27 = vmul.f32 %v3941_v25, %v6910_v2 }
 0x374   : > { %v3992_v26 = vmul.f32 %v6943_v38, %v3991_v46  ;;  %v3993_v2 = vmul.f32 %v3991_v46, %v6940_v10 }
 0x376   : > { %v3869_v53 = vpop.permute.xlu1 %3868  ;;  %v3881_v61 = vpop.permute.xlu0 %3880 }
 0x377   : > { %v3873_v39 = vadd.f32 %v3869_v53, %v3859_v57  ;;  %v3886_v58 = vadd.f32 %v3881_v61, %v3872_v35  ;;  %v4041_v61 = vstv %s4568_s21 }
 0x378   : > { %v4042_v38 = vmul.f32 %v6973_v62, %v4041_v61  ;;  %v4043_v10 = vmul.f32 %v4041_v61, %v6970_v52  ;;  %v4141_v61 = vstv %s4576_s23 }
 0x379   : > { %v3894_v6 = vadd.f32 %v3892_v49, %v3886_v58 }
 0x37a   : > { %v3883_v34 = vpop.permute.xlu1 %3882  ;;  %v3903_v13 = vpop.permute.xlu0 %3902 }
 0x37b   : > { %v3887_v44 = vadd.f32 %v3883_v34, %v3873_v39  ;;  %v3908_v7 = vadd.f32 %v3903_v13, %v3894_v6 }
 0x37d   : > { %v3895_v33 = vadd.f32 %v3893_v43, %v3887_v44 }
 0x37e   : > { %v3905_v60 = vpop.permute.xlu1 %3904  ;;  %v3917_v16 = vpop.permute.xlu0 %3916 }
 0x37f   : > { %v3909_v4 = vadd.f32 %v3905_v60, %v3895_v33  ;;  %v3922_v22 = vadd.f32 %v3917_v16, %v3908_v7 }
 0x382   : > { %v3919_v40 = vpop.permute.xlu1 %3918  ;;  %v3931_v28 = vpop.permute.xlu0 %3930 }
 0x383   : > { %v3923_v32 = vadd.f32 %v3919_v40, %v3909_v4  ;;  %v3936_v30 = vadd.f32 %v3931_v28, %v3922_v22  ;;  %v3234_v40 = vadd.f32 %v6845_v56, %v6838_v1  ;;  %v3267_v4 = vstv %s4508_s2 }
 0x384   : > { %v3235_v22 = vadd.f32 %v6853_v20, %v6848_v47 }
 0x385   : > { %v3944_v21 = vadd.f32 %v3942_v12, %v3936_v30  ;;  %v3248_v62 = vadd.f32 %v6858_v17, %v3234_v40  ;;  %v3268_v12 = vmul.f32 %v3267_v4, %v7002_v11 }
 0x386   : > { %v3933_v45 = vpop.permute.xlu1 %3932  ;;  %v3953_v48 = vpop.permute.xlu0 %3952 }
 0x387   : > { %v3937_v18 = vadd.f32 %v3933_v45, %v3923_v32  ;;  %v3958_v51 = vadd.f32 %v3953_v48, %v3944_v21  ;;  %v3249_v32 = vadd.f32 %v6866_v9, %v3235_v22 }
 0x389   : > { %v3945_v29 = vadd.f32 %v3943_v27, %v3937_v18  ;;  %v3269_v18 = vmul.f32 %v3267_v4, %v7009_v19  ;;  %v4091_v27 = vstv %s4572_s3 }
 0x38a   : > { %v3955_v23 = vpop.permute.xlu1 %3954  ;;  %v3967_v3 = vpop.permute.xlu0 %3966  ;;  %v4092_v17 = vmul.f32 %v4091_v27, %v7002_v11 }
 0x38b   : > { %v3959_v50 = vadd.f32 %v3955_v23, %v3945_v29  ;;  %v3972_v55 = vadd.f32 %v3967_v3, %v3958_v51  ;;  %v4093_v51 = vmul.f32 %v4091_v27, %v7022_v31 }
 0x38e   : > { %v3969_v15 = vpop.permute.xlu1 %3968  ;;  %v3981_v14 = vpop.permute.xlu0 %3980 }
 0x38f   : > { %v3973_v36 = vadd.f32 %v3969_v15, %v3959_v50  ;;  %v3986_v41 = vadd.f32 %v3981_v14, %v3972_v55 }
 0x391   : > { %v3994_v5 = vadd.f32 %v3992_v26, %v3986_v41 }
 0x392   : > { %v3983_v63 = vpop.permute.xlu1 %3982  ;;  %v4003_v8 = vpop.permute.xlu0 %4002 }
 0x393   : > { %v3987_v37 = vadd.f32 %v3983_v63, %v3973_v36  ;;  %v4008_v57 = vadd.f32 %v4003_v8, %v3994_v5 }
 0x395   : > { %v3995_v54 = vadd.f32 %v3993_v2, %v3987_v37  ;;  %v3317_v2 = vstv %s4512_s22 }
 0x396   : > { %v4005_v53 = vpop.permute.xlu1 %4004  ;;  %v4017_v42 = vpop.permute.xlu0 %4016 }
 0x397   : > { %v4009_v39 = vadd.f32 %v4005_v53, %v3995_v54  ;;  %v4022_v58 = vadd.f32 %v4017_v42, %v4008_v57  ;;  %v3318_v42 = vmul.f32 %v3317_v2, %v7060_v59 }
 0x39a   : > { %v4019_v35 = vpop.permute.xlu1 %4018  ;;  %v4031_v49 = vpop.permute.xlu0 %4030 }
 0x39b   : > { %v4023_v34 = vadd.f32 %v4019_v35, %v4009_v39  ;;  %v4036_v44 = vadd.f32 %v4031_v49, %v4022_v58  ;;  %v3319_v35 = vmul.f32 %v3317_v2, %v7067_v0 }
 0x39d   : > { %v4044_v13 = vadd.f32 %v4042_v38, %v4036_v44 }
 0x39e   : > { %v4033_v43 = vpop.permute.xlu1 %4032  ;;  %v4053_v33 = vpop.permute.xlu0 %4052 }
 0x39f   : > { %v4037_v6 = vadd.f32 %v4033_v43, %v4023_v34  ;;  %v4058_v52 = vadd.f32 %v4053_v33, %v4044_v13 }
 0x3a1   : > { %v4045_v60 = vadd.f32 %v4043_v10, %v4037_v6  ;;  %v4142_v10 = vmul.f32 %v4141_v61, %v7060_v59  ;;  %v3365_v59 = vstv %s3364_s25 }
 0x3a2   : > { %v4055_v16 = vpop.permute.xlu1 %4054  ;;  %v4067_v7 = vpop.permute.xlu0 %4066 }
 0x3a3   : > { %v4059_v21 = vadd.f32 %v4055_v16, %v4045_v60  ;;  %v4072_v1 = vadd.f32 %v4067_v7, %v4058_v52  ;;  %v4143_v60 = vmul.f32 %v4141_v61, %v7080_v24 }
 0x3a6   : > { %v4069_v25 = vpop.permute.xlu1 %4068  ;;  %v3257_v28 = vpop.permute.xlu0 %3256 }
 0x3a7   : > { %v3262_v30 = vadd.f32 %v3257_v28, %v3248_v62  ;;  %v4073_v23 = vadd.f32 %v4069_v25, %v4059_v21 }
 0x3a9   : > { %v3270_v48 = vadd.f32 %v3268_v12, %v3262_v30 }
 0x3aa   : > { %v3259_v45 = vpop.permute.xlu1 %3258  ;;  %v4081_v29 = vpop.permute.xlu0 %4080 }
 0x3ab   : > { %v3263_v56 = vadd.f32 %v3259_v45, %v3249_v32  ;;  %v4086_v47 = vadd.f32 %v4081_v29, %v4072_v1 }
 0x3ad   : > { %v3271_v20 = vadd.f32 %v3269_v18, %v3263_v56  ;;  %v4094_v15 = vadd.f32 %v4092_v17, %v4086_v47 }
 0x3ae   : > { %v4083_v3 = vpop.permute.xlu1 %4082  ;;  %v3279_v46 = vpop.permute.xlu0 %3278 }
 0x3af   : > { %v4087_v9 = vadd.f32 %v4083_v3, %v4073_v23  ;;  %v3284_v63 = vadd.f32 %v3279_v46, %v3270_v48  ;;  %v4189_v23 = vstv %s4580_s26 }
 0x3b1   : > { %v4095_v50 = vadd.f32 %v4093_v51, %v4087_v9 }
 0x3b2   : > { %v3281_v55 = vpop.permute.xlu1 %3280  ;;  %v4103_v19 = vpop.permute.xlu0 %4102 }
 0x3b3   : > { %v3285_v5 = vadd.f32 %v3281_v55, %v3271_v20  ;;  %v4108_v54 = vadd.f32 %v4103_v19, %v4094_v15 }
 0x3b6   : > { %v4105_v14 = vpop.permute.xlu1 %4104  ;;  %v3293_v36 = vpop.permute.xlu0 %3292 }
 0x3b7   : > { %v3298_v11 = vadd.f32 %v3293_v36, %v3284_v63  ;;  %v4109_v39 = vadd.f32 %v4105_v14, %v4095_v50 }
 0x3ba   : > { %v3295_v41 = vpop.permute.xlu1 %3294  ;;  %v4117_v26 = vpop.permute.xlu0 %4116 }
 0x3bb   : > { %v3299_v53 = vadd.f32 %v3295_v41, %v3285_v5  ;;  %v4122_v58 = vadd.f32 %v4117_v26, %v4108_v54 }
 0x3be   : > { %v4119_v37 = vpop.permute.xlu1 %4118  ;;  %v3307_v8 = vpop.permute.xlu0 %3306 }
 0x3bf   : > { %v3312_v31 = vadd.f32 %v3307_v8, %v3298_v11  ;;  %v4123_v38 = vadd.f32 %v4119_v37, %v4109_v39 }
 0x3c1   : > { %v3320_v34 = vadd.f32 %v3318_v42, %v3312_v31 }
 0x3c2   : > { %v3309_v57 = vpop.permute.xlu1 %3308  ;;  %v4131_v44 = vpop.permute.xlu0 %4130 }
 0x3c3   : > { %v3313_v49 = vadd.f32 %v3309_v57, %v3299_v53  ;;  %v4136_v43 = vadd.f32 %v4131_v44, %v4122_v58 }
 0x3c5   : > { %v3321_v6 = vadd.f32 %v3319_v35, %v3313_v49  ;;  %v4144_v16 = vadd.f32 %v4142_v10, %v4136_v43 }
 0x3c6   : > { %v4133_v13 = vpop.permute.xlu1 %4132  ;;  %v3329_v7 = vpop.permute.xlu0 %3328 }
 0x3c7   : > { %v4137_v33 = vadd.f32 %v4133_v13, %v4123_v38  ;;  %v3334_v32 = vadd.f32 %v3329_v7, %v3320_v34 }
 0x3c9   : > { %v4145_v40 = vadd.f32 %v4143_v60, %v4137_v33 }
 0x3ca   : > { %v3331_v25 = vpop.permute.xlu1 %3330  ;;  %v4153_v0 = vpop.permute.xlu0 %4152 }
 0x3cb   : > { %v3335_v30 = vadd.f32 %v3331_v25, %v3321_v6  ;;  %v4158_v18 = vadd.f32 %v4153_v0, %v4144_v16 }
 0x3ce   : > { %v4155_v4 = vpop.permute.xlu1 %4154  ;;  %v3343_v22 = vpop.permute.xlu0 %3342 }
 0x3cf   : > { %v3348_v12 = vadd.f32 %v3343_v22, %v3334_v32  ;;  %v4159_v1 = vadd.f32 %v4155_v4, %v4145_v40 }
 0x3d2   : > { %v3345_v62 = vpop.permute.xlu1 %3344  ;;  %v4167_v28 = vpop.permute.xlu0 %4166 }
 0x3d3   : > { %v3349_v27 = vadd.f32 %v3345_v62, %v3335_v30  ;;  %v4172_v56 = vadd.f32 %v4167_v28, %v4158_v18 }
 0x3d6   : > { %v4169_v52 = vpop.permute.xlu1 %4168  ;;  %v3357_v45 = vpop.permute.xlu0 %3356 }
 0x3d7   : > { %v3362_v24 = vadd.f32 %v3357_v45, %v3348_v12  ;;  %v4173_v20 = vadd.f32 %v4169_v52, %v4159_v1 }
 0x3d9   : > { %v3366_v29 = vadd.f32 %v3365_v59, %v3362_v24 }
 0x3da   : > { %v3359_v21 = vpop.permute.xlu1 %3358  ;;  %v4181_v47 = vpop.permute.xlu0 %4180 }
 0x3db   : > { %v3363_v48 = vadd.f32 %v3359_v21, %v3349_v27  ;;  %v3370_v3 = vand.u32 2147483647, %v3366_v29  ;;  %v4186_v9 = vadd.f32 %v4181_v47, %v4172_v56  ;;  %v3368_v58 = vmin.f32 %v3366_v29, 0.0 }
 0x3dd   : > { %v3367_v17 = vadd.f32 %v3365_v59, %v3363_v48  ;;  %v3372_v46 = vsub.f32 0.0, %v3370_v3  ;;  %v4190_v55 = vadd.f32 %v4189_v23, %v4186_v9 }
 0x3de   : > { %v4183_v51 = vpop.permute.xlu1 %4182 }
 0x3df   : > { %v3371_v15 = vand.u32 2147483647, %v3367_v17  ;;  %v4187_v50 = vadd.f32 %v4183_v51, %v4173_v20  ;;  %v3374_v14 = vmul.f32 1.442695, %v3372_v46  ;;  %v4194_v41 = vand.u32 2147483647, %v4190_v55 }
 0x3e0   : > { %v3369_v44 = vmin.f32 %v3367_v17, 0.0  ;;  %v4192_v33 = vmin.f32 %v4190_v55, 0.0 }
 0x3e1   : > { %v3373_v19 = vsub.f32 0.0, %v3371_v15  ;;  %v4191_v36 = vadd.f32 %v4189_v23, %v4187_v50  ;;  %4604 = vpow2.f32 %v3374_v14  ;;  %v4196_v37 = vsub.f32 0.0, %v4194_v41 }
 0x3e3   : > { %v3376_v26 = vmul.f32 1.442695, %v3373_v19  ;;  %v4195_v63 = vand.u32 2147483647, %v4191_v36  ;;  %v4198_v5 = vmul.f32 1.442695, %v4196_v37 }
 0x3e4   : > { %v4193_v16 = vmin.f32 %v4191_v36, 0.0 }
 0x3e5   : > { %4606 = vpow2.f32 %v3376_v26  ;;  %v4197_v2 = vsub.f32 0.0, %v4195_v63 }
 0x3e6   : > { %4608 = vpow2.f32 %v4198_v5 }
 0x3e7   : > { %v4200_v11 = vmul.f32 1.442695, %v4197_v2 }
 0x3e9   : > { %4610 = vpow2.f32 %v4200_v11 }
 0x3eb   : > { %v4605_v8 = vpop.eup %4604 }
 0x3ec   : > { %v3378_v54 = vadd.f32 1.0, %v4605_v8 }
 0x3ee   : > { %4612 = vlog2.f32 %v3378_v54 }
 0x3ef   : > { %v4607_v53 = vpop.eup %4606 }
 0x3f0   : > { %v3379_v31 = vadd.f32 1.0, %v4607_v53  ;;  %v4609_v42 = vpop.eup %4608 }
 0x3f1   : > { %v4202_v35 = vadd.f32 1.0, %v4609_v42 }
 0x3f2   : > { %4614 = vlog2.f32 %v3379_v31 }
 0x3f3   : > { %v4611_v57 = vpop.eup %4610  ;;  %4616 = vlog2.f32 %v4202_v35 }
 0x3f4   : > { %v4203_v61 = vadd.f32 1.0, %v4611_v57 }
 0x3f6   : > { %4618 = vlog2.f32 %v4203_v61 }
 0x3f8   : > { %v4613_v39 = vpop.eup %4612 }
 0x3f9   : > { %v3381_v49 = vmul.f32 0.6931472, %v4613_v39 }
 0x3fb   : > { %v3384_v43 = vsub.f32 %v3368_v58, %v3381_v49 }
 0x3fc   : > { %v4615_v34 = vpop.eup %4614 }
 0x3fd   : > { %v3383_v38 = vmul.f32 0.6931472, %v4615_v34  ;;  %v4617_v6 = vpop.eup %4616  ;;  %3387 = vst.msk [vmem:[%s175_s9] sm:$0xff] %vm3386_vm2, %v3384_v43 }
 0x3fe   : > { %v4205_v60 = vmul.f32 0.6931472, %v4617_v6 }
 0x3ff   : > { %v3385_v10 = vsub.f32 %v3369_v44, %v3383_v38 }
 0x400   : > { %v4619_v13 = vpop.eup %4618  ;;  %v4208_v40 = vsub.f32 %v4192_v33, %v4205_v60 }
 0x401   : > { %3389 = vst.msk [vmem:[%s175_s9 + $0x8] sm:$0x3f] %vm3388_vm3, %v3385_v10  ;;  %v4207_v7 = vmul.f32 0.6931472, %v4619_v13 }
 0x402   : > { %4581 = vst.msk [vmem:[%s175_s9 + $0x10] sm:$0xff] %vm3386_vm2, %v4208_v40 }
 0x403   : > { %v4209_v25 = vsub.f32 %v4193_v16, %v4207_v7 }
 0x405   : > { %4582 = vst.msk [vmem:[%s175_s9 + $0x18] sm:$0x3f] %vm3388_vm3, %v4209_v25 }
 0x406 PF: > { %s44_s5 = sadd.s32 1, %s4771_s5  }
 0x407   : > { %p41_p6 = scmp.ge.s32.totalorder %s44_s5, 4  }
 0x409   :  { %43 = sbr.rel (!%p41_p6) target bundleno = 68 (0x44), region = 72 }

</bundles_post_ra>
